<compile_context>
chip_gen: v7x
topology: tpu7x:2x2x1
jax: 0.10.0
libtpu: 0.0.40
codegen_flags: <defaults>
</compile_context>

<pallas_src>
import functools

import jax
import jax.numpy as jnp
from jax.experimental import pallas as pl
from jax.experimental.pallas import tpu as pltpu


def _round_up(x, m):
    return (x + m - 1) // m * m


# ----------------------------------------------------------------------------
# Fused decoder kernel: one grid step = one batch tile of `tb` latent vectors.
# ----------------------------------------------------------------------------
def _decoder_kernel(x_ref,
                    fcw_ref, fcb_ref,
                    w0_ref, b0_ref,
                    w1_ref, b1_ref,
                    w2_ref, b2_ref,
                    w3_ref, b3_ref,
                    wo_ref, bo_ref,
                    out_ref,
                    a0, a1, a2, a3, a4,
                    *, tb, cd, lanes):
    """ConvTranspose2d(k=2,s=2) == matmul with packed weight (Cin, 4*Cout);
    the result for each (kh, kw) kernel tap is computed as a separate column
    chunk and scattered into one of 4 row-groups of the next activation (a
    known row permutation, fixed up once on the host).  All lane widths are
    padded to multiples of 128 at init, so every slice and every store is
    lane-aligned / lane-dense."""

    npix = cd * cd
    l0 = lanes[0]

    # fc + ReLU; split the per-pixel channel groups (columns) into rows.
    h = jnp.dot(x_ref[...], fcw_ref[...], preferred_element_type=jnp.float32)
    h = jnp.maximum(h + fcb_ref[...], 0.0)                   # (tb, npix*l0)
    for p in range(npix):                                    # static unroll
        a0[p * tb:(p + 1) * tb, :] = h[:, p * l0:(p + 1) * l0]

    def upconv(src_ref, dst_ref, w_ref, b_ref, rows, cout_p):
        a = src_ref[...]                                     # (rows, cin_p)
        b = b_ref[...]                                       # (1, cout_p)
        for k in range(4):                                   # (kh, kw) taps
            w_k = w_ref[:, k * cout_p:(k + 1) * cout_p]      # lane-aligned slice
            y = jnp.dot(a, w_k, preferred_element_type=jnp.float32)
            dst_ref[k * rows:(k + 1) * rows, :] = jnp.maximum(y + b, 0.0)

    r0 = tb * npix
    upconv(a0, a1, w0_ref, b0_ref, r0, lanes[1])
    upconv(a1, a2, w1_ref, b1_ref, 4 * r0, lanes[2])
    upconv(a2, a3, w2_ref, b2_ref, 16 * r0, lanes[3])
    upconv(a3, a4, w3_ref, b3_ref, 64 * r0, lanes[4])

    # Fused 1x1 conv (no ReLU); lanes padded to 128 -> unmasked lane-dense store.
    yo = jnp.dot(a4[...], wo_ref[...], preferred_element_type=jnp.float32)
    out_ref[...] = (yo + bo_ref[...]).astype(out_ref.dtype)


# ----------------------------------------------------------------------------
# Host wrapper (jitted): pad batch, one pallas_call, one small layout fix-up.
# ----------------------------------------------------------------------------
@functools.partial(jax.jit, static_argnames=("cfg",))
def _decode_impl(x, params, cfg):
    dimension, latent_dim, spatial_channel, cd, tb, lanes = cfg
    npix = cd * cd
    B = x.shape[0]
    b_pad = _round_up(max(B, tb), tb)
    nb = b_pad // tb
    x_pad = jnp.pad(x.astype(jnp.float32), ((0, b_pad - B), (0, 0)))

    r0 = tb * npix
    rows_out_blk = 256 * r0          # rows produced per batch tile
    lane_out = lanes[5]

    weight_args = (
        params["fc_w"], params["fc_b"],
        params["up0_w"], params["up0_b"],
        params["up1_w"], params["up1_b"],
        params["up2_w"], params["up2_b"],
        params["up3_w"], params["up3_b"],
        params["out_w"], params["out_b"],
    )
    # Weights are constant across the grid -> fetched once, resident in VMEM.
    w_specs = [pl.BlockSpec(w.shape, lambda i: (0, 0)) for w in weight_args]

    kernel = functools.partial(_decoder_kernel, tb=tb, cd=cd, lanes=lanes)

    out = pl.pallas_call(
        kernel,
        out_shape=jax.ShapeDtypeStruct((nb * rows_out_blk, lane_out), jnp.float32),
        grid_spec=pltpu.PrefetchScalarGridSpec(
            num_scalar_prefetch=0,
            grid=(nb,),
            in_specs=[pl.BlockSpec((tb, latent_dim), lambda i: (i, 0))] + w_specs,
            out_specs=pl.BlockSpec((rows_out_blk, lane_out), lambda i: (i, 0)),
            scratch_shapes=[
                pltpu.VMEM((r0, lanes[0]), jnp.float32),
                pltpu.VMEM((4 * r0, lanes[1]), jnp.float32),
                pltpu.VMEM((16 * r0, lanes[2]), jnp.float32),
                pltpu.VMEM((64 * r0, lanes[3]), jnp.float32),
                pltpu.VMEM((256 * r0, lanes[4]), jnp.float32),
            ],
        ),
        compiler_params=pltpu.CompilerParams(
            dimension_semantics=("parallel",),           # batch tiles are independent
            vmem_limit_bytes=32 * 1024 * 1024,           # ~6 MiB used; fits v5e/v6e/v7x
        ),
    )(x_pad, *weight_args)

    # Single layout fix-up. Row order within one grid step is
    #   (kh3, kw3, kh2, kw2, kh1, kw1, kh0, kw0, h, w, b)
    # with H = h*16 + kh0*8 + kh1*4 + kh2*2 + kh3 (same for W).
    # Slice the padded channel lanes BEFORE the transpose (32x less data moved).
    o = out.reshape(nb, 2, 2, 2, 2, 2, 2, 2, 2, cd, cd, tb, lane_out)
    o = o[..., :spatial_channel]
    o = jnp.transpose(o, (0, 11, 12, 9, 7, 5, 3, 1, 10, 8, 6, 4, 2))
    o = o.reshape(b_pad, spatial_channel, 16 * cd, 16 * cd)
    return o[:B]                                         # NCHW


# ----------------------------------------------------------------------------
# Base module (decoder-only, as in FeatureMapping.Base)
# ----------------------------------------------------------------------------
class Base:
    def __init__(self, dimension, latent_dimension, spatial_channel, key, batch_tile=8):
        assert dimension % 16 == 0, "decoder upsamples by 2**4"
        self.dimension = dimension
        self.latent_dimension = latent_dimension
        self.spatial_channel = spatial_channel
        self.decoder_channels = [256, 256, 128, 64, 64, spatial_channel]
        self.conv_dimension = dimension // 16
        self.lanes = tuple(_round_up(c, 128) for c in self.decoder_channels)
        self.batch_tile = batch_tile                      # rows per grid step (mult of 8)
        self._raw = self._init_raw_params(key)            # torch-layout weights
        self.params = self._pack_params(self._raw)        # packed/padded once, at init
        self._cfg = (dimension, latent_dimension, spatial_channel,
                     self.conv_dimension, self.batch_tile, self.lanes)

    # -- raw (torch-layout) parameter init -----------------------------------
    def _init_raw_params(self, key):
        cd = self.conv_dimension
        ch = self.decoder_channels
        keys = jax.random.split(key, 12)
        ki = iter(keys)

        def unif(k, shape, fan_in):
            bound = 1.0 / (float(fan_in) ** 0.5)
            return jax.random.uniform(k, shape, jnp.float32, -bound, bound)

        raw = {}
        fc_out = ch[0] * cd * cd
        raw["fc_w"] = unif(next(ki), (self.latent_dimension, fc_out), self.latent_dimension)
        raw["fc_b"] = unif(next(ki), (fc_out,), self.latent_dimension)
        raw["up"] = []
        for l in range(4):
            cin, cout = ch[l], ch[l + 1]
            fan_in = cin * 4
            w = unif(next(ki), (cin, cout, 2, 2), fan_in)   # torch ConvTranspose2d layout
            b = unif(next(ki), (cout,), fan_in)
            raw["up"].append((w, b))
        raw["out_w"] = unif(next(ki), (ch[4], ch[5]), ch[4])
        raw["out_b"] = unif(next(ki), (ch[5],), ch[4])
        return raw
        # TODO(synk): torch.save / torch.load checkpoint I/O intentionally not translated.

    # -- one-time packing: transpose / tile / pad to lane-aligned layouts -----
    def _pack_params(self, raw):
        cd = self.conv_dimension
        npix = cd * cd
        ch = self.decoder_channels
        lanes = self.lanes
        p = {}

        # fc: torch reshapes its output as NCHW (c,h,w); reorder columns to
        # (h,w,c) and pad each per-pixel channel group to lanes[0].
        fw = raw["fc_w"].reshape(self.latent_dimension, ch[0], cd, cd)
        fw = jnp.transpose(fw, (0, 2, 3, 1))
        fw = jnp.pad(fw, ((0, 0), (0, 0), (0, 0), (0, lanes[0] - ch[0])))
        p["fc_w"] = fw.reshape(self.latent_dimension, npix * lanes[0])
        fb = raw["fc_b"].reshape(ch[0], cd, cd)
        fb = jnp.transpose(fb, (1, 2, 0))
        fb = jnp.pad(fb, ((0, 0), (0, 0), (0, lanes[0] - ch[0])))
        p["fc_b"] = fb.reshape(1, npix * lanes[0])

        # ConvTranspose2d(k=2,s=2): pack (Cin,Cout,kh,kw) -> (Cin_p, 4*Cout_p),
        # column index = (kh*2+kw)*Cout_p + cout, zero padding for alignment.
        # Bias stored once (1, Cout_p); the kernel reuses it for all 4 taps.
        for l, (w, b) in enumerate(raw["up"]):
            cin, cout = ch[l], ch[l + 1]
            cin_p, cout_p = lanes[l], lanes[l + 1]
            wt = jnp.transpose(w, (0, 2, 3, 1))                      # (cin, kh, kw, cout)
            wt = jnp.pad(wt, ((0, cin_p - cin), (0, 0), (0, 0), (0, cout_p - cout)))
            p[f"up{l}_w"] = wt.reshape(cin_p, 4 * cout_p)
            p[f"up{l}_b"] = jnp.pad(b, (0, cout_p - cout)).reshape(1, cout_p)

        # 1x1 conv, padded to 128 lanes in and out (zeros).
        cin, cout = ch[4], ch[5]
        p["out_w"] = jnp.pad(raw["out_w"], ((0, lanes[4] - cin), (0, lanes[5] - cout)))
        p["out_b"] = jnp.pad(raw["out_b"], (0, lanes[5] - cout)).reshape(1, lanes[5])
        return p

    # -- public API -----------------------------------------------------------
    def decode(self, x):
        assert x.shape[1:] == (self.latent_dimension,), (
            f"[Feature Mapping : decode] Expected input shape "
            f"{(-1, self.latent_dimension)}, but received {x.shape}.")
        out = _decode_impl(x, self.params, self._cfg)
        assert out.shape[1:] == (self.decoder_channels[-1], self.dimension, self.dimension), (
            f"[Feature Mapping : decode] Expected output shape "
            f"{(-1, self.decoder_channels[-1], self.dimension, self.dimension)}, "
            f"but yield {out.shape}.")
        return out

    def forward(self, x):
        return self.decode(x)

    # -- pure-JAX reference (same raw params, straightforward NHWC ops) -------
    def _reference_decode(self, x):
        hp = jax.lax.Precision.HIGHEST
        raw = self._raw
        cd = self.conv_dimension
        h = jnp.maximum(jnp.dot(x, raw["fc_w"], precision=hp) + raw["fc_b"], 0.0)
        h = h.reshape(-1, self.decoder_channels[0], cd, cd).transpose(0, 2, 3, 1)  # NHWC
        for (w, b) in raw["up"]:
            Bsz, H, W, _ = h.shape
            cout = w.shape[1]
            y = jnp.einsum("bhwi,iokl->bhkwlo", h, w, precision=hp)
            y = y.reshape(Bsz, 2 * H, 2 * W, cout) + b
            h = jnp.maximum(y, 0.0)
        y = jnp.dot(h, raw["out_w"], precision=hp) + raw["out_b"]
        return jnp.transpose(y, (0, 3, 1, 2))                                     # NCHW


if __name__ == "__main__":
    dimension = 16
    latent_dimension = 32
    spatial_channel = 4
    batch = 2

    key = jax.random.PRNGKey(0)
    k_model, k_x = jax.random.split(key)

    model = Base(dimension, latent_dimension, spatial_channel, key=k_model)
    x = jax.random.normal(k_x, (batch, latent_dimension), jnp.float32)

    y = model.forward(x)
    y = jax.block_until_ready(y)

    assert y.shape == (batch, spatial_channel, dimension, dimension)
    assert bool(jnp.isfinite(y).all())

    # Correctness check against a pure-JAX reference of the same decoder.
    y_ref = jax.block_until_ready(model._reference_decode(x))
    err = float(jnp.max(jnp.abs(y - y_ref)))
    assert err < 1e-2, f"kernel mismatch vs reference: max abs err = {err}"

    print("KERNEL_OK")
</pallas_src>

<mosaic_0001>
module attributes {stable_mosaic.version = 11 : i64} {
  func.func @_decoder_kernel(%arg0: i32, %arg1: memref<8x32xf32, #tpu.memory_space<vmem>>, %arg2: memref<32x256xf32, #tpu.memory_space<vmem>>, %arg3: memref<1x256xf32, #tpu.memory_space<vmem>>, %arg4: memref<256x1024xf32, #tpu.memory_space<vmem>>, %arg5: memref<1x256xf32, #tpu.memory_space<vmem>>, %arg6: memref<256x512xf32, #tpu.memory_space<vmem>>, %arg7: memref<1x128xf32, #tpu.memory_space<vmem>>, %arg8: memref<128x512xf32, #tpu.memory_space<vmem>>, %arg9: memref<1x128xf32, #tpu.memory_space<vmem>>, %arg10: memref<128x512xf32, #tpu.memory_space<vmem>>, %arg11: memref<1x128xf32, #tpu.memory_space<vmem>>, %arg12: memref<128x128xf32, #tpu.memory_space<vmem>>, %arg13: memref<1x128xf32, #tpu.memory_space<vmem>>, %arg14: memref<2048x128xf32, #tpu.memory_space<vmem>>, %arg15: memref<8x256xf32, #tpu.memory_space<vmem>>, %arg16: memref<32x256xf32, #tpu.memory_space<vmem>>, %arg17: memref<128x128xf32, #tpu.memory_space<vmem>>, %arg18: memref<512x128xf32, #tpu.memory_space<vmem>>, %arg19: memref<2048x128xf32, #tpu.memory_space<vmem>>) attributes {dimension_semantics = [#tpu.dimension_semantics<parallel>], iteration_bounds = array<i64: 1>, scalar_prefetch = 0 : i64, scratch_operands = 5 : i64, tpu.core_type = #tpu.core_type<tc>, window_params = [{transform_indices = @transform_0, window_bounds = array<i64: 8, 32>}, {pipeline_mode = #tpu.pipeline_mode<synchronous>, transform_indices = @transform_1, window_bounds = array<i64: 32, 256>}, {pipeline_mode = #tpu.pipeline_mode<synchronous>, transform_indices = @transform_2, window_bounds = array<i64: 1, 256>}, {pipeline_mode = #tpu.pipeline_mode<synchronous>, transform_indices = @transform_3, window_bounds = array<i64: 256, 1024>}, {pipeline_mode = #tpu.pipeline_mode<synchronous>, transform_indices = @transform_4, window_bounds = array<i64: 1, 256>}, {pipeline_mode = #tpu.pipeline_mode<synchronous>, transform_indices = @transform_5, window_bounds = array<i64: 256, 512>}, {pipeline_mode = #tpu.pipeline_mode<synchronous>, transform_indices = @transform_6, window_bounds = array<i64: 1, 128>}, {pipeline_mode = #tpu.pipeline_mode<synchronous>, transform_indices = @transform_7, window_bounds = array<i64: 128, 512>}, {pipeline_mode = #tpu.pipeline_mode<synchronous>, transform_indices = @transform_8, window_bounds = array<i64: 1, 128>}, {pipeline_mode = #tpu.pipeline_mode<synchronous>, transform_indices = @transform_9, window_bounds = array<i64: 128, 512>}, {pipeline_mode = #tpu.pipeline_mode<synchronous>, transform_indices = @transform_10, window_bounds = array<i64: 1, 128>}, {pipeline_mode = #tpu.pipeline_mode<synchronous>, transform_indices = @transform_11, window_bounds = array<i64: 128, 128>}, {pipeline_mode = #tpu.pipeline_mode<synchronous>, transform_indices = @transform_12, window_bounds = array<i64: 1, 128>}, {transform_indices = @transform_13, window_bounds = array<i64: 2048, 128>}]} {
    %c0 = arith.constant 0 : index
    %c0_0 = arith.constant 0 : index
    %0 = vector.load %arg1[%c0, %c0_0] : memref<8x32xf32, #tpu.memory_space<vmem>>, vector<8x32xf32>
    %c0_1 = arith.constant 0 : index
    %c0_2 = arith.constant 0 : index
    %1 = vector.load %arg2[%c0_1, %c0_2] : memref<32x256xf32, #tpu.memory_space<vmem>>, vector<32x256xf32>
    %cst = arith.constant dense<0.000000e+00> : vector<8x256xf32>
    %2 = tpu.matmul %0, %1, %cst {dimension_numbers = #tpu.dot_dimension_numbers<[1], [0], [0], [1], [0, 0, 1, 1], [], []>} : vector<8x32xf32>, vector<32x256xf32>, vector<8x256xf32> -> vector<8x256xf32>
    %c0_3 = arith.constant 0 : index
    %c0_4 = arith.constant 0 : index
    %3 = vector.load %arg3[%c0_3, %c0_4] : memref<1x256xf32, #tpu.memory_space<vmem>>, vector<1x256xf32>
    %4 = vector.broadcast %3 : vector<1x256xf32> to vector<8x256xf32>
    %5 = arith.addf %2, %4 : vector<8x256xf32>
    %cst_5 = arith.constant 0.000000e+00 : f32
    %6 = vector.broadcast %cst_5 : f32 to vector<8x256xf32>
    %7 = arith.maximumf %5, %6 : vector<8x256xf32>
    %c0_6 = arith.constant 0 : index
    %c0_7 = arith.constant 0 : index
    %8 = vector.load %arg15[%c0_6, %c0_7] : memref<8x256xf32, #tpu.memory_space<vmem>>, vector<8x256xf32>
    tpu.vector_store %arg15[%c0_6, %c0_7], %7 {strides = array<i32>} : memref<8x256xf32, #tpu.memory_space<vmem>>, vector<8x256xf32>,
    %c0_8 = arith.constant 0 : index
    %c0_9 = arith.constant 0 : index
    %9 = vector.load %arg15[%c0_8, %c0_9] : memref<8x256xf32, #tpu.memory_space<vmem>>, vector<8x256xf32>
    %c0_10 = arith.constant 0 : index
    %c0_11 = arith.constant 0 : index
    %10 = vector.load %arg5[%c0_10, %c0_11] : memref<1x256xf32, #tpu.memory_space<vmem>>, vector<1x256xf32>
    %c0_12 = arith.constant 0 : index
    %c0_13 = arith.constant 0 : index
    %11 = vector.load %arg4[%c0_12, %c0_13] : memref<256x1024xf32, #tpu.memory_space<vmem>>, vector<256x256xf32>
    %cst_14 = arith.constant dense<0.000000e+00> : vector<8x256xf32>
    %12 = tpu.matmul %9, %11, %cst_14 {dimension_numbers = #tpu.dot_dimension_numbers<[1], [0], [0], [1], [0, 0, 1, 1], [], []>} : vector<8x256xf32>, vector<256x256xf32>, vector<8x256xf32> -> vector<8x256xf32>
    %13 = vector.broadcast %10 : vector<1x256xf32> to vector<8x256xf32>
    %14 = arith.addf %12, %13 : vector<8x256xf32>
    %cst_15 = arith.constant 0.000000e+00 : f32
    %15 = vector.broadcast %cst_15 : f32 to vector<8x256xf32>
    %16 = arith.maximumf %14, %15 : vector<8x256xf32>
    %c0_16 = arith.constant 0 : index
    %c0_17 = arith.constant 0 : index
    %17 = vector.load %arg16[%c0_16, %c0_17] : memref<32x256xf32, #tpu.memory_space<vmem>>, vector<8x256xf32>
    tpu.vector_store %arg16[%c0_16, %c0_17], %16 {strides = array<i32>} : memref<32x256xf32, #tpu.memory_space<vmem>>, vector<8x256xf32>,
    %c0_18 = arith.constant 0 : index
    %c256 = arith.constant 256 : index
    %18 = vector.load %arg4[%c0_18, %c256] : memref<256x1024xf32, #tpu.memory_space<vmem>>, vector<256x256xf32>
    %cst_19 = arith.constant dense<0.000000e+00> : vector<8x256xf32>
    %19 = tpu.matmul %9, %18, %cst_19 {dimension_numbers = #tpu.dot_dimension_numbers<[1], [0], [0], [1], [0, 0, 1, 1], [], []>} : vector<8x256xf32>, vector<256x256xf32>, vector<8x256xf32> -> vector<8x256xf32>
    %20 = vector.broadcast %10 : vector<1x256xf32> to vector<8x256xf32>
    %21 = arith.addf %19, %20 : vector<8x256xf32>
    %cst_20 = arith.constant 0.000000e+00 : f32
    %22 = vector.broadcast %cst_20 : f32 to vector<8x256xf32>
    %23 = arith.maximumf %21, %22 : vector<8x256xf32>
    %c8 = arith.constant 8 : index
    %c0_21 = arith.constant 0 : index
    %24 = vector.load %arg16[%c8, %c0_21] : memref<32x256xf32, #tpu.memory_space<vmem>>, vector<8x256xf32>
    tpu.vector_store %arg16[%c8, %c0_21], %23 {strides = array<i32>} : memref<32x256xf32, #tpu.memory_space<vmem>>, vector<8x256xf32>,
    %c0_22 = arith.constant 0 : index
    %c512 = arith.constant 512 : index
    %25 = vector.load %arg4[%c0_22, %c512] : memref<256x1024xf32, #tpu.memory_space<vmem>>, vector<256x256xf32>
    %cst_23 = arith.constant dense<0.000000e+00> : vector<8x256xf32>
    %26 = tpu.matmul %9, %25, %cst_23 {dimension_numbers = #tpu.dot_dimension_numbers<[1], [0], [0], [1], [0, 0, 1, 1], [], []>} : vector<8x256xf32>, vector<256x256xf32>, vector<8x256xf32> -> vector<8x256xf32>
    %27 = vector.broadcast %10 : vector<1x256xf32> to vector<8x256xf32>
    %28 = arith.addf %26, %27 : vector<8x256xf32>
    %cst_24 = arith.constant 0.000000e+00 : f32
    %29 = vector.broadcast %cst_24 : f32 to vector<8x256xf32>
    %30 = arith.maximumf %28, %29 : vector<8x256xf32>
    %c16 = arith.constant 16 : index
    %c0_25 = arith.constant 0 : index
    %31 = vector.load %arg16[%c16, %c0_25] : memref<32x256xf32, #tpu.memory_space<vmem>>, vector<8x256xf32>
    tpu.vector_store %arg16[%c16, %c0_25], %30 {strides = array<i32>} : memref<32x256xf32, #tpu.memory_space<vmem>>, vector<8x256xf32>,
    %c0_26 = arith.constant 0 : index
    %c768 = arith.constant 768 : index
    %32 = vector.load %arg4[%c0_26, %c768] : memref<256x1024xf32, #tpu.memory_space<vmem>>, vector<256x256xf32>
    %cst_27 = arith.constant dense<0.000000e+00> : vector<8x256xf32>
    %33 = tpu.matmul %9, %32, %cst_27 {dimension_numbers = #tpu.dot_dimension_numbers<[1], [0], [0], [1], [0, 0, 1, 1], [], []>} : vector<8x256xf32>, vector<256x256xf32>, vector<8x256xf32> -> vector<8x256xf32>
    %34 = vector.broadcast %10 : vector<1x256xf32> to vector<8x256xf32>
    %35 = arith.addf %33, %34 : vector<8x256xf32>
    %cst_28 = arith.constant 0.000000e+00 : f32
    %36 = vector.broadcast %cst_28 : f32 to vector<8x256xf32>
    %37 = arith.maximumf %35, %36 : vector<8x256xf32>
    %c24 = arith.constant 24 : index
    %c0_29 = arith.constant 0 : index
    %38 = vector.load %arg16[%c24, %c0_29] : memref<32x256xf32, #tpu.memory_space<vmem>>, vector<8x256xf32>
    tpu.vector_store %arg16[%c24, %c0_29], %37 {strides = array<i32>} : memref<32x256xf32, #tpu.memory_space<vmem>>, vector<8x256xf32>,
    %c0_30 = arith.constant 0 : index
    %c0_31 = arith.constant 0 : index
    %39 = vector.load %arg16[%c0_30, %c0_31] : memref<32x256xf32, #tpu.memory_space<vmem>>, vector<32x256xf32>
    %c0_32 = arith.constant 0 : index
    %c0_33 = arith.constant 0 : index
    %40 = vector.load %arg7[%c0_32, %c0_33] : memref<1x128xf32, #tpu.memory_space<vmem>>, vector<1x128xf32>
    %c0_34 = arith.constant 0 : index
    %c0_35 = arith.constant 0 : index
    %41 = vector.load %arg6[%c0_34, %c0_35] : memref<256x512xf32, #tpu.memory_space<vmem>>, vector<256x128xf32>
    %cst_36 = arith.constant dense<0.000000e+00> : vector<32x128xf32>
    %42 = tpu.matmul %39, %41, %cst_36 {dimension_numbers = #tpu.dot_dimension_numbers<[1], [0], [0], [1], [0, 0, 1, 1], [], []>} : vector<32x256xf32>, vector<256x128xf32>, vector<32x128xf32> -> vector<32x128xf32>
    %43 = vector.broadcast %40 : vector<1x128xf32> to vector<32x128xf32>
    %44 = arith.addf %42, %43 : vector<32x128xf32>
    %cst_37 = arith.constant 0.000000e+00 : f32
    %45 = vector.broadcast %cst_37 : f32 to vector<32x128xf32>
    %46 = arith.maximumf %44, %45 : vector<32x128xf32>
    %c0_38 = arith.constant 0 : index
    %c0_39 = arith.constant 0 : index
    %47 = vector.load %arg17[%c0_38, %c0_39] : memref<128x128xf32, #tpu.memory_space<vmem>>, vector<32x128xf32>
    tpu.vector_store %arg17[%c0_38, %c0_39], %46 {strides = array<i32>} : memref<128x128xf32, #tpu.memory_space<vmem>>, vector<32x128xf32>,
    %c0_40 = arith.constant 0 : index
    %c128 = arith.constant 128 : index
    %48 = vector.load %arg6[%c0_40, %c128] : memref<256x512xf32, #tpu.memory_space<vmem>>, vector<256x128xf32>
    %cst_41 = arith.constant dense<0.000000e+00> : vector<32x128xf32>
    %49 = tpu.matmul %39, %48, %cst_41 {dimension_numbers = #tpu.dot_dimension_numbers<[1], [0], [0], [1], [0, 0, 1, 1], [], []>} : vector<32x256xf32>, vector<256x128xf32>, vector<32x128xf32> -> vector<32x128xf32>
    %50 = vector.broadcast %40 : vector<1x128xf32> to vector<32x128xf32>
    %51 = arith.addf %49, %50 : vector<32x128xf32>
    %cst_42 = arith.constant 0.000000e+00 : f32
    %52 = vector.broadcast %cst_42 : f32 to vector<32x128xf32>
    %53 = arith.maximumf %51, %52 : vector<32x128xf32>
    %c32 = arith.constant 32 : index
    %c0_43 = arith.constant 0 : index
    %54 = vector.load %arg17[%c32, %c0_43] : memref<128x128xf32, #tpu.memory_space<vmem>>, vector<32x128xf32>
    tpu.vector_store %arg17[%c32, %c0_43], %53 {strides = array<i32>} : memref<128x128xf32, #tpu.memory_space<vmem>>, vector<32x128xf32>,
    %c0_44 = arith.constant 0 : index
    %c256_45 = arith.constant 256 : index
    %55 = vector.load %arg6[%c0_44, %c256_45] : memref<256x512xf32, #tpu.memory_space<vmem>>, vector<256x128xf32>
    %cst_46 = arith.constant dense<0.000000e+00> : vector<32x128xf32>
    %56 = tpu.matmul %39, %55, %cst_46 {dimension_numbers = #tpu.dot_dimension_numbers<[1], [0], [0], [1], [0, 0, 1, 1], [], []>} : vector<32x256xf32>, vector<256x128xf32>, vector<32x128xf32> -> vector<32x128xf32>
    %57 = vector.broadcast %40 : vector<1x128xf32> to vector<32x128xf32>
    %58 = arith.addf %56, %57 : vector<32x128xf32>
    %cst_47 = arith.constant 0.000000e+00 : f32
    %59 = vector.broadcast %cst_47 : f32 to vector<32x128xf32>
    %60 = arith.maximumf %58, %59 : vector<32x128xf32>
    %c64 = arith.constant 64 : index
    %c0_48 = arith.constant 0 : index
    %61 = vector.load %arg17[%c64, %c0_48] : memref<128x128xf32, #tpu.memory_space<vmem>>, vector<32x128xf32>
    tpu.vector_store %arg17[%c64, %c0_48], %60 {strides = array<i32>} : memref<128x128xf32, #tpu.memory_space<vmem>>, vector<32x128xf32>,
    %c0_49 = arith.constant 0 : index
    %c384 = arith.constant 384 : index
    %62 = vector.load %arg6[%c0_49, %c384] : memref<256x512xf32, #tpu.memory_space<vmem>>, vector<256x128xf32>
    %cst_50 = arith.constant dense<0.000000e+00> : vector<32x128xf32>
    %63 = tpu.matmul %39, %62, %cst_50 {dimension_numbers = #tpu.dot_dimension_numbers<[1], [0], [0], [1], [0, 0, 1, 1], [], []>} : vector<32x256xf32>, vector<256x128xf32>, vector<32x128xf32> -> vector<32x128xf32>
    %64 = vector.broadcast %40 : vector<1x128xf32> to vector<32x128xf32>
    %65 = arith.addf %63, %64 : vector<32x128xf32>
    %cst_51 = arith.constant 0.000000e+00 : f32
    %66 = vector.broadcast %cst_51 : f32 to vector<32x128xf32>
    %67 = arith.maximumf %65, %66 : vector<32x128xf32>
    %c96 = arith.constant 96 : index
    %c0_52 = arith.constant 0 : index
    %68 = vector.load %arg17[%c96, %c0_52] : memref<128x128xf32, #tpu.memory_space<vmem>>, vector<32x128xf32>
    tpu.vector_store %arg17[%c96, %c0_52], %67 {strides = array<i32>} : memref<128x128xf32, #tpu.memory_space<vmem>>, vector<32x128xf32>,
    %c0_53 = arith.constant 0 : index
    %c0_54 = arith.constant 0 : index
    %69 = vector.load %arg17[%c0_53, %c0_54] : memref<128x128xf32, #tpu.memory_space<vmem>>, vector<128x128xf32>
    %c0_55 = arith.constant 0 : index
    %c0_56 = arith.constant 0 : index
    %70 = vector.load %arg9[%c0_55, %c0_56] : memref<1x128xf32, #tpu.memory_space<vmem>>, vector<1x128xf32>
    %c0_57 = arith.constant 0 : index
    %c0_58 = arith.constant 0 : index
    %71 = vector.load %arg8[%c0_57, %c0_58] : memref<128x512xf32, #tpu.memory_space<vmem>>, vector<128x128xf32>
    %cst_59 = arith.constant dense<0.000000e+00> : vector<128x128xf32>
    %72 = tpu.matmul %69, %71, %cst_59 {dimension_numbers = #tpu.dot_dimension_numbers<[1], [0], [0], [1], [0, 0, 1, 1], [], []>} : vector<128x128xf32>, vector<128x128xf32>, vector<128x128xf32> -> vector<128x128xf32>
    %73 = vector.broadcast %70 : vector<1x128xf32> to vector<128x128xf32>
    %74 = arith.addf %72, %73 : vector<128x128xf32>
    %cst_60 = arith.constant 0.000000e+00 : f32
    %75 = vector.broadcast %cst_60 : f32 to vector<128x128xf32>
    %76 = arith.maximumf %74, %75 : vector<128x128xf32>
    %c0_61 = arith.constant 0 : index
    %c0_62 = arith.constant 0 : index
    %77 = vector.load %arg18[%c0_61, %c0_62] : memref<512x128xf32, #tpu.memory_space<vmem>>, vector<128x128xf32>
    tpu.vector_store %arg18[%c0_61, %c0_62], %76 {strides = array<i32>} : memref<512x128xf32, #tpu.memory_space<vmem>>, vector<128x128xf32>,
    %c0_63 = arith.constant 0 : index
    %c128_64 = arith.constant 128 : index
    %78 = vector.load %arg8[%c0_63, %c128_64] : memref<128x512xf32, #tpu.memory_space<vmem>>, vector<128x128xf32>
    %cst_65 = arith.constant dense<0.000000e+00> : vector<128x128xf32>
    %79 = tpu.matmul %69, %78, %cst_65 {dimension_numbers = #tpu.dot_dimension_numbers<[1], [0], [0], [1], [0, 0, 1, 1], [], []>} : vector<128x128xf32>, vector<128x128xf32>, vector<128x128xf32> -> vector<128x128xf32>
    %80 = vector.broadcast %70 : vector<1x128xf32> to vector<128x128xf32>
    %81 = arith.addf %79, %80 : vector<128x128xf32>
    %cst_66 = arith.constant 0.000000e+00 : f32
    %82 = vector.broadcast %cst_66 : f32 to vector<128x128xf32>
    %83 = arith.maximumf %81, %82 : vector<128x128xf32>
    %c128_67 = arith.constant 128 : index
    %c0_68 = arith.constant 0 : index
    %84 = vector.load %arg18[%c128_67, %c0_68] : memref<512x128xf32, #tpu.memory_space<vmem>>, vector<128x128xf32>
    tpu.vector_store %arg18[%c128_67, %c0_68], %83 {strides = array<i32>} : memref<512x128xf32, #tpu.memory_space<vmem>>, vector<128x128xf32>,
    %c0_69 = arith.constant 0 : index
    %c256_70 = arith.constant 256 : index
    %85 = vector.load %arg8[%c0_69, %c256_70] : memref<128x512xf32, #tpu.memory_space<vmem>>, vector<128x128xf32>
    %cst_71 = arith.constant dense<0.000000e+00> : vector<128x128xf32>
    %86 = tpu.matmul %69, %85, %cst_71 {dimension_numbers = #tpu.dot_dimension_numbers<[1], [0], [0], [1], [0, 0, 1, 1], [], []>} : vector<128x128xf32>, vector<128x128xf32>, vector<128x128xf32> -> vector<128x128xf32>
    %87 = vector.broadcast %70 : vector<1x128xf32> to vector<128x128xf32>
    %88 = arith.addf %86, %87 : vector<128x128xf32>
    %cst_72 = arith.constant 0.000000e+00 : f32
    %89 = vector.broadcast %cst_72 : f32 to vector<128x128xf32>
    %90 = arith.maximumf %88, %89 : vector<128x128xf32>
    %c256_73 = arith.constant 256 : index
    %c0_74 = arith.constant 0 : index
    %91 = vector.load %arg18[%c256_73, %c0_74] : memref<512x128xf32, #tpu.memory_space<vmem>>, vector<128x128xf32>
    tpu.vector_store %arg18[%c256_73, %c0_74], %90 {strides = array<i32>} : memref<512x128xf32, #tpu.memory_space<vmem>>, vector<128x128xf32>,
    %c0_75 = arith.constant 0 : index
    %c384_76 = arith.constant 384 : index
    %92 = vector.load %arg8[%c0_75, %c384_76] : memref<128x512xf32, #tpu.memory_space<vmem>>, vector<128x128xf32>
    %cst_77 = arith.constant dense<0.000000e+00> : vector<128x128xf32>
    %93 = tpu.matmul %69, %92, %cst_77 {dimension_numbers = #tpu.dot_dimension_numbers<[1], [0], [0], [1], [0, 0, 1, 1], [], []>} : vector<128x128xf32>, vector<128x128xf32>, vector<128x128xf32> -> vector<128x128xf32>
    %94 = vector.broadcast %70 : vector<1x128xf32> to vector<128x128xf32>
    %95 = arith.addf %93, %94 : vector<128x128xf32>
    %cst_78 = arith.constant 0.000000e+00 : f32
    %96 = vector.broadcast %cst_78 : f32 to vector<128x128xf32>
    %97 = arith.maximumf %95, %96 : vector<128x128xf32>
    %c384_79 = arith.constant 384 : index
    %c0_80 = arith.constant 0 : index
    %98 = vector.load %arg18[%c384_79, %c0_80] : memref<512x128xf32, #tpu.memory_space<vmem>>, vector<128x128xf32>
    tpu.vector_store %arg18[%c384_79, %c0_80], %97 {strides = array<i32>} : memref<512x128xf32, #tpu.memory_space<vmem>>, vector<128x128xf32>,
    %c0_81 = arith.constant 0 : index
    %c0_82 = arith.constant 0 : index
    %99 = vector.load %arg18[%c0_81, %c0_82] : memref<512x128xf32, #tpu.memory_space<vmem>>, vector<512x128xf32>
    %c0_83 = arith.constant 0 : index
    %c0_84 = arith.constant 0 : index
    %100 = vector.load %arg11[%c0_83, %c0_84] : memref<1x128xf32, #tpu.memory_space<vmem>>, vector<1x128xf32>
    %c0_85 = arith.constant 0 : index
    %c0_86 = arith.constant 0 : index
    %101 = vector.load %arg10[%c0_85, %c0_86] : memref<128x512xf32, #tpu.memory_space<vmem>>, vector<128x128xf32>
    %cst_87 = arith.constant dense<0.000000e+00> : vector<512x128xf32>
    %102 = tpu.matmul %99, %101, %cst_87 {dimension_numbers = #tpu.dot_dimension_numbers<[1], [0], [0], [1], [0, 0, 1, 1], [], []>} : vector<512x128xf32>, vector<128x128xf32>, vector<512x128xf32> -> vector<512x128xf32>
    %103 = vector.broadcast %100 : vector<1x128xf32> to vector<512x128xf32>
    %104 = arith.addf %102, %103 : vector<512x128xf32>
    %cst_88 = arith.constant 0.000000e+00 : f32
    %105 = vector.broadcast %cst_88 : f32 to vector<512x128xf32>
    %106 = arith.maximumf %104, %105 : vector<512x128xf32>
    %c0_89 = arith.constant 0 : index
    %c0_90 = arith.constant 0 : index
    %107 = vector.load %arg19[%c0_89, %c0_90] : memref<2048x128xf32, #tpu.memory_space<vmem>>, vector<512x128xf32>
    tpu.vector_store %arg19[%c0_89, %c0_90], %106 {strides = array<i32>} : memref<2048x128xf32, #tpu.memory_space<vmem>>, vector<512x128xf32>,
    %c0_91 = arith.constant 0 : index
    %c128_92 = arith.constant 128 : index
    %108 = vector.load %arg10[%c0_91, %c128_92] : memref<128x512xf32, #tpu.memory_space<vmem>>, vector<128x128xf32>
    %cst_93 = arith.constant dense<0.000000e+00> : vector<512x128xf32>
    %109 = tpu.matmul %99, %108, %cst_93 {dimension_numbers = #tpu.dot_dimension_numbers<[1], [0], [0], [1], [0, 0, 1, 1], [], []>} : vector<512x128xf32>, vector<128x128xf32>, vector<512x128xf32> -> vector<512x128xf32>
    %110 = vector.broadcast %100 : vector<1x128xf32> to vector<512x128xf32>
    %111 = arith.addf %109, %110 : vector<512x128xf32>
    %cst_94 = arith.constant 0.000000e+00 : f32
    %112 = vector.broadcast %cst_94 : f32 to vector<512x128xf32>
    %113 = arith.maximumf %111, %112 : vector<512x128xf32>
    %c512_95 = arith.constant 512 : index
    %c0_96 = arith.constant 0 : index
    %114 = vector.load %arg19[%c512_95, %c0_96] : memref<2048x128xf32, #tpu.memory_space<vmem>>, vector<512x128xf32>
    tpu.vector_store %arg19[%c512_95, %c0_96], %113 {strides = array<i32>} : memref<2048x128xf32, #tpu.memory_space<vmem>>, vector<512x128xf32>,
    %c0_97 = arith.constant 0 : index
    %c256_98 = arith.constant 256 : index
    %115 = vector.load %arg10[%c0_97, %c256_98] : memref<128x512xf32, #tpu.memory_space<vmem>>, vector<128x128xf32>
    %cst_99 = arith.constant dense<0.000000e+00> : vector<512x128xf32>
    %116 = tpu.matmul %99, %115, %cst_99 {dimension_numbers = #tpu.dot_dimension_numbers<[1], [0], [0], [1], [0, 0, 1, 1], [], []>} : vector<512x128xf32>, vector<128x128xf32>, vector<512x128xf32> -> vector<512x128xf32>
    %117 = vector.broadcast %100 : vector<1x128xf32> to vector<512x128xf32>
    %118 = arith.addf %116, %117 : vector<512x128xf32>
    %cst_100 = arith.constant 0.000000e+00 : f32
    %119 = vector.broadcast %cst_100 : f32 to vector<512x128xf32>
    %120 = arith.maximumf %118, %119 : vector<512x128xf32>
    %c1024 = arith.constant 1024 : index
    %c0_101 = arith.constant 0 : index
    %121 = vector.load %arg19[%c1024, %c0_101] : memref<2048x128xf32, #tpu.memory_space<vmem>>, vector<512x128xf32>
    tpu.vector_store %arg19[%c1024, %c0_101], %120 {strides = array<i32>} : memref<2048x128xf32, #tpu.memory_space<vmem>>, vector<512x128xf32>,
    %c0_102 = arith.constant 0 : index
    %c384_103 = arith.constant 384 : index
    %122 = vector.load %arg10[%c0_102, %c384_103] : memref<128x512xf32, #tpu.memory_space<vmem>>, vector<128x128xf32>
    %cst_104 = arith.constant dense<0.000000e+00> : vector<512x128xf32>
    %123 = tpu.matmul %99, %122, %cst_104 {dimension_numbers = #tpu.dot_dimension_numbers<[1], [0], [0], [1], [0, 0, 1, 1], [], []>} : vector<512x128xf32>, vector<128x128xf32>, vector<512x128xf32> -> vector<512x128xf32>
    %124 = vector.broadcast %100 : vector<1x128xf32> to vector<512x128xf32>
    %125 = arith.addf %123, %124 : vector<512x128xf32>
    %cst_105 = arith.constant 0.000000e+00 : f32
    %126 = vector.broadcast %cst_105 : f32 to vector<512x128xf32>
    %127 = arith.maximumf %125, %126 : vector<512x128xf32>
    %c1536 = arith.constant 1536 : index
    %c0_106 = arith.constant 0 : index
    %128 = vector.load %arg19[%c1536, %c0_106] : memref<2048x128xf32, #tpu.memory_space<vmem>>, vector<512x128xf32>
    tpu.vector_store %arg19[%c1536, %c0_106], %127 {strides = array<i32>} : memref<2048x128xf32, #tpu.memory_space<vmem>>, vector<512x128xf32>,
    %c0_107 = arith.constant 0 : index
    %c0_108 = arith.constant 0 : index
    %129 = vector.load %arg19[%c0_107, %c0_108] : memref<2048x128xf32, #tpu.memory_space<vmem>>, vector<2048x128xf32>
    %c0_109 = arith.constant 0 : index
    %c0_110 = arith.constant 0 : index
    %130 = vector.load %arg12[%c0_109, %c0_110] : memref<128x128xf32, #tpu.memory_space<vmem>>, vector<128x128xf32>
    %cst_111 = arith.constant dense<0.000000e+00> : vector<2048x128xf32>
    %131 = tpu.matmul %129, %130, %cst_111 {dimension_numbers = #tpu.dot_dimension_numbers<[1], [0], [0], [1], [0, 0, 1, 1], [], []>} : vector<2048x128xf32>, vector<128x128xf32>, vector<2048x128xf32> -> vector<2048x128xf32>
    %c0_112 = arith.constant 0 : index
    %c0_113 = arith.constant 0 : index
    %132 = vector.load %arg13[%c0_112, %c0_113] : memref<1x128xf32, #tpu.memory_space<vmem>>, vector<1x128xf32>
    %133 = vector.broadcast %132 : vector<1x128xf32> to vector<2048x128xf32>
    %134 = arith.addf %131, %133 : vector<2048x128xf32>
    %c0_114 = arith.constant 0 : index
    %c0_115 = arith.constant 0 : index
    %135 = vector.load %arg14[%c0_114, %c0_115] : memref<2048x128xf32, #tpu.memory_space<vmem>>, vector<2048x128xf32>
    tpu.vector_store %arg14[%c0_114, %c0_115], %134 {strides = array<i32>} : memref<2048x128xf32, #tpu.memory_space<vmem>>, vector<2048x128xf32>,
    return
  }
  func.func @transform_0(%arg0: i32) -> (i32, i32) {
    %c0_i32 = arith.constant 0 : i32
    %c0_i32_0 = arith.constant 0 : i32
    return %arg0, %c0_i32 : i32, i32
  }
  func.func @transform_1(%arg0: i32) -> (i32, i32) {
    %c0_i32 = arith.constant 0 : i32
    %c0_i32_0 = arith.constant 0 : i32
    %c0_i32_1 = arith.constant 0 : i32
    return %c0_i32, %c0_i32_0 : i32, i32
  }
  func.func @transform_2(%arg0: i32) -> (i32, i32) {
    %c0_i32 = arith.constant 0 : i32
    %c0_i32_0 = arith.constant 0 : i32
    %c0_i32_1 = arith.constant 0 : i32
    return %c0_i32, %c0_i32_0 : i32, i32
  }
  func.func @transform_3(%arg0: i32) -> (i32, i32) {
    %c0_i32 = arith.constant 0 : i32
    %c0_i32_0 = arith.constant 0 : i32
    %c0_i32_1 = arith.constant 0 : i32
    return %c0_i32, %c0_i32_0 : i32, i32
  }
  func.func @transform_4(%arg0: i32) -> (i32, i32) {
    %c0_i32 = arith.constant 0 : i32
    %c0_i32_0 = arith.constant 0 : i32
    %c0_i32_1 = arith.constant 0 : i32
    return %c0_i32, %c0_i32_0 : i32, i32
  }
  func.func @transform_5(%arg0: i32) -> (i32, i32) {
    %c0_i32 = arith.constant 0 : i32
    %c0_i32_0 = arith.constant 0 : i32
    %c0_i32_1 = arith.constant 0 : i32
    return %c0_i32, %c0_i32_0 : i32, i32
  }
  func.func @transform_6(%arg0: i32) -> (i32, i32) {
    %c0_i32 = arith.constant 0 : i32
    %c0_i32_0 = arith.constant 0 : i32
    %c0_i32_1 = arith.constant 0 : i32
    return %c0_i32, %c0_i32_0 : i32, i32
  }
  func.func @transform_7(%arg0: i32) -> (i32, i32) {
    %c0_i32 = arith.constant 0 : i32
    %c0_i32_0 = arith.constant 0 : i32
    %c0_i32_1 = arith.constant 0 : i32
    return %c0_i32, %c0_i32_0 : i32, i32
  }
  func.func @transform_8(%arg0: i32) -> (i32, i32) {
    %c0_i32 = arith.constant 0 : i32
    %c0_i32_0 = arith.constant 0 : i32
    %c0_i32_1 = arith.constant 0 : i32
    return %c0_i32, %c0_i32_0 : i32, i32
  }
  func.func @transform_9(%arg0: i32) -> (i32, i32) {
    %c0_i32 = arith.constant 0 : i32
    %c0_i32_0 = arith.constant 0 : i32
    %c0_i32_1 = arith.constant 0 : i32
    return %c0_i32, %c0_i32_0 : i32, i32
  }
  func.func @transform_10(%arg0: i32) -> (i32, i32) {
    %c0_i32 = arith.constant 0 : i32
    %c0_i32_0 = arith.constant 0 : i32
    %c0_i32_1 = arith.constant 0 : i32
    return %c0_i32, %c0_i32_0 : i32, i32
  }
  func.func @transform_11(%arg0: i32) -> (i32, i32) {
    %c0_i32 = arith.constant 0 : i32
    %c0_i32_0 = arith.constant 0 : i32
    %c0_i32_1 = arith.constant 0 : i32
    return %c0_i32, %c0_i32_0 : i32, i32
  }
  func.func @transform_12(%arg0: i32) -> (i32, i32) {
    %c0_i32 = arith.constant 0 : i32
    %c0_i32_0 = arith.constant 0 : i32
    %c0_i32_1 = arith.constant 0 : i32
    return %c0_i32, %c0_i32_0 : i32, i32
  }
  func.func @transform_13(%arg0: i32) -> (i32, i32) {
    %c0_i32 = arith.constant 0 : i32
    %c0_i32_0 = arith.constant 0 : i32
    return %arg0, %c0_i32 : i32, i32
  }
}

</mosaic_0001>

<bundles_post_ra>
// kernel: _decode_impl.1
= control target key start
LH: loop header
LB: loop body
LE: loop exit
PB: predicated region body
PF: predicated region fallthrough
CT: control target
= control target key end

     0   :  { %18 = vsyncpa [#allocation8], 0  ;;  %s11923_s0 = inlined_call_operand.vmem [shape: f32[8,32], index: 0, kind: input, shape index: {}]   ;;  %s11924_s1 = inlined_call_operand.hbm [shape: f32[32,256], index: 1, kind: input, shape index: {}]   ;;  %s11925_s2 = inlined_call_operand.vmem [shape: f32[1,256], index: 2, kind: input, shape index: {}]   ;;  %s11926_s3 = inlined_call_operand.hbm [shape: f32[256,1024], index: 3, kind: input, shape index: {}]   ;;  %s11927_s4 = inlined_call_operand.vmem [shape: f32[1,256], index: 4, kind: input, shape index: {}]   ;;  %s11928_s5 = inlined_call_operand.hbm [shape: f32[256,512], index: 5, kind: input, shape index: {}]   ;;  %s11929_s6 = inlined_call_operand.vmem [shape: f32[1,128], index: 6, kind: input, shape index: {}]   ;;  %s11930_s7 = inlined_call_operand.hbm [shape: f32[128,512], index: 7, kind: input, shape index: {}]   ;;  %s11931_s8 = inlined_call_operand.vmem [shape: f32[1,128], index: 8, kind: input, shape index: {}]   ;;  %s11932_s9 = inlined_call_operand.hbm [shape: f32[128,512], index: 9, kind: input, shape index: {}]   ;;  %s11933_s10 = inlined_call_operand.vmem [shape: f32[1,128], index: 10, kind: input, shape index: {}]   ;;  %s11934_s11 = inlined_call_operand.hbm [shape: f32[128,128], index: 11, kind: input, shape index: {}]   ;;  %s11935_s12 = inlined_call_operand.vmem [shape: f32[1,128], index: 12, kind: input, shape index: {}]   ;;  %s11936_s13 = inlined_call_operand.vmem [shape: f32[2048,128], index: 13, kind: output, shape index: {}]  }
   0x1   :  { %19 = vsyncpa [#allocation10], 0 }
   0x2   :  { %20 = vsyncpa [#allocation13], 0 }
   0x3   :  { %21 = vsyncpa [#allocation16], 0  ;;  %s9088_s25 = smov [#allocation9]   ;;  %s8948_s29 = scalar_lea.hbm %s11926_s3, 32768 }
   0x4   :  { %s43_s26 = sshll.u32 %s9088_s25, 4  ;;  %p8949_p0 = scmp.ne.s32.totalorder %s11926_s3, %s8948_s29  ;;  %s44_s26 = int_to_ptr.vmem [resolvable:$true] %s43_s26 }
   0x5   :  { %p8952_p1 = scmp.lt.u32.totalorder %s8948_s29, %s11926_s3 }
   0x7   :  { %p8954_p2 = pnand %p8952_p1, %p8949_p0 }
   0x9   :  { %8957 = shalt.err (!%p8954_p2)
}
   0xa   :  { %s8958_s17 = scalar_lea.vmem %s44_s26, 32768  ;;  %p8963_p4 = scmp.lt.s32.totalorder %s44_s26, %s44_s26 }
   0xb   :  { %p8959_p3 = scmp.ne.s32.totalorder %s44_s26, %s8958_s17  ;;  %p8964_p5 = scmp.lt.s32.totalorder %s8958_s17, %s8958_s17 }
   0xd   :  { %p8965_p6 = por %p8964_p5, %p8963_p4 }
   0xf   :  { %p8966_p7 = pnand %p8965_p6, %p8959_p3 }
  0x11   :  { %8969 = shalt.err (!%p8966_p7)
}
  0x12   :  { %s9089_s18 = smov 1024   ;;  %s9090_s19 = smov 64  }
  0x13   :  { %49 = dma.hbm_to_vmem [thread:$0]  %s11926_s3, 32768, %s44_s26, [#allocation10], %s9089_s18, %s9089_s18, %s9090_s19  }
  0x14   :  { %s9091_s22 = smov [#allocation12]   ;;  %s9092_s24 = smov [#allocation7]  }
  0x15   :  { %s71_s23 = sshll.u32 %s9091_s22, 4  ;;  %s29_s25 = sshll.u32 %s9092_s24, 4  ;;  %s72_s23 = int_to_ptr.vmem [resolvable:$true] %s71_s23  ;;  %s30_s25 = int_to_ptr.vmem [resolvable:$true] %s29_s25 }
  0x16   :  { %s8970_s29 = scalar_lea.hbm %s11930_s7, 8192 }
  0x17   :  { %p8971_p8 = scmp.ne.s32.totalorder %s11930_s7, %s8970_s29  ;;  %p8974_p9 = scmp.lt.u32.totalorder %s8970_s29, %s11930_s7 }
  0x19   :  { %p8976_p10 = pnand %p8974_p9, %p8971_p8 }
  0x1b   :  { %8979 = shalt.err (!%p8976_p10)
}
  0x1c   :  { %s8980_s3 = scalar_lea.vmem %s72_s23, 8192  ;;  %p8985_p12 = scmp.lt.s32.totalorder %s72_s23, %s72_s23 }
  0x1d   :  { %p8981_p11 = scmp.ne.s32.totalorder %s72_s23, %s8980_s3  ;;  %p8986_p13 = scmp.lt.s32.totalorder %s8980_s3, %s8980_s3 }
  0x1f   :  { %p8987_p0 = por %p8986_p13, %p8985_p12 }
  0x21   :  { %p8988_p1 = pnand %p8987_p0, %p8981_p11 }
  0x23   :  { %8991 = shalt.err (!%p8988_p1)
}
  0x24   :  { %s9093_s26 = smov 512   ;;  %s9094_s17 = smov 32  }
  0x25   :  { %77 = dma.hbm_to_vmem [thread:$0]  %s11930_s7, 8192, %s72_s23, [#allocation13], %s9093_s26, %s9093_s26, %s9094_s17  }
  0x26   :  { %s8992_s22 = scalar_lea.hbm %s11924_s1, 1024 }
  0x27   :  { %p8993_p2 = scmp.ne.s32.totalorder %s11924_s1, %s8992_s22  ;;  %p8996_p3 = scmp.lt.u32.totalorder %s8992_s22, %s11924_s1 }
  0x29   :  { %p8998_p4 = pnand %p8996_p3, %p8993_p2 }
  0x2b   :  { %9001 = shalt.err (!%p8998_p4)
}
  0x2c   :  { %s9002_s30 = scalar_lea.vmem %s30_s25, 1024  ;;  %p9007_p6 = scmp.lt.s32.totalorder %s30_s25, %s30_s25 }
  0x2d   :  { %p9003_p5 = scmp.ne.s32.totalorder %s30_s25, %s9002_s30  ;;  %p9008_p7 = scmp.lt.s32.totalorder %s9002_s30, %s9002_s30 }
  0x2f   :  { %p9009_p8 = por %p9008_p7, %p9007_p6 }
  0x31   :  { %p9010_p9 = pnand %p9009_p8, %p9003_p5 }
  0x33   :  { %9013 = shalt.err (!%p9010_p9)
}
  0x34   :  { %s9095_s7 = smov 256   ;;  %s9096_s23 = smov 16  }
  0x35   :  { %35 = dma.hbm_to_vmem [thread:$0]  %s11924_s1, 1024, %s30_s25, [#allocation8], %s9095_s7, %s9095_s7, %s9096_s23  }
  0x36   :  { %s9097_s16 = smov [#allocation11]   ;;  %s9098_s18 = smov [#allocation14]  }
  0x37   :  { %s57_s3 = sshll.u32 %s9097_s16, 4  ;;  %s85_s19 = sshll.u32 %s9098_s18, 4  ;;  %s58_s3 = int_to_ptr.vmem [resolvable:$true] %s57_s3  ;;  %s86_s19 = int_to_ptr.vmem [resolvable:$true] %s85_s19 }
  0x38   :  { %s9014_s22 = scalar_lea.hbm %s11928_s5, 16384 }
  0x39   :  { %p9015_p10 = scmp.ne.s32.totalorder %s11928_s5, %s9014_s22  ;;  %p9018_p11 = scmp.lt.u32.totalorder %s9014_s22, %s11928_s5 }
  0x3b   :  { %p9020_p12 = pnand %p9018_p11, %p9015_p10 }
  0x3d   :  { %9023 = shalt.err (!%p9020_p12)
}
  0x3e   :  { %s9024_s1 = scalar_lea.vmem %s58_s3, 16384  ;;  %p9029_p0 = scmp.lt.s32.totalorder %s58_s3, %s58_s3 }
  0x3f   :  { %p9025_p13 = scmp.ne.s32.totalorder %s58_s3, %s9024_s1  ;;  %p9030_p1 = scmp.lt.s32.totalorder %s9024_s1, %s9024_s1 }
  0x41   :  { %p9031_p2 = por %p9030_p1, %p9029_p0 }
  0x43   :  { %p9032_p3 = pnand %p9031_p2, %p9025_p13 }
  0x45   :  { %9035 = shalt.err (!%p9032_p3)
}
  0x46   :  { %63 = dma.hbm_to_vmem [thread:$0]  %s11928_s5, 16384, %s58_s3, [#allocation10], %s9093_s26, %s9093_s26, %s9094_s17  }
  0x47   :  { %s9036_s14 = scalar_lea.hbm %s11932_s9, 8192 }
  0x48   :  { %p9037_p4 = scmp.ne.s32.totalorder %s11932_s9, %s9036_s14  ;;  %p9040_p5 = scmp.lt.u32.totalorder %s9036_s14, %s11932_s9 }
  0x4a   :  { %p9042_p6 = pnand %p9040_p5, %p9037_p4 }
  0x4c   :  { %9045 = shalt.err (!%p9042_p6)
}
  0x4d   :  { %s9046_s21 = scalar_lea.vmem %s86_s19, 8192  ;;  %p9051_p8 = scmp.lt.s32.totalorder %s86_s19, %s86_s19 }
  0x4e   :  { %p9047_p7 = scmp.ne.s32.totalorder %s86_s19, %s9046_s21  ;;  %p9052_p9 = scmp.lt.s32.totalorder %s9046_s21, %s9046_s21 }
  0x50   :  { %p9053_p10 = por %p9052_p9, %p9051_p8 }
  0x52   :  { %p9054_p11 = pnand %p9053_p10, %p9047_p7 }
  0x54   :  { %9057 = shalt.err (!%p9054_p11)
}
  0x55   :  { %91 = dma.hbm_to_vmem [thread:$0]  %s11932_s9, 8192, %s86_s19, [#allocation13], %s9093_s26, %s9093_s26, %s9094_s17  }
  0x56   :  { %s9099_s22 = smov [#allocation15]   ;;  %s9058_s29 = scalar_lea.hbm %s11934_s11, 2048 }
  0x57   :  { %s99_s24 = sshll.u32 %s9099_s22, 4  ;;  %p9059_p12 = scmp.ne.s32.totalorder %s11934_s11, %s9058_s29  ;;  %s100_s24 = int_to_ptr.vmem [resolvable:$true] %s99_s24 }
  0x58   :  { %p9062_p13 = scmp.lt.u32.totalorder %s9058_s29, %s11934_s11 }
  0x5a   :  { %p9064_p0 = pnand %p9062_p13, %p9059_p12 }
  0x5c   :  { %9067 = shalt.err (!%p9064_p0)
}
  0x5d   :  { %s9068_s23 = scalar_lea.vmem %s100_s24, 2048  ;;  %p9073_p2 = scmp.lt.s32.totalorder %s100_s24, %s100_s24 }
  0x5e   :  { %p9069_p1 = scmp.ne.s32.totalorder %s100_s24, %s9068_s23  ;;  %p9074_p3 = scmp.lt.s32.totalorder %s9068_s23, %s9068_s23 }
  0x60   :  { %p9075_p4 = por %p9074_p3, %p9073_p2 }
  0x62   :  { %p9076_p5 = pnand %p9075_p4, %p9069_p1 }
  0x64   :  { %9079 = shalt.err (!%p9076_p5)
}
  0x65   :  { %s9100_s9 = smov 128   ;;  %s9101_s26 = smov 8  }
  0x66   :  { %105 = dma.hbm_to_vmem [thread:$0]  %s11934_s11, 2048, %s100_s24, [#allocation16], %s9100_s9, %s9100_s9, %s9101_s26  }
  0x67   :  { %9080 = dma.done.wait [#allocation8], 1024  }
  0x68   :  { %9081 = vsyncadd [#allocation8], 4294966272 }
  0x69   :  { %9082 = dma.done.wait [#allocation10], 49152  }
  0x6a   :  { %9083 = vsyncadd [#allocation10], 4294918144 }
  0x6b   :  { %9084 = dma.done.wait [#allocation13], 16384  }
  0x6c   :  { %9085 = vsyncadd [#allocation13], 4294950912 }
  0x6d   :  { %9086 = dma.done.wait [#allocation16], 2048  }
  0x6e   :  { %9087 = vsyncadd [#allocation16], 4294965248  ;;  %v9102_v0 = vmov 0.0   ;;  %v128_v1 = vld [vmem:[#allocation7 + $0x8] sm:$0xff]  ;;  %v130_v2 = vld [vmem:[#allocation7 + $0x18] sm:$0xff]  ;;  %vm147_vm0 = vcmask 261120  }
  0x6f   :  { %215 = vmatprep.mubr.f32.mxu0 %v9102_v0  ;;  %v127_v3 = vld [vmem:[#allocation7] sm:$0xff]  ;;  %v8234_v4 = vpack.c.bf16 %v130_v2, %v128_v1  ;;  %v129_v5 = vld [vmem:[#allocation7 + $0x10] sm:$0xff]  ;;  %v132_v6 = vld [vmem:[#allocation7 + $0x28] sm:$0xff] }
  0x70   :  { %v134_v7 = vld [vmem:[#allocation7 + $0x38] sm:$0xff]  ;;  %v8236_v8 = vpack.c.bf16 %v129_v5, %v127_v3  ;;  %v131_v10 = vld [vmem:[#allocation7 + $0x20] sm:$0xff]  ;;  %v133_v11 = vld [vmem:[#allocation7 + $0x30] sm:$0xff] }
  0x71   :  { %v8238_v9 = vpack.c.bf16 %v134_v7, %v132_v6  ;;  %8235 = vmatprep.subr.bf16.mxu0 %v8234_v4  ;;  %v230_v12 = vld [vmem:[#allocation9 + $0x8] sm:$0xff]  ;;  %v380_v14 = vld [vmem:[#allocation9 + $0x18] sm:$0xff]  ;;  %v8240_v15 = vpack.c.bf16 %v133_v11, %v131_v10  ;;  %v229_v18 = vld [vmem:[#allocation9] sm:$0xff] }
  0x72   :  { %v232_v13 = vld [vmem:[#allocation9 + $0x48] sm:$0xff]  ;;  %8237 = vmatpush1.bf16.msra.mxu0 %v8236_v8  ;;  %v382_v17 = vld [vmem:[#allocation9 + $0x58] sm:$0xff]  ;;  %v231_v19 = vld [vmem:[#allocation9 + $0x40] sm:$0xff] }
  0x73   :  { %v8242_v16 = vpack.c.bf16 %v232_v13, %v230_v12  ;;  %8239 = vmatprep.subr.bf16.mxu0 %v8238_v9  ;;  %v8306_v20 = vpack.c.bf16 %v382_v17, %v380_v14  ;;  %v8244_v21 = vpack.c.bf16 %v231_v19, %v229_v18  ;;  %v379_v22 = vld [vmem:[#allocation9 + $0x10] sm:$0xff]  ;;  %v234_v24 = vld [vmem:[#allocation9 + $0x88] sm:$0xff]  ;;  %v384_v26 = vld [vmem:[#allocation9 + $0x98] sm:$0xff] }
  0x74   :  { %v381_v23 = vld [vmem:[#allocation9 + $0x50] sm:$0xff]  ;;  %v236_v25 = vld [vmem:[#allocation9 + $0xc8] sm:$0xff]  ;;  %v386_v27 = vld [vmem:[#allocation9 + $0xd8] sm:$0xff] }
  0x75   :  { %8243 = vmatprep.subr.bf16.mxu1 %v8242_v16  ;;  %v8246_v28 = vpack.c.bf16 %v236_v25, %v234_v24  ;;  %v233_v29 = vld [vmem:[#allocation9 + $0x80] sm:$0xff]  ;;  %v8308_v32 = vpack.c.bf16 %v381_v23, %v379_v22  ;;  %v238_v34 = vld [vmem:[#allocation9 + $0x108] sm:$0xff]  ;;  %v8310_v36 = vpack.c.bf16 %v386_v27, %v384_v26  ;;  %v383_v37 = vld [vmem:[#allocation9 + $0x90] sm:$0xff] }
  0x76   :  { %8245 = vmatpush1.bf16.msra.mxu1 %v8244_v21  ;;  %v235_v30 = vld [vmem:[#allocation9 + $0xc0] sm:$0xff]  ;;  %8241 = vmatpush1.bf16.msra.mxu0 %v8240_v15  ;;  %v240_v35 = vld [vmem:[#allocation9 + $0x148] sm:$0xff]  ;;  %v385_v38 = vld [vmem:[#allocation9 + $0xd0] sm:$0xff] }
  0x77   :  { %v126_v31 = vld [vmem:[%s11923_s0] sm:$0xff]  ;;  %v8248_v33 = vpack.c.bf16 %v235_v30, %v233_v29  ;;  %8307 = vmatprep.subr.bf16.mxu0 %v8306_v20  ;;  %8247 = vmatprep.subr.bf16.mxu1 %v8246_v28  ;;  %v8250_v39 = vpack.c.bf16 %v240_v35, %v238_v34  ;;  %v388_v41 = vld [vmem:[#allocation9 + $0x118] sm:$0xff]  ;;  %v242_v45 = vld [vmem:[#allocation9 + $0x188] sm:$0xff]  ;;  %v8312_v47 = vpack.c.bf16 %v385_v38, %v383_v37 }
  0x78   :  { %v237_v40 = vld [vmem:[#allocation9 + $0x100] sm:$0xff]  ;;  %v390_v42 = vld [vmem:[#allocation9 + $0x158] sm:$0xff]  ;;  %v244_v46 = vld [vmem:[#allocation9 + $0x1c8] sm:$0xff] }
  0x79   :  { %v239_v43 = vld [vmem:[#allocation9 + $0x140] sm:$0xff]  ;;  %6181 = vmatmul.mubr.msk.f32.vlgmr.msra.gmra.mrb[0].mxu0 %vm147_vm0, %v126_v31  ;;  %v8254_v48 = vpack.c.bf16 %v244_v46, %v242_v45  ;;  %v8314_v51 = vpack.c.bf16 %v390_v42, %v388_v41  ;;  %v387_v52 = vld [vmem:[#allocation9 + $0x110] sm:$0xff]  ;;  %v246_v54 = vld [vmem:[#allocation9 + $0x208] sm:$0xff] }
  0x7a   :  { %8249 = vmatpush1.bf16.msra.mxu1 %v8248_v33  ;;  %v8252_v44 = vpack.c.bf16 %v239_v43, %v237_v40  ;;  %8309 = vmatpush1.bf16.msra.mxu0 %v8308_v32  ;;  %v241_v49 = vld [vmem:[#allocation9 + $0x180] sm:$0xff]  ;;  %v389_v53 = vld [vmem:[#allocation9 + $0x150] sm:$0xff]  ;;  %v392_v55 = vld [vmem:[#allocation9 + $0x198] sm:$0xff] }
  0x7b   :  { %8251 = vmatprep.subr.bf16.mxu1 %v8250_v39  ;;  %v243_v50 = vld [vmem:[#allocation9 + $0x1c0] sm:$0xff]  ;;  %8311 = vmatprep.subr.bf16.mxu0 %v8310_v36  ;;  %v394_v56 = vld [vmem:[#allocation9 + $0x1d8] sm:$0xff]  ;;  %v248_v57 = vld [vmem:[#allocation9 + $0x248] sm:$0xff]  ;;  %v8316_v59 = vpack.c.bf16 %v389_v53, %v387_v52 }
  0x7c   :  { %v8256_v58 = vpack.c.bf16 %v243_v50, %v241_v49  ;;  %v391_v60 = vld [vmem:[#allocation9 + $0x190] sm:$0xff]  ;;  %v8258_v61 = vpack.c.bf16 %v248_v57, %v246_v54  ;;  %v245_v62 = vld [vmem:[#allocation9 + $0x200] sm:$0xff]  ;;  %v8318_v0 = vpack.c.bf16 %v394_v56, %v392_v55  ;;  %v250_v2 = vld [vmem:[#allocation9 + $0x288] sm:$0xff] }
  0x7d   :  { %v247_v63 = vld [vmem:[#allocation9 + $0x240] sm:$0xff]  ;;  %v393_v1 = vld [vmem:[#allocation9 + $0x1d0] sm:$0xff]  ;;  %v252_v3 = vld [vmem:[#allocation9 + $0x2c8] sm:$0xff] }
  0x7e   :  { %8253 = vmatpush1.bf16.msra.mxu1 %v8252_v44  ;;  %8313 = vmatpush1.bf16.msra.mxu0 %v8312_v47  ;;  %v396_v4 = vld [vmem:[#allocation9 + $0x218] sm:$0xff]  ;;  %v8260_v6 = vpack.c.bf16 %v247_v63, %v245_v62  ;;  %v8320_v7 = vpack.c.bf16 %v393_v1, %v391_v60  ;;  %v395_v8 = vld [vmem:[#allocation9 + $0x210] sm:$0xff]  ;;  %v8262_v9 = vpack.c.bf16 %v252_v3, %v250_v2  ;;  %v249_v10 = vld [vmem:[#allocation9 + $0x280] sm:$0xff] }
  0x7f   :  { %8255 = vmatprep.subr.bf16.mxu1 %v8254_v48  ;;  %8315 = vmatprep.subr.bf16.mxu0 %v8314_v51  ;;  %v398_v5 = vld [vmem:[#allocation9 + $0x258] sm:$0xff]  ;;  %v251_v11 = vld [vmem:[#allocation9 + $0x2c0] sm:$0xff]  ;;  %v397_v13 = vld [vmem:[#allocation9 + $0x250] sm:$0xff] }
  0x80   :  { %v8322_v12 = vpack.c.bf16 %v398_v5, %v396_v4  ;;  %v254_v14 = vld [vmem:[#allocation9 + $0x308] sm:$0xff]  ;;  %v400_v16 = vld [vmem:[#allocation9 + $0x298] sm:$0xff]  ;;  %v8264_v18 = vpack.c.bf16 %v251_v11, %v249_v10  ;;  %v8324_v19 = vpack.c.bf16 %v397_v13, %v395_v8  ;;  %v399_v20 = vld [vmem:[#allocation9 + $0x290] sm:$0xff] }
  0x81   :  { %v256_v15 = vld [vmem:[#allocation9 + $0x348] sm:$0xff]  ;;  %v402_v17 = vld [vmem:[#allocation9 + $0x2d8] sm:$0xff]  ;;  %v253_v22 = vld [vmem:[#allocation9 + $0x300] sm:$0xff] }
  0x82   :  { %8257 = vmatpush1.bf16.msra.mxu1 %v8256_v58  ;;  %8317 = vmatpush1.bf16.msra.mxu0 %v8316_v59  ;;  %v8266_v21 = vpack.c.bf16 %v256_v15, %v254_v14  ;;  %v255_v23 = vld [vmem:[#allocation9 + $0x340] sm:$0xff]  ;;  %v8326_v24 = vpack.c.bf16 %v402_v17, %v400_v16  ;;  %v401_v25 = vld [vmem:[#allocation9 + $0x2d0] sm:$0xff]  ;;  %v258_v26 = vld [vmem:[#allocation9 + $0x388] sm:$0xff] }
  0x83   :  { %8259 = vmatprep.subr.bf16.mxu1 %v8258_v61  ;;  %8319 = vmatprep.subr.bf16.mxu0 %v8318_v0  ;;  %v260_v27 = vld [vmem:[#allocation9 + $0x3c8] sm:$0xff]  ;;  %v404_v28 = vld [vmem:[#allocation9 + $0x318] sm:$0xff]  ;;  %v8268_v30 = vpack.c.bf16 %v255_v23, %v253_v22  ;;  %v8328_v31 = vpack.c.bf16 %v401_v25, %v399_v20  ;;  %v403_v32 = vld [vmem:[#allocation9 + $0x310] sm:$0xff] }
  0x84   :  { %v406_v29 = vld [vmem:[#allocation9 + $0x358] sm:$0xff]  ;;  %v8270_v33 = vpack.c.bf16 %v260_v27, %v258_v26  ;;  %v257_v34 = vld [vmem:[#allocation9 + $0x380] sm:$0xff]  ;;  %v405_v37 = vld [vmem:[#allocation9 + $0x350] sm:$0xff] }
  0x85   :  { %v259_v35 = vld [vmem:[#allocation9 + $0x3c0] sm:$0xff]  ;;  %v8330_v36 = vpack.c.bf16 %v406_v29, %v404_v28  ;;  %v262_v38 = vld [vmem:[#allocation9 + $0x408] sm:$0xff]  ;;  %v408_v40 = vld [vmem:[#allocation9 + $0x398] sm:$0xff]  ;;  %v8332_v43 = vpack.c.bf16 %v405_v37, %v403_v32 }
  0x86   :  { %8261 = vmatpush1.bf16.msra.mxu1 %v8260_v6  ;;  %8321 = vmatpush1.bf16.msra.mxu0 %v8320_v7  ;;  %v264_v39 = vld [vmem:[#allocation9 + $0x448] sm:$0xff]  ;;  %v410_v41 = vld [vmem:[#allocation9 + $0x3d8] sm:$0xff]  ;;  %v8272_v42 = vpack.c.bf16 %v259_v35, %v257_v34  ;;  %v407_v44 = vld [vmem:[#allocation9 + $0x390] sm:$0xff] }
  0x87   :  { %8263 = vmatprep.subr.bf16.mxu1 %v8262_v9  ;;  %8323 = vmatprep.subr.bf16.mxu0 %v8322_v12  ;;  %v8274_v45 = vpack.c.bf16 %v264_v39, %v262_v38  ;;  %v261_v46 = vld [vmem:[#allocation9 + $0x400] sm:$0xff]  ;;  %v8334_v48 = vpack.c.bf16 %v410_v41, %v408_v40  ;;  %v409_v49 = vld [vmem:[#allocation9 + $0x3d0] sm:$0xff]  ;;  %v266_v50 = vld [vmem:[#allocation9 + $0x488] sm:$0xff] }
  0x88   :  { %v263_v47 = vld [vmem:[#allocation9 + $0x440] sm:$0xff]  ;;  %v268_v51 = vld [vmem:[#allocation9 + $0x4c8] sm:$0xff]  ;;  %v412_v52 = vld [vmem:[#allocation9 + $0x418] sm:$0xff]  ;;  %v8336_v55 = vpack.c.bf16 %v409_v49, %v407_v44 }
  0x89   :  { %v414_v53 = vld [vmem:[#allocation9 + $0x458] sm:$0xff]  ;;  %v8276_v54 = vpack.c.bf16 %v263_v47, %v261_v46  ;;  %v411_v56 = vld [vmem:[#allocation9 + $0x410] sm:$0xff]  ;;  %v8278_v57 = vpack.c.bf16 %v268_v51, %v266_v50  ;;  %v265_v58 = vld [vmem:[#allocation9 + $0x480] sm:$0xff] }
  0x8a   :  { %8265 = vmatpush1.bf16.msra.mxu1 %v8264_v18  ;;  %8325 = vmatpush1.bf16.msra.mxu0 %v8324_v19  ;;  %v267_v59 = vld [vmem:[#allocation9 + $0x4c0] sm:$0xff]  ;;  %v8338_v60 = vpack.c.bf16 %v414_v53, %v412_v52  ;;  %v413_v61 = vld [vmem:[#allocation9 + $0x450] sm:$0xff]  ;;  %v270_v62 = vld [vmem:[#allocation9 + $0x508] sm:$0xff] }
  0x8b   :  { %8267 = vmatprep.subr.bf16.mxu1 %v8266_v21  ;;  %8327 = vmatprep.subr.bf16.mxu0 %v8326_v24  ;;  %v272_v63 = vld [vmem:[#allocation9 + $0x548] sm:$0xff]  ;;  %v416_v0 = vld [vmem:[#allocation9 + $0x498] sm:$0xff]  ;;  %v8280_v2 = vpack.c.bf16 %v267_v59, %v265_v58  ;;  %v8340_v3 = vpack.c.bf16 %v413_v61, %v411_v56  ;;  %v415_v4 = vld [vmem:[#allocation9 + $0x490] sm:$0xff] }
  0x8c   :  { %v418_v1 = vld [vmem:[#allocation9 + $0x4d8] sm:$0xff]  ;;  %v8282_v5 = vpack.c.bf16 %v272_v63, %v270_v62  ;;  %v269_v6 = vld [vmem:[#allocation9 + $0x500] sm:$0xff]  ;;  %v417_v9 = vld [vmem:[#allocation9 + $0x4d0] sm:$0xff] }
  0x8d   :  { %v271_v7 = vld [vmem:[#allocation9 + $0x540] sm:$0xff]  ;;  %v8342_v8 = vpack.c.bf16 %v418_v1, %v416_v0  ;;  %v274_v10 = vld [vmem:[#allocation9 + $0x588] sm:$0xff]  ;;  %v420_v12 = vld [vmem:[#allocation9 + $0x518] sm:$0xff]  ;;  %v8344_v15 = vpack.c.bf16 %v417_v9, %v415_v4 }
  0x8e   :  { %8269 = vmatpush1.bf16.msra.mxu1 %v8268_v30  ;;  %8329 = vmatpush1.bf16.msra.mxu0 %v8328_v31  ;;  %v276_v11 = vld [vmem:[#allocation9 + $0x5c8] sm:$0xff]  ;;  %v422_v13 = vld [vmem:[#allocation9 + $0x558] sm:$0xff]  ;;  %v8284_v14 = vpack.c.bf16 %v271_v7, %v269_v6  ;;  %v419_v16 = vld [vmem:[#allocation9 + $0x510] sm:$0xff] }
  0x8f   :  { %8271 = vmatprep.subr.bf16.mxu1 %v8270_v33  ;;  %8331 = vmatprep.subr.bf16.mxu0 %v8330_v36  ;;  %v8286_v17 = vpack.c.bf16 %v276_v11, %v274_v10  ;;  %v273_v18 = vld [vmem:[#allocation9 + $0x580] sm:$0xff]  ;;  %v8346_v20 = vpack.c.bf16 %v422_v13, %v420_v12  ;;  %v421_v21 = vld [vmem:[#allocation9 + $0x550] sm:$0xff]  ;;  %v278_v22 = vld [vmem:[#allocation9 + $0x608] sm:$0xff] }
  0x90   :  { %v275_v19 = vld [vmem:[#allocation9 + $0x5c0] sm:$0xff]  ;;  %v280_v23 = vld [vmem:[#allocation9 + $0x648] sm:$0xff]  ;;  %v424_v24 = vld [vmem:[#allocation9 + $0x598] sm:$0xff]  ;;  %v8348_v27 = vpack.c.bf16 %v421_v21, %v419_v16 }
  0x91   :  { %v426_v25 = vld [vmem:[#allocation9 + $0x5d8] sm:$0xff]  ;;  %v8288_v26 = vpack.c.bf16 %v275_v19, %v273_v18  ;;  %v423_v28 = vld [vmem:[#allocation9 + $0x590] sm:$0xff]  ;;  %v8290_v29 = vpack.c.bf16 %v280_v23, %v278_v22  ;;  %v277_v30 = vld [vmem:[#allocation9 + $0x600] sm:$0xff] }
  0x92   :  { %8273 = vmatpush1.bf16.msra.mxu1 %v8272_v42  ;;  %8333 = vmatpush1.bf16.msra.mxu0 %v8332_v43  ;;  %v279_v31 = vld [vmem:[#allocation9 + $0x640] sm:$0xff]  ;;  %v8350_v32 = vpack.c.bf16 %v426_v25, %v424_v24  ;;  %v425_v33 = vld [vmem:[#allocation9 + $0x5d0] sm:$0xff]  ;;  %v282_v34 = vld [vmem:[#allocation9 + $0x688] sm:$0xff] }
  0x93   :  { %8275 = vmatprep.subr.bf16.mxu1 %v8274_v45  ;;  %8335 = vmatprep.subr.bf16.mxu0 %v8334_v48  ;;  %v284_v35 = vld [vmem:[#allocation9 + $0x6c8] sm:$0xff]  ;;  %v428_v36 = vld [vmem:[#allocation9 + $0x618] sm:$0xff]  ;;  %v8292_v38 = vpack.c.bf16 %v279_v31, %v277_v30  ;;  %v8352_v39 = vpack.c.bf16 %v425_v33, %v423_v28  ;;  %v427_v40 = vld [vmem:[#allocation9 + $0x610] sm:$0xff] }
  0x94   :  { %v430_v37 = vld [vmem:[#allocation9 + $0x658] sm:$0xff]  ;;  %v8294_v41 = vpack.c.bf16 %v284_v35, %v282_v34  ;;  %v281_v42 = vld [vmem:[#allocation9 + $0x680] sm:$0xff]  ;;  %v429_v45 = vld [vmem:[#allocation9 + $0x650] sm:$0xff] }
  0x95   :  { %v283_v43 = vld [vmem:[#allocation9 + $0x6c0] sm:$0xff]  ;;  %v8354_v44 = vpack.c.bf16 %v430_v37, %v428_v36  ;;  %v286_v46 = vld [vmem:[#allocation9 + $0x708] sm:$0xff]  ;;  %v432_v48 = vld [vmem:[#allocation9 + $0x698] sm:$0xff]  ;;  %v8356_v51 = vpack.c.bf16 %v429_v45, %v427_v40 }
  0x96   :  { %8277 = vmatpush1.bf16.msra.mxu1 %v8276_v54  ;;  %8337 = vmatpush1.bf16.msra.mxu0 %v8336_v55  ;;  %v288_v47 = vld [vmem:[#allocation9 + $0x748] sm:$0xff]  ;;  %v434_v49 = vld [vmem:[#allocation9 + $0x6d8] sm:$0xff]  ;;  %v8296_v50 = vpack.c.bf16 %v283_v43, %v281_v42  ;;  %v285_v53 = vld [vmem:[#allocation9 + $0x700] sm:$0xff] }
  0x97   :  { %8279 = vmatprep.subr.bf16.mxu1 %v8278_v57  ;;  %8339 = vmatprep.subr.bf16.mxu0 %v8338_v60  ;;  %v8298_v52 = vpack.c.bf16 %v288_v47, %v286_v46  ;;  %v287_v54 = vld [vmem:[#allocation9 + $0x740] sm:$0xff]  ;;  %v8358_v55 = vpack.c.bf16 %v434_v49, %v432_v48  ;;  %v431_v56 = vld [vmem:[#allocation9 + $0x690] sm:$0xff]  ;;  %v436_v58 = vld [vmem:[#allocation9 + $0x718] sm:$0xff] }
  0x98   :  { %v433_v57 = vld [vmem:[#allocation9 + $0x6d0] sm:$0xff]  ;;  %v438_v59 = vld [vmem:[#allocation9 + $0x758] sm:$0xff]  ;;  %v8300_v60 = vpack.c.bf16 %v287_v54, %v285_v53  ;;  %v289_v7 = vld [vmem:[#allocation9 + $0x780] sm:$0xff] }
  0x99   :  { %v8360_v61 = vpack.c.bf16 %v433_v57, %v431_v56  ;;  %v8362_v62 = vpack.c.bf16 %v438_v59, %v436_v58  ;;  %v435_v63 = vld [vmem:[#allocation9 + $0x710] sm:$0xff]  ;;  %v440_v4 = vld [vmem:[#allocation9 + $0x798] sm:$0xff]  ;;  %v135_v23 = vld [vmem:[%s11925_s2] sm:$0x3] }
  0x9a   :  { %8281 = vmatpush1.bf16.msra.mxu1 %v8280_v2  ;;  %8341 = vmatpush1.bf16.msra.mxu0 %v8340_v3  ;;  %v437_v0 = vld [vmem:[#allocation9 + $0x750] sm:$0xff]  ;;  %v290_v2 = vld [vmem:[#allocation9 + $0x788] sm:$0xff]  ;;  %v442_v6 = vld [vmem:[#allocation9 + $0x7d8] sm:$0xff] }
  0x9b   :  { %8283 = vmatprep.subr.bf16.mxu1 %v8282_v5  ;;  %8343 = vmatprep.subr.bf16.mxu0 %v8342_v8  ;;  %v8364_v1 = vpack.c.bf16 %v437_v0, %v435_v63  ;;  %v292_v3 = vld [vmem:[#allocation9 + $0x7c8] sm:$0xff]  ;;  %v291_v8 = vld [vmem:[#allocation9 + $0x7c0] sm:$0xff]  ;;  %v8366_v9 = vpack.c.bf16 %v442_v6, %v440_v4  ;;  %v439_v11 = vld [vmem:[#allocation9 + $0x790] sm:$0xff] }
  0x9c   :  { %v8302_v5 = vpack.c.bf16 %v292_v3, %v290_v2  ;;  %v8304_v10 = vpack.c.bf16 %v291_v8, %v289_v7  ;;  %v441_v12 = vld [vmem:[#allocation9 + $0x7d0] sm:$0xff]  ;;  %v660_v18 = vld [vmem:[#allocation9 + $0x78] sm:$0xff]  ;;  %v518_v28 = vld [vmem:[#allocation9 + $0x20] sm:$0xff] }
  0x9d   :  { %v8368_v13 = vpack.c.bf16 %v441_v12, %v439_v11  ;;  %v520_v31 = vld [vmem:[#allocation9 + $0x60] sm:$0xff]  ;;  %v659_v33 = vld [vmem:[#allocation9 + $0x70] sm:$0xff]  ;;  %v523_v35 = vld [vmem:[#allocation9 + $0xa8] sm:$0xff] }
  0x9e   :  { %8285 = vmatpush1.bf16.msra.mxu1 %v8284_v14  ;;  %8345 = vmatpush1.bf16.msra.mxu0 %v8344_v15  ;;  %v519_v14 = vld [vmem:[#allocation9 + $0x28] sm:$0xff]  ;;  %v662_v37 = vld [vmem:[#allocation9 + $0xb8] sm:$0xff]  ;;  %v8372_v40 = vpack.c.bf16 %v520_v31, %v518_v28  ;;  %v522_v42 = vld [vmem:[#allocation9 + $0xa0] sm:$0xff] }
  0x9f   :  { %8287 = vmatprep.subr.bf16.mxu1 %v8286_v17  ;;  %8347 = vmatprep.subr.bf16.mxu0 %v8346_v20  ;;  %v521_v15 = vld [vmem:[#allocation9 + $0x68] sm:$0xff]  ;;  %v658_v17 = vld [vmem:[#allocation9 + $0x38] sm:$0xff]  ;;  %v137_v20 = vlaneseq  ;;  %v524_v43 = vld [vmem:[#allocation9 + $0xe0] sm:$0xff] }
  0xa0   :  { %v8370_v16 = vpack.c.bf16 %v521_v15, %v519_v14  ;;  %v8434_v19 = vpack.c.bf16 %v660_v18, %v658_v17  ;;  %v525_v36 = vld [vmem:[#allocation9 + $0xe8] sm:$0xff]  ;;  %v661_v45 = vld [vmem:[#allocation9 + $0xb0] sm:$0xff]  ;;  %v8376_v53 = vpack.c.bf16 %v524_v43, %v522_v42  ;;  %v528_v56 = vld [vmem:[#allocation9 + $0x160] sm:$0xff] }
  0xa1   :  { %v9257_v21 = vshrl.u32 %v137_v20, 7  ;;  %v663_v46 = vld [vmem:[#allocation9 + $0xf0] sm:$0xff]  ;;  %v527_v47 = vld [vmem:[#allocation9 + $0x128] sm:$0xff]  ;;  %v8374_v48 = vpack.c.bf16 %v525_v36, %v523_v35  ;;  %v670_v63 = vld [vmem:[#allocation9 + $0x1b8] sm:$0xff] }
  0xa2   :  { %8289 = vmatpush1.bf16.msra.mxu1 %v8288_v26  ;;  %8349 = vmatpush1.bf16.msra.mxu0 %v8348_v27  ;;  %v8440_v54 = vpack.c.bf16 %v663_v46, %v661_v45  ;;  %v665_v59 = vld [vmem:[#allocation9 + $0x130] sm:$0xff]  ;;  %v672_v0 = vld [vmem:[#allocation9 + $0x1f8] sm:$0xff]  ;;  %v530_v3 = vld [vmem:[#allocation9 + $0x1a0] sm:$0xff] }
  0xa3   :  { %8291 = vmatprep.subr.bf16.mxu1 %v8290_v29  ;;  %8351 = vmatprep.subr.bf16.mxu0 %v8350_v32  ;;  %v139_v22 = vsub.s32 0, %v9257_v21  ;;  %v143_v24 = vsub.s32 1, %v9257_v21  ;;  %v657_v32 = vld [vmem:[#allocation9 + $0x30] sm:$0xff]  ;;  %v532_v4 = vld [vmem:[#allocation9 + $0x1e0] sm:$0xff]  ;;  %v8446_v6 = vpack.c.bf16 %v672_v0, %v670_v63  ;;  %v674_v11 = vld [vmem:[#allocation9 + $0x238] sm:$0xff] }
  0xa4   :  { %v669_v7 = vld [vmem:[#allocation9 + $0x1b0] sm:$0xff]  ;;  %v676_v12 = vld [vmem:[#allocation9 + $0x278] sm:$0xff]  ;;  %v534_v15 = vld [vmem:[#allocation9 + $0x220] sm:$0xff] }
  0xa5   :  { %v140_v25 = vrot.slane %v135_v23, %v139_v22  ;;  %v144_v26 = vrot.slane %v135_v23, %v143_v24  ;;  %v671_v8 = vld [vmem:[#allocation9 + $0x1f0] sm:$0xff]  ;;  %v8450_v18 = vpack.c.bf16 %v676_v12, %v674_v11  ;;  %v539_v23 = vld [vmem:[#allocation9 + $0x2a8] sm:$0xff]  ;;  %v540_v31 = vld [vmem:[#allocation9 + $0x2e0] sm:$0xff] }
  0xa6   :  { %8293 = vmatpush1.bf16.msra.mxu1 %v8292_v38  ;;  %8353 = vmatpush1.bf16.msra.mxu0 %v8352_v39  ;;  %v664_v38 = vld [vmem:[#allocation9 + $0xf8] sm:$0xff]  ;;  %v8448_v14 = vpack.c.bf16 %v671_v8, %v669_v7  ;;  %v675_v20 = vld [vmem:[#allocation9 + $0x270] sm:$0xff]  ;;  %v543_v36 = vld [vmem:[#allocation9 + $0x328] sm:$0xff] }
  0xa7   :  { %8295 = vmatprep.subr.bf16.mxu1 %v8294_v41  ;;  %8355 = vmatprep.subr.bf16.mxu0 %v8354_v44  ;;  %v8436_v41 = vpack.c.bf16 %v659_v33, %v657_v32  ;;  %v8438_v49 = vpack.c.bf16 %v664_v38, %v662_v37  ;;  %v679_v35 = vld [vmem:[#allocation9 + $0x2f0] sm:$0xff]  ;;  %v545_v37 = vld [vmem:[#allocation9 + $0x368] sm:$0xff]  ;;  %v682_v38 = vld [vmem:[#allocation9 + $0x338] sm:$0xff] }
  0xa8   :  { %v542_v42 = vld [vmem:[#allocation9 + $0x320] sm:$0xff]  ;;  %v8394_v45 = vpack.c.bf16 %v545_v37, %v543_v36  ;;  %v690_v63 = vld [vmem:[#allocation9 + $0x438] sm:$0xff]  ;;  %v689_v7 = vld [vmem:[#allocation9 + $0x430] sm:$0xff] }
  0xa9   :  { %v544_v43 = vld [vmem:[#allocation9 + $0x360] sm:$0xff]  ;;  %v692_v0 = vld [vmem:[#allocation9 + $0x478] sm:$0xff]  ;;  %v691_v8 = vld [vmem:[#allocation9 + $0x470] sm:$0xff] }
  0xaa   :  { %8297 = vmatpush1.bf16.msra.mxu1 %v8296_v50  ;;  %8357 = vmatpush1.bf16.msra.mxu0 %v8356_v51  ;;  %v529_v50 = vld [vmem:[#allocation9 + $0x168] sm:$0xff]  ;;  %v666_v51 = vld [vmem:[#allocation9 + $0x138] sm:$0xff]  ;;  %v1080_v21 = vld [vmem:[#allocation11 + $0x270] sm:$0xff] }
  0xab   :  { %8299 = vmatprep.subr.bf16.mxu1 %v8298_v52  ;;  %8359 = vmatprep.subr.bf16.mxu0 %v8358_v55  ;;  %v668_v52 = vld [vmem:[#allocation9 + $0x178] sm:$0xff]  ;;  %v526_v55 = vld [vmem:[#allocation9 + $0x120] sm:$0xff]  ;;  %v8378_v57 = vpack.c.bf16 %v529_v50, %v527_v47  ;;  %v681_v47 = vld [vmem:[#allocation9 + $0x330] sm:$0xff] }
  0xac   :  { %v8442_v58 = vpack.c.bf16 %v668_v52, %v666_v51  ;;  %v549_v50 = vld [vmem:[#allocation9 + $0x3e8] sm:$0xff]  ;;  %v686_v51 = vld [vmem:[#allocation9 + $0x3b8] sm:$0xff] }
  0xad   :  { %v688_v52 = vld [vmem:[#allocation9 + $0x3f8] sm:$0xff]  ;;  %v563_v36 = vld [vmem:[#allocation9 + $0x5a8] sm:$0xff] }
  0xae   :  { %8301 = vmatpush1.bf16.msra.mxu1 %v8300_v60  ;;  %8361 = vmatpush1.bf16.msra.mxu0 %v8360_v61  ;;  %v667_v60 = vld [vmem:[#allocation9 + $0x170] sm:$0xff]  ;;  %v531_v61 = vld [vmem:[#allocation9 + $0x1a8] sm:$0xff]  ;;  %v694_v11 = vld [vmem:[#allocation9 + $0x4b8] sm:$0xff] }
  0xaf   :  { %8363 = vmatprep.subr.bf16.mxu0 %v8362_v62  ;;  %8303 = vmatprep.subr.bf16.mxu1 %v8302_v5  ;;  %v533_v62 = vld [vmem:[#allocation9 + $0x1e8] sm:$0xff]  ;;  %v8444_v2 = vpack.c.bf16 %v667_v60, %v665_v59  ;;  %v685_v59 = vld [vmem:[#allocation9 + $0x3b0] sm:$0xff]  ;;  %v696_v12 = vld [vmem:[#allocation9 + $0x4f8] sm:$0xff] }
  0xb0   :  { %v8382_v5 = vpack.c.bf16 %v533_v62, %v531_v61  ;;  %v687_v60 = vld [vmem:[#allocation9 + $0x3f0] sm:$0xff]  ;;  %v551_v61 = vld [vmem:[#allocation9 + $0x428] sm:$0xff] }
  0xb1   :  { %v553_v62 = vld [vmem:[#allocation9 + $0x468] sm:$0xff] }
  0xb2   :  { %8365 = vmatpush1.bf16.msra.mxu0 %v8364_v1  ;;  %8305 = vmatpush1.bf16.msra.mxu1 %v8304_v10  ;;  %v8380_v1 = vpack.c.bf16 %v528_v56, %v526_v55  ;;  %v537_v10 = vld [vmem:[#allocation9 + $0x268] sm:$0xff]  ;;  %v546_v55 = vld [vmem:[#allocation9 + $0x3a0] sm:$0xff] }
  0xb3   :  { %8367 = vmatprep.subr.bf16.mxu0 %v8366_v9  ;;  %8371 = vmatprep.subr.bf16.mxu1 %v8370_v16  ;;  %v535_v9 = vld [vmem:[#allocation9 + $0x228] sm:$0xff]  ;;  %v536_v16 = vld [vmem:[#allocation9 + $0x260] sm:$0xff] }
  0xb4   :  { %v8386_v17 = vpack.c.bf16 %v537_v10, %v535_v9  ;;  %v8388_v28 = vpack.c.bf16 %v536_v16, %v534_v15  ;;  %v548_v56 = vld [vmem:[#allocation9 + $0x3e0] sm:$0xff]  ;;  %v555_v9 = vld [vmem:[#allocation9 + $0x4a8] sm:$0xff] }
  0xb5   :  { %v557_v10 = vld [vmem:[#allocation9 + $0x4e8] sm:$0xff]  ;;  %v554_v15 = vld [vmem:[#allocation9 + $0x4a0] sm:$0xff] }
  0xb6   :  { %8369 = vmatpush1.bf16.msra.mxu0 %v8368_v13  ;;  %v8384_v13 = vpack.c.bf16 %v532_v4, %v530_v3  ;;  %v550_v3 = vld [vmem:[#allocation9 + $0x420] sm:$0xff]  ;;  %v565_v37 = vld [vmem:[#allocation9 + $0x5e8] sm:$0xff] }
  0xb7   :  { %8435 = vmatprep.subr.bf16.mxu0 %v8434_v19  ;;  %v673_v19 = vld [vmem:[#allocation9 + $0x230] sm:$0xff]  ;;  %v552_v4 = vld [vmem:[#allocation9 + $0x460] sm:$0xff] }
  0xb8   :  { %v556_v16 = vld [vmem:[#allocation9 + $0x4e0] sm:$0xff] }
 0x14c   :  { %v217_v27 = vpop.f32.mrb[0].mxu0 }
 0x14d   :  { %v218_v29 = vadd.f32 %v217_v27, %v140_v25  ;;  %v219_v30 = vpop.f32.mrb[1].mxu0  ;;  %v541_v25 = vld [vmem:[#allocation9 + $0x2e8] sm:$0xff]  ;;  %v680_v27 = vld [vmem:[#allocation9 + $0x2f8] sm:$0xff] }
 0x14e   :  { %v220_v34 = vadd.f32 %v219_v30, %v144_v26  ;;  %v678_v26 = vld [vmem:[#allocation9 + $0x2b8] sm:$0xff]  ;;  %v538_v30 = vld [vmem:[#allocation9 + $0x2a0] sm:$0xff]  ;;  %v8390_v32 = vpack.c.bf16 %v541_v25, %v539_v23  ;;  %v559_v23 = vld [vmem:[#allocation9 + $0x528] sm:$0xff] }
 0x14f   :  { %v9268_v44 = vmax.f32 %v218_v29, 0.0  ;;  %v8452_v29 = vpack.c.bf16 %v675_v20, %v673_v19  ;;  %v8454_v33 = vpack.c.bf16 %v680_v27, %v678_v26  ;;  %v693_v19 = vld [vmem:[#allocation9 + $0x4b0] sm:$0xff]  ;;  %v561_v25 = vld [vmem:[#allocation9 + $0x568] sm:$0xff]  ;;  %v698_v26 = vld [vmem:[#allocation9 + $0x538] sm:$0xff] }
 0x150   :  { %v223_v39 = vmax.f32 %v220_v34, 0.0  ;;  %v677_v34 = vld [vmem:[#allocation9 + $0x2b0] sm:$0xff]  ;;  %v700_v27 = vld [vmem:[#allocation9 + $0x578] sm:$0xff] }
 0x151   :  { %v695_v20 = vld [vmem:[#allocation9 + $0x4f0] sm:$0xff] }
 0x152   :  { %368 = vmatprep.mubr.f32.mxu1 %v223_v39  ;;  %507 = vmatprep.mubr.f32.mxu0 %v223_v39 }
 0x153   :  { %369 = vmatmul.mubr.f32.vlgmr.msra.gmra.mrb[0].mxu1 %v9268_v44  ;;  %508 = vmatmul.mubr.f32.vlgmr.msra.gmra.mrb[2].mxu0 %v9268_v44 }
 0x154   :  { %8373 = vmatpush1.bf16.msra.mxu1 %v8372_v40  ;;  %8437 = vmatpush1.bf16.msra.mxu0 %v8436_v41  ;;  %v8392_v40 = vpack.c.bf16 %v540_v31, %v538_v30  ;;  %v8456_v41 = vpack.c.bf16 %v679_v35, %v677_v34  ;;  %v558_v30 = vld [vmem:[#allocation9 + $0x520] sm:$0xff]  ;;  %v697_v34 = vld [vmem:[#allocation9 + $0x530] sm:$0xff] }
 0x155   :  { %646 = vmatprep.mubr.f32.mxu1 %v223_v39  ;;  %785 = vmatprep.mubr.f32.mxu0 %v223_v39  ;;  %v684_v39 = vld [vmem:[#allocation9 + $0x378] sm:$0xff]  ;;  %v560_v31 = vld [vmem:[#allocation9 + $0x560] sm:$0xff]  ;;  %v699_v35 = vld [vmem:[#allocation9 + $0x570] sm:$0xff] }
 0x156   :  { %8375 = vmatprep.subr.bf16.mxu1 %v8374_v48  ;;  %8439 = vmatprep.subr.bf16.mxu0 %v8438_v49  ;;  %v8458_v46 = vpack.c.bf16 %v684_v39, %v682_v38  ;;  %v683_v48 = vld [vmem:[#allocation9 + $0x370] sm:$0xff]  ;;  %v547_v49 = vld [vmem:[#allocation9 + $0x3a8] sm:$0xff]  ;;  %v702_v38 = vld [vmem:[#allocation9 + $0x5b8] sm:$0xff] }
 0x157   :  { %v704_v39 = vld [vmem:[#allocation9 + $0x5f8] sm:$0xff] }
 0x158   :  { %8377 = vmatpush1.bf16.msra.mxu1 %v8376_v53  ;;  %8441 = vmatpush1.bf16.msra.mxu0 %v8440_v54  ;;  %v8396_v53 = vpack.c.bf16 %v544_v43, %v542_v42  ;;  %v8460_v54 = vpack.c.bf16 %v683_v48, %v681_v47  ;;  %v562_v42 = vld [vmem:[#allocation9 + $0x5a0] sm:$0xff]  ;;  %v701_v47 = vld [vmem:[#allocation9 + $0x5b0] sm:$0xff] }
 0x159   :  { %8379 = vmatprep.subr.bf16.mxu1 %v8378_v57  ;;  %8443 = vmatprep.subr.bf16.mxu0 %v8442_v58  ;;  %v8398_v57 = vpack.c.bf16 %v549_v50, %v547_v49  ;;  %v8462_v58 = vpack.c.bf16 %v688_v52, %v686_v51  ;;  %v564_v43 = vld [vmem:[#allocation9 + $0x5e0] sm:$0xff]  ;;  %v703_v48 = vld [vmem:[#allocation9 + $0x5f0] sm:$0xff]  ;;  %v567_v49 = vld [vmem:[#allocation9 + $0x628] sm:$0xff] }
 0x15a   :  { %v569_v50 = vld [vmem:[#allocation9 + $0x668] sm:$0xff]  ;;  %v706_v51 = vld [vmem:[#allocation9 + $0x638] sm:$0xff] }
 0x15b   :  { %v708_v52 = vld [vmem:[#allocation9 + $0x678] sm:$0xff] }
 0x15c   :  { %8381 = vmatpush1.bf16.msra.mxu1 %v8380_v1  ;;  %8445 = vmatpush1.bf16.msra.mxu0 %v8444_v2  ;;  %v8400_v1 = vpack.c.bf16 %v548_v56, %v546_v55  ;;  %v8464_v2 = vpack.c.bf16 %v687_v60, %v685_v59  ;;  %v566_v55 = vld [vmem:[#allocation9 + $0x620] sm:$0xff]  ;;  %v705_v59 = vld [vmem:[#allocation9 + $0x630] sm:$0xff] }
 0x15d   :  { %8383 = vmatprep.subr.bf16.mxu1 %v8382_v5  ;;  %8447 = vmatprep.subr.bf16.mxu0 %v8446_v6  ;;  %v8402_v5 = vpack.c.bf16 %v553_v62, %v551_v61  ;;  %v8466_v6 = vpack.c.bf16 %v692_v0, %v690_v63  ;;  %v568_v56 = vld [vmem:[#allocation9 + $0x660] sm:$0xff]  ;;  %v707_v60 = vld [vmem:[#allocation9 + $0x670] sm:$0xff]  ;;  %v571_v61 = vld [vmem:[#allocation9 + $0x6a8] sm:$0xff] }
 0x15e   :  { %v573_v62 = vld [vmem:[#allocation9 + $0x6e8] sm:$0xff]  ;;  %v710_v63 = vld [vmem:[#allocation9 + $0x6b8] sm:$0xff] }
 0x15f   :  { %v712_v0 = vld [vmem:[#allocation9 + $0x6f8] sm:$0xff] }
 0x160   :  { %8385 = vmatpush1.bf16.msra.mxu1 %v8384_v13  ;;  %8449 = vmatpush1.bf16.msra.mxu0 %v8448_v14  ;;  %v8404_v13 = vpack.c.bf16 %v552_v4, %v550_v3  ;;  %v8468_v14 = vpack.c.bf16 %v691_v8, %v689_v7  ;;  %v570_v3 = vld [vmem:[#allocation9 + $0x6a0] sm:$0xff]  ;;  %v709_v7 = vld [vmem:[#allocation9 + $0x6b0] sm:$0xff] }
 0x161   :  { %8387 = vmatprep.subr.bf16.mxu1 %v8386_v17  ;;  %8451 = vmatprep.subr.bf16.mxu0 %v8450_v18  ;;  %v8406_v17 = vpack.c.bf16 %v557_v10, %v555_v9  ;;  %v8470_v18 = vpack.c.bf16 %v696_v12, %v694_v11  ;;  %v572_v4 = vld [vmem:[#allocation9 + $0x6e0] sm:$0xff]  ;;  %v711_v8 = vld [vmem:[#allocation9 + $0x6f0] sm:$0xff]  ;;  %v575_v9 = vld [vmem:[#allocation9 + $0x728] sm:$0xff] }
 0x162   :  { %v577_v10 = vld [vmem:[#allocation9 + $0x768] sm:$0xff]  ;;  %v714_v11 = vld [vmem:[#allocation9 + $0x738] sm:$0xff] }
 0x163   :  { %v716_v12 = vld [vmem:[#allocation9 + $0x778] sm:$0xff] }
 0x164   :  { %8389 = vmatpush1.bf16.msra.mxu1 %v8388_v28  ;;  %8453 = vmatpush1.bf16.msra.mxu0 %v8452_v29  ;;  %v8408_v28 = vpack.c.bf16 %v556_v16, %v554_v15  ;;  %v8472_v29 = vpack.c.bf16 %v695_v20, %v693_v19  ;;  %v574_v15 = vld [vmem:[#allocation9 + $0x720] sm:$0xff]  ;;  %v713_v19 = vld [vmem:[#allocation9 + $0x730] sm:$0xff] }
 0x165   :  { %8391 = vmatprep.subr.bf16.mxu1 %v8390_v32  ;;  %8455 = vmatprep.subr.bf16.mxu0 %v8454_v33  ;;  %v8410_v32 = vpack.c.bf16 %v561_v25, %v559_v23  ;;  %v8474_v33 = vpack.c.bf16 %v700_v27, %v698_v26  ;;  %v576_v16 = vld [vmem:[#allocation9 + $0x760] sm:$0xff]  ;;  %v715_v20 = vld [vmem:[#allocation9 + $0x770] sm:$0xff]  ;;  %v579_v23 = vld [vmem:[#allocation9 + $0x7a8] sm:$0xff] }
 0x166   :  { %v581_v25 = vld [vmem:[#allocation9 + $0x7e8] sm:$0xff]  ;;  %v718_v26 = vld [vmem:[#allocation9 + $0x7b8] sm:$0xff] }
 0x167   :  { %v720_v27 = vld [vmem:[#allocation9 + $0x7f8] sm:$0xff] }
 0x168   :  { %8393 = vmatpush1.bf16.msra.mxu1 %v8392_v40  ;;  %8457 = vmatpush1.bf16.msra.mxu0 %v8456_v41  ;;  %v8412_v40 = vpack.c.bf16 %v560_v31, %v558_v30  ;;  %v8476_v41 = vpack.c.bf16 %v699_v35, %v697_v34  ;;  %v578_v30 = vld [vmem:[#allocation9 + $0x7a0] sm:$0xff]  ;;  %v717_v34 = vld [vmem:[#allocation9 + $0x7b0] sm:$0xff] }
 0x169   :  { %8395 = vmatprep.subr.bf16.mxu1 %v8394_v45  ;;  %8459 = vmatprep.subr.bf16.mxu0 %v8458_v46  ;;  %v8414_v45 = vpack.c.bf16 %v565_v37, %v563_v36  ;;  %v8478_v46 = vpack.c.bf16 %v704_v39, %v702_v38  ;;  %v580_v31 = vld [vmem:[#allocation9 + $0x7e0] sm:$0xff]  ;;  %v719_v35 = vld [vmem:[#allocation9 + $0x7f0] sm:$0xff]  ;;  %v952_v38 = vld [vmem:[#allocation11 + $0x208] sm:$0xff] }
 0x16a   :  { %v821_v36 = vld [vmem:[#allocation11 + $0x200] sm:$0xff]  ;;  %v953_v39 = vld [vmem:[#allocation11 + $0x228] sm:$0xff] }
 0x16b   :  { %v822_v37 = vld [vmem:[#allocation11 + $0x220] sm:$0xff] }
 0x16c   :  { %8397 = vmatpush1.bf16.msra.mxu1 %v8396_v53  ;;  %8461 = vmatpush1.bf16.msra.mxu0 %v8460_v54  ;;  %v8416_v53 = vpack.c.bf16 %v564_v43, %v562_v42  ;;  %v8480_v54 = vpack.c.bf16 %v703_v48, %v701_v47  ;;  %v805_v42 = vld [vmem:[#allocation11] sm:$0xff]  ;;  %v936_v47 = vld [vmem:[#allocation11 + $0x8] sm:$0xff] }
 0x16d   :  { %8399 = vmatprep.subr.bf16.mxu1 %v8398_v57  ;;  %8463 = vmatprep.subr.bf16.mxu0 %v8462_v58  ;;  %v8418_v57 = vpack.c.bf16 %v569_v50, %v567_v49  ;;  %v8482_v58 = vpack.c.bf16 %v708_v52, %v706_v51  ;;  %v806_v43 = vld [vmem:[#allocation11 + $0x20] sm:$0xff]  ;;  %v937_v48 = vld [vmem:[#allocation11 + $0x28] sm:$0xff] }
 0x16e   :  { %v823_v49 = vld [vmem:[#allocation11 + $0x240] sm:$0xff]  ;;  %v954_v51 = vld [vmem:[#allocation11 + $0x248] sm:$0xff] }
 0x16f   :  { %v824_v50 = vld [vmem:[#allocation11 + $0x260] sm:$0xff]  ;;  %v955_v52 = vld [vmem:[#allocation11 + $0x268] sm:$0xff] }
 0x170   :  { %8401 = vmatpush1.bf16.msra.mxu1 %v8400_v1  ;;  %8465 = vmatpush1.bf16.msra.mxu0 %v8464_v2  ;;  %v8420_v1 = vpack.c.bf16 %v568_v56, %v566_v55  ;;  %v8484_v2 = vpack.c.bf16 %v707_v60, %v705_v59  ;;  %v807_v55 = vld [vmem:[#allocation11 + $0x40] sm:$0xff]  ;;  %v938_v59 = vld [vmem:[#allocation11 + $0x48] sm:$0xff] }
 0x171   :  { %8403 = vmatprep.subr.bf16.mxu1 %v8402_v5  ;;  %8467 = vmatprep.subr.bf16.mxu0 %v8466_v6  ;;  %v8422_v5 = vpack.c.bf16 %v573_v62, %v571_v61  ;;  %v8486_v6 = vpack.c.bf16 %v712_v0, %v710_v63  ;;  %v808_v56 = vld [vmem:[#allocation11 + $0x60] sm:$0xff]  ;;  %v939_v60 = vld [vmem:[#allocation11 + $0x68] sm:$0xff] }
 0x172   :  { %v825_v61 = vld [vmem:[#allocation11 + $0x280] sm:$0xff]  ;;  %v956_v63 = vld [vmem:[#allocation11 + $0x288] sm:$0xff] }
 0x173   :  { %v826_v62 = vld [vmem:[#allocation11 + $0x2a0] sm:$0xff]  ;;  %v957_v0 = vld [vmem:[#allocation11 + $0x2a8] sm:$0xff] }
 0x174   :  { %8405 = vmatpush1.bf16.msra.mxu1 %v8404_v13  ;;  %8469 = vmatpush1.bf16.msra.mxu0 %v8468_v14  ;;  %v8424_v13 = vpack.c.bf16 %v572_v4, %v570_v3  ;;  %v8488_v14 = vpack.c.bf16 %v711_v8, %v709_v7  ;;  %v809_v3 = vld [vmem:[#allocation11 + $0x80] sm:$0xff]  ;;  %v940_v7 = vld [vmem:[#allocation11 + $0x88] sm:$0xff] }
 0x175   :  { %8407 = vmatprep.subr.bf16.mxu1 %v8406_v17  ;;  %8471 = vmatprep.subr.bf16.mxu0 %v8470_v18  ;;  %v8426_v17 = vpack.c.bf16 %v577_v10, %v575_v9  ;;  %v8490_v18 = vpack.c.bf16 %v716_v12, %v714_v11  ;;  %v810_v4 = vld [vmem:[#allocation11 + $0xa0] sm:$0xff]  ;;  %v941_v8 = vld [vmem:[#allocation11 + $0xa8] sm:$0xff] }
 0x176   :  { %v827_v9 = vld [vmem:[#allocation11 + $0x2c0] sm:$0xff]  ;;  %v958_v11 = vld [vmem:[#allocation11 + $0x2c8] sm:$0xff] }
 0x177   :  { %v828_v10 = vld [vmem:[#allocation11 + $0x2e0] sm:$0xff]  ;;  %v959_v12 = vld [vmem:[#allocation11 + $0x2e8] sm:$0xff] }
 0x178   :  { %8409 = vmatpush1.bf16.msra.mxu1 %v8408_v28  ;;  %8473 = vmatpush1.bf16.msra.mxu0 %v8472_v29  ;;  %v8428_v28 = vpack.c.bf16 %v576_v16, %v574_v15  ;;  %v8492_v29 = vpack.c.bf16 %v715_v20, %v713_v19  ;;  %v812_v15 = vld [vmem:[#allocation11 + $0xe0] sm:$0xff]  ;;  %v8510_v16 = vpack.c.bf16 %v828_v10, %v827_v9  ;;  %v943_v19 = vld [vmem:[#allocation11 + $0xe8] sm:$0xff]  ;;  %v1077_v10 = vld [vmem:[#allocation11 + $0x210] sm:$0xff] }
 0x179   :  { %8411 = vmatprep.subr.bf16.mxu1 %v8410_v32  ;;  %8475 = vmatprep.subr.bf16.mxu0 %v8474_v33  ;;  %v8430_v32 = vpack.c.bf16 %v581_v25, %v579_v23  ;;  %v8494_v33 = vpack.c.bf16 %v720_v27, %v718_v26  ;;  %v829_v20 = vld [vmem:[#allocation11 + $0x300] sm:$0xff]  ;;  %v960_v25 = vld [vmem:[#allocation11 + $0x308] sm:$0xff] }
 0x17a   :  { %v830_v23 = vld [vmem:[#allocation11 + $0x320] sm:$0xff]  ;;  %v961_v26 = vld [vmem:[#allocation11 + $0x328] sm:$0xff] }
 0x17c   :  { %8413 = vmatpush1.bf16.msra.mxu1 %v8412_v40  ;;  %8477 = vmatpush1.bf16.msra.mxu0 %v8476_v41  ;;  %v8432_v40 = vpack.c.bf16 %v580_v31, %v578_v30  ;;  %v8496_v41 = vpack.c.bf16 %v719_v35, %v717_v34  ;;  %v814_v30 = vld [vmem:[#allocation11 + $0x120] sm:$0xff]  ;;  %v8514_v31 = vpack.c.bf16 %v830_v23, %v829_v20  ;;  %v945_v34 = vld [vmem:[#allocation11 + $0x128] sm:$0xff] }
 0x17d   :  { %8415 = vmatprep.subr.bf16.mxu1 %v8414_v45  ;;  %8479 = vmatprep.subr.bf16.mxu0 %v8478_v46  ;;  %v8498_v45 = vpack.c.bf16 %v822_v37, %v821_v36  ;;  %v8530_v46 = vpack.c.bf16 %v953_v39, %v952_v38  ;;  %v831_v35 = vld [vmem:[#allocation11 + $0x340] sm:$0xff]  ;;  %v962_v37 = vld [vmem:[#allocation11 + $0x348] sm:$0xff] }
 0x17e   :  { %v832_v36 = vld [vmem:[#allocation11 + $0x360] sm:$0xff]  ;;  %v963_v38 = vld [vmem:[#allocation11 + $0x368] sm:$0xff] }
 0x180   :  { %8417 = vmatpush1.bf16.msra.mxu1 %v8416_v53  ;;  %8481 = vmatpush1.bf16.msra.mxu0 %v8480_v54  ;;  %v8500_v53 = vpack.c.bf16 %v806_v43, %v805_v42  ;;  %v8532_v54 = vpack.c.bf16 %v937_v48, %v936_v47  ;;  %v816_v42 = vld [vmem:[#allocation11 + $0x160] sm:$0xff]  ;;  %v8518_v43 = vpack.c.bf16 %v832_v36, %v831_v35  ;;  %v947_v47 = vld [vmem:[#allocation11 + $0x168] sm:$0xff] }
 0x181   :  { %8419 = vmatprep.subr.bf16.mxu1 %v8418_v57  ;;  %8483 = vmatprep.subr.bf16.mxu0 %v8482_v58  ;;  %v8502_v57 = vpack.c.bf16 %v824_v50, %v823_v49  ;;  %v8534_v58 = vpack.c.bf16 %v955_v52, %v954_v51  ;;  %v833_v48 = vld [vmem:[#allocation11 + $0x380] sm:$0xff]  ;;  %v964_v50 = vld [vmem:[#allocation11 + $0x388] sm:$0xff] }
 0x182   :  { %v834_v49 = vld [vmem:[#allocation11 + $0x3a0] sm:$0xff]  ;;  %v965_v51 = vld [vmem:[#allocation11 + $0x3a8] sm:$0xff] }
 0x184   :  { %8421 = vmatpush1.bf16.msra.mxu1 %v8420_v1  ;;  %8485 = vmatpush1.bf16.msra.mxu0 %v8484_v2  ;;  %v8504_v1 = vpack.c.bf16 %v808_v56, %v807_v55  ;;  %v8536_v2 = vpack.c.bf16 %v939_v60, %v938_v59  ;;  %v8522_v55 = vpack.c.bf16 %v834_v49, %v833_v48  ;;  %v949_v59 = vld [vmem:[#allocation11 + $0x1a8] sm:$0xff]  ;;  %v835_v60 = vld [vmem:[#allocation11 + $0x3c0] sm:$0xff]  ;;  %v1206_v48 = vld [vmem:[#allocation11 + $0x298] sm:$0xff] }
 0x185   :  { %8423 = vmatprep.subr.bf16.mxu1 %v8422_v5  ;;  %8487 = vmatprep.subr.bf16.mxu0 %v8486_v6  ;;  %v8506_v5 = vpack.c.bf16 %v826_v62, %v825_v61  ;;  %v8538_v6 = vpack.c.bf16 %v957_v0, %v956_v63  ;;  %v8554_v56 = vpack.c.bf16 %v965_v51, %v964_v50  ;;  %v836_v61 = vld [vmem:[#allocation11 + $0x3e0] sm:$0xff]  ;;  %v966_v62 = vld [vmem:[#allocation11 + $0x3c8] sm:$0xff]  ;;  %v1207_v49 = vld [vmem:[#allocation11 + $0x2b8] sm:$0xff] }
 0x188   :  { %8425 = vmatpush1.bf16.msra.mxu1 %v8424_v13  ;;  %8489 = vmatpush1.bf16.msra.mxu0 %v8488_v14  ;;  %v8508_v13 = vpack.c.bf16 %v810_v4, %v809_v3  ;;  %v811_v14 = vld [vmem:[#allocation11 + $0xc0] sm:$0xff]  ;;  %v8526_v3 = vpack.c.bf16 %v836_v61, %v835_v60  ;;  %v1084_v60 = vld [vmem:[#allocation11 + $0x2f0] sm:$0xff]  ;;  %v1208_v61 = vld [vmem:[#allocation11 + $0x2d8] sm:$0xff] }
 0x189   :  { %8427 = vmatprep.subr.bf16.mxu1 %v8426_v17  ;;  %8491 = vmatprep.subr.bf16.mxu0 %v8490_v18  ;;  %v8542_v17 = vpack.c.bf16 %v959_v12, %v958_v11  ;;  %v942_v18 = vld [vmem:[#allocation11 + $0xc8] sm:$0xff]  ;;  %v8512_v27 = vpack.c.bf16 %v812_v15, %v811_v14  ;;  %v1078_v11 = vld [vmem:[#allocation11 + $0x230] sm:$0xff]  ;;  %v1202_v12 = vld [vmem:[#allocation11 + $0x218] sm:$0xff] }
 0x18a   :  { %v228_v15 = vld [vmem:[%s11927_s4] sm:$0x3] }
 0x18c   :  { %8429 = vmatpush1.bf16.msra.mxu1 %v8428_v28  ;;  %8493 = vmatpush1.bf16.msra.mxu0 %v8492_v29  ;;  %v8544_v28 = vpack.c.bf16 %v943_v19, %v942_v18  ;;  %v813_v29 = vld [vmem:[#allocation11 + $0x100] sm:$0xff] }
 0x18d   :  { %8431 = vmatprep.subr.bf16.mxu1 %v8430_v32  ;;  %8495 = vmatprep.subr.bf16.mxu0 %v8494_v33  ;;  %v8546_v32 = vpack.c.bf16 %v961_v26, %v960_v25  ;;  %v944_v33 = vld [vmem:[#allocation11 + $0x108] sm:$0xff]  ;;  %v8516_v39 = vpack.c.bf16 %v814_v30, %v813_v29 }
 0x190   :  { %8433 = vmatpush1.bf16.msra.mxu1 %v8432_v40  ;;  %8497 = vmatpush1.bf16.msra.mxu0 %v8496_v41  ;;  %v8548_v40 = vpack.c.bf16 %v945_v34, %v944_v33  ;;  %v815_v41 = vld [vmem:[#allocation11 + $0x140] sm:$0xff]  ;;  %v1205_v33 = vld [vmem:[#allocation11 + $0x278] sm:$0xff] }
 0x191   :  { %8499 = vmatprep.subr.bf16.mxu1 %v8498_v45  ;;  %8531 = vmatprep.subr.bf16.mxu0 %v8530_v46  ;;  %v8550_v45 = vpack.c.bf16 %v963_v38, %v962_v37  ;;  %v946_v46 = vld [vmem:[#allocation11 + $0x148] sm:$0xff]  ;;  %v8520_v52 = vpack.c.bf16 %v816_v42, %v815_v41  ;;  %v1063_v38 = vld [vmem:[#allocation11 + $0x50] sm:$0xff] }
 0x193   :  { %647 = vmatmul.mubr.f32.vlgmr.msra.gmra.mrb[2].mxu1 %v9268_v44  ;;  %786 = vmatmul.mubr.f32.vlgmr.msra.gmra.mrb[4].mxu0 %v9268_v44  ;;  %v8540_v44 = vpack.c.bf16 %v941_v8, %v940_v7  ;;  %v951_v7 = vld [vmem:[#allocation11 + $0x1e8] sm:$0xff] }
 0x194   :  { %8501 = vmatpush3.bf16.msra.mxu1 %v8500_v53  ;;  %8533 = vmatpush3.bf16.msra.mxu0 %v8532_v54  ;;  %v8552_v53 = vpack.c.bf16 %v947_v47, %v946_v46  ;;  %v817_v54 = vld [vmem:[#allocation11 + $0x180] sm:$0xff]  ;;  %v1081_v46 = vld [vmem:[#allocation11 + $0x290] sm:$0xff] }
 0x195   :  { %8503 = vmatprep.subr.bf16.mxu1 %v8502_v57  ;;  %8535 = vmatprep.subr.bf16.mxu0 %v8534_v58  ;;  %v818_v57 = vld [vmem:[#allocation11 + $0x1a0] sm:$0xff]  ;;  %v948_v58 = vld [vmem:[#allocation11 + $0x188] sm:$0xff]  ;;  %v1082_v47 = vld [vmem:[#allocation11 + $0x2b0] sm:$0xff] }
 0x196   :  { %v8524_v63 = vpack.c.bf16 %v818_v57, %v817_v54  ;;  %v8556_v0 = vpack.c.bf16 %v949_v59, %v948_v58  ;;  %v1066_v54 = vld [vmem:[#allocation11 + $0xb0] sm:$0xff]  ;;  %v1190_v57 = vld [vmem:[#allocation11 + $0x98] sm:$0xff] }
 0x197   :  { %v1191_v58 = vld [vmem:[#allocation11 + $0xb8] sm:$0xff]  ;;  %v1083_v59 = vld [vmem:[#allocation11 + $0x2d0] sm:$0xff] }
 0x198   :  { %8505 = vmatpush3.bf16.msra.mxu1 %v8504_v1  ;;  %8537 = vmatpush3.bf16.msra.mxu0 %v8536_v2  ;;  %v967_v1 = vld [vmem:[#allocation11 + $0x3e8] sm:$0xff]  ;;  %v819_v2 = vld [vmem:[#allocation11 + $0x1c0] sm:$0xff] }
 0x199   :  { %8507 = vmatprep.subr.bf16.mxu1 %v8506_v5  ;;  %8539 = vmatprep.subr.bf16.mxu0 %v8538_v6  ;;  %v8558_v4 = vpack.c.bf16 %v967_v1, %v966_v62  ;;  %v820_v5 = vld [vmem:[#allocation11 + $0x1e0] sm:$0xff]  ;;  %v950_v6 = vld [vmem:[#allocation11 + $0x1c8] sm:$0xff]  ;;  %v1209_v62 = vld [vmem:[#allocation11 + $0x2f8] sm:$0xff] }
 0x19a   :  { %v8528_v8 = vpack.c.bf16 %v820_v5, %v819_v2  ;;  %v8560_v9 = vpack.c.bf16 %v951_v7, %v950_v6  ;;  %v1067_v1 = vld [vmem:[#allocation11 + $0xd0] sm:$0xff]  ;;  %v1192_v5 = vld [vmem:[#allocation11 + $0xd8] sm:$0xff] }
 0x19b   :  { %v1068_v2 = vld [vmem:[#allocation11 + $0xf0] sm:$0xff]  ;;  %v1193_v6 = vld [vmem:[#allocation11 + $0xf8] sm:$0xff] }
 0x19c   :  { %8509 = vmatpush3.bf16.msra.mxu1 %v8508_v13  ;;  %8541 = vmatpush3.bf16.msra.mxu0 %v8540_v44  ;;  %v8562_v13 = vpack.c.bf16 %v1078_v11, %v1077_v10  ;;  %v1203_v44 = vld [vmem:[#allocation11 + $0x238] sm:$0xff]  ;;  %v1085_v7 = vld [vmem:[#allocation11 + $0x310] sm:$0xff]  ;;  %v8576_v11 = vpack.c.bf16 %v1068_v2, %v1067_v1 }
 0x19d   :  { %8511 = vmatprep.subr.bf16.mxu1 %v8510_v16  ;;  %8543 = vmatprep.subr.bf16.mxu0 %v8542_v17  ;;  %v8594_v14 = vpack.c.bf16 %v1203_v44, %v1202_v12  ;;  %v9279_v16 = vrot.slane %v228_v15, %v139_v22  ;;  %v9283_v17 = vrot.slane %v228_v15, %v143_v24  ;;  %v1186_v22 = vld [vmem:[#allocation11 + $0x18] sm:$0xff]  ;;  %v1070_v44 = vld [vmem:[#allocation11 + $0x130] sm:$0xff] }
 0x19e   :  { %v1204_v24 = vld [vmem:[#allocation11 + $0x258] sm:$0xff]  ;;  %v8608_v12 = vpack.c.bf16 %v1193_v6, %v1192_v5 }
 0x19f   :  { %v8598_v42 = vpack.c.bf16 %v1205_v33, %v1204_v24  ;;  %v1211_v10 = vld [vmem:[#allocation11 + $0x338] sm:$0xff]  ;;  %v1089_v24 = vld [vmem:[#allocation11 + $0x390] sm:$0xff] }
 0x1a0   :  { %8513 = vmatpush3.bf16.msra.mxu1 %v8512_v27  ;;  %8545 = vmatpush3.bf16.msra.mxu0 %v8544_v28  ;;  %v1061_v27 = vld [vmem:[#allocation11 + $0x10] sm:$0xff] }
 0x1a1   :  { %8515 = vmatprep.subr.bf16.mxu1 %v8514_v31  ;;  %8547 = vmatprep.subr.bf16.mxu0 %v8546_v32  ;;  %v1062_v28 = vld [vmem:[#allocation11 + $0x30] sm:$0xff]  ;;  %v1187_v31 = vld [vmem:[#allocation11 + $0x38] sm:$0xff] }
 0x1a2   :  { %v1079_v32 = vld [vmem:[#allocation11 + $0x250] sm:$0xff]  ;;  %v8564_v36 = vpack.c.bf16 %v1062_v28, %v1061_v27  ;;  %v8596_v37 = vpack.c.bf16 %v1187_v31, %v1186_v22 }
 0x1a3   :  { %v8566_v41 = vpack.c.bf16 %v1080_v21, %v1079_v32  ;;  %v1196_v32 = vld [vmem:[#allocation11 + $0x158] sm:$0xff]  ;;  %v1090_v33 = vld [vmem:[#allocation11 + $0x3b0] sm:$0xff] }
 0x1a4   :  { %8517 = vmatpush3.bf16.msra.mxu1 %v8516_v39  ;;  %8549 = vmatpush3.bf16.msra.mxu0 %v8548_v40  ;;  %v1064_v39 = vld [vmem:[#allocation11 + $0x70] sm:$0xff]  ;;  %v1197_v21 = vld [vmem:[#allocation11 + $0x178] sm:$0xff] }
 0x1a5   :  { %8519 = vmatprep.subr.bf16.mxu1 %v8518_v43  ;;  %8551 = vmatprep.subr.bf16.mxu0 %v8550_v45  ;;  %v1188_v43 = vld [vmem:[#allocation11 + $0x58] sm:$0xff]  ;;  %v8568_v51 = vpack.c.bf16 %v1064_v39, %v1063_v38  ;;  %v8616_v39 = vpack.c.bf16 %v1197_v21, %v1196_v32  ;;  %v1336_v21 = vld [vmem:[#allocation12 + $0x100] sm:$0xff] }
 0x1a6   :  { %v1189_v45 = vld [vmem:[#allocation11 + $0x78] sm:$0xff] }
 0x1a8   :  { %8521 = vmatpush3.bf16.msra.mxu1 %v8520_v52  ;;  %8553 = vmatpush3.bf16.msra.mxu0 %v8552_v53  ;;  %v8600_v52 = vpack.c.bf16 %v1189_v45, %v1188_v43  ;;  %v1065_v53 = vld [vmem:[#allocation11 + $0x90] sm:$0xff]  ;;  %v8586_v43 = vpack.c.bf16 %v1090_v33, %v1089_v24  ;;  %v1337_v24 = vld [vmem:[#allocation12 + $0x120] sm:$0xff]  ;;  %v1535_v33 = vld [vmem:[#allocation12 + $0x108] sm:$0xff] }
 0x1a9   :  { %8523 = vmatprep.subr.bf16.mxu1 %v8522_v55  ;;  %8555 = vmatprep.subr.bf16.mxu0 %v8554_v56  ;;  %v8570_v55 = vpack.c.bf16 %v1082_v47, %v1081_v46  ;;  %v8602_v56 = vpack.c.bf16 %v1207_v49, %v1206_v48  ;;  %v1198_v46 = vld [vmem:[#allocation11 + $0x198] sm:$0xff]  ;;  %v1091_v48 = vld [vmem:[#allocation11 + $0x3d0] sm:$0xff] }
 0x1aa   :  { %v1199_v47 = vld [vmem:[#allocation11 + $0x1b8] sm:$0xff]  ;;  %v1092_v49 = vld [vmem:[#allocation11 + $0x3f0] sm:$0xff] }
 0x1ac   :  { %8525 = vmatpush3.bf16.msra.mxu1 %v8524_v63  ;;  %8557 = vmatpush3.bf16.msra.mxu0 %v8556_v0  ;;  %v8572_v63 = vpack.c.bf16 %v1066_v54, %v1065_v53  ;;  %v8604_v0 = vpack.c.bf16 %v1191_v58, %v1190_v57  ;;  %v8620_v54 = vpack.c.bf16 %v1199_v47, %v1198_v46  ;;  %v1340_v46 = vld [vmem:[#allocation12 + $0x180] sm:$0xff] }
 0x1ad   :  { %8527 = vmatprep.subr.bf16.mxu1 %v8526_v3  ;;  %8559 = vmatprep.subr.bf16.mxu0 %v8558_v4  ;;  %v8574_v3 = vpack.c.bf16 %v1084_v60, %v1083_v59  ;;  %v8606_v4 = vpack.c.bf16 %v1209_v62, %v1208_v61  ;;  %v8590_v57 = vpack.c.bf16 %v1092_v49, %v1091_v48  ;;  %v1200_v59 = vld [vmem:[#allocation11 + $0x1d8] sm:$0xff]  ;;  %v1328_v61 = vld [vmem:[#allocation12] sm:$0xff]  ;;  %v1539_v48 = vld [vmem:[#allocation12 + $0x188] sm:$0xff] }
 0x1ae   :  { %v1201_v60 = vld [vmem:[#allocation11 + $0x1f8] sm:$0xff]  ;;  %v1329_v62 = vld [vmem:[#allocation12 + $0x20] sm:$0xff]  ;;  %v1540_v49 = vld [vmem:[#allocation12 + $0x1a8] sm:$0xff] }
 0x1af   :  { %v8624_v2 = vpack.c.bf16 %v1201_v60, %v1200_v59  ;;  %v1341_v47 = vld [vmem:[#allocation12 + $0x1a0] sm:$0xff]  ;;  %v1720_v59 = vld [vmem:[#allocation12 + $0x10] sm:$0xff] }
 0x1b0   :  { %8529 = vmatpush3.bf16.msra.mxu1 %v8528_v8  ;;  %8561 = vmatpush3.bf16.msra.mxu0 %v8560_v9  ;;  %v1086_v8 = vld [vmem:[#allocation11 + $0x330] sm:$0xff]  ;;  %v1210_v9 = vld [vmem:[#allocation11 + $0x318] sm:$0xff] }
 0x1b1   :  { %8563 = vmatprep.subr.bf16.mxu1 %v8562_v13  ;;  %8595 = vmatprep.subr.bf16.mxu0 %v8594_v14  ;;  %v1069_v13 = vld [vmem:[#allocation11 + $0x110] sm:$0xff]  ;;  %v8578_v14 = vpack.c.bf16 %v1086_v8, %v1085_v7  ;;  %v8610_v15 = vpack.c.bf16 %v1211_v10, %v1210_v9 }
 0x1b2   :  { %v8580_v27 = vpack.c.bf16 %v1070_v44, %v1069_v13  ;;  %v1721_v60 = vld [vmem:[#allocation12 + $0x30] sm:$0xff] }
 0x226   :  { %v370_v18 = vpop.f32.mrb[0].mxu1  ;;  %v509_v19 = vpop.f32.mrb[2].mxu0 }
 0x227   :  { %v371_v20 = vadd.f32 %v370_v18, %v9279_v16  ;;  %v510_v23 = vadd.f32 %v509_v19, %v9279_v16  ;;  %v372_v25 = vpop.f32.mrb[1].mxu1  ;;  %v511_v26 = vpop.f32.mrb[3].mxu0  ;;  %v1194_v18 = vld [vmem:[#allocation11 + $0x118] sm:$0xff] }
 0x228   :  { %v373_v29 = vadd.f32 %v372_v25, %v9283_v17  ;;  %v512_v30 = vadd.f32 %v511_v26, %v9283_v17  ;;  %v1195_v19 = vld [vmem:[#allocation11 + $0x138] sm:$0xff] }
 0x229   :  { %v9291_v35 = vmax.f32 %v371_v20, 0.0  ;;  %v9301_v50 = vmax.f32 %v510_v23, 0.0  ;;  %v1087_v20 = vld [vmem:[#allocation11 + $0x350] sm:$0xff]  ;;  %v1212_v25 = vld [vmem:[#allocation11 + $0x358] sm:$0xff]  ;;  %v8612_v28 = vpack.c.bf16 %v1195_v19, %v1194_v18  ;;  %v1330_v18 = vld [vmem:[#allocation12 + $0x40] sm:$0xff] }
 0x22a   :  { %v9289_v34 = vmax.f32 %v373_v29, 0.0  ;;  %v9293_v40 = vmax.f32 %v512_v30, 0.0  ;;  %v1088_v23 = vld [vmem:[#allocation11 + $0x370] sm:$0xff]  ;;  %v1213_v26 = vld [vmem:[#allocation11 + $0x378] sm:$0xff]  ;;  %v1529_v19 = vld [vmem:[#allocation12 + $0x48] sm:$0xff] }
 0x22b   :  { %v1071_v29 = vld [vmem:[#allocation11 + $0x150] sm:$0xff]  ;;  %v8582_v22 = vpack.c.bf16 %v1088_v23, %v1087_v20  ;;  %v8614_v31 = vpack.c.bf16 %v1213_v26, %v1212_v25  ;;  %v1530_v20 = vld [vmem:[#allocation12 + $0x68] sm:$0xff]  ;;  %v1332_v25 = vld [vmem:[#allocation12 + $0x80] sm:$0xff] }
 0x22c   :  { %907 = vmatprep.mubr.f32.mxu1 %v9289_v34  ;;  %1032 = vmatprep.mubr.f32.mxu0 %v9289_v34  ;;  %v1072_v30 = vld [vmem:[#allocation11 + $0x170] sm:$0xff]  ;;  %v8662_v23 = vpack.c.bf16 %v1530_v20, %v1529_v19  ;;  %v1333_v26 = vld [vmem:[#allocation12 + $0xa0] sm:$0xff]  ;;  %v1916_v19 = vld [vmem:[#allocation12 + $0x78] sm:$0xff] }
 0x22d   :  { %908 = vmatmul.mubr.f32.vlgmr.msra.gmra.mrb[4].mxu1 %v9291_v35  ;;  %1033 = vmatmul.mubr.f32.vlgmr.msra.gmra.mrb[6].mxu0 %v9291_v35  ;;  %v8584_v38 = vpack.c.bf16 %v1072_v30, %v1071_v29  ;;  %v8634_v29 = vpack.c.bf16 %v1333_v26, %v1332_v25  ;;  %v1334_v30 = vld [vmem:[#allocation12 + $0xc0] sm:$0xff]  ;;  %v1724_v26 = vld [vmem:[#allocation12 + $0x90] sm:$0xff] }
 0x22e   :  { %912 = vmatprep.mubr.f32.mxu1 %v9293_v40  ;;  %1037 = vmatprep.mubr.f32.mxu0 %v9293_v40 }
 0x22f   :  { %8565 = vmatpush3.bf16.msra.mxu1 %v8564_v36  ;;  %8597 = vmatpush3.bf16.msra.mxu0 %v8596_v37  ;;  %v1214_v36 = vld [vmem:[#allocation11 + $0x398] sm:$0xff] }
 0x230   :  { %8567 = vmatprep.subr.bf16.mxu1 %v8566_v41  ;;  %8599 = vmatprep.subr.bf16.mxu0 %v8598_v42  ;;  %v1215_v37 = vld [vmem:[#allocation11 + $0x3b8] sm:$0xff]  ;;  %v1073_v41 = vld [vmem:[#allocation11 + $0x190] sm:$0xff] }
 0x231   :  { %913 = vmatmul.mubr.f32.gmra.mrb[6].mxu1 %v9301_v50  ;;  %1038 = vmatmul.mubr.f32.gmra.mrb[8].mxu0 %v9301_v50  ;;  %v1074_v42 = vld [vmem:[#allocation11 + $0x1b0] sm:$0xff]  ;;  %v8618_v45 = vpack.c.bf16 %v1215_v37, %v1214_v36  ;;  %v1536_v36 = vld [vmem:[#allocation12 + $0x128] sm:$0xff] }
 0x232   :  { %v8588_v53 = vpack.c.bf16 %v1074_v42, %v1073_v41  ;;  %v8674_v37 = vpack.c.bf16 %v1536_v36, %v1535_v33  ;;  %v1537_v41 = vld [vmem:[#allocation12 + $0x148] sm:$0xff]  ;;  %v1729_v33 = vld [vmem:[#allocation12 + $0x130] sm:$0xff]  ;;  %v1921_v36 = vld [vmem:[#allocation12 + $0x118] sm:$0xff] }
 0x233   :  { %8569 = vmatpush3.bf16.msra.mxu1 %v8568_v51  ;;  %8601 = vmatpush3.bf16.msra.mxu0 %v8600_v52  ;;  %v1216_v51 = vld [vmem:[#allocation11 + $0x3d8] sm:$0xff]  ;;  %v1538_v42 = vld [vmem:[#allocation12 + $0x168] sm:$0xff] }
 0x234   :  { %8571 = vmatprep.subr.bf16.mxu1 %v8570_v55  ;;  %8603 = vmatprep.subr.bf16.mxu0 %v8602_v56  ;;  %v1217_v52 = vld [vmem:[#allocation11 + $0x3f8] sm:$0xff]  ;;  %v1075_v55 = vld [vmem:[#allocation11 + $0x1d0] sm:$0xff] }
 0x235   :  { %v1076_v56 = vld [vmem:[#allocation11 + $0x1f0] sm:$0xff]  ;;  %v8622_v58 = vpack.c.bf16 %v1217_v52, %v1216_v51  ;;  %v8650_v51 = vpack.c.bf16 %v1341_v47, %v1340_v46  ;;  %v8682_v52 = vpack.c.bf16 %v1540_v49, %v1539_v48  ;;  %v1925_v49 = vld [vmem:[#allocation12 + $0x198] sm:$0xff] }
 0x236   :  { %v8592_v1 = vpack.c.bf16 %v1076_v56, %v1075_v55  ;;  %v1541_v55 = vld [vmem:[#allocation12 + $0x1c8] sm:$0xff]  ;;  %v1732_v47 = vld [vmem:[#allocation12 + $0x190] sm:$0xff] }
 0x237   :  { %8573 = vmatpush3.bf16.msra.mxu1 %v8572_v63  ;;  %8605 = vmatpush3.bf16.msra.mxu0 %v8604_v0  ;;  %v1527_v63 = vld [vmem:[#allocation12 + $0x8] sm:$0xff]  ;;  %v1733_v48 = vld [vmem:[#allocation12 + $0x1b0] sm:$0xff] }
 0x238   :  { %8575 = vmatprep.subr.bf16.mxu1 %v8574_v3  ;;  %8607 = vmatprep.subr.bf16.mxu0 %v8606_v4  ;;  %v1528_v0 = vld [vmem:[#allocation12 + $0x28] sm:$0xff]  ;;  %v8626_v3 = vpack.c.bf16 %v1329_v62, %v1328_v61  ;;  %v1913_v61 = vld [vmem:[#allocation12 + $0x18] sm:$0xff]  ;;  %v8690_v62 = vpack.c.bf16 %v1721_v60, %v1720_v59  ;;  %v2171_v60 = vld [vmem:[#allocation14] sm:$0xff] }
 0x239   :  { %v8658_v4 = vpack.c.bf16 %v1528_v0, %v1527_v63  ;;  %v1542_v56 = vld [vmem:[#allocation12 + $0x1e8] sm:$0xff]  ;;  %v1914_v63 = vld [vmem:[#allocation12 + $0x38] sm:$0xff] }
 0x23a   :  { %v8722_v0 = vpack.c.bf16 %v1914_v63, %v1913_v61  ;;  %v2172_v61 = vld [vmem:[#allocation14 + $0x20] sm:$0xff]  ;;  %v2707_v63 = vld [vmem:[#allocation14 + $0x28] sm:$0xff] }
 0x23b   :  { %8577 = vmatpush3.bf16.msra.mxu1 %v8576_v11  ;;  %8609 = vmatpush3.bf16.msra.mxu0 %v8608_v12 }
 0x23c   :  { %8579 = vmatprep.subr.bf16.mxu1 %v8578_v14  ;;  %8611 = vmatprep.subr.bf16.mxu0 %v8610_v15 }
 0x23f   :  { %8581 = vmatpush3.bf16.msra.mxu1 %v8580_v27  ;;  %8613 = vmatpush3.bf16.msra.mxu0 %v8612_v28  ;;  %v1531_v27 = vld [vmem:[#allocation12 + $0x88] sm:$0xff] }
 0x240   :  { %8583 = vmatprep.subr.bf16.mxu1 %v8582_v22  ;;  %8615 = vmatprep.subr.bf16.mxu0 %v8614_v31  ;;  %v1532_v28 = vld [vmem:[#allocation12 + $0xa8] sm:$0xff]  ;;  %v1335_v22 = vld [vmem:[#allocation12 + $0xe0] sm:$0xff] }
 0x241   :  { %v1534_v31 = vld [vmem:[#allocation12 + $0xe8] sm:$0xff] }
 0x243   :  { %8585 = vmatpush3.bf16.msra.mxu1 %v8584_v38  ;;  %8617 = vmatpush3.bf16.msra.mxu0 %v8616_v39  ;;  %v1338_v38 = vld [vmem:[#allocation12 + $0x140] sm:$0xff] }
 0x244   :  { %8587 = vmatprep.subr.bf16.mxu1 %v8586_v43  ;;  %8619 = vmatprep.subr.bf16.mxu0 %v8618_v45  ;;  %v1339_v39 = vld [vmem:[#allocation12 + $0x160] sm:$0xff]  ;;  %v8678_v45 = vpack.c.bf16 %v1538_v42, %v1537_v41  ;;  %v1731_v41 = vld [vmem:[#allocation12 + $0x170] sm:$0xff]  ;;  %v1923_v42 = vld [vmem:[#allocation12 + $0x158] sm:$0xff] }
 0x245   :  { %v8646_v43 = vpack.c.bf16 %v1339_v39, %v1338_v38  ;;  %v1730_v39 = vld [vmem:[#allocation12 + $0x150] sm:$0xff] }
 0x247   :  { %8589 = vmatpush3.bf16.msra.mxu1 %v8588_v53  ;;  %8621 = vmatpush3.bf16.msra.mxu0 %v8620_v54  ;;  %v1342_v53 = vld [vmem:[#allocation12 + $0x1c0] sm:$0xff] }
 0x248   :  { %8591 = vmatprep.subr.bf16.mxu1 %v8590_v57  ;;  %8623 = vmatprep.subr.bf16.mxu0 %v8622_v58  ;;  %v1343_v54 = vld [vmem:[#allocation12 + $0x1e0] sm:$0xff]  ;;  %v8686_v58 = vpack.c.bf16 %v1542_v56, %v1541_v55  ;;  %v1735_v55 = vld [vmem:[#allocation12 + $0x1f0] sm:$0xff]  ;;  %v1927_v56 = vld [vmem:[#allocation12 + $0x1d8] sm:$0xff] }
 0x249   :  { %v8654_v57 = vpack.c.bf16 %v1343_v54, %v1342_v53  ;;  %v1734_v54 = vld [vmem:[#allocation12 + $0x1d0] sm:$0xff] }
 0x24b   :  { %8593 = vmatpush3.bf16.msra.mxu1 %v8592_v1  ;;  %8625 = vmatpush3.bf16.msra.mxu0 %v8624_v2 }
 0x24c   :  { %8627 = vmatprep.subr.bf16.mxu1 %v8626_v3  ;;  %8659 = vmatprep.subr.bf16.mxu0 %v8658_v4 }
 0x266   :  { %v648_v5 = vpop.f32.mrb[2].mxu1  ;;  %v787_v6 = vpop.f32.mrb[4].mxu0 }
 0x267   :  { %v649_v7 = vadd.f32 %v648_v5, %v9279_v16  ;;  %v788_v8 = vadd.f32 %v787_v6, %v9279_v16  ;;  %v650_v9 = vpop.f32.mrb[3].mxu1  ;;  %v789_v10 = vpop.f32.mrb[5].mxu0  ;;  %v1331_v16 = vld [vmem:[#allocation12 + $0x60] sm:$0xff] }
 0x268   :  { %v651_v11 = vadd.f32 %v650_v9, %v9283_v17  ;;  %v790_v12 = vadd.f32 %v789_v10, %v9283_v17  ;;  %v8630_v17 = vpack.c.bf16 %v1331_v16, %v1330_v18  ;;  %v1723_v18 = vld [vmem:[#allocation12 + $0x70] sm:$0xff]  ;;  %v1915_v16 = vld [vmem:[#allocation12 + $0x58] sm:$0xff] }
 0x269   :  { %v653_v44 = vmax.f32 %v649_v7, 0.0  ;;  %v792_v15 = vmax.f32 %v788_v8, 0.0  ;;  %v8726_v25 = vpack.c.bf16 %v1916_v19, %v1915_v16 }
 0x26a   :  { %v654_v13 = vmax.f32 %v651_v11, 0.0  ;;  %v793_v14 = vmax.f32 %v790_v12, 0.0 }
 0x26c   :  { %917 = vmatprep.mubr.f32.mxu1 %v654_v13  ;;  %1042 = vmatprep.mubr.f32.mxu0 %v654_v13 }
 0x26d   :  { %918 = vmatmul.mubr.f32.gmra.mrb[8].mxu1 %v653_v44  ;;  %1043 = vmatmul.mubr.f32.gmra.mrb[10].mxu0 %v653_v44 }
 0x26e   :  { %922 = vmatprep.mubr.f32.mxu1 %v793_v14  ;;  %1047 = vmatprep.mubr.f32.mxu0 %v793_v14 }
 0x271   :  { %923 = vmatmul.mubr.f32.gmra.mrb[10].mxu1 %v792_v15  ;;  %1048 = vmatmul.mubr.f32.gmra.mrb[12].mxu0 %v792_v15 }
 0x272   :  { %1157 = vmatprep.mubr.f32.mxu1 %v9289_v34  ;;  %1282 = vmatprep.mubr.f32.mxu0 %v9289_v34  ;;  %v8666_v34 = vpack.c.bf16 %v1532_v28, %v1531_v27  ;;  %v1725_v27 = vld [vmem:[#allocation12 + $0xb0] sm:$0xff]  ;;  %v1917_v28 = vld [vmem:[#allocation12 + $0x98] sm:$0xff] }
 0x275   :  { %1158 = vmatmul.mubr.f32.vlgmr.msra.gmra.mrb[12].mxu1 %v9291_v35  ;;  %1283 = vmatmul.mubr.f32.vlgmr.msra.gmra.mrb[14].mxu0 %v9291_v35  ;;  %v1533_v35 = vld [vmem:[#allocation12 + $0xc8] sm:$0xff] }
 0x276   :  { %1162 = vmatprep.mubr.f32.mxu1 %v9293_v40  ;;  %1287 = vmatprep.mubr.f32.mxu0 %v9293_v40  ;;  %v8638_v40 = vpack.c.bf16 %v1335_v22, %v1334_v30  ;;  %v8670_v32 = vpack.c.bf16 %v1534_v31, %v1533_v35  ;;  %v1726_v22 = vld [vmem:[#allocation12 + $0xd0] sm:$0xff]  ;;  %v1919_v31 = vld [vmem:[#allocation12 + $0xd8] sm:$0xff] }
 0x277   :  { %8629 = vmatpush3.bf16.msra.mxu1 %v8626_v3  ;;  %8661 = vmatpush3.bf16.msra.mxu0 %v8658_v4  ;;  %v9320_v3 = vld [vmem:[%s11929_s6] ss:$0 sm:$0xff]  ;;  %v1727_v35 = vld [vmem:[#allocation12 + $0xf0] sm:$0xff] }
 0x278   :  { %8631 = vmatprep.subr.bf16.mxu1 %v8630_v17  ;;  %8663 = vmatprep.subr.bf16.mxu0 %v8662_v23 }
 0x279   :  { %1163 = vmatmul.mubr.f32.gmra.mrb[14].mxu1 %v9301_v50  ;;  %1288 = vmatmul.mubr.f32.gmra.mrb[16].mxu0 %v9301_v50  ;;  %v8642_v50 = vpack.c.bf16 %v1337_v24, %v1336_v21  ;;  %v1728_v24 = vld [vmem:[#allocation12 + $0x110] sm:$0xff] }
 0x27a   :  { %1167 = vmatprep.mubr.f32.mxu1 %v654_v13  ;;  %1292 = vmatprep.mubr.f32.mxu0 %v654_v13 }
 0x27b   :  { %8633 = vmatpush3.bf16.msra.mxu1 %v8630_v17  ;;  %8665 = vmatpush3.bf16.msra.mxu0 %v8662_v23 }
 0x27c   :  { %8635 = vmatprep.subr.bf16.mxu1 %v8634_v29  ;;  %8667 = vmatprep.subr.bf16.mxu0 %v8666_v34 }
 0x27d   :  { %1168 = vmatmul.mubr.f32.gmra.mrb[16].mxu1 %v653_v44  ;;  %1293 = vmatmul.mubr.f32.gmra.mrb[18].mxu0 %v653_v44 }
 0x27e   :  { %1172 = vmatprep.mubr.f32.mxu1 %v793_v14  ;;  %1297 = vmatprep.mubr.f32.mxu0 %v793_v14 }
 0x27f   :  { %8637 = vmatpush3.bf16.msra.mxu1 %v8634_v29  ;;  %8669 = vmatpush3.bf16.msra.mxu0 %v8666_v34  ;;  %v1918_v29 = vld [vmem:[#allocation12 + $0xb8] sm:$0xff]  ;;  %v8698_v34 = vpack.c.bf16 %v1725_v27, %v1724_v26 }
 0x280   :  { %8639 = vmatprep.subr.bf16.mxu1 %v8638_v40  ;;  %8671 = vmatprep.subr.bf16.mxu0 %v8670_v32  ;;  %v8730_v30 = vpack.c.bf16 %v1918_v29, %v1917_v28 }
 0x281   :  { %1173 = vmatmul.mubr.f32.gmra.mrb[18].mxu1 %v792_v15  ;;  %1298 = vmatmul.mubr.f32.gmra.mrb[20].mxu0 %v792_v15  ;;  %v1722_v15 = vld [vmem:[#allocation12 + $0x50] sm:$0xff] }
 0x282   :  { %v8694_v23 = vpack.c.bf16 %v1723_v18, %v1722_v15 }
 0x283   :  { %8641 = vmatpush3.bf16.msra.mxu1 %v8638_v40  ;;  %8673 = vmatpush3.bf16.msra.mxu0 %v8670_v32  ;;  %v1920_v40 = vld [vmem:[#allocation12 + $0xf8] sm:$0xff]  ;;  %v8702_v32 = vpack.c.bf16 %v1727_v35, %v1726_v22 }
 0x284   :  { %8643 = vmatprep.subr.bf16.mxu1 %v8642_v50  ;;  %8675 = vmatprep.subr.bf16.mxu0 %v8674_v37  ;;  %v8734_v21 = vpack.c.bf16 %v1920_v40, %v1919_v31 }
 0x287   :  { %8645 = vmatpush3.bf16.msra.mxu1 %v8642_v50  ;;  %8677 = vmatpush3.bf16.msra.mxu0 %v8674_v37  ;;  %v1922_v50 = vld [vmem:[#allocation12 + $0x138] sm:$0xff]  ;;  %v8706_v37 = vpack.c.bf16 %v1729_v33, %v1728_v24 }
 0x288   :  { %8647 = vmatprep.subr.bf16.mxu1 %v8646_v43  ;;  %8679 = vmatprep.subr.bf16.mxu0 %v8678_v45  ;;  %v8738_v38 = vpack.c.bf16 %v1922_v50, %v1921_v36 }
 0x28b   :  { %8649 = vmatpush3.bf16.msra.mxu1 %v8646_v43  ;;  %8681 = vmatpush3.bf16.msra.mxu0 %v8678_v45  ;;  %v1924_v43 = vld [vmem:[#allocation12 + $0x178] sm:$0xff]  ;;  %v8710_v45 = vpack.c.bf16 %v1731_v41, %v1730_v39 }
 0x28c   :  { %8651 = vmatprep.subr.bf16.mxu1 %v8650_v51  ;;  %8683 = vmatprep.subr.bf16.mxu0 %v8682_v52  ;;  %v8742_v46 = vpack.c.bf16 %v1924_v43, %v1923_v42 }
 0x28f   :  { %8653 = vmatpush3.bf16.msra.mxu1 %v8650_v51  ;;  %8685 = vmatpush3.bf16.msra.mxu0 %v8682_v52  ;;  %v1926_v51 = vld [vmem:[#allocation12 + $0x1b8] sm:$0xff]  ;;  %v8714_v52 = vpack.c.bf16 %v1733_v48, %v1732_v47 }
 0x290   :  { %8655 = vmatprep.subr.bf16.mxu1 %v8654_v57  ;;  %8687 = vmatprep.subr.bf16.mxu0 %v8686_v58  ;;  %v8746_v53 = vpack.c.bf16 %v1926_v51, %v1925_v49 }
 0x293   :  { %8657 = vmatpush3.bf16.msra.mxu1 %v8654_v57  ;;  %8689 = vmatpush3.bf16.msra.mxu0 %v8686_v58  ;;  %v1928_v57 = vld [vmem:[#allocation12 + $0x1f8] sm:$0xff]  ;;  %v8718_v58 = vpack.c.bf16 %v1735_v55, %v1734_v54 }
 0x294   :  { %8691 = vmatprep.subr.bf16.mxu1 %v8690_v62  ;;  %8723 = vmatprep.subr.bf16.mxu0 %v8722_v0  ;;  %v8750_v59 = vpack.c.bf16 %v1928_v57, %v1927_v56 }
 0x300   :  { %v6218_v1 = vpop.f32.mrb[4].mxu1  ;;  %v6262_v2 = vpop.f32.mrb[6].mxu0 }
 0x301   :  { %v6219_v4 = vpop.f32.mrb[5].mxu1  ;;  %v6263_v5 = vpop.f32.mrb[7].mxu0 }
 0x302   :  { %v6220_v6 = vadd.f32 %v6219_v4, %v6218_v1  ;;  %v9322_v7 = vadd.f32 %v6263_v5, %v6262_v2 }
 0x304   :  { %v910_v8 = vadd.f32 %v6220_v6, %v9320_v3  ;;  %v6221_v9 = vpop.f32.mrb[6].mxu1  ;;  %v6265_v10 = vpop.f32.mrb[8].mxu0 }
 0x305   :  { %v6222_v11 = vpop.f32.mrb[7].mxu1  ;;  %v6266_v12 = vpop.f32.mrb[9].mxu0 }
 0x306   :  { %v9325_v13 = vmax.f32 %v910_v8, 0.0  ;;  %v6223_v44 = vadd.f32 %v6222_v11, %v6221_v9  ;;  %v9327_v14 = vadd.f32 %v6266_v12, %v6265_v10 }
 0x308   :  { %v915_v20 = vadd.f32 %v6223_v44, %v9320_v3  ;;  %7114 = vmatprep.mubr.f32.mxu1 %v9325_v13  ;;  %7170 = vmatprep.mubr.f32.mxu0 %v9325_v13  ;;  %v1040_v29 = vadd.f32 %v9327_v14, %v9320_v3 }
 0x30a   :  { %v9332_v17 = vmax.f32 %v915_v20, 0.0  ;;  %v1035_v20 = vadd.f32 %v9322_v7, %v9320_v3  ;;  %v9361_v14 = vmax.f32 %v1040_v29, 0.0  ;;  %v2714_v29 = vld [vmem:[#allocation14 + $0x108] sm:$0xff] }
 0x30c   :  { %7115 = vmatmul.mubr.f32.vlgmr.msra.gmra.mrb[20].mxu1 %v9332_v17  ;;  %7171 = vmatmul.mubr.f32.vlgmr.msra.gmra.mrb[22].mxu0 %v9332_v17  ;;  %v9354_v35 = vmax.f32 %v1035_v20, 0.0  ;;  %v2711_v20 = vld [vmem:[#allocation14 + $0xa8] sm:$0xff] }
 0x30d   :  { %8693 = vmatpush3.bf16.msra.mxu1 %v8690_v62  ;;  %8725 = vmatpush3.bf16.msra.mxu0 %v8722_v0  ;;  %v2706_v62 = vld [vmem:[#allocation14 + $0x8] sm:$0xff]  ;;  %v9336_v0 = vpack.c.bf16 %v2172_v61, %v2171_v60 }
 0x30e   :  { %8695 = vmatprep.subr.bf16.mxu1 %v8694_v23  ;;  %8727 = vmatprep.subr.bf16.mxu0 %v8726_v25  ;;  %v9338_v1 = vpack.c.bf16 %v2707_v63, %v2706_v62 }
 0x311   :  { %8697 = vmatpush3.bf16.msra.mxu1 %v8694_v23  ;;  %8729 = vmatpush3.bf16.msra.mxu0 %v8726_v25 }
 0x312   :  { %8699 = vmatprep.subr.bf16.mxu1 %v8698_v34  ;;  %8731 = vmatprep.subr.bf16.mxu0 %v8730_v30 }
 0x315   :  { %8701 = vmatpush3.bf16.msra.mxu1 %v8698_v34  ;;  %8733 = vmatpush3.bf16.msra.mxu0 %v8730_v30 }
 0x316   :  { %8703 = vmatprep.subr.bf16.mxu1 %v8702_v32  ;;  %8735 = vmatprep.subr.bf16.mxu0 %v8734_v21 }
 0x319   :  { %8705 = vmatpush3.bf16.msra.mxu1 %v8702_v32  ;;  %8737 = vmatpush3.bf16.msra.mxu0 %v8734_v21 }
 0x31a   :  { %8707 = vmatprep.subr.bf16.mxu1 %v8706_v37  ;;  %8739 = vmatprep.subr.bf16.mxu0 %v8738_v38 }
 0x31d   :  { %8709 = vmatpush3.bf16.msra.mxu1 %v8706_v37  ;;  %8741 = vmatpush3.bf16.msra.mxu0 %v8738_v38 }
 0x31e   :  { %8711 = vmatprep.subr.bf16.mxu1 %v8710_v45  ;;  %8743 = vmatprep.subr.bf16.mxu0 %v8742_v46 }
 0x321   :  { %8713 = vmatpush3.bf16.msra.mxu1 %v8710_v45  ;;  %8745 = vmatpush3.bf16.msra.mxu0 %v8742_v46 }
 0x322   :  { %8715 = vmatprep.subr.bf16.mxu1 %v8714_v52  ;;  %8747 = vmatprep.subr.bf16.mxu0 %v8746_v53 }
 0x325   :  { %8717 = vmatpush3.bf16.msra.mxu1 %v8714_v52  ;;  %8749 = vmatpush3.bf16.msra.mxu0 %v8746_v53 }
 0x326   :  { %8719 = vmatprep.subr.bf16.mxu1 %v8718_v58  ;;  %8751 = vmatprep.subr.bf16.mxu0 %v8750_v59 }
 0x329   :  { %8721 = vmatpush3.bf16.msra.mxu1 %v8718_v58  ;;  %8753 = vmatpush3.bf16.msra.mxu0 %v8750_v59 }
 0x32a   :  { %8755 = vmatprep.subr.bf16.mxu1 %v9336_v0  ;;  %8787 = vmatprep.subr.bf16.mxu0 %v9338_v1 }
 0x340   :  { %v6224_v2 = vpop.f32.mrb[8].mxu1  ;;  %v6268_v4 = vpop.f32.mrb[10].mxu0 }
 0x341   :  { %v6225_v5 = vpop.f32.mrb[9].mxu1  ;;  %v6269_v6 = vpop.f32.mrb[11].mxu0 }
 0x342   :  { %v6226_v8 = vadd.f32 %v6225_v5, %v6224_v2  ;;  %v6270_v9 = vadd.f32 %v6269_v6, %v6268_v4 }
 0x344   :  { %v920_v10 = vadd.f32 %v6226_v8, %v9320_v3  ;;  %v6227_v11 = vpop.f32.mrb[10].mxu1  ;;  %v6271_v12 = vpop.f32.mrb[12].mxu0  ;;  %v1045_v7 = vadd.f32 %v6270_v9, %v9320_v3  ;;  %v2173_v9 = vld [vmem:[#allocation14 + $0x40] sm:$0xff] }
 0x345   :  { %v6228_v44 = vpop.f32.mrb[11].mxu1  ;;  %v6272_v15 = vpop.f32.mrb[13].mxu0 }
 0x346   :  { %v9343_v18 = vmax.f32 %v920_v10, 0.0  ;;  %v6229_v16 = vadd.f32 %v6228_v44, %v6227_v11  ;;  %v6273_v19 = vadd.f32 %v6272_v15, %v6271_v12  ;;  %v9364_v50 = vmax.f32 %v1045_v7, 0.0  ;;  %v2174_v10 = vld [vmem:[#allocation14 + $0x60] sm:$0xff]  ;;  %v2708_v11 = vld [vmem:[#allocation14 + $0x48] sm:$0xff] }
 0x347   :  { %v8758_v12 = vpack.c.bf16 %v2174_v10, %v2173_v9  ;;  %v2175_v15 = vld [vmem:[#allocation14 + $0x80] sm:$0xff]  ;;  %v3244_v9 = vld [vmem:[#allocation14 + $0x130] sm:$0xff] }
 0x348   :  { %v925_v23 = vadd.f32 %v6229_v16, %v9320_v3  ;;  %v6306_v25 = vpop.f32.mrb[12].mxu1  ;;  %v6350_v26 = vpop.f32.mrb[14].mxu0  ;;  %7117 = vmatprep.mubr.f32.mxu1 %v9343_v18  ;;  %7173 = vmatprep.mubr.f32.mxu0 %v9343_v18  ;;  %v1050_v24 = vadd.f32 %v6273_v19, %v9320_v3  ;;  %v2176_v16 = vld [vmem:[#allocation14 + $0xa0] sm:$0xff]  ;;  %v2710_v19 = vld [vmem:[#allocation14 + $0x88] sm:$0xff] }
 0x349   :  { %v6307_v27 = vpop.f32.mrb[13].mxu1  ;;  %v6351_v28 = vpop.f32.mrb[15].mxu0  ;;  %v2182_v7 = vld [vmem:[#allocation14 + $0x160] sm:$0xff] }
 0x34a   :  { %v9352_v34 = vmax.f32 %v925_v23, 0.0  ;;  %v6308_v30 = vadd.f32 %v6307_v27, %v6306_v25  ;;  %v6352_v22 = vadd.f32 %v6351_v28, %v6350_v26  ;;  %v9371_v43 = vmax.f32 %v1050_v24, 0.0  ;;  %v2177_v25 = vld [vmem:[#allocation14 + $0xc0] sm:$0xff]  ;;  %v2712_v26 = vld [vmem:[#allocation14 + $0xc8] sm:$0xff] }
 0x34b   :  { %v8794_v23 = vpack.c.bf16 %v2711_v20, %v2710_v19  ;;  %v2713_v27 = vld [vmem:[#allocation14 + $0xe8] sm:$0xff]  ;;  %v2180_v28 = vld [vmem:[#allocation14 + $0x120] sm:$0xff]  ;;  %v3248_v20 = vld [vmem:[#allocation14 + $0x1b0] sm:$0xff] }
 0x34c   :  { %v6309_v31 = vpop.f32.mrb[14].mxu1  ;;  %v6353_v40 = vpop.f32.mrb[16].mxu0  ;;  %7118 = vmatmul.mubr.f32.gmra.mrb[22].mxu1 %v9352_v34  ;;  %7174 = vmatmul.mubr.f32.gmra.mrb[24].mxu0 %v9352_v34  ;;  %v1160_v37 = vadd.f32 %v6308_v30, %v9320_v3  ;;  %v1285_v59 = vadd.f32 %v6352_v22, %v9320_v3  ;;  %v2184_v24 = vld [vmem:[#allocation14 + $0x1a0] sm:$0xff] }
 0x34d   :  { %v6310_v32 = vpop.f32.mrb[15].mxu1  ;;  %v6354_v21 = vpop.f32.mrb[17].mxu0  ;;  %7120 = vmatprep.mubr.f32.mxu1 %v9354_v35  ;;  %7176 = vmatprep.mubr.f32.mxu0 %v9354_v35 }
 0x34e   :  { %v6311_v33 = vadd.f32 %v6310_v32, %v6309_v31  ;;  %v6355_v36 = vadd.f32 %v6354_v21, %v6353_v40  ;;  %v9374_v48 = vmax.f32 %v1160_v37, 0.0  ;;  %v9394_v63 = vmax.f32 %v1285_v59, 0.0  ;;  %v2716_v31 = vld [vmem:[#allocation14 + $0x148] sm:$0xff] }
 0x34f   :  { %v2717_v40 = vld [vmem:[#allocation14 + $0x168] sm:$0xff] }
 0x350   :  { %v6312_v38 = vpop.f32.mrb[16].mxu1  ;;  %v6356_v39 = vpop.f32.mrb[18].mxu0  ;;  %7121 = vmatmul.mubr.f32.gmra.mrb[24].mxu1 %v9361_v14  ;;  %7177 = vmatmul.mubr.f32.gmra.mrb[26].mxu0 %v9361_v14  ;;  %v1165_v45 = vadd.f32 %v6311_v33, %v9320_v3  ;;  %v1290_v61 = vadd.f32 %v6355_v36, %v9320_v3  ;;  %v8806_v21 = vpack.c.bf16 %v2717_v40, %v2716_v31  ;;  %v2718_v33 = vld [vmem:[#allocation14 + $0x188] sm:$0xff]  ;;  %v3774_v31 = vld [vmem:[#allocation14 + $0x158] sm:$0xff] }
 0x351   :  { %v6313_v41 = vpop.f32.mrb[17].mxu1  ;;  %v6357_v42 = vpop.f32.mrb[19].mxu0  ;;  %7123 = vmatprep.mubr.f32.mxu1 %v9364_v50  ;;  %7179 = vmatprep.mubr.f32.mxu0 %v9364_v50  ;;  %v2719_v36 = vld [vmem:[#allocation14 + $0x1a8] sm:$0xff]  ;;  %v3775_v40 = vld [vmem:[#allocation14 + $0x178] sm:$0xff] }
 0x352   :  { %v6314_v46 = vadd.f32 %v6313_v41, %v6312_v38  ;;  %v6358_v47 = vadd.f32 %v6357_v42, %v6356_v39  ;;  %v9381_v55 = vmax.f32 %v1165_v45, 0.0  ;;  %v9401_v4 = vmax.f32 %v1290_v61, 0.0  ;;  %v2185_v38 = vld [vmem:[#allocation14 + $0x1c0] sm:$0xff]  ;;  %v2720_v41 = vld [vmem:[#allocation14 + $0x1c8] sm:$0xff] }
 0x353   :  { %v8810_v37 = vpack.c.bf16 %v2719_v36, %v2718_v33  ;;  %v2186_v39 = vld [vmem:[#allocation14 + $0x1e0] sm:$0xff]  ;;  %v2721_v42 = vld [vmem:[#allocation14 + $0x1e8] sm:$0xff]  ;;  %v3778_v33 = vld [vmem:[#allocation14 + $0x1d8] sm:$0xff] }
 0x354   :  { %v1170_v49 = vadd.f32 %v6314_v46, %v9320_v3  ;;  %v6315_v51 = vpop.f32.mrb[18].mxu1  ;;  %v6359_v52 = vpop.f32.mrb[20].mxu0  ;;  %7124 = vmatmul.mubr.f32.gmra.mrb[26].mxu1 %v9371_v43  ;;  %7180 = vmatmul.mubr.f32.gmra.mrb[28].mxu0 %v9371_v43  ;;  %v1295_v2 = vadd.f32 %v6358_v47, %v9320_v3  ;;  %v8814_v45 = vpack.c.bf16 %v2721_v42, %v2720_v41  ;;  %v3235_v46 = vld [vmem:[#allocation14 + $0x10] sm:$0xff]  ;;  %v3779_v36 = vld [vmem:[#allocation14 + $0x1f8] sm:$0xff] }
 0x355   :  { %v6316_v53 = vpop.f32.mrb[19].mxu1  ;;  %v6360_v54 = vpop.f32.mrb[21].mxu0  ;;  %7126 = vmatprep.mubr.f32.mxu1 %v9374_v48  ;;  %7182 = vmatprep.mubr.f32.mxu0 %v9374_v48  ;;  %v3236_v47 = vld [vmem:[#allocation14 + $0x30] sm:$0xff] }
 0x356   :  { %v9383_v56 = vmax.f32 %v1170_v49, 0.0  ;;  %v6317_v57 = vadd.f32 %v6316_v53, %v6315_v51  ;;  %v6361_v58 = vadd.f32 %v6360_v54, %v6359_v52  ;;  %v9404_v6 = vmax.f32 %v1295_v2, 0.0  ;;  %v9451_v49 = vld [vmem:[%s11931_s8] ss:$0 sm:$0xff] }
 0x358   :  { %v1175_v60 = vadd.f32 %v6317_v57, %v9320_v3  ;;  %7127 = vmatmul.mubr.f32.gmra.mrb[28].mxu1 %v9381_v55  ;;  %7183 = vmatmul.mubr.f32.gmra.mrb[30].mxu0 %v9381_v55  ;;  %v1300_v5 = vadd.f32 %v6361_v58, %v9320_v3  ;;  %v2709_v3 = vld [vmem:[#allocation14 + $0x68] sm:$0xff]  ;;  %v3237_v57 = vld [vmem:[#allocation14 + $0x50] sm:$0xff] }
 0x359   :  { %7129 = vmatprep.mubr.f32.mxu1 %v9383_v56  ;;  %7185 = vmatprep.mubr.f32.mxu0 %v9383_v56  ;;  %v8790_v44 = vpack.c.bf16 %v2709_v3, %v2708_v11  ;;  %v3238_v58 = vld [vmem:[#allocation14 + $0x70] sm:$0xff] }
 0x35a   :  { %v9392_v62 = vmax.f32 %v1175_v60, 0.0  ;;  %v9410_v8 = vmax.f32 %v1300_v5, 0.0  ;;  %v8822_v61 = vpack.c.bf16 %v3238_v58, %v3237_v57  ;;  %v3242_v5 = vld [vmem:[#allocation14 + $0xf0] sm:$0xff] }
 0x35b   :  { %v3245_v11 = vld [vmem:[#allocation14 + $0x150] sm:$0xff] }
 0x35c   :  { %7130 = vmatmul.mubr.f32.gmra.mrb[30].mxu1 %v9392_v62  ;;  %7186 = vmatmul.mubr.f32.gmra.mrb[32].mxu0 %v9392_v62  ;;  %v3246_v3 = vld [vmem:[#allocation14 + $0x170] sm:$0xff] }
 0x35d   :  { %7132 = vmatprep.mubr.f32.mxu1 %v9394_v63  ;;  %7188 = vmatprep.mubr.f32.mxu0 %v9394_v63 }
 0x360   :  { %7133 = vmatmul.mubr.f32.gmra.mrb[32].mxu1 %v9401_v4  ;;  %7189 = vmatmul.mubr.f32.gmra.mrb[34].mxu0 %v9401_v4 }
 0x361   :  { %7135 = vmatprep.mubr.f32.mxu1 %v9404_v6  ;;  %7191 = vmatprep.mubr.f32.mxu0 %v9404_v6 }
 0x364   :  { %7136 = vmatmul.mubr.f32.gmra.mrb[34].mxu1 %v9410_v8  ;;  %7192 = vmatmul.mubr.f32.gmra.mrb[36].mxu0 %v9410_v8 }
 0x365   :  { %7226 = vmatprep.mubr.f32.mxu1 %v9325_v13  ;;  %7282 = vmatprep.mubr.f32.mxu0 %v9325_v13  ;;  %v8762_v13 = vpack.c.bf16 %v2176_v16, %v2175_v15  ;;  %v3765_v15 = vld [vmem:[#allocation14 + $0x38] sm:$0xff]  ;;  %v3247_v16 = vld [vmem:[#allocation14 + $0x190] sm:$0xff] }
 0x368   :  { %7227 = vmatmul.mubr.f32.vlgmr.msra.gmra.mrb[36].mxu1 %v9332_v17  ;;  %7283 = vmatmul.mubr.f32.vlgmr.msra.gmra.mrb[38].mxu0 %v9332_v17  ;;  %v2178_v17 = vld [vmem:[#allocation14 + $0xe0] sm:$0xff] }
 0x369   :  { %7229 = vmatprep.mubr.f32.mxu1 %v9343_v18  ;;  %7285 = vmatprep.mubr.f32.mxu0 %v9343_v18  ;;  %v2179_v18 = vld [vmem:[#allocation14 + $0x100] sm:$0xff] }
 0x36a   :  { %8757 = vmatpush3.bf16.msra.mxu1 %v9336_v0  ;;  %8789 = vmatpush3.bf16.msra.mxu0 %v9338_v1  ;;  %v8766_v0 = vpack.c.bf16 %v2178_v17, %v2177_v25  ;;  %v8798_v1 = vpack.c.bf16 %v2713_v27, %v2712_v26  ;;  %v8770_v30 = vpack.c.bf16 %v2180_v28, %v2179_v18  ;;  %v3767_v25 = vld [vmem:[#allocation14 + $0x78] sm:$0xff] }
 0x36b   :  { %8759 = vmatprep.subr.bf16.mxu1 %v8758_v12  ;;  %8791 = vmatprep.subr.bf16.mxu0 %v8790_v44  ;;  %v3768_v26 = vld [vmem:[#allocation14 + $0x98] sm:$0xff] }
 0x36c   :  { %7230 = vmatmul.mubr.f32.gmra.mrb[38].mxu1 %v9352_v34  ;;  %7286 = vmatmul.mubr.f32.gmra.mrb[40].mxu0 %v9352_v34  ;;  %v2715_v34 = vld [vmem:[#allocation14 + $0x128] sm:$0xff]  ;;  %v3769_v27 = vld [vmem:[#allocation14 + $0xb8] sm:$0xff] }
 0x36d   :  { %7232 = vmatprep.mubr.f32.mxu1 %v9354_v35  ;;  %7288 = vmatprep.mubr.f32.mxu0 %v9354_v35  ;;  %v8802_v22 = vpack.c.bf16 %v2715_v34, %v2714_v29  ;;  %v2181_v35 = vld [vmem:[#allocation14 + $0x140] sm:$0xff]  ;;  %v3771_v18 = vld [vmem:[#allocation14 + $0xf8] sm:$0xff]  ;;  %v3249_v29 = vld [vmem:[#allocation14 + $0x1d0] sm:$0xff] }
 0x36e   :  { %8761 = vmatpush3.bf16.msra.mxu1 %v8758_v12  ;;  %8793 = vmatpush3.bf16.msra.mxu0 %v8790_v44  ;;  %v8774_v32 = vpack.c.bf16 %v2182_v7, %v2181_v35  ;;  %v8838_v12 = vpack.c.bf16 %v3246_v3, %v3245_v11  ;;  %v3764_v44 = vld [vmem:[#allocation14 + $0x18] sm:$0xff]  ;;  %v3250_v34 = vld [vmem:[#allocation14 + $0x1f0] sm:$0xff] }
 0x36f   :  { %8763 = vmatprep.subr.bf16.mxu1 %v8762_v13  ;;  %8795 = vmatprep.subr.bf16.mxu0 %v8794_v23  ;;  %v8850_v19 = vpack.c.bf16 %v3765_v15, %v3764_v44  ;;  %v3773_v35 = vld [vmem:[#allocation14 + $0x138] sm:$0xff] }
 0x370   :  { %7233 = vmatmul.mubr.f32.gmra.mrb[40].mxu1 %v9361_v14  ;;  %7289 = vmatmul.mubr.f32.gmra.mrb[42].mxu0 %v9361_v14  ;;  %v2183_v14 = vld [vmem:[#allocation14 + $0x180] sm:$0xff] }
 0x371   :  { %7235 = vmatprep.mubr.f32.mxu1 %v9364_v50  ;;  %7291 = vmatprep.mubr.f32.mxu0 %v9364_v50  ;;  %v8778_v50 = vpack.c.bf16 %v2184_v24, %v2183_v14  ;;  %v3777_v14 = vld [vmem:[#allocation14 + $0x1b8] sm:$0xff] }
 0x372   :  { %8765 = vmatpush3.bf16.msra.mxu1 %v8762_v13  ;;  %8797 = vmatpush3.bf16.msra.mxu0 %v8794_v23  ;;  %v8842_v13 = vpack.c.bf16 %v3248_v20, %v3247_v16  ;;  %v3766_v23 = vld [vmem:[#allocation14 + $0x58] sm:$0xff] }
 0x373   :  { %8767 = vmatprep.subr.bf16.mxu1 %v8766_v0  ;;  %8799 = vmatprep.subr.bf16.mxu0 %v8798_v1  ;;  %v8854_v17 = vpack.c.bf16 %v3767_v25, %v3766_v23 }
 0x374   :  { %7236 = vmatmul.mubr.f32.gmra.mrb[42].mxu1 %v9371_v43  ;;  %7292 = vmatmul.mubr.f32.gmra.mrb[44].mxu0 %v9371_v43  ;;  %v8782_v43 = vpack.c.bf16 %v2186_v39, %v2185_v38 }
 0x375   :  { %7238 = vmatprep.mubr.f32.mxu1 %v9374_v48  ;;  %7294 = vmatprep.mubr.f32.mxu0 %v9374_v48  ;;  %v8818_v48 = vpack.c.bf16 %v3236_v47, %v3235_v46 }
 0x376   :  { %8769 = vmatpush3.bf16.msra.mxu1 %v8766_v0  ;;  %8801 = vmatpush3.bf16.msra.mxu0 %v8798_v1  ;;  %v8858_v0 = vpack.c.bf16 %v3769_v27, %v3768_v26  ;;  %v3770_v1 = vld [vmem:[#allocation14 + $0xd8] sm:$0xff] }
 0x377   :  { %8771 = vmatprep.subr.bf16.mxu1 %v8770_v30  ;;  %8803 = vmatprep.subr.bf16.mxu0 %v8802_v22  ;;  %v8862_v28 = vpack.c.bf16 %v3771_v18, %v3770_v1 }
 0x378   :  { %7239 = vmatmul.mubr.f32.gmra.mrb[44].mxu1 %v9381_v55  ;;  %7295 = vmatmul.mubr.f32.gmra.mrb[46].mxu0 %v9381_v55 }
 0x379   :  { %7241 = vmatprep.mubr.f32.mxu1 %v9383_v56  ;;  %7297 = vmatprep.mubr.f32.mxu0 %v9383_v56 }
 0x37a   :  { %8773 = vmatpush3.bf16.msra.mxu1 %v8770_v30  ;;  %8805 = vmatpush3.bf16.msra.mxu0 %v8802_v22  ;;  %v3772_v30 = vld [vmem:[#allocation14 + $0x118] sm:$0xff]  ;;  %v8846_v22 = vpack.c.bf16 %v3250_v34, %v3249_v29 }
 0x37b   :  { %8775 = vmatprep.subr.bf16.mxu1 %v8774_v32  ;;  %8807 = vmatprep.subr.bf16.mxu0 %v8806_v21  ;;  %v8866_v7 = vpack.c.bf16 %v3773_v35, %v3772_v30 }
 0x37c   :  { %7242 = vmatmul.mubr.f32.gmra.mrb[46].mxu1 %v9392_v62  ;;  %7298 = vmatmul.mubr.f32.gmra.mrb[48].mxu0 %v9392_v62  ;;  %v3239_v62 = vld [vmem:[#allocation14 + $0x90] sm:$0xff] }
 0x37d   :  { %7244 = vmatprep.mubr.f32.mxu1 %v9394_v63  ;;  %7300 = vmatprep.mubr.f32.mxu0 %v9394_v63  ;;  %v3240_v63 = vld [vmem:[#allocation14 + $0xb0] sm:$0xff] }
 0x37e   :  { %8777 = vmatpush3.bf16.msra.mxu1 %v8774_v32  ;;  %8809 = vmatpush3.bf16.msra.mxu0 %v8806_v21  ;;  %v8826_v2 = vpack.c.bf16 %v3240_v63, %v3239_v62  ;;  %v8870_v32 = vpack.c.bf16 %v3775_v40, %v3774_v31  ;;  %v3776_v21 = vld [vmem:[#allocation14 + $0x198] sm:$0xff] }
 0x37f   :  { %8779 = vmatprep.subr.bf16.mxu1 %v8778_v50  ;;  %8811 = vmatprep.subr.bf16.mxu0 %v8810_v37  ;;  %v8874_v24 = vpack.c.bf16 %v3777_v14, %v3776_v21 }
 0x380   :  { %7245 = vmatmul.mubr.f32.gmra.mrb[48].mxu1 %v9401_v4  ;;  %7301 = vmatmul.mubr.f32.gmra.mrb[50].mxu0 %v9401_v4  ;;  %v3241_v4 = vld [vmem:[#allocation14 + $0xd0] sm:$0xff] }
 0x381   :  { %7247 = vmatprep.mubr.f32.mxu1 %v9404_v6  ;;  %7303 = vmatprep.mubr.f32.mxu0 %v9404_v6  ;;  %v8830_v6 = vpack.c.bf16 %v3242_v5, %v3241_v4 }
 0x382   :  { %8781 = vmatpush3.bf16.msra.mxu1 %v8778_v50  ;;  %8813 = vmatpush3.bf16.msra.mxu0 %v8810_v37  ;;  %v8878_v50 = vpack.c.bf16 %v3779_v36, %v3778_v33 }
 0x383   :  { %8783 = vmatprep.subr.bf16.mxu1 %v8782_v43  ;;  %8815 = vmatprep.subr.bf16.mxu0 %v8814_v45 }
 0x384   :  { %7248 = vmatmul.mubr.f32.gmra.mrb[50].mxu1 %v9410_v8  ;;  %7304 = vmatmul.mubr.f32.gmra.mrb[52].mxu0 %v9410_v8  ;;  %v3243_v8 = vld [vmem:[#allocation14 + $0x110] sm:$0xff] }
 0x385   :  { %v8834_v10 = vpack.c.bf16 %v3244_v9, %v3243_v8 }
 0x386   :  { %8785 = vmatpush3.bf16.msra.mxu1 %v8782_v43  ;;  %8817 = vmatpush3.bf16.msra.mxu0 %v8814_v45 }
 0x387   :  { %8819 = vmatprep.subr.bf16.mxu1 %v8818_v48  ;;  %8851 = vmatprep.subr.bf16.mxu0 %v8850_v19 }
 0x3df   :  { %v7116_v51 = vpop.f32.mrb[20].mxu1  ;;  %v9453_v52 = vpop.f32.mrb[22].mxu0 }
 0x3e0   :  { %v1422_v53 = vadd.f32 %v7116_v51, %v9451_v49  ;;  %v1416_v54 = vpop.f32.mrb[21].mxu1  ;;  %v9456_v55 = vpop.f32.mrb[23].mxu0 }
 0x3e1   :  { %v1417_v56 = vadd.f32 %v9451_v49, %v1416_v54  ;;  %v1610_v21 = vadd.f32 %v9451_v49, %v9456_v55 }
 0x3e2   :  { %v9461_v60 = vmax.f32 %v1422_v53, 0.0 }
 0x3e3   :  { %v9459_v59 = vmax.f32 %v1417_v56, 0.0 }
 0x3e5   :  { %7338 = vmatprep.mubr.f32.mxu1 %v9459_v59  ;;  %7466 = vmatprep.mubr.f32.mxu0 %v9459_v59 }
 0x3e6   :  { %7339 = vmatmul.mubr.f32.vlgmr.msra.gmra.mrb[52].mxu1 %v9461_v60  ;;  %7467 = vmatmul.mubr.f32.vlgmr.msra.gmra.mrb[54].mxu0 %v9461_v60 }
 0x3e7   :  { %8821 = vmatpush3.bf16.msra.mxu1 %v8818_v48  ;;  %8853 = vmatpush3.bf16.msra.mxu0 %v8850_v19 }
 0x3e8   :  { %8823 = vmatprep.subr.bf16.mxu1 %v8822_v61  ;;  %8855 = vmatprep.subr.bf16.mxu0 %v8854_v17 }
 0x3eb   :  { %8825 = vmatpush3.bf16.msra.mxu1 %v8822_v61  ;;  %8857 = vmatpush3.bf16.msra.mxu0 %v8854_v17 }
 0x3ec   :  { %8827 = vmatprep.subr.bf16.mxu1 %v8826_v2  ;;  %8859 = vmatprep.subr.bf16.mxu0 %v8858_v0 }
 0x3ef   :  { %8829 = vmatpush3.bf16.msra.mxu1 %v8826_v2  ;;  %8861 = vmatpush3.bf16.msra.mxu0 %v8858_v0 }
 0x3f0   :  { %8831 = vmatprep.subr.bf16.mxu1 %v8830_v6  ;;  %8863 = vmatprep.subr.bf16.mxu0 %v8862_v28 }
 0x3f3   :  { %8833 = vmatpush3.bf16.msra.mxu1 %v8830_v6  ;;  %8865 = vmatpush3.bf16.msra.mxu0 %v8862_v28 }
 0x3f4   :  { %8835 = vmatprep.subr.bf16.mxu1 %v8834_v10  ;;  %8867 = vmatprep.subr.bf16.mxu0 %v8866_v7 }
 0x3f7   :  { %8837 = vmatpush3.bf16.msra.mxu1 %v8834_v10  ;;  %8869 = vmatpush3.bf16.msra.mxu0 %v8866_v7 }
 0x3f8   :  { %8839 = vmatprep.subr.bf16.mxu1 %v8838_v12  ;;  %8871 = vmatprep.subr.bf16.mxu0 %v8870_v32 }
 0x3fb   :  { %8841 = vmatpush3.bf16.msra.mxu1 %v8838_v12  ;;  %8873 = vmatpush3.bf16.msra.mxu0 %v8870_v32 }
 0x3fc   :  { %8843 = vmatprep.subr.bf16.mxu1 %v8842_v13  ;;  %8875 = vmatprep.subr.bf16.mxu0 %v8874_v24 }
 0x3ff   :  { %8845 = vmatpush3.bf16.msra.mxu1 %v8842_v13  ;;  %8877 = vmatpush3.bf16.msra.mxu0 %v8874_v24 }
 0x400   :  { %8847 = vmatprep.subr.bf16.mxu1 %v8846_v22  ;;  %8879 = vmatprep.subr.bf16.mxu0 %v8878_v50 }
 0x403   :  { %8849 = vmatpush3.bf16.msra.mxu1 %v8846_v22  ;;  %8881 = vmatpush3.bf16.msra.mxu0 %v8878_v50  ;;  %v1615_v50 = vadd.f32 %v9453_v52, %v9451_v49 }
 0x41f   :  { %v7119_v37 = vpop.f32.mrb[22].mxu1  ;;  %v9467_v38 = vpop.f32.mrb[24].mxu0 }
 0x420   :  { %v1432_v39 = vadd.f32 %v7119_v37, %v9451_v49  ;;  %v1426_v41 = vpop.f32.mrb[23].mxu1  ;;  %v9470_v42 = vpop.f32.mrb[25].mxu0 }
 0x421   :  { %v1427_v43 = vadd.f32 %v9451_v49, %v1426_v41  ;;  %v9573_v41 = vmax.f32 %v1610_v21, 0.0 }
 0x422   :  { %v9477_v48 = vmax.f32 %v1432_v39, 0.0 }
 0x423   :  { %v9473_v45 = vmax.f32 %v1427_v43, 0.0  ;;  %v7122_v46 = vpop.f32.mrb[24].mxu1  ;;  %v9475_v47 = vpop.f32.mrb[26].mxu0  ;;  %v1620_v43 = vadd.f32 %v9451_v49, %v9470_v42  ;;  %v1625_v42 = vadd.f32 %v9467_v38, %v9451_v49 }
 0x424   :  { %v1442_v51 = vadd.f32 %v7122_v46, %v9451_v49  ;;  %v1436_v53 = vpop.f32.mrb[25].mxu1  ;;  %v9480_v54 = vpop.f32.mrb[27].mxu0 }
 0x425   :  { %v1437_v56 = vadd.f32 %v9451_v49, %v1436_v53  ;;  %7341 = vmatprep.mubr.f32.mxu1 %v9473_v45  ;;  %7469 = vmatprep.mubr.f32.mxu0 %v9473_v45  ;;  %v9607_v38 = vmax.f32 %v1625_v42, 0.0 }
 0x426   :  { %7342 = vmatmul.mubr.f32.gmra.mrb[54].mxu1 %v9477_v48  ;;  %7470 = vmatmul.mubr.f32.gmra.mrb[56].mxu0 %v9477_v48  ;;  %v9491_v62 = vmax.f32 %v1442_v51, 0.0  ;;  %v9587_v51 = vmax.f32 %v1615_v50, 0.0 }
 0x427   :  { %v9487_v57 = vmax.f32 %v1437_v56, 0.0  ;;  %v7125_v58 = vpop.f32.mrb[26].mxu1  ;;  %v9489_v61 = vpop.f32.mrb[28].mxu0 }
 0x428   :  { %v1452_v63 = vadd.f32 %v7125_v58, %v9451_v49  ;;  %v1446_v2 = vpop.f32.mrb[27].mxu1  ;;  %v9494_v4 = vpop.f32.mrb[29].mxu0  ;;  %v9595_v58 = vmax.f32 %v1620_v43, 0.0 }
 0x429   :  { %v1447_v5 = vadd.f32 %v9451_v49, %v1446_v2  ;;  %7344 = vmatprep.mubr.f32.mxu1 %v9487_v57  ;;  %7472 = vmatprep.mubr.f32.mxu0 %v9487_v57 }
 0x42a   :  { %7345 = vmatmul.mubr.f32.gmra.mrb[56].mxu1 %v9491_v62  ;;  %7473 = vmatmul.mubr.f32.gmra.mrb[58].mxu0 %v9491_v62  ;;  %v9505_v10 = vmax.f32 %v1452_v63, 0.0  ;;  %v1630_v63 = vadd.f32 %v9451_v49, %v9480_v54 }
 0x42b   :  { %v9501_v6 = vmax.f32 %v1447_v5, 0.0  ;;  %v7128_v8 = vpop.f32.mrb[28].mxu1  ;;  %v9503_v9 = vpop.f32.mrb[30].mxu0 }
 0x42c   :  { %v1462_v11 = vadd.f32 %v7128_v8, %v9451_v49  ;;  %v1456_v3 = vpop.f32.mrb[29].mxu1  ;;  %v9508_v12 = vpop.f32.mrb[31].mxu0  ;;  %v1635_v8 = vadd.f32 %v9475_v47, %v9451_v49 }
 0x42d   :  { %v1457_v44 = vadd.f32 %v9451_v49, %v1456_v3  ;;  %7347 = vmatprep.mubr.f32.mxu1 %v9501_v6  ;;  %7475 = vmatprep.mubr.f32.mxu0 %v9501_v6  ;;  %v9615_v3 = vmax.f32 %v1630_v63, 0.0 }
 0x42e   :  { %7348 = vmatmul.mubr.f32.gmra.mrb[58].mxu1 %v9505_v10  ;;  %7476 = vmatmul.mubr.f32.gmra.mrb[60].mxu0 %v9505_v10  ;;  %v9519_v20 = vmax.f32 %v1462_v11, 0.0  ;;  %v9627_v47 = vmax.f32 %v1635_v8, 0.0 }
 0x42f   :  { %v9515_v15 = vmax.f32 %v1457_v44, 0.0  ;;  %v7131_v16 = vpop.f32.mrb[30].mxu1  ;;  %v9517_v19 = vpop.f32.mrb[32].mxu0  ;;  %v1640_v44 = vadd.f32 %v9451_v49, %v9494_v4 }
 0x430   :  { %v1472_v13 = vadd.f32 %v7131_v16, %v9451_v49  ;;  %v1466_v23 = vpop.f32.mrb[31].mxu1  ;;  %v9522_v25 = vpop.f32.mrb[33].mxu0  ;;  %v1665_v43 = vadd.f32 %v9517_v19, %v9451_v49 }
 0x431   :  { %v1467_v17 = vadd.f32 %v9451_v49, %v1466_v23  ;;  %7350 = vmatprep.mubr.f32.mxu1 %v9515_v15  ;;  %7478 = vmatprep.mubr.f32.mxu0 %v9515_v15  ;;  %v1645_v23 = vadd.f32 %v9489_v61, %v9451_v49  ;;  %v1660_v21 = vadd.f32 %v9451_v49, %v9522_v25 }
 0x432   :  { %7351 = vmatmul.mubr.f32.gmra.mrb[60].mxu1 %v9519_v20  ;;  %7479 = vmatmul.mubr.f32.gmra.mrb[62].mxu0 %v9519_v20  ;;  %v9533_v1 = vmax.f32 %v1472_v13, 0.0  ;;  %v9687_v19 = vmax.f32 %v1665_v43, 0.0 }
 0x433   :  { %v9529_v26 = vmax.f32 %v1467_v17, 0.0  ;;  %v7134_v27 = vpop.f32.mrb[32].mxu1  ;;  %v9531_v0 = vpop.f32.mrb[34].mxu0  ;;  %v9647_v61 = vmax.f32 %v1645_v23, 0.0  ;;  %v9675_v63 = vmax.f32 %v1660_v21, 0.0 }
 0x434   :  { %v1482_v18 = vadd.f32 %v7134_v27, %v9451_v49  ;;  %v1476_v28 = vpop.f32.mrb[33].mxu1  ;;  %v9536_v29 = vpop.f32.mrb[35].mxu0  ;;  %v9635_v27 = vmax.f32 %v1640_v44, 0.0  ;;  %11959 = vst [vmem:[#allocation25_spill] sm:$0xff] %v9687_v19 }
 0x435   :  { %v1477_v34 = vadd.f32 %v9451_v49, %v1476_v28  ;;  %7353 = vmatprep.mubr.f32.mxu1 %v9529_v26  ;;  %7481 = vmatprep.mubr.f32.mxu0 %v9529_v26  ;;  %11955 = vst [vmem:[#allocation21_spill] sm:$0xff] %v9647_v61  ;;  %11958 = vst [vmem:[#allocation24_spill] sm:$0xff] %v9675_v63  ;;  %v1670_v8 = vadd.f32 %v9451_v49, %v9536_v29 }
 0x436   :  { %7354 = vmatmul.mubr.f32.gmra.mrb[62].mxu1 %v9533_v1  ;;  %7482 = vmatmul.mubr.f32.gmra.mrb[64].mxu0 %v9533_v1  ;;  %v9547_v7 = vmax.f32 %v1482_v18, 0.0  ;;  %v1650_v18 = vadd.f32 %v9451_v49, %v9508_v12 }
 0x437   :  { %v9543_v30 = vmax.f32 %v1477_v34, 0.0  ;;  %v7137_v22 = vpop.f32.mrb[34].mxu1  ;;  %v9545_v35 = vpop.f32.mrb[36].mxu0  ;;  %v9695_v21 = vmax.f32 %v1670_v8, 0.0 }
 0x438   :  { %v1492_v31 = vadd.f32 %v7137_v22, %v9451_v49  ;;  %v1486_v40 = vpop.f32.mrb[35].mxu1  ;;  %v9550_v32 = vpop.f32.mrb[37].mxu0  ;;  %v1655_v22 = vadd.f32 %v9503_v9, %v9451_v49  ;;  %v1685_v8 = vadd.f32 %v9545_v35, %v9451_v49 }
 0x439   :  { %v1487_v14 = vadd.f32 %v9451_v49, %v1486_v40  ;;  %7356 = vmatprep.mubr.f32.mxu1 %v9543_v30  ;;  %7484 = vmatprep.mubr.f32.mxu0 %v9543_v30  ;;  %v9655_v40 = vmax.f32 %v1650_v18, 0.0  ;;  %v1675_v18 = vadd.f32 %v9531_v0, %v9451_v49  ;;  %11960 = vst [vmem:[#allocation26_spill] sm:$0xff] %v9695_v21 }
 0x43a   :  { %7357 = vmatmul.mubr.f32.gmra.mrb[64].mxu1 %v9547_v7  ;;  %7485 = vmatmul.mubr.f32.gmra.mrb[66].mxu0 %v9547_v7  ;;  %v9567_v55 = vmax.f32 %v1492_v31, 0.0  ;;  %v9667_v9 = vmax.f32 %v1655_v22, 0.0 }
 0x43b   :  { %v9559_v24 = vmax.f32 %v1487_v14, 0.0  ;;  %v9561_v33 = vpop.f32.mrb[36].mxu1  ;;  %v9563_v36 = vpop.f32.mrb[38].mxu0  ;;  %11956 = vst [vmem:[#allocation22_spill] sm:$0xff] %v9655_v40  ;;  %v9707_v0 = vmax.f32 %v1675_v18, 0.0  ;;  %v9721_v18 = vmax.f32 %v1685_v8, 0.0 }
 0x43c   :  { %v9569_v37 = vpop.f32.mrb[37].mxu1  ;;  %v9571_v39 = vpop.f32.mrb[39].mxu0  ;;  %11957 = vst [vmem:[#allocation23_spill] sm:$0xff] %v9667_v9  ;;  %v1808_v35 = vadd.f32 %v9561_v33, %v9451_v49 }
 0x43d   :  { %7359 = vmatprep.mubr.f32.mxu1 %v9559_v24  ;;  %7487 = vmatprep.mubr.f32.mxu0 %v9559_v24 }
 0x43e   :  { %7360 = vmatmul.mubr.f32.gmra.mrb[66].mxu1 %v9567_v55  ;;  %7488 = vmatmul.mubr.f32.gmra.mrb[68].mxu0 %v9567_v55 }
 0x43f   :  { %v9581_v52 = vpop.f32.mrb[38].mxu1  ;;  %v9583_v46 = vpop.f32.mrb[40].mxu0  ;;  %7362 = vmatprep.mubr.f32.mxu1 %v9573_v41  ;;  %7490 = vmatprep.mubr.f32.mxu0 %v9573_v41 }
 0x440   :  { %v9591_v53 = vpop.f32.mrb[39].mxu1  ;;  %v9593_v56 = vpop.f32.mrb[41].mxu0  ;;  %v1818_v8 = vadd.f32 %v9581_v52, %v9451_v49 }
 0x442   :  { %7363 = vmatmul.mubr.f32.gmra.mrb[68].mxu1 %v9587_v51  ;;  %7491 = vmatmul.mubr.f32.gmra.mrb[70].mxu0 %v9587_v51 }
 0x443   :  { %v9601_v2 = vpop.f32.mrb[40].mxu1  ;;  %v9603_v5 = vpop.f32.mrb[42].mxu0  ;;  %7365 = vmatprep.mubr.f32.mxu1 %v9595_v58  ;;  %7493 = vmatprep.mubr.f32.mxu0 %v9595_v58 }
 0x444   :  { %v9611_v11 = vpop.f32.mrb[41].mxu1  ;;  %v9613_v54 = vpop.f32.mrb[43].mxu0 }
 0x445   :  { %v1823_v33 = vadd.f32 %v9451_v49, %v9611_v11 }
 0x446   :  { %7366 = vmatmul.mubr.f32.gmra.mrb[70].mxu1 %v9607_v38  ;;  %7494 = vmatmul.mubr.f32.gmra.mrb[72].mxu0 %v9607_v38 }
 0x447   :  { %v9621_v16 = vpop.f32.mrb[42].mxu1  ;;  %v9623_v13 = vpop.f32.mrb[44].mxu0  ;;  %7368 = vmatprep.mubr.f32.mxu1 %v9615_v3  ;;  %7496 = vmatprep.mubr.f32.mxu0 %v9615_v3 }
 0x448   :  { %v9631_v17 = vpop.f32.mrb[43].mxu1  ;;  %v9633_v4 = vpop.f32.mrb[45].mxu0 }
 0x449   :  { %v1833_v52 = vadd.f32 %v9451_v49, %v9631_v17 }
 0x44a   :  { %7369 = vmatmul.mubr.f32.gmra.mrb[72].mxu1 %v9627_v47  ;;  %7497 = vmatmul.mubr.f32.gmra.mrb[74].mxu0 %v9627_v47 }
 0x44b   :  { %v9641_v28 = vpop.f32.mrb[44].mxu1  ;;  %v9643_v34 = vpop.f32.mrb[46].mxu0  ;;  %7371 = vmatprep.mubr.f32.mxu1 %v9635_v27  ;;  %7499 = vmatprep.mubr.f32.mxu0 %v9635_v27 }
 0x44c   :  { %v9651_v31 = vpop.f32.mrb[45].mxu1  ;;  %v9653_v12 = vpop.f32.mrb[47].mxu0 }
 0x44e   :  { %7372 = vmatmul.mubr.f32.gmra.mrb[74].mxu1 %v9647_v61  ;;  %7500 = vmatmul.mubr.f32.gmra.mrb[76].mxu0 %v9647_v61 }
 0x44f   :  { %v9661_v14 = vpop.f32.mrb[46].mxu1  ;;  %v9663_v50 = vpop.f32.mrb[48].mxu0  ;;  %7374 = vmatprep.mubr.f32.mxu1 %v9655_v40  ;;  %7502 = vmatprep.mubr.f32.mxu0 %v9655_v40 }
 0x450   :  { %v9671_v42 = vpop.f32.mrb[47].mxu1  ;;  %v9673_v25 = vpop.f32.mrb[49].mxu0 }
 0x452   :  { %7375 = vmatmul.mubr.f32.gmra.mrb[76].mxu1 %v9667_v9  ;;  %7503 = vmatmul.mubr.f32.gmra.mrb[78].mxu0 %v9667_v9  ;;  %v1680_v9 = vadd.f32 %v9451_v49, %v9550_v32 }
 0x453   :  { %v9681_v44 = vpop.f32.mrb[48].mxu1  ;;  %v9683_v23 = vpop.f32.mrb[50].mxu0  ;;  %7377 = vmatprep.mubr.f32.mxu1 %v9675_v63  ;;  %7505 = vmatprep.mubr.f32.mxu0 %v9675_v63 }
 0x454   :  { %v9691_v22 = vpop.f32.mrb[49].mxu1  ;;  %v9693_v29 = vpop.f32.mrb[51].mxu0  ;;  %v9713_v32 = vmax.f32 %v1680_v9, 0.0  ;;  %v1813_v9 = vadd.f32 %v9451_v49, %v9591_v53  ;;  %v9745_v53 = vmax.f32 %v1818_v8, 0.0  ;;  %v9761_v8 = vmax.f32 %v1833_v52, 0.0 }
 0x455   :  { %v1858_v52 = vadd.f32 %v9661_v14, %v9451_v49 }
 0x456   :  { %7378 = vmatmul.mubr.f32.gmra.mrb[78].mxu1 %v9687_v19  ;;  %7506 = vmatmul.mubr.f32.gmra.mrb[80].mxu0 %v9687_v19  ;;  %11961 = vst [vmem:[#allocation27_spill] sm:$0xff] %v9713_v32  ;;  %v1803_v19 = vadd.f32 %v9451_v49, %v9569_v37  ;;  %v9733_v37 = vmax.f32 %v1808_v35, 0.0  ;;  %v9749_v35 = vmax.f32 %v1823_v33, 0.0  ;;  %v1848_v33 = vadd.f32 %v9641_v28, %v9451_v49 }
 0x457   :  { %v9701_v40 = vpop.f32.mrb[50].mxu1  ;;  %v9703_v43 = vpop.f32.mrb[52].mxu0  ;;  %7380 = vmatprep.mubr.f32.mxu1 %v9695_v21  ;;  %7508 = vmatprep.mubr.f32.mxu0 %v9695_v21  ;;  %v1863_v28 = vadd.f32 %v9451_v49, %v9691_v22  ;;  %v4549_v22 = vld [vmem:[#allocation15] sm:$0xff] }
 0x458   :  { %v1872_v63 = vpop.f32.mrb[51].mxu1  ;;  %v9711_v61 = vpop.f32.mrb[53].mxu0  ;;  %v9725_v21 = vmax.f32 %v1803_v19, 0.0  ;;  %v1828_v19 = vadd.f32 %v9601_v2, %v9451_v49  ;;  %v1843_v2 = vadd.f32 %v9451_v49, %v9651_v31  ;;  %v9781_v31 = vmax.f32 %v1848_v33, 0.0 }
 0x459   :  { %v9797_v33 = vmax.f32 %v1863_v28, 0.0  ;;  %v1873_v14 = vadd.f32 %v9451_v49, %v1872_v63  ;;  %v1996_v63 = vadd.f32 %v9451_v49, %v9571_v39 }
 0x45a   :  { %7381 = vmatmul.mubr.f32.gmra.mrb[80].mxu1 %v9707_v0  ;;  %7509 = vmatmul.mubr.f32.gmra.mrb[82].mxu0 %v9707_v0  ;;  %v9757_v11 = vmax.f32 %v1828_v19, 0.0  ;;  %v9773_v19 = vmax.f32 %v1843_v2, 0.0  ;;  %v1868_v2 = vadd.f32 %v9681_v44, %v9451_v49 }
 0x45b   :  { %7383 = vmatprep.mubr.f32.mxu1 %v9713_v32  ;;  %7511 = vmatprep.mubr.f32.mxu0 %v9713_v32  ;;  %v9737_v32 = vmax.f32 %v1813_v9, 0.0  ;;  %v1838_v9 = vadd.f32 %v9621_v16, %v9451_v49  ;;  %v1853_v16 = vadd.f32 %v9451_v49, %v9671_v42  ;;  %v9793_v42 = vmax.f32 %v1858_v52, 0.0  ;;  %11963 = vst [vmem:[#allocation29_spill] sm:$0xff] %v9797_v33 }
 0x45c   :  { %v1878_v52 = vadd.f32 %v9701_v40, %v9451_v49  ;;  %v9812_v28 = vmax.f32 %v1873_v14, 0.0  ;;  %v9824_v39 = vmax.f32 %v1996_v63, 0.0  ;;  %v2006_v40 = vadd.f32 %v9451_v49, %v9593_v56 }
 0x45d   :  { %v9769_v17 = vmax.f32 %v1838_v9, 0.0  ;;  %v9785_v9 = vmax.f32 %v1853_v16, 0.0  ;;  %v4550_v16 = vld [vmem:[#allocation15 + $0x8] sm:$0xff]  ;;  %v2011_v14 = vadd.f32 %v9583_v46, %v9451_v49  ;;  %v2026_v46 = vadd.f32 %v9451_v49, %v9633_v4 }
 0x45e   :  { %7384 = vmatmul.mubr.f32.gmra.mrb[82].mxu1 %v9721_v18  ;;  %7512 = vmatmul.mubr.f32.gmra.mrb[84].mxu0 %v9721_v18  ;;  %v9808_v44 = vpack.c.bf16 %v4550_v16, %v4549_v22  ;;  %v9836_v22 = vmax.f32 %v2006_v40, 0.0  ;;  %v2016_v16 = vadd.f32 %v9451_v49, %v9613_v54 }
 0x45f   :  { %7386 = vmatprep.mubr.f32.mxu1 %v9725_v21  ;;  %7514 = vmatprep.mubr.f32.mxu0 %v9725_v21  ;;  %11962 = vst [vmem:[#allocation28_spill] sm:$0xff] %v9785_v9  ;;  %v9844_v56 = vmax.f32 %v2011_v14, 0.0  ;;  %v9860_v40 = vmax.f32 %v2026_v46, 0.0  ;;  %v2041_v14 = vadd.f32 %v9643_v34, %v9451_v49  ;;  %v2056_v34 = vadd.f32 %v9451_v49, %v9693_v29 }
 0x460   :  { %8914 = vmatprep.subr.bf16.mxu1 %v9808_v44  ;;  %8883 = vmatprep.subr.bf16.mxu0 %v9808_v44  ;;  %v9848_v63 = vmax.f32 %v2016_v16, 0.0 }
 0x462   :  { %7387 = vmatmul.mubr.f32.gmra.mrb[84].mxu1 %v9733_v37  ;;  %7515 = vmatmul.mubr.f32.gmra.mrb[86].mxu0 %v9733_v37 }
 0x463   :  { %7389 = vmatprep.mubr.f32.mxu1 %v9737_v32  ;;  %7517 = vmatprep.mubr.f32.mxu0 %v9737_v32 }
 0x466   :  { %7390 = vmatmul.mubr.f32.gmra.mrb[86].mxu1 %v9745_v53  ;;  %7518 = vmatmul.mubr.f32.gmra.mrb[88].mxu0 %v9745_v53 }
 0x467   :  { %7392 = vmatprep.mubr.f32.mxu1 %v9749_v35  ;;  %7520 = vmatprep.mubr.f32.mxu0 %v9749_v35 }
 0x46a   :  { %7393 = vmatmul.mubr.f32.gmra.mrb[88].mxu1 %v9757_v11  ;;  %7521 = vmatmul.mubr.f32.gmra.mrb[90].mxu0 %v9757_v11 }
 0x46b   :  { %7395 = vmatprep.mubr.f32.mxu1 %v9761_v8  ;;  %7523 = vmatprep.mubr.f32.mxu0 %v9761_v8 }
 0x46e   :  { %7396 = vmatmul.mubr.f32.gmra.mrb[90].mxu1 %v9769_v17  ;;  %7524 = vmatmul.mubr.f32.gmra.mrb[92].mxu0 %v9769_v17 }
 0x46f   :  { %7398 = vmatprep.mubr.f32.mxu1 %v9773_v19  ;;  %7526 = vmatprep.mubr.f32.mxu0 %v9773_v19 }
 0x472   :  { %7399 = vmatmul.mubr.f32.gmra.mrb[92].mxu1 %v9781_v31  ;;  %7527 = vmatmul.mubr.f32.gmra.mrb[94].mxu0 %v9781_v31 }
 0x473   :  { %7401 = vmatprep.mubr.f32.mxu1 %v9785_v9  ;;  %7529 = vmatprep.mubr.f32.mxu0 %v9785_v9  ;;  %v9804_v9 = vmax.f32 %v1868_v2, 0.0  ;;  %v2001_v2 = vadd.f32 %v9563_v36, %v9451_v49 }
 0x475   :  { %v9832_v36 = vmax.f32 %v2001_v2, 0.0  ;;  %v2031_v2 = vadd.f32 %v9623_v13, %v9451_v49  ;;  %v2046_v13 = vadd.f32 %v9451_v49, %v9673_v25 }
 0x476   :  { %7402 = vmatmul.mubr.f32.gmra.mrb[94].mxu1 %v9793_v42  ;;  %7530 = vmatmul.mubr.f32.gmra.mrb[96].mxu0 %v9793_v42 }
 0x477   :  { %7404 = vmatprep.mubr.f32.mxu1 %v9797_v33  ;;  %7532 = vmatprep.mubr.f32.mxu0 %v9797_v33  ;;  %v9820_v33 = vmax.f32 %v1878_v52, 0.0  ;;  %v2021_v52 = vadd.f32 %v9603_v5, %v9451_v49  ;;  %v2036_v5 = vadd.f32 %v9451_v49, %v9653_v12  ;;  %v9868_v4 = vmax.f32 %v2031_v2, 0.0 }
 0x478   :  { %v9880_v12 = vmax.f32 %v2041_v14, 0.0  ;;  %v9884_v46 = vmax.f32 %v2046_v13, 0.0  ;;  %v2061_v2 = vadd.f32 %v9683_v23, %v9451_v49  ;;  %v2071_v14 = vadd.f32 %v9703_v43, %v9451_v49  ;;  %v4551_v23 = vld [vmem:[#allocation15 + $0x10] sm:$0xff]  ;;  %v4553_v43 = vld [vmem:[#allocation15 + $0x20] sm:$0xff] }
 0x479   :  { %v9856_v54 = vmax.f32 %v2021_v52, 0.0  ;;  %v9872_v16 = vmax.f32 %v2036_v5, 0.0  ;;  %v2051_v52 = vadd.f32 %v9663_v50, %v9451_v49  ;;  %v9896_v5 = vmax.f32 %v2056_v34, 0.0  ;;  %v4554_v34 = vld [vmem:[#allocation15 + $0x28] sm:$0xff] }
 0x47a   :  { %7405 = vmatmul.mubr.f32.gmra.mrb[96].mxu1 %v9804_v9  ;;  %7533 = vmatmul.mubr.f32.gmra.mrb[98].mxu0 %v9804_v9  ;;  %v2066_v50 = vadd.f32 %v9451_v49, %v9711_v61  ;;  %v9904_v29 = vmax.f32 %v2061_v2, 0.0  ;;  %v9914_v61 = vmax.f32 %v2071_v14, 0.0  ;;  %v8890_v2 = vpack.c.bf16 %v4554_v34, %v4553_v43  ;;  %v4560_v14 = vld [vmem:[#allocation15 + $0x58] sm:$0xff] }
 0x47b   :  { %7407 = vmatprep.mubr.f32.mxu1 %v9812_v28  ;;  %7535 = vmatprep.mubr.f32.mxu0 %v9812_v28  ;;  %v9892_v25 = vmax.f32 %v2051_v52, 0.0  ;;  %v4552_v52 = vld [vmem:[#allocation15 + $0x18] sm:$0xff] }
 0x47c   :  { %v9908_v13 = vmax.f32 %v2066_v50, 0.0  ;;  %v8886_v49 = vpack.c.bf16 %v4552_v52, %v4551_v23  ;;  %v4556_v50 = vld [vmem:[#allocation15 + $0x38] sm:$0xff]  ;;  %v4562_v23 = vld [vmem:[#allocation15 + $0x68] sm:$0xff] }
 0x47d   :  { %v4564_v52 = vld [vmem:[#allocation15 + $0x78] sm:$0xff] }
 0x47e   :  { %7408 = vmatmul.mubr.f32.gmra.mrb[98].mxu1 %v9820_v33  ;;  %7536 = vmatmul.mubr.f32.gmra.mrb[100].mxu0 %v9820_v33 }
 0x47f   :  { %7410 = vmatprep.mubr.f32.mxu1 %v9824_v39  ;;  %7538 = vmatprep.mubr.f32.mxu0 %v9824_v39 }
 0x482   :  { %7411 = vmatmul.mubr.f32.gmra.mrb[100].mxu1 %v9832_v36  ;;  %7539 = vmatmul.mubr.f32.gmra.mrb[102].mxu0 %v9832_v36 }
 0x483   :  { %7413 = vmatprep.mubr.f32.mxu1 %v9836_v22  ;;  %7541 = vmatprep.mubr.f32.mxu0 %v9836_v22 }
 0x486   :  { %7414 = vmatmul.mubr.f32.gmra.mrb[102].mxu1 %v9844_v56  ;;  %7542 = vmatmul.mubr.f32.gmra.mrb[104].mxu0 %v9844_v56 }
 0x487   :  { %7416 = vmatprep.mubr.f32.mxu1 %v9848_v63  ;;  %7544 = vmatprep.mubr.f32.mxu0 %v9848_v63 }
 0x48a   :  { %7417 = vmatmul.mubr.f32.gmra.mrb[104].mxu1 %v9856_v54  ;;  %7545 = vmatmul.mubr.f32.gmra.mrb[106].mxu0 %v9856_v54 }
 0x48b   :  { %7419 = vmatprep.mubr.f32.mxu1 %v9860_v40  ;;  %7547 = vmatprep.mubr.f32.mxu0 %v9860_v40 }
 0x48e   :  { %7420 = vmatmul.mubr.f32.gmra.mrb[106].mxu1 %v9868_v4  ;;  %7548 = vmatmul.mubr.f32.gmra.mrb[108].mxu0 %v9868_v4 }
 0x48f   :  { %7422 = vmatprep.mubr.f32.mxu1 %v9872_v16  ;;  %7550 = vmatprep.mubr.f32.mxu0 %v9872_v16 }
 0x492   :  { %7423 = vmatmul.mubr.f32.gmra.mrb[108].mxu1 %v9880_v12  ;;  %7551 = vmatmul.mubr.f32.gmra.mrb[110].mxu0 %v9880_v12 }
 0x493   :  { %7425 = vmatprep.mubr.f32.mxu1 %v9884_v46  ;;  %7553 = vmatprep.mubr.f32.mxu0 %v9884_v46 }
 0x496   :  { %7426 = vmatmul.mubr.f32.gmra.mrb[110].mxu1 %v9892_v25  ;;  %7554 = vmatmul.mubr.f32.gmra.mrb[112].mxu0 %v9892_v25 }
 0x497   :  { %7428 = vmatprep.mubr.f32.mxu1 %v9896_v5  ;;  %7556 = vmatprep.mubr.f32.mxu0 %v9896_v5 }
 0x49a   :  { %7429 = vmatmul.mubr.f32.gmra.mrb[112].mxu1 %v9904_v29  ;;  %7557 = vmatmul.mubr.f32.gmra.mrb[114].mxu0 %v9904_v29 }
 0x49b   :  { %7431 = vmatprep.mubr.f32.mxu1 %v9908_v13  ;;  %7559 = vmatprep.mubr.f32.mxu0 %v9908_v13 }
 0x49e   :  { %7432 = vmatmul.mubr.f32.gmra.mrb[114].mxu1 %v9914_v61  ;;  %7560 = vmatmul.mubr.f32.gmra.mrb[116].mxu0 %v9914_v61 }
 0x49f   :  { %7594 = vmatprep.mubr.f32.mxu1 %v9459_v59  ;;  %7722 = vmatprep.mubr.f32.mxu0 %v9459_v59  ;;  %v4555_v59 = vld [vmem:[#allocation15 + $0x30] sm:$0xff] }
 0x4a2   :  { %7595 = vmatmul.mubr.f32.vlgmr.msra.gmra.mrb[116].mxu1 %v9461_v60  ;;  %7723 = vmatmul.mubr.f32.vlgmr.msra.gmra.mrb[118].mxu0 %v9461_v60  ;;  %v8894_v60 = vpack.c.bf16 %v4556_v50, %v4555_v59 }
 0x4a3   :  { %7597 = vmatprep.mubr.f32.mxu1 %v9473_v45  ;;  %7725 = vmatprep.mubr.f32.mxu0 %v9473_v45  ;;  %v4557_v45 = vld [vmem:[#allocation15 + $0x40] sm:$0xff] }
 0x4a4   :  { %8922 = vmatpush3.bf16.msra.mxu1 %v9808_v44  ;;  %8885 = vmatpush3.bf16.msra.mxu0 %v9808_v44  ;;  %v4558_v44 = vld [vmem:[#allocation15 + $0x48] sm:$0xff] }
 0x4a5   :  { %8887 = vmatprep.subr.bf16.mxu0 %v8886_v49  ;;  %8915 = vmatprep.subr.bf16.mxu1 %v8886_v49 }
 0x4a6   :  { %7598 = vmatmul.mubr.f32.gmra.mrb[118].mxu1 %v9477_v48  ;;  %7726 = vmatmul.mubr.f32.gmra.mrb[120].mxu0 %v9477_v48  ;;  %v8898_v48 = vpack.c.bf16 %v4558_v44, %v4557_v45 }
 0x4a7   :  { %7600 = vmatprep.mubr.f32.mxu1 %v9487_v57  ;;  %7728 = vmatprep.mubr.f32.mxu0 %v9487_v57  ;;  %v4559_v57 = vld [vmem:[#allocation15 + $0x50] sm:$0xff] }
 0x4a8   :  { %8889 = vmatpush3.bf16.msra.mxu0 %v8886_v49  ;;  %8923 = vmatpush3.bf16.msra.mxu1 %v8886_v49 }
 0x4a9   :  { %8891 = vmatprep.subr.bf16.mxu0 %v8890_v2  ;;  %8916 = vmatprep.subr.bf16.mxu1 %v8890_v2 }
 0x4aa   :  { %7601 = vmatmul.mubr.f32.gmra.mrb[120].mxu1 %v9491_v62  ;;  %7729 = vmatmul.mubr.f32.gmra.mrb[122].mxu0 %v9491_v62  ;;  %v8902_v62 = vpack.c.bf16 %v4560_v14, %v4559_v57 }
 0x4ab   :  { %7603 = vmatprep.mubr.f32.mxu1 %v9501_v6  ;;  %7731 = vmatprep.mubr.f32.mxu0 %v9501_v6  ;;  %v4561_v6 = vld [vmem:[#allocation15 + $0x60] sm:$0xff] }
 0x4ac   :  { %8893 = vmatpush3.bf16.msra.mxu0 %v8890_v2  ;;  %8924 = vmatpush3.bf16.msra.mxu1 %v8890_v2 }
 0x4ad   :  { %8895 = vmatprep.subr.bf16.mxu0 %v8894_v60  ;;  %8917 = vmatprep.subr.bf16.mxu1 %v8894_v60 }
 0x4ae   :  { %7604 = vmatmul.mubr.f32.gmra.mrb[122].mxu1 %v9505_v10  ;;  %7732 = vmatmul.mubr.f32.gmra.mrb[124].mxu0 %v9505_v10  ;;  %v8906_v10 = vpack.c.bf16 %v4562_v23, %v4561_v6 }
 0x4af   :  { %7606 = vmatprep.mubr.f32.mxu1 %v9515_v15  ;;  %7734 = vmatprep.mubr.f32.mxu0 %v9515_v15  ;;  %v4563_v15 = vld [vmem:[#allocation15 + $0x70] sm:$0xff] }
 0x4b0   :  { %8897 = vmatpush3.bf16.msra.mxu0 %v8894_v60  ;;  %8925 = vmatpush3.bf16.msra.mxu1 %v8894_v60  ;;  %v8910_v49 = vpack.c.bf16 %v4564_v52, %v4563_v15 }
 0x4b1   :  { %8899 = vmatprep.subr.bf16.mxu0 %v8898_v48  ;;  %8918 = vmatprep.subr.bf16.mxu1 %v8898_v48 }
 0x4b2   :  { %7607 = vmatmul.mubr.f32.gmra.mrb[124].mxu1 %v9519_v20  ;;  %7735 = vmatmul.mubr.f32.gmra.mrb[126].mxu0 %v9519_v20 }
 0x4b3   :  { %7609 = vmatprep.mubr.f32.mxu1 %v9529_v26  ;;  %7737 = vmatprep.mubr.f32.mxu0 %v9529_v26 }
 0x4b4   :  { %8901 = vmatpush3.bf16.msra.mxu0 %v8898_v48  ;;  %8926 = vmatpush3.bf16.msra.mxu1 %v8898_v48 }
 0x4b5   :  { %8903 = vmatprep.subr.bf16.mxu0 %v8902_v62  ;;  %8919 = vmatprep.subr.bf16.mxu1 %v8902_v62 }
 0x4b6   :  { %7610 = vmatmul.mubr.f32.gmra.mrb[126].mxu1 %v9533_v1  ;;  %7738 = vmatmul.mubr.f32.gmra.mrb[128].mxu0 %v9533_v1 }
 0x4b7   :  { %7612 = vmatprep.mubr.f32.mxu1 %v9543_v30  ;;  %7740 = vmatprep.mubr.f32.mxu0 %v9543_v30  ;;  %v11964_v30 = vld [vmem:[#allocation21_spill] sm:$0xff] }
 0x4b8   :  { %8905 = vmatpush3.bf16.msra.mxu0 %v8902_v62  ;;  %8927 = vmatpush3.bf16.msra.mxu1 %v8902_v62 }
 0x4b9   :  { %v9946_v20 = vpop.f32.mrb[52].mxu1  ;;  %v9948_v26 = vpop.f32.mrb[54].mxu0  ;;  %8907 = vmatprep.subr.bf16.mxu0 %v8906_v10  ;;  %8920 = vmatprep.subr.bf16.mxu1 %v8906_v10 }
 0x4ba   :  { %7613 = vmatmul.mubr.f32.gmra.mrb[128].mxu1 %v9547_v7  ;;  %7741 = vmatmul.mubr.f32.gmra.mrb[130].mxu0 %v9547_v7  ;;  %v9952_v1 = vpop.f32.mrb[53].mxu1  ;;  %v9954_v43 = vpop.f32.mrb[55].mxu0  ;;  %v11965_v7 = vld [vmem:[#allocation22_spill] sm:$0xff] }
 0x4bb   :  { %7615 = vmatprep.mubr.f32.mxu1 %v9559_v24  ;;  %7743 = vmatprep.mubr.f32.mxu0 %v9559_v24  ;;  %v11966_v24 = vld [vmem:[#allocation23_spill] sm:$0xff] }
 0x4bc   :  { %8909 = vmatpush3.bf16.msra.mxu0 %v8906_v10  ;;  %8928 = vmatpush3.bf16.msra.mxu1 %v8906_v10 }
 0x4bd   :  { %8911 = vmatprep.subr.bf16.mxu0 %v8910_v49  ;;  %8921 = vmatprep.subr.bf16.mxu1 %v8910_v49 }
 0x4be   :  { %7616 = vmatmul.mubr.f32.gmra.mrb[130].mxu1 %v9567_v55  ;;  %7744 = vmatmul.mubr.f32.gmra.mrb[132].mxu0 %v9567_v55  ;;  %v11967_v55 = vld [vmem:[#allocation24_spill] sm:$0xff] }
 0x4bf   :  { %7618 = vmatprep.mubr.f32.mxu1 %v9573_v41  ;;  %7746 = vmatprep.mubr.f32.mxu0 %v9573_v41  ;;  %v11968_v41 = vld [vmem:[#allocation25_spill] sm:$0xff] }
 0x4c0   :  { %8913 = vmatpush3.bf16.msra.mxu0 %v8910_v49  ;;  %8929 = vmatpush3.bf16.msra.mxu1 %v8910_v49 }
 0x4c2   :  { %7619 = vmatmul.mubr.f32.gmra.mrb[132].mxu1 %v9587_v51  ;;  %7747 = vmatmul.mubr.f32.gmra.mrb[134].mxu0 %v9587_v51  ;;  %v11969_v51 = vld [vmem:[#allocation26_spill] sm:$0xff] }
 0x4c3   :  { %7621 = vmatprep.mubr.f32.mxu1 %v9595_v58  ;;  %7749 = vmatprep.mubr.f32.mxu0 %v9595_v58  ;;  %v11970_v58 = vld [vmem:[#allocation27_spill] sm:$0xff] }
 0x4c6   :  { %7622 = vmatmul.mubr.f32.gmra.mrb[134].mxu1 %v9607_v38  ;;  %7750 = vmatmul.mubr.f32.gmra.mrb[136].mxu0 %v9607_v38  ;;  %v11971_v38 = vld [vmem:[#allocation28_spill] sm:$0xff] }
 0x4c7   :  { %7624 = vmatprep.mubr.f32.mxu1 %v9615_v3  ;;  %7752 = vmatprep.mubr.f32.mxu0 %v9615_v3  ;;  %v11972_v3 = vld [vmem:[#allocation29_spill] sm:$0xff] }
 0x4ca   :  { %7625 = vmatmul.mubr.f32.gmra.mrb[136].mxu1 %v9627_v47  ;;  %7753 = vmatmul.mubr.f32.gmra.mrb[138].mxu0 %v9627_v47 }
 0x4cb   :  { %7627 = vmatprep.mubr.f32.mxu1 %v9635_v27  ;;  %7755 = vmatprep.mubr.f32.mxu0 %v9635_v27 }
 0x4ce   :  { %7628 = vmatmul.mubr.f32.gmra.mrb[138].mxu1 %v11964_v30  ;;  %7756 = vmatmul.mubr.f32.gmra.mrb[140].mxu0 %v11964_v30 }
 0x4cf   :  { %7630 = vmatprep.mubr.f32.mxu1 %v11965_v7  ;;  %7758 = vmatprep.mubr.f32.mxu0 %v11965_v7 }
 0x4d2   :  { %7631 = vmatmul.mubr.f32.gmra.mrb[140].mxu1 %v11966_v24  ;;  %7759 = vmatmul.mubr.f32.gmra.mrb[142].mxu0 %v11966_v24 }
 0x4d3   :  { %7633 = vmatprep.mubr.f32.mxu1 %v11967_v55  ;;  %7761 = vmatprep.mubr.f32.mxu0 %v11967_v55 }
 0x4d6   :  { %7634 = vmatmul.mubr.f32.gmra.mrb[142].mxu1 %v11968_v41  ;;  %7762 = vmatmul.mubr.f32.gmra.mrb[144].mxu0 %v11968_v41 }
 0x4d7   :  { %7636 = vmatprep.mubr.f32.mxu1 %v11969_v51  ;;  %7764 = vmatprep.mubr.f32.mxu0 %v11969_v51 }
 0x4da   :  { %7637 = vmatmul.mubr.f32.gmra.mrb[144].mxu1 %v9707_v0  ;;  %7765 = vmatmul.mubr.f32.gmra.mrb[146].mxu0 %v9707_v0 }
 0x4db   :  { %7639 = vmatprep.mubr.f32.mxu1 %v11970_v58  ;;  %7767 = vmatprep.mubr.f32.mxu0 %v11970_v58 }
 0x4de   :  { %7640 = vmatmul.mubr.f32.gmra.mrb[146].mxu1 %v9721_v18  ;;  %7768 = vmatmul.mubr.f32.gmra.mrb[148].mxu0 %v9721_v18 }
 0x4df   :  { %7642 = vmatprep.mubr.f32.mxu1 %v9725_v21  ;;  %7770 = vmatprep.mubr.f32.mxu0 %v9725_v21 }
 0x4e2   :  { %7643 = vmatmul.mubr.f32.gmra.mrb[148].mxu1 %v9733_v37  ;;  %7771 = vmatmul.mubr.f32.gmra.mrb[150].mxu0 %v9733_v37 }
 0x4e3   :  { %7645 = vmatprep.mubr.f32.mxu1 %v9737_v32  ;;  %7773 = vmatprep.mubr.f32.mxu0 %v9737_v32 }
 0x4e6   :  { %7646 = vmatmul.mubr.f32.gmra.mrb[150].mxu1 %v9745_v53  ;;  %7774 = vmatmul.mubr.f32.gmra.mrb[152].mxu0 %v9745_v53 }
 0x4e7   :  { %7648 = vmatprep.mubr.f32.mxu1 %v9749_v35  ;;  %7776 = vmatprep.mubr.f32.mxu0 %v9749_v35 }
 0x4ea   :  { %7649 = vmatmul.mubr.f32.gmra.mrb[152].mxu1 %v9757_v11  ;;  %7777 = vmatmul.mubr.f32.gmra.mrb[154].mxu0 %v9757_v11 }
 0x4eb   :  { %7651 = vmatprep.mubr.f32.mxu1 %v9761_v8  ;;  %7779 = vmatprep.mubr.f32.mxu0 %v9761_v8 }
 0x4ee   :  { %7652 = vmatmul.mubr.f32.gmra.mrb[154].mxu1 %v9769_v17  ;;  %7780 = vmatmul.mubr.f32.gmra.mrb[156].mxu0 %v9769_v17 }
 0x4ef   :  { %7654 = vmatprep.mubr.f32.mxu1 %v9773_v19  ;;  %7782 = vmatprep.mubr.f32.mxu0 %v9773_v19 }
 0x4f2   :  { %7655 = vmatmul.mubr.f32.gmra.mrb[156].mxu1 %v9781_v31  ;;  %7783 = vmatmul.mubr.f32.gmra.mrb[158].mxu0 %v9781_v31 }
 0x4f3   :  { %7657 = vmatprep.mubr.f32.mxu1 %v11971_v38  ;;  %7785 = vmatprep.mubr.f32.mxu0 %v11971_v38 }
 0x4f6   :  { %7658 = vmatmul.mubr.f32.gmra.mrb[158].mxu1 %v9793_v42  ;;  %7786 = vmatmul.mubr.f32.gmra.mrb[160].mxu0 %v9793_v42 }
 0x4f7   :  { %7660 = vmatprep.mubr.f32.mxu1 %v11972_v3  ;;  %7788 = vmatprep.mubr.f32.mxu0 %v11972_v3 }
 0x4f9   :  { %v10018_v47 = vpop.f32.mrb[54].mxu1  ;;  %v10020_v27 = vpop.f32.mrb[56].mxu0 }
 0x4fa   :  { %v10022_v21 = vpop.f32.mrb[55].mxu1  ;;  %v10024_v0 = vpop.f32.mrb[57].mxu0  ;;  %7661 = vmatmul.mubr.f32.gmra.mrb[160].mxu1 %v9804_v9  ;;  %7789 = vmatmul.mubr.f32.gmra.mrb[162].mxu0 %v9804_v9 }
 0x4fb   :  { %7663 = vmatprep.mubr.f32.mxu1 %v9812_v28  ;;  %7791 = vmatprep.mubr.f32.mxu0 %v9812_v28 }
 0x4fd   :  { %v10030_v32 = vpop.f32.mrb[56].mxu1  ;;  %v10032_v18 = vpop.f32.mrb[58].mxu0 }
 0x4fe   :  { %v10034_v37 = vpop.f32.mrb[57].mxu1  ;;  %v10036_v53 = vpop.f32.mrb[59].mxu0  ;;  %7664 = vmatmul.mubr.f32.gmra.mrb[162].mxu1 %v9820_v33  ;;  %7792 = vmatmul.mubr.f32.gmra.mrb[164].mxu0 %v9820_v33 }
 0x4ff   :  { %7666 = vmatprep.mubr.f32.mxu1 %v9824_v39  ;;  %7794 = vmatprep.mubr.f32.mxu0 %v9824_v39 }
 0x501   :  { %v10042_v35 = vpop.f32.mrb[58].mxu1  ;;  %v10044_v11 = vpop.f32.mrb[60].mxu0 }
 0x502   :  { %v10046_v8 = vpop.f32.mrb[59].mxu1  ;;  %v10048_v17 = vpop.f32.mrb[61].mxu0  ;;  %7667 = vmatmul.mubr.f32.gmra.mrb[164].mxu1 %v9832_v36  ;;  %7795 = vmatmul.mubr.f32.gmra.mrb[166].mxu0 %v9832_v36 }
 0x503   :  { %7669 = vmatprep.mubr.f32.mxu1 %v9836_v22  ;;  %7797 = vmatprep.mubr.f32.mxu0 %v9836_v22 }
 0x505   :  { %v10054_v19 = vpop.f32.mrb[60].mxu1  ;;  %v10056_v31 = vpop.f32.mrb[62].mxu0 }
 0x506   :  { %v10058_v9 = vpop.f32.mrb[61].mxu1  ;;  %v10060_v42 = vpop.f32.mrb[63].mxu0  ;;  %7670 = vmatmul.mubr.f32.gmra.mrb[166].mxu1 %v9844_v56  ;;  %7798 = vmatmul.mubr.f32.gmra.mrb[168].mxu0 %v9844_v56 }
 0x507   :  { %7672 = vmatprep.mubr.f32.mxu1 %v9848_v63  ;;  %7800 = vmatprep.mubr.f32.mxu0 %v9848_v63 }
 0x509   :  { %v10066_v33 = vpop.f32.mrb[62].mxu1  ;;  %v10068_v28 = vpop.f32.mrb[64].mxu0 }
 0x50a   :  { %v10070_v39 = vpop.f32.mrb[63].mxu1  ;;  %v10072_v36 = vpop.f32.mrb[65].mxu0  ;;  %7673 = vmatmul.mubr.f32.gmra.mrb[168].mxu1 %v9856_v54  ;;  %7801 = vmatmul.mubr.f32.gmra.mrb[170].mxu0 %v9856_v54 }
 0x50b   :  { %7675 = vmatprep.mubr.f32.mxu1 %v9860_v40  ;;  %7803 = vmatprep.mubr.f32.mxu0 %v9860_v40 }
 0x50d   :  { %v10078_v22 = vpop.f32.mrb[64].mxu1  ;;  %v10080_v56 = vpop.f32.mrb[66].mxu0 }
 0x50e   :  { %v10082_v63 = vpop.f32.mrb[65].mxu1  ;;  %v10084_v34 = vpop.f32.mrb[67].mxu0  ;;  %7676 = vmatmul.mubr.f32.gmra.mrb[170].mxu1 %v9868_v4  ;;  %7804 = vmatmul.mubr.f32.gmra.mrb[172].mxu0 %v9868_v4 }
 0x50f   :  { %7678 = vmatprep.mubr.f32.mxu1 %v9872_v16  ;;  %7806 = vmatprep.mubr.f32.mxu0 %v9872_v16  ;;  %v10109_v16 = vld [vmem:[%s11933_s10] ss:$0 sm:$0xff] }
 0x510   :  { %v2280_v52 = vadd.f32 %v10109_v16, %v10034_v37  ;;  %v2285_v7 = vadd.f32 %v10030_v32, %v10109_v16  ;;  %v2290_v55 = vadd.f32 %v10109_v16, %v10046_v8  ;;  %v2300_v32 = vadd.f32 %v10109_v16, %v10058_v9 }
 0x511   :  { %v10090_v54 = vpop.f32.mrb[66].mxu1  ;;  %v10092_v2 = vpop.f32.mrb[68].mxu0 }
 0x512   :  { %v10094_v40 = vpop.f32.mrb[67].mxu1  ;;  %v10096_v59 = vpop.f32.mrb[69].mxu0  ;;  %7679 = vmatmul.mubr.f32.gmra.mrb[172].mxu1 %v9880_v12  ;;  %7807 = vmatmul.mubr.f32.gmra.mrb[174].mxu0 %v9880_v12  ;;  %v2260_v12 = vadd.f32 %v10109_v16, %v9952_v1  ;;  %v2582_v24 = vmax.f32 %v2280_v52, 0.0  ;;  %v2583_v3 = vmax.f32 %v2285_v7, 0.0  ;;  %v2315_v7 = vadd.f32 %v10066_v33, %v10109_v16 }
 0x513   :  { %7681 = vmatprep.mubr.f32.mxu1 %v9884_v46  ;;  %7809 = vmatprep.mubr.f32.mxu0 %v9884_v46  ;;  %v2330_v33 = vadd.f32 %v10109_v16, %v10094_v40 }
 0x514   :  { %v2578_v6 = vmax.f32 %v2260_v12, 0.0 }
 0x515   :  { %v10102_v4 = vpop.f32.mrb[68].mxu1  ;;  %v10104_v50 = vpop.f32.mrb[70].mxu0 }
 0x516   :  { %v10111_v60 = vpop.f32.mrb[69].mxu1  ;;  %v10113_v45 = vpop.f32.mrb[71].mxu0  ;;  %7682 = vmatmul.mubr.f32.gmra.mrb[174].mxu1 %v9892_v25  ;;  %7810 = vmatmul.mubr.f32.gmra.mrb[176].mxu0 %v9892_v25  ;;  %v2265_v25 = vadd.f32 %v9946_v20, %v10109_v16 }
 0x517   :  { %7684 = vmatprep.mubr.f32.mxu1 %v9896_v5  ;;  %7812 = vmatprep.mubr.f32.mxu0 %v9896_v5  ;;  %v2270_v5 = vadd.f32 %v10109_v16, %v10022_v21  ;;  %v2584_v21 = vmax.f32 %v2290_v55, 0.0 }
 0x519   :  { %v10121_v46 = vpop.f32.mrb[70].mxu1  ;;  %v10123_v44 = vpop.f32.mrb[72].mxu0  ;;  %v2580_v15 = vmax.f32 %v2270_v5, 0.0 }
 0x51a   :  { %v10125_v48 = vpop.f32.mrb[71].mxu1  ;;  %v10127_v57 = vpop.f32.mrb[73].mxu0  ;;  %7685 = vmatmul.mubr.f32.gmra.mrb[176].mxu1 %v9904_v29  ;;  %7813 = vmatmul.mubr.f32.gmra.mrb[178].mxu0 %v9904_v29  ;;  %v2579_v29 = vmax.f32 %v2265_v25, 0.0 }
 0x51b   :  { %7687 = vmatprep.mubr.f32.mxu1 %v9908_v13  ;;  %7815 = vmatprep.mubr.f32.mxu0 %v9908_v13  ;;  %v2275_v13 = vadd.f32 %v10018_v47, %v10109_v16  ;;  %v2295_v47 = vadd.f32 %v10042_v35, %v10109_v16  ;;  %v2310_v35 = vadd.f32 %v10109_v16, %v10070_v39 }
 0x51d   :  { %v10137_v14 = vpop.f32.mrb[72].mxu1  ;;  %v10139_v62 = vpop.f32.mrb[74].mxu0  ;;  %v2585_v5 = vmax.f32 %v2295_v47, 0.0 }
 0x51e   :  { %v10141_v23 = vpop.f32.mrb[73].mxu1  ;;  %v10143_v10 = vpop.f32.mrb[75].mxu0  ;;  %7688 = vmatmul.mubr.f32.gmra.mrb[178].mxu1 %v9914_v61  ;;  %7816 = vmatmul.mubr.f32.gmra.mrb[180].mxu0 %v9914_v61  ;;  %v2581_v61 = vmax.f32 %v2275_v13, 0.0 }
 0x51f   :  { %7850 = vmatprep.mubr.f32.mxu0 %v2578_v6  ;;  %v2305_v6 = vadd.f32 %v10054_v19, %v10109_v16  ;;  %v2320_v19 = vadd.f32 %v10109_v16, %v10082_v63 }
 0x521   :  { %v10151_v20 = vpop.f32.mrb[74].mxu1  ;;  %v10153_v49 = vpop.f32.mrb[76].mxu0 }
 0x522   :  { %v10155_v1 = vpop.f32.mrb[75].mxu1  ;;  %v10157_v30 = vpop.f32.mrb[77].mxu0  ;;  %7851 = vmatmul.mubr.f32.vlgmr.msra.gmra.mrb[182].mxu0 %v2579_v29  ;;  %v2586_v29 = vmax.f32 %v2300_v32, 0.0  ;;  %v2325_v32 = vadd.f32 %v10078_v22, %v10109_v16  ;;  %v2340_v22 = vadd.f32 %v10109_v16, %v10111_v60 }
 0x523   :  { %7853 = vmatprep.mubr.f32.mxu0 %v2580_v15 }
 0x525   :  { %v10163_v41 = vpop.f32.mrb[76].mxu1  ;;  %v10165_v51 = vpop.f32.mrb[78].mxu0 }
 0x526   :  { %v10167_v58 = vpop.f32.mrb[77].mxu1  ;;  %v10169_v38 = vpop.f32.mrb[79].mxu0  ;;  %7854 = vmatmul.mubr.f32.gmra.mrb[184].mxu0 %v2581_v61  ;;  %v2587_v61 = vmax.f32 %v2305_v6, 0.0 }
 0x527   :  { %7856 = vmatprep.mubr.f32.mxu0 %v2582_v24  ;;  %v2588_v24 = vmax.f32 %v2310_v35, 0.0 }
 0x529   :  { %v10175_v37 = vpop.f32.mrb[78].mxu1  ;;  %v10177_v8 = vpop.f32.mrb[80].mxu0 }
 0x52a   :  { %11973 = vst [vmem:[#allocation21_spill] sm:$0xff] %v10177_v8  ;;  %v10179_v12 = vpop.f32.mrb[79].mxu1  ;;  %v10181_v25 = vpop.f32.mrb[81].mxu0  ;;  %7857 = vmatmul.mubr.f32.gmra.mrb[186].mxu0 %v2583_v3 }
 0x52b   :  { %7859 = vmatprep.mubr.f32.mxu0 %v2584_v21  ;;  %v2589_v21 = vmax.f32 %v2315_v7, 0.0  ;;  %v2335_v7 = vadd.f32 %v10090_v54, %v10109_v16  ;;  %v2350_v54 = vadd.f32 %v10109_v16, %v10125_v48 }
 0x52d   :  { %v10187_v13 = vpop.f32.mrb[80].mxu1  ;;  %v10189_v9 = vpop.f32.mrb[82].mxu0 }
 0x52e   :  { %11974 = vst [vmem:[#allocation22_spill] sm:$0xff] %v10189_v9  ;;  %v10191_v15 = vpop.f32.mrb[81].mxu1  ;;  %v10193_v52 = vpop.f32.mrb[83].mxu0  ;;  %7860 = vmatmul.mubr.f32.gmra.mrb[188].mxu0 %v2585_v5  ;;  %v2590_v5 = vmax.f32 %v2320_v19, 0.0 }
 0x52f   :  { %11975 = vst [vmem:[#allocation23_spill] sm:$0xff] %v10193_v52  ;;  %7862 = vmatprep.mubr.f32.mxu0 %v2586_v29 }
 0x531   :  { %v10199_v55 = vpop.f32.mrb[82].mxu1  ;;  %v10201_v39 = vpop.f32.mrb[84].mxu0 }
 0x532   :  { %11976 = vst [vmem:[#allocation24_spill] sm:$0xff] %v10201_v39  ;;  %v10203_v3 = vpop.f32.mrb[83].mxu1  ;;  %v10205_v47 = vpop.f32.mrb[85].mxu0  ;;  %7863 = vmatmul.mubr.f32.gmra.mrb[190].mxu0 %v2587_v61  ;;  %v2591_v61 = vmax.f32 %v2325_v32, 0.0  ;;  %v2345_v32 = vadd.f32 %v10102_v4, %v10109_v16  ;;  %v2360_v4 = vadd.f32 %v10109_v16, %v10141_v23 }
 0x533   :  { %11977 = vst [vmem:[#allocation25_spill] sm:$0xff] %v10205_v47  ;;  %7865 = vmatprep.mubr.f32.mxu0 %v2588_v24  ;;  %v2592_v24 = vmax.f32 %v2330_v33, 0.0 }
 0x535   :  { %v10211_v6 = vpop.f32.mrb[84].mxu1  ;;  %v10213_v63 = vpop.f32.mrb[86].mxu0 }
 0x536   :  { %11978 = vst [vmem:[#allocation26_spill] sm:$0xff] %v10213_v63  ;;  %v10215_v29 = vpop.f32.mrb[85].mxu1  ;;  %v10217_v35 = vpop.f32.mrb[87].mxu0  ;;  %7866 = vmatmul.mubr.f32.gmra.mrb[192].mxu0 %v2589_v21  ;;  %v2593_v21 = vmax.f32 %v2335_v7, 0.0  ;;  %v2355_v7 = vadd.f32 %v10121_v46, %v10109_v16  ;;  %v2370_v46 = vadd.f32 %v10109_v16, %v10155_v1 }
 0x537   :  { %11979 = vst [vmem:[#allocation27_spill] sm:$0xff] %v10217_v35  ;;  %7868 = vmatprep.mubr.f32.mxu0 %v2590_v5  ;;  %v2594_v5 = vmax.f32 %v2340_v22, 0.0 }
 0x539   :  { %v10223_v19 = vpop.f32.mrb[86].mxu1  ;;  %v10225_v40 = vpop.f32.mrb[88].mxu0 }
 0x53a   :  { %11980 = vst [vmem:[#allocation28_spill] sm:$0xff] %v10225_v40  ;;  %v10227_v39 = vpop.f32.mrb[87].mxu1  ;;  %v10229_v63 = vpop.f32.mrb[89].mxu0  ;;  %7869 = vmatmul.mubr.f32.gmra.mrb[194].mxu0 %v2591_v61  ;;  %v2595_v61 = vmax.f32 %v2345_v32, 0.0  ;;  %v2365_v32 = vadd.f32 %v10137_v14, %v10109_v16  ;;  %v2380_v14 = vadd.f32 %v10109_v16, %v10167_v58 }
 0x53b   :  { %11981 = vst [vmem:[#allocation29_spill] sm:$0xff] %v10229_v63  ;;  %7871 = vmatprep.mubr.f32.mxu0 %v2592_v24  ;;  %v2596_v24 = vmax.f32 %v2350_v54, 0.0 }
 0x53d   :  { %v10235_v33 = vpop.f32.mrb[88].mxu1  ;;  %v10237_v60 = vpop.f32.mrb[90].mxu0 }
 0x53e   :  { %11982 = vst [vmem:[#allocation30_spill] sm:$0xff] %v10237_v60  ;;  %v10239_v35 = vpop.f32.mrb[89].mxu1  ;;  %v10241_v40 = vpop.f32.mrb[91].mxu0  ;;  %7872 = vmatmul.mubr.f32.gmra.mrb[196].mxu0 %v2593_v21  ;;  %v2597_v21 = vmax.f32 %v2355_v7, 0.0  ;;  %v2375_v7 = vadd.f32 %v10151_v20, %v10109_v16  ;;  %v2390_v20 = vadd.f32 %v10109_v16, %v10179_v12 }
 0x53f   :  { %11983 = vst [vmem:[#allocation31_spill] sm:$0xff] %v10241_v40  ;;  %7874 = vmatprep.mubr.f32.mxu0 %v2594_v5  ;;  %v2598_v5 = vmax.f32 %v2360_v4, 0.0 }
 0x541   :  { %v10247_v22 = vpop.f32.mrb[90].mxu1  ;;  %v10249_v48 = vpop.f32.mrb[92].mxu0 }
 0x542   :  { %11984 = vst [vmem:[#allocation32_spill] sm:$0xff] %v10249_v48  ;;  %v10251_v63 = vpop.f32.mrb[91].mxu1  ;;  %v10253_v60 = vpop.f32.mrb[93].mxu0  ;;  %7875 = vmatmul.mubr.f32.gmra.mrb[198].mxu0 %v2595_v61  ;;  %v2599_v61 = vmax.f32 %v2365_v32, 0.0  ;;  %v2385_v32 = vadd.f32 %v10163_v41, %v10109_v16  ;;  %v2400_v41 = vadd.f32 %v10109_v16, %v10191_v15 }
 0x543   :  { %11985 = vst [vmem:[#allocation33_spill] sm:$0xff] %v10253_v60  ;;  %7877 = vmatprep.mubr.f32.mxu0 %v2596_v24  ;;  %v2600_v24 = vmax.f32 %v2370_v46, 0.0 }
 0x545   :  { %v10259_v54 = vpop.f32.mrb[92].mxu1  ;;  %v10261_v23 = vpop.f32.mrb[94].mxu0 }
 0x546   :  { %11986 = vst [vmem:[#allocation34_spill] sm:$0xff] %v10261_v23  ;;  %v10263_v40 = vpop.f32.mrb[93].mxu1  ;;  %v10265_v48 = vpop.f32.mrb[95].mxu0  ;;  %7878 = vmatmul.mubr.f32.gmra.mrb[200].mxu0 %v2597_v21  ;;  %v2601_v21 = vmax.f32 %v2375_v7, 0.0  ;;  %v2395_v7 = vadd.f32 %v10175_v37, %v10109_v16  ;;  %v2410_v37 = vadd.f32 %v10109_v16, %v10203_v3 }
 0x547   :  { %11987 = vst [vmem:[#allocation35_spill] sm:$0xff] %v10265_v48  ;;  %7880 = vmatprep.mubr.f32.mxu0 %v2598_v5  ;;  %v2602_v5 = vmax.f32 %v2380_v14, 0.0 }
 0x549   :  { %v10271_v4 = vpop.f32.mrb[94].mxu1  ;;  %v10273_v1 = vpop.f32.mrb[96].mxu0 }
 0x54a   :  { %11988 = vst [vmem:[#allocation36_spill] sm:$0xff] %v10273_v1  ;;  %v10275_v60 = vpop.f32.mrb[95].mxu1  ;;  %v10277_v23 = vpop.f32.mrb[97].mxu0  ;;  %7881 = vmatmul.mubr.f32.gmra.mrb[202].mxu0 %v2599_v61  ;;  %v2603_v61 = vmax.f32 %v2385_v32, 0.0  ;;  %v2405_v32 = vadd.f32 %v10187_v13, %v10109_v16  ;;  %v2420_v13 = vadd.f32 %v10109_v16, %v10215_v29 }
 0x54b   :  { %11989 = vst [vmem:[#allocation37_spill] sm:$0xff] %v10277_v23  ;;  %7883 = vmatprep.mubr.f32.mxu0 %v2600_v24  ;;  %v2604_v24 = vmax.f32 %v2390_v20, 0.0 }
 0x54d   :  { %v10283_v46 = vpop.f32.mrb[96].mxu1  ;;  %v10285_v58 = vpop.f32.mrb[98].mxu0 }
 0x54e   :  { %11990 = vst [vmem:[#allocation38_spill] sm:$0xff] %v10285_v58  ;;  %v10287_v48 = vpop.f32.mrb[97].mxu1  ;;  %v10289_v1 = vpop.f32.mrb[99].mxu0  ;;  %7884 = vmatmul.mubr.f32.gmra.mrb[204].mxu0 %v2601_v21  ;;  %v2605_v21 = vmax.f32 %v2395_v7, 0.0  ;;  %v2415_v7 = vadd.f32 %v10199_v55, %v10109_v16  ;;  %v2430_v55 = vadd.f32 %v10109_v16, %v10227_v39 }
 0x54f   :  { %11991 = vst [vmem:[#allocation39_spill] sm:$0xff] %v10289_v1  ;;  %7886 = vmatprep.mubr.f32.mxu0 %v2602_v5  ;;  %v2606_v5 = vmax.f32 %v2400_v41, 0.0 }
 0x551   :  { %v10295_v14 = vpop.f32.mrb[98].mxu1  ;;  %v10297_v12 = vpop.f32.mrb[100].mxu0 }
 0x552   :  { %11992 = vst [vmem:[#allocation40_spill] sm:$0xff] %v10297_v12  ;;  %v10299_v23 = vpop.f32.mrb[99].mxu1  ;;  %v10301_v58 = vpop.f32.mrb[101].mxu0  ;;  %7887 = vmatmul.mubr.f32.gmra.mrb[206].mxu0 %v2603_v61  ;;  %v2607_v61 = vmax.f32 %v2405_v32, 0.0  ;;  %v2425_v32 = vadd.f32 %v10211_v6, %v10109_v16  ;;  %v2440_v6 = vadd.f32 %v10109_v16, %v10239_v35 }
 0x553   :  { %11993 = vst [vmem:[#allocation41_spill] sm:$0xff] %v10301_v58  ;;  %7889 = vmatprep.mubr.f32.mxu0 %v2604_v24  ;;  %v2608_v24 = vmax.f32 %v2410_v37, 0.0 }
 0x555   :  { %v10307_v20 = vpop.f32.mrb[100].mxu1  ;;  %v10309_v15 = vpop.f32.mrb[102].mxu0 }
 0x556   :  { %11994 = vst [vmem:[#allocation42_spill] sm:$0xff] %v10309_v15  ;;  %v10311_v1 = vpop.f32.mrb[101].mxu1  ;;  %v10313_v12 = vpop.f32.mrb[103].mxu0  ;;  %7890 = vmatmul.mubr.f32.gmra.mrb[208].mxu0 %v2605_v21  ;;  %v2609_v21 = vmax.f32 %v2415_v7, 0.0  ;;  %v2435_v7 = vadd.f32 %v10223_v19, %v10109_v16  ;;  %v2450_v19 = vadd.f32 %v10109_v16, %v10251_v63 }
 0x557   :  { %11995 = vst [vmem:[#allocation43_spill] sm:$0xff] %v10313_v12  ;;  %7892 = vmatprep.mubr.f32.mxu0 %v2606_v5  ;;  %v2610_v5 = vmax.f32 %v2420_v13, 0.0 }
 0x559   :  { %v10319_v41 = vpop.f32.mrb[102].mxu1  ;;  %v10321_v3 = vpop.f32.mrb[104].mxu0 }
 0x55a   :  { %11996 = vst [vmem:[#allocation44_spill] sm:$0xff] %v10321_v3  ;;  %v10323_v58 = vpop.f32.mrb[103].mxu1  ;;  %v10325_v15 = vpop.f32.mrb[105].mxu0  ;;  %7893 = vmatmul.mubr.f32.gmra.mrb[210].mxu0 %v2607_v61  ;;  %v2611_v61 = vmax.f32 %v2425_v32, 0.0  ;;  %v2445_v32 = vadd.f32 %v10235_v33, %v10109_v16  ;;  %v2460_v33 = vadd.f32 %v10109_v16, %v10263_v40 }
 0x55b   :  { %11997 = vst [vmem:[#allocation45_spill] sm:$0xff] %v10325_v15  ;;  %7895 = vmatprep.mubr.f32.mxu0 %v2608_v24  ;;  %v2612_v24 = vmax.f32 %v2430_v55, 0.0 }
 0x55d   :  { %v10331_v37 = vpop.f32.mrb[104].mxu1  ;;  %v10333_v29 = vpop.f32.mrb[106].mxu0 }
 0x55e   :  { %11998 = vst [vmem:[#allocation46_spill] sm:$0xff] %v10333_v29  ;;  %v10335_v12 = vpop.f32.mrb[105].mxu1  ;;  %v10337_v3 = vpop.f32.mrb[107].mxu0  ;;  %7896 = vmatmul.mubr.f32.gmra.mrb[212].mxu0 %v2609_v21  ;;  %v2613_v21 = vmax.f32 %v2435_v7, 0.0  ;;  %v2455_v7 = vadd.f32 %v10247_v22, %v10109_v16  ;;  %v2470_v22 = vadd.f32 %v10109_v16, %v10275_v60 }
 0x55f   :  { %11999 = vst [vmem:[#allocation47_spill] sm:$0xff] %v10337_v3  ;;  %7898 = vmatprep.mubr.f32.mxu0 %v2610_v5  ;;  %v2614_v5 = vmax.f32 %v2440_v6, 0.0 }
 0x561   :  { %v10343_v13 = vpop.f32.mrb[106].mxu1  ;;  %v10345_v39 = vpop.f32.mrb[108].mxu0 }
 0x562   :  { %12000 = vst [vmem:[#allocation48_spill] sm:$0xff] %v10345_v39  ;;  %v10347_v15 = vpop.f32.mrb[107].mxu1  ;;  %v10349_v29 = vpop.f32.mrb[109].mxu0  ;;  %7899 = vmatmul.mubr.f32.gmra.mrb[214].mxu0 %v2611_v61  ;;  %v2615_v61 = vmax.f32 %v2445_v32, 0.0  ;;  %v2465_v32 = vadd.f32 %v10259_v54, %v10109_v16  ;;  %v2480_v54 = vadd.f32 %v10109_v16, %v10287_v48  ;;  %v2490_v48 = vadd.f32 %v10109_v16, %v10299_v23 }
 0x563   :  { %12001 = vst [vmem:[#allocation49_spill] sm:$0xff] %v10349_v29  ;;  %7901 = vmatprep.mubr.f32.mxu0 %v2612_v24  ;;  %v2616_v24 = vmax.f32 %v2450_v19, 0.0 }
 0x564   :  { %v2624_v23 = vmax.f32 %v2490_v48, 0.0  ;;  %v2510_v48 = vadd.f32 %v10109_v16, %v10323_v58 }
 0x565   :  { %v10355_v55 = vpop.f32.mrb[108].mxu1  ;;  %v10357_v35 = vpop.f32.mrb[110].mxu0 }
 0x566   :  { %12002 = vst [vmem:[#allocation50_spill] sm:$0xff] %v10357_v35  ;;  %v10359_v3 = vpop.f32.mrb[109].mxu1  ;;  %v10361_v39 = vpop.f32.mrb[111].mxu0  ;;  %7902 = vmatmul.mubr.f32.gmra.mrb[216].mxu0 %v2613_v21  ;;  %v2617_v21 = vmax.f32 %v2455_v7, 0.0  ;;  %v2475_v7 = vadd.f32 %v10271_v4, %v10109_v16  ;;  %v2485_v4 = vadd.f32 %v10283_v46, %v10109_v16  ;;  %v2628_v58 = vmax.f32 %v2510_v48, 0.0 }
 0x567   :  { %12003 = vst [vmem:[#allocation51_spill] sm:$0xff] %v10361_v39  ;;  %7904 = vmatprep.mubr.f32.mxu0 %v2614_v5  ;;  %v2618_v5 = vmax.f32 %v2460_v33, 0.0  ;;  %v2530_v48 = vadd.f32 %v10109_v16, %v10347_v15 }
 0x568   :  { %v2623_v46 = vmax.f32 %v2485_v4, 0.0 }
 0x569   :  { %v10367_v6 = vpop.f32.mrb[110].mxu1  ;;  %v10369_v63 = vpop.f32.mrb[112].mxu0  ;;  %v2632_v15 = vmax.f32 %v2530_v48, 0.0 }
 0x56a   :  { %12004 = vst [vmem:[#allocation52_spill] sm:$0xff] %v10369_v63  ;;  %v10371_v29 = vpop.f32.mrb[111].mxu1  ;;  %v10373_v35 = vpop.f32.mrb[113].mxu0  ;;  %7905 = vmatmul.mubr.f32.gmra.mrb[218].mxu0 %v2615_v61  ;;  %v2619_v61 = vmax.f32 %v2465_v32, 0.0  ;;  %v2621_v32 = vmax.f32 %v2475_v7, 0.0  ;;  %v2495_v7 = vadd.f32 %v10295_v14, %v10109_v16 }
 0x56b   :  { %12005 = vst [vmem:[#allocation53_spill] sm:$0xff] %v10373_v35  ;;  %7907 = vmatprep.mubr.f32.mxu0 %v2616_v24  ;;  %v2620_v24 = vmax.f32 %v2470_v22, 0.0  ;;  %v2550_v48 = vadd.f32 %v10109_v16, %v10371_v29 }
 0x56c   :  { %v2625_v14 = vmax.f32 %v2495_v7, 0.0 }
 0x56d   :  { %v10379_v19 = vpop.f32.mrb[112].mxu1  ;;  %v10381_v40 = vpop.f32.mrb[114].mxu0  ;;  %v2636_v29 = vmax.f32 %v2550_v48, 0.0 }
 0x56e   :  { %12006 = vst [vmem:[#allocation54_spill] sm:$0xff] %v10381_v40  ;;  %v10383_v39 = vpop.f32.mrb[113].mxu1  ;;  %v10385_v63 = vpop.f32.mrb[115].mxu0  ;;  %7908 = vmatmul.mubr.f32.gmra.mrb[220].mxu0 %v2617_v21 }
 0x56f   :  { %12007 = vst [vmem:[#allocation55_spill] sm:$0xff] %v10385_v63  ;;  %7910 = vmatprep.mubr.f32.mxu0 %v2618_v5  ;;  %v2622_v5 = vmax.f32 %v2480_v54, 0.0 }
 0x571   :  { %v10391_v33 = vpop.f32.mrb[114].mxu1  ;;  %v7561_v60 = vpop.f32.mrb[116].mxu0 }
 0x572   :  { %v3104_v35 = vadd.f32 %v7561_v60, %v10109_v16  ;;  %v10394_v40 = vpop.f32.mrb[115].mxu1  ;;  %v3098_v47 = vpop.f32.mrb[117].mxu0  ;;  %7911 = vmatmul.mubr.f32.gmra.mrb[222].mxu0 %v2619_v61 }
 0x573   :  { %v3099_v21 = vadd.f32 %v10109_v16, %v3098_v47  ;;  %7913 = vmatprep.mubr.f32.mxu0 %v2620_v24  ;;  %v2500_v24 = vadd.f32 %v10109_v16, %v10311_v1  ;;  %v2570_v48 = vadd.f32 %v10109_v16, %v10394_v40  ;;  %v2789_v40 = vadd.f32 %v10109_v16, %v9954_v43 }
 0x574   :  { %v3170_v60 = vmax.f32 %v3104_v35, 0.0 }
 0x575   :  { %v3169_v22 = vmax.f32 %v3099_v21, 0.0  ;;  %v7596_v63 = vpop.f32.mrb[116].mxu1  ;;  %v10401_v9 = vpop.f32.mrb[118].mxu0  ;;  %v2626_v1 = vmax.f32 %v2500_v24, 0.0  ;;  %v2520_v24 = vadd.f32 %v10109_v16, %v10335_v12 }
 0x576   :  { %12008 = vst [vmem:[#allocation56_spill] sm:$0xff] %v10401_v9  ;;  %v3323_v52 = vadd.f32 %v7596_v63, %v10109_v16  ;;  %v3317_v8 = vpop.f32.mrb[117].mxu1  ;;  %v10404_v61 = vpop.f32.mrb[119].mxu0  ;;  %7914 = vmatmul.mubr.f32.gmra.mrb[224].mxu0 %v2621_v32 }
 0x577   :  { %v3318_v47 = vadd.f32 %v10109_v16, %v3317_v8  ;;  %7916 = vmatprep.mubr.f32.mxu0 %v2622_v5  ;;  %8039 = vmatprep.mubr.f32.mxu1 %v3169_v22  ;;  %v2505_v5 = vadd.f32 %v10307_v20, %v10109_v16  ;;  %v2630_v12 = vmax.f32 %v2520_v24, 0.0  ;;  %v2540_v24 = vadd.f32 %v10109_v16, %v10359_v3 }
 0x578   :  { %8040 = vmatmul.mubr.f32.vlgmr.msra.gmra.mrb[180].mxu1 %v3170_v60  ;;  %v3637_v21 = vmax.f32 %v3323_v52, 0.0 }
 0x579   :  { %v3636_v35 = vmax.f32 %v3318_v47, 0.0  ;;  %v7599_v54 = vpop.f32.mrb[118].mxu1  ;;  %v10411_v63 = vpop.f32.mrb[120].mxu0  ;;  %v2627_v20 = vmax.f32 %v2505_v5, 0.0  ;;  %v2634_v3 = vmax.f32 %v2540_v24, 0.0  ;;  %v2560_v24 = vadd.f32 %v10109_v16, %v10383_v39 }
 0x57a   :  { %v3333_v32 = vadd.f32 %v7599_v54, %v10109_v16  ;;  %v3327_v9 = vpop.f32.mrb[119].mxu1  ;;  %v10414_v8 = vpop.f32.mrb[121].mxu0  ;;  %7917 = vmatmul.mubr.f32.gmra.mrb[226].mxu0 %v2623_v46 }
 0x57b   :  { %v3328_v4 = vadd.f32 %v10109_v16, %v3327_v9  ;;  %7919 = vmatprep.mubr.f32.mxu0 %v2624_v23  ;;  %8042 = vmatprep.mubr.f32.mxu1 %v3636_v35  ;;  %v2515_v23 = vadd.f32 %v10319_v41, %v10109_v16  ;;  %v2638_v39 = vmax.f32 %v2560_v24, 0.0  ;;  %v2640_v24 = vmax.f32 %v2570_v48, 0.0 }
 0x57c   :  { %8043 = vmatmul.mubr.f32.gmra.mrb[182].mxu1 %v3637_v21  ;;  %v3639_v47 = vmax.f32 %v3333_v32, 0.0  ;;  %v2799_v48 = vadd.f32 %v10109_v16, %v10024_v0 }
 0x57d   :  { %v3638_v52 = vmax.f32 %v3328_v4, 0.0  ;;  %v7602_v22 = vpop.f32.mrb[120].mxu1  ;;  %v10421_v60 = vpop.f32.mrb[122].mxu0  ;;  %v2629_v41 = vmax.f32 %v2515_v23, 0.0 }
 0x57e   :  { %v3343_v46 = vadd.f32 %v7602_v22, %v10109_v16  ;;  %v3337_v54 = vpop.f32.mrb[121].mxu1  ;;  %v10424_v9 = vpop.f32.mrb[123].mxu0  ;;  %7920 = vmatmul.mubr.f32.gmra.mrb[228].mxu0 %v2625_v14  ;;  %v3109_v0 = vmax.f32 %v2799_v48, 0.0  ;;  %v2819_v48 = vadd.f32 %v10109_v16, %v10048_v17 }
 0x57f   :  { %v3338_v7 = vadd.f32 %v10109_v16, %v3337_v54  ;;  %7922 = vmatprep.mubr.f32.mxu0 %v2626_v1  ;;  %8045 = vmatprep.mubr.f32.mxu1 %v3638_v52  ;;  %v2525_v1 = vadd.f32 %v10331_v37, %v10109_v16 }
 0x580   :  { %8046 = vmatmul.mubr.f32.gmra.mrb[184].mxu1 %v3639_v47  ;;  %v3641_v4 = vmax.f32 %v3343_v46, 0.0  ;;  %v3113_v17 = vmax.f32 %v2819_v48, 0.0  ;;  %v2839_v48 = vadd.f32 %v10109_v16, %v10072_v36 }
 0x581   :  { %v3640_v35 = vmax.f32 %v3338_v7, 0.0  ;;  %v7605_v21 = vpop.f32.mrb[122].mxu1  ;;  %v10431_v32 = vpop.f32.mrb[124].mxu0  ;;  %v2631_v37 = vmax.f32 %v2525_v1, 0.0 }
 0x582   :  { %v3353_v14 = vadd.f32 %v7605_v21, %v10109_v16  ;;  %v3347_v22 = vpop.f32.mrb[123].mxu1  ;;  %v10434_v54 = vpop.f32.mrb[125].mxu0  ;;  %7923 = vmatmul.mubr.f32.gmra.mrb[230].mxu0 %v2627_v20  ;;  %v3117_v36 = vmax.f32 %v2839_v48, 0.0  ;;  %v2859_v48 = vadd.f32 %v10109_v16, %v10096_v59 }
 0x583   :  { %v3348_v5 = vadd.f32 %v10109_v16, %v3347_v22  ;;  %7925 = vmatprep.mubr.f32.mxu0 %v2628_v58  ;;  %8048 = vmatprep.mubr.f32.mxu1 %v3640_v35  ;;  %v2535_v58 = vadd.f32 %v10343_v13, %v10109_v16 }
 0x584   :  { %8049 = vmatmul.mubr.f32.gmra.mrb[186].mxu1 %v3641_v4  ;;  %v3643_v7 = vmax.f32 %v3353_v14, 0.0  ;;  %v3121_v59 = vmax.f32 %v2859_v48, 0.0 }
 0x585   :  { %v3642_v52 = vmax.f32 %v3348_v5, 0.0  ;;  %v7608_v47 = vpop.f32.mrb[124].mxu1  ;;  %v10441_v46 = vpop.f32.mrb[126].mxu0  ;;  %v2633_v13 = vmax.f32 %v2535_v58, 0.0 }
 0x586   :  { %v3363_v20 = vadd.f32 %v7608_v47, %v10109_v16  ;;  %v3357_v21 = vpop.f32.mrb[125].mxu1  ;;  %v10444_v22 = vpop.f32.mrb[127].mxu0  ;;  %7926 = vmatmul.mubr.f32.gmra.mrb[232].mxu0 %v2629_v41 }
 0x587   :  { %v3358_v23 = vadd.f32 %v10109_v16, %v3357_v21  ;;  %7928 = vmatprep.mubr.f32.mxu0 %v2630_v12  ;;  %8051 = vmatprep.mubr.f32.mxu1 %v3642_v52  ;;  %v2545_v12 = vadd.f32 %v10355_v55, %v10109_v16 }
 0x588   :  { %8052 = vmatmul.mubr.f32.gmra.mrb[188].mxu1 %v3643_v7  ;;  %v3645_v5 = vmax.f32 %v3363_v20, 0.0 }
 0x589   :  { %v3644_v35 = vmax.f32 %v3358_v23, 0.0  ;;  %v7611_v4 = vpop.f32.mrb[126].mxu1  ;;  %v10451_v14 = vpop.f32.mrb[128].mxu0  ;;  %v2635_v55 = vmax.f32 %v2545_v12, 0.0 }
 0x58a   :  { %v3373_v41 = vadd.f32 %v7611_v4, %v10109_v16  ;;  %v3367_v47 = vpop.f32.mrb[127].mxu1  ;;  %v10454_v21 = vpop.f32.mrb[129].mxu0  ;;  %7929 = vmatmul.mubr.f32.gmra.mrb[234].mxu0 %v2631_v37 }
 0x58b   :  { %v3368_v1 = vadd.f32 %v10109_v16, %v3367_v47  ;;  %7931 = vmatprep.mubr.f32.mxu0 %v2632_v15  ;;  %8054 = vmatprep.mubr.f32.mxu1 %v3644_v35  ;;  %v2555_v15 = vadd.f32 %v10367_v6, %v10109_v16 }
 0x58c   :  { %8055 = vmatmul.mubr.f32.gmra.mrb[190].mxu1 %v3645_v5  ;;  %v3647_v23 = vmax.f32 %v3373_v41, 0.0 }
 0x58d   :  { %v3646_v52 = vmax.f32 %v3368_v1, 0.0  ;;  %v7614_v7 = vpop.f32.mrb[128].mxu1  ;;  %v10461_v20 = vpop.f32.mrb[130].mxu0  ;;  %v2637_v6 = vmax.f32 %v2555_v15, 0.0 }
 0x58e   :  { %v3383_v37 = vadd.f32 %v7614_v7, %v10109_v16  ;;  %v3377_v4 = vpop.f32.mrb[129].mxu1  ;;  %v10464_v47 = vpop.f32.mrb[131].mxu0  ;;  %7932 = vmatmul.mubr.f32.gmra.mrb[236].mxu0 %v2633_v13 }
 0x58f   :  { %v3378_v58 = vadd.f32 %v10109_v16, %v3377_v4  ;;  %7934 = vmatprep.mubr.f32.mxu0 %v2634_v3  ;;  %8057 = vmatprep.mubr.f32.mxu1 %v3646_v52  ;;  %v2565_v3 = vadd.f32 %v10379_v19, %v10109_v16 }
 0x590   :  { %8058 = vmatmul.mubr.f32.gmra.mrb[192].mxu1 %v3647_v23  ;;  %v3649_v1 = vmax.f32 %v3383_v37, 0.0 }
 0x591   :  { %v3648_v35 = vmax.f32 %v3378_v58, 0.0  ;;  %v7617_v5 = vpop.f32.mrb[130].mxu1  ;;  %v10471_v41 = vpop.f32.mrb[132].mxu0  ;;  %v2639_v19 = vmax.f32 %v2565_v3, 0.0 }
 0x592   :  { %v3393_v13 = vadd.f32 %v7617_v5, %v10109_v16  ;;  %v3387_v7 = vpop.f32.mrb[131].mxu1  ;;  %v10474_v4 = vpop.f32.mrb[133].mxu0  ;;  %7935 = vmatmul.mubr.f32.gmra.mrb[238].mxu0 %v2635_v55 }
 0x593   :  { %v3388_v12 = vadd.f32 %v10109_v16, %v3387_v7  ;;  %7937 = vmatprep.mubr.f32.mxu0 %v2636_v29  ;;  %8060 = vmatprep.mubr.f32.mxu1 %v3648_v35  ;;  %v2575_v29 = vadd.f32 %v10391_v33, %v10109_v16  ;;  %v2794_v33 = vadd.f32 %v9948_v26, %v10109_v16 }
 0x594   :  { %8061 = vmatmul.mubr.f32.gmra.mrb[194].mxu1 %v3649_v1  ;;  %v3651_v58 = vmax.f32 %v3393_v13, 0.0 }
 0x595   :  { %v3650_v52 = vmax.f32 %v3388_v12, 0.0  ;;  %v7620_v23 = vpop.f32.mrb[132].mxu1  ;;  %v10481_v37 = vpop.f32.mrb[134].mxu0  ;;  %v2641_v43 = vmax.f32 %v2575_v29, 0.0  ;;  %v3108_v26 = vmax.f32 %v2794_v33, 0.0  ;;  %v2804_v29 = vadd.f32 %v10020_v27, %v10109_v16 }
 0x596   :  { %v3403_v55 = vadd.f32 %v7620_v23, %v10109_v16  ;;  %v3397_v5 = vpop.f32.mrb[133].mxu1  ;;  %v10484_v7 = vpop.f32.mrb[135].mxu0  ;;  %7938 = vmatmul.mubr.f32.gmra.mrb[240].mxu0 %v2637_v6 }
 0x597   :  { %v3398_v15 = vadd.f32 %v10109_v16, %v3397_v5  ;;  %7940 = vmatprep.mubr.f32.mxu0 %v2638_v39  ;;  %8063 = vmatprep.mubr.f32.mxu1 %v3650_v52  ;;  %v3107_v39 = vmax.f32 %v2789_v40, 0.0  ;;  %v2809_v40 = vadd.f32 %v10109_v16, %v10036_v53  ;;  %v3110_v27 = vmax.f32 %v2804_v29, 0.0 }
 0x598   :  { %8064 = vmatmul.mubr.f32.gmra.mrb[196].mxu1 %v3651_v58  ;;  %v3653_v12 = vmax.f32 %v3403_v55, 0.0 }
 0x599   :  { %v3652_v35 = vmax.f32 %v3398_v15, 0.0  ;;  %v7623_v1 = vpop.f32.mrb[134].mxu1  ;;  %v10491_v13 = vpop.f32.mrb[136].mxu0  ;;  %v3111_v53 = vmax.f32 %v2809_v40, 0.0  ;;  %v2829_v40 = vadd.f32 %v10109_v16, %v10060_v42 }
 0x59a   :  { %v3413_v6 = vadd.f32 %v7623_v1, %v10109_v16  ;;  %v3407_v23 = vpop.f32.mrb[135].mxu1  ;;  %v10494_v5 = vpop.f32.mrb[137].mxu0  ;;  %7941 = vmatmul.mubr.f32.gmra.mrb[242].mxu0 %v2639_v19 }
 0x59b   :  { %v3408_v3 = vadd.f32 %v10109_v16, %v3407_v23  ;;  %7943 = vmatprep.mubr.f32.mxu0 %v2640_v24  ;;  %8066 = vmatprep.mubr.f32.mxu1 %v3652_v35  ;;  %v3115_v42 = vmax.f32 %v2829_v40, 0.0  ;;  %v2849_v40 = vadd.f32 %v10109_v16, %v10084_v34 }
 0x59c   :  { %8067 = vmatmul.mubr.f32.gmra.mrb[198].mxu1 %v3653_v12  ;;  %v3655_v15 = vmax.f32 %v3413_v6, 0.0 }
 0x59d   :  { %v3654_v52 = vmax.f32 %v3408_v3, 0.0  ;;  %v7626_v58 = vpop.f32.mrb[136].mxu1  ;;  %v10501_v55 = vpop.f32.mrb[138].mxu0  ;;  %v3119_v34 = vmax.f32 %v2849_v40, 0.0  ;;  %v10572_v40 = vld [vmem:[%s11933_s10] ss:$0 sm:$0xff] }
 0x59e   :  { %v3423_v19 = vadd.f32 %v7626_v58, %v10109_v16  ;;  %v3417_v1 = vpop.f32.mrb[137].mxu1  ;;  %v10504_v23 = vpop.f32.mrb[139].mxu0  ;;  %7944 = vmatmul.mubr.f32.gmra.mrb[244].mxu0 %v2641_v43  ;;  %v2874_v48 = vadd.f32 %v10572_v40, %v10104_v50 }
 0x59f   :  { %v3418_v24 = vadd.f32 %v10109_v16, %v3417_v1  ;;  %7946 = vmatprep.mubr.f32.mxu0 %v3107_v39  ;;  %8069 = vmatprep.mubr.f32.mxu1 %v3654_v52  ;;  %v2814_v39 = vadd.f32 %v10032_v18, %v10109_v16 }
 0x5a0   :  { %8070 = vmatmul.mubr.f32.gmra.mrb[200].mxu1 %v3655_v15  ;;  %v3657_v3 = vmax.f32 %v3423_v19, 0.0  ;;  %v3124_v50 = vmax.f32 %v2874_v48, 0.0 }
 0x5a1   :  { %v3656_v35 = vmax.f32 %v3418_v24, 0.0  ;;  %v7629_v12 = vpop.f32.mrb[138].mxu1  ;;  %v10511_v6 = vpop.f32.mrb[140].mxu0  ;;  %v3112_v18 = vmax.f32 %v2814_v39, 0.0 }
 0x5a2   :  { %v3433_v43 = vadd.f32 %v7629_v12, %v10109_v16  ;;  %v3427_v58 = vpop.f32.mrb[139].mxu1  ;;  %v10514_v1 = vpop.f32.mrb[141].mxu0  ;;  %7947 = vmatmul.mubr.f32.gmra.mrb[246].mxu0 %v3108_v26 }
 0x5a3   :  { %v3428_v33 = vadd.f32 %v10109_v16, %v3427_v58  ;;  %7949 = vmatprep.mubr.f32.mxu0 %v3109_v0  ;;  %8072 = vmatprep.mubr.f32.mxu1 %v3656_v35  ;;  %v2824_v0 = vadd.f32 %v10044_v11, %v10109_v16 }
 0x5a4   :  { %8073 = vmatmul.mubr.f32.gmra.mrb[202].mxu1 %v3657_v3  ;;  %v3659_v24 = vmax.f32 %v3433_v43, 0.0 }
 0x5a5   :  { %v3658_v52 = vmax.f32 %v3428_v33, 0.0  ;;  %v7632_v15 = vpop.f32.mrb[140].mxu1  ;;  %v10521_v19 = vpop.f32.mrb[142].mxu0  ;;  %v3114_v11 = vmax.f32 %v2824_v0, 0.0 }
 0x5a6   :  { %v3443_v26 = vadd.f32 %v7632_v15, %v10109_v16  ;;  %v3437_v12 = vpop.f32.mrb[141].mxu1  ;;  %v10524_v58 = vpop.f32.mrb[143].mxu0  ;;  %7950 = vmatmul.mubr.f32.gmra.mrb[248].mxu0 %v3110_v27 }
 0x5a7   :  { %v3438_v29 = vadd.f32 %v10109_v16, %v3437_v12  ;;  %7952 = vmatprep.mubr.f32.mxu0 %v3111_v53  ;;  %8075 = vmatprep.mubr.f32.mxu1 %v3658_v52  ;;  %v2834_v53 = vadd.f32 %v10056_v31, %v10109_v16 }
 0x5a8   :  { %8076 = vmatmul.mubr.f32.gmra.mrb[204].mxu1 %v3659_v24  ;;  %v3661_v33 = vmax.f32 %v3443_v26, 0.0 }
 0x5a9   :  { %v3660_v35 = vmax.f32 %v3438_v29, 0.0  ;;  %v7635_v3 = vpop.f32.mrb[142].mxu1  ;;  %v10531_v43 = vpop.f32.mrb[144].mxu0  ;;  %v3116_v31 = vmax.f32 %v2834_v53, 0.0 }
 0x5aa   :  { %v3453_v27 = vadd.f32 %v7635_v3, %v10109_v16  ;;  %v3447_v15 = vpop.f32.mrb[143].mxu1  ;;  %v10534_v12 = vpop.f32.mrb[145].mxu0  ;;  %7953 = vmatmul.mubr.f32.gmra.mrb[250].mxu0 %v3112_v18 }
 0x5ab   :  { %v3448_v39 = vadd.f32 %v10109_v16, %v3447_v15  ;;  %7955 = vmatprep.mubr.f32.mxu0 %v3113_v17  ;;  %8078 = vmatprep.mubr.f32.mxu1 %v3660_v35  ;;  %v2844_v17 = vadd.f32 %v10068_v28, %v10109_v16 }
 0x5ac   :  { %8079 = vmatmul.mubr.f32.gmra.mrb[206].mxu1 %v3661_v33  ;;  %v3663_v29 = vmax.f32 %v3453_v27, 0.0 }
 0x5ad   :  { %v3662_v52 = vmax.f32 %v3448_v39, 0.0  ;;  %v7638_v24 = vpop.f32.mrb[144].mxu1  ;;  %v10541_v26 = vpop.f32.mrb[146].mxu0  ;;  %v3118_v28 = vmax.f32 %v2844_v17, 0.0 }
 0x5ae   :  { %v3463_v18 = vadd.f32 %v7638_v24, %v10109_v16  ;;  %v3457_v3 = vpop.f32.mrb[145].mxu1  ;;  %v10544_v15 = vpop.f32.mrb[147].mxu0  ;;  %7956 = vmatmul.mubr.f32.gmra.mrb[252].mxu0 %v3114_v11 }
 0x5af   :  { %v3458_v0 = vadd.f32 %v10109_v16, %v3457_v3  ;;  %7958 = vmatprep.mubr.f32.mxu0 %v3115_v42  ;;  %8081 = vmatprep.mubr.f32.mxu1 %v3662_v52  ;;  %v2854_v42 = vadd.f32 %v10080_v56, %v10109_v16 }
 0x5b0   :  { %8082 = vmatmul.mubr.f32.gmra.mrb[208].mxu1 %v3663_v29  ;;  %v3665_v39 = vmax.f32 %v3463_v18, 0.0 }
 0x5b1   :  { %v3664_v35 = vmax.f32 %v3458_v0, 0.0  ;;  %v7641_v33 = vpop.f32.mrb[146].mxu1  ;;  %v10551_v27 = vpop.f32.mrb[148].mxu0  ;;  %v3120_v56 = vmax.f32 %v2854_v42, 0.0 }
 0x5b2   :  { %v3473_v11 = vadd.f32 %v7641_v33, %v10109_v16  ;;  %v3467_v24 = vpop.f32.mrb[147].mxu1  ;;  %v10554_v3 = vpop.f32.mrb[149].mxu0  ;;  %7959 = vmatmul.mubr.f32.gmra.mrb[254].mxu0 %v3116_v31 }
 0x5b3   :  { %v3468_v53 = vadd.f32 %v10109_v16, %v3467_v24  ;;  %7961 = vmatprep.mubr.f32.mxu0 %v3117_v36  ;;  %8084 = vmatprep.mubr.f32.mxu1 %v3664_v35  ;;  %v2864_v36 = vadd.f32 %v10092_v2, %v10109_v16  ;;  %v2869_v35 = vadd.f32 %v10572_v40, %v10113_v45 }
 0x5b4   :  { %8085 = vmatmul.mubr.f32.gmra.mrb[210].mxu1 %v3665_v39  ;;  %v3667_v0 = vmax.f32 %v3473_v11, 0.0 }
 0x5b5   :  { %v3666_v52 = vmax.f32 %v3468_v53, 0.0  ;;  %v7644_v29 = vpop.f32.mrb[148].mxu1  ;;  %v10561_v18 = vpop.f32.mrb[150].mxu0  ;;  %v3123_v45 = vmax.f32 %v2869_v35, 0.0  ;;  %v2889_v35 = vadd.f32 %v10572_v40, %v10143_v10 }
 0x5b6   :  { %v3483_v31 = vadd.f32 %v7644_v29, %v10109_v16  ;;  %v3477_v33 = vpop.f32.mrb[149].mxu1  ;;  %v10564_v24 = vpop.f32.mrb[151].mxu0  ;;  %7962 = vmatmul.mubr.f32.gmra.mrb[0].mxu0 %v3118_v28  ;;  %v2879_v29 = vadd.f32 %v10572_v40, %v10127_v57 }
 0x5b7   :  { %v3478_v17 = vadd.f32 %v10109_v16, %v3477_v33  ;;  %7964 = vmatprep.mubr.f32.mxu0 %v3119_v34  ;;  %8087 = vmatprep.mubr.f32.mxu1 %v3666_v52  ;;  %v3122_v16 = vmax.f32 %v2864_v36, 0.0  ;;  %v3127_v10 = vmax.f32 %v2889_v35, 0.0  ;;  %v2909_v35 = vadd.f32 %v10572_v40, %v10169_v38 }
 0x5b8   :  { %8088 = vmatmul.mubr.f32.gmra.mrb[212].mxu1 %v3667_v0  ;;  %v3669_v28 = vmax.f32 %v3483_v31, 0.0  ;;  %v3125_v57 = vmax.f32 %v2879_v29, 0.0  ;;  %v2899_v29 = vadd.f32 %v10572_v40, %v10157_v30 }
 0x5b9   :  { %v3668_v39 = vmax.f32 %v3478_v17, 0.0  ;;  %v7647_v11 = vpop.f32.mrb[150].mxu1  ;;  %v10576_v53 = vpop.f32.mrb[152].mxu0  ;;  %v3131_v38 = vmax.f32 %v2909_v35, 0.0 }
 0x5ba   :  { %v3493_v42 = vadd.f32 %v10572_v40, %v7647_v11  ;;  %v3487_v34 = vpop.f32.mrb[151].mxu1  ;;  %v10579_v52 = vpop.f32.mrb[153].mxu0  ;;  %7965 = vmatmul.mubr.f32.gmra.mrb[2].mxu0 %v3120_v56  ;;  %v3129_v30 = vmax.f32 %v2899_v29, 0.0  ;;  %v2919_v29 = vadd.f32 %v10572_v40, %v10181_v25 }
 0x5bb   :  { %v3488_v2 = vadd.f32 %v10572_v40, %v3487_v34  ;;  %7967 = vmatprep.mubr.f32.mxu0 %v3121_v59  ;;  %8090 = vmatprep.mubr.f32.mxu1 %v3668_v39  ;;  %v2884_v59 = vadd.f32 %v10572_v40, %v10123_v44 }
 0x5bc   :  { %8091 = vmatmul.mubr.f32.gmra.mrb[214].mxu1 %v3669_v28  ;;  %v3671_v17 = vmax.f32 %v3493_v42, 0.0  ;;  %v3133_v25 = vmax.f32 %v2919_v29, 0.0  ;;  %v12015_v29 = vld [vmem:[#allocation22_spill] sm:$0xff] }
 0x5bd   :  { %v3670_v0 = vmax.f32 %v3488_v2, 0.0  ;;  %v7650_v31 = vpop.f32.mrb[152].mxu1  ;;  %v10586_v33 = vpop.f32.mrb[154].mxu0  ;;  %v3126_v44 = vmax.f32 %v2884_v59, 0.0 }
 0x5be   :  { %v3503_v56 = vadd.f32 %v10572_v40, %v7650_v31  ;;  %v3497_v11 = vpop.f32.mrb[153].mxu1  ;;  %v10589_v34 = vpop.f32.mrb[155].mxu0  ;;  %7968 = vmatmul.mubr.f32.gmra.mrb[4].mxu0 %v3122_v16 }
 0x5bf   :  { %v3498_v36 = vadd.f32 %v10572_v40, %v3497_v11  ;;  %7970 = vmatprep.mubr.f32.mxu0 %v3123_v45  ;;  %8093 = vmatprep.mubr.f32.mxu1 %v3670_v0  ;;  %v2894_v45 = vadd.f32 %v10572_v40, %v10139_v62 }
 0x5c0   :  { %8094 = vmatmul.mubr.f32.gmra.mrb[216].mxu1 %v3671_v17  ;;  %v3673_v2 = vmax.f32 %v3503_v56, 0.0 }
 0x5c1   :  { %v3672_v39 = vmax.f32 %v3498_v36, 0.0  ;;  %v7653_v28 = vpop.f32.mrb[154].mxu1  ;;  %v10596_v42 = vpop.f32.mrb[156].mxu0  ;;  %v3128_v62 = vmax.f32 %v2894_v45, 0.0 }
 0x5c2   :  { %v3513_v16 = vadd.f32 %v10572_v40, %v7653_v28  ;;  %v3507_v31 = vpop.f32.mrb[155].mxu1  ;;  %v10599_v11 = vpop.f32.mrb[157].mxu0  ;;  %7971 = vmatmul.mubr.f32.gmra.mrb[6].mxu0 %v3124_v50 }
 0x5c3   :  { %v3508_v48 = vadd.f32 %v10572_v40, %v3507_v31  ;;  %7973 = vmatprep.mubr.f32.mxu0 %v3125_v57  ;;  %8096 = vmatprep.mubr.f32.mxu1 %v3672_v39  ;;  %v2904_v57 = vadd.f32 %v10572_v40, %v10153_v49 }
 0x5c4   :  { %8097 = vmatmul.mubr.f32.gmra.mrb[218].mxu1 %v3673_v2  ;;  %v3675_v36 = vmax.f32 %v3513_v16, 0.0 }
 0x5c5   :  { %v3674_v0 = vmax.f32 %v3508_v48, 0.0  ;;  %v7656_v17 = vpop.f32.mrb[156].mxu1  ;;  %v10606_v56 = vpop.f32.mrb[158].mxu0  ;;  %v3130_v49 = vmax.f32 %v2904_v57, 0.0 }
 0x5c6   :  { %v3523_v50 = vadd.f32 %v10572_v40, %v7656_v17  ;;  %v3517_v28 = vpop.f32.mrb[157].mxu1  ;;  %v10609_v31 = vpop.f32.mrb[159].mxu0  ;;  %7974 = vmatmul.mubr.f32.gmra.mrb[8].mxu0 %v3126_v44 }
 0x5c7   :  { %v3518_v59 = vadd.f32 %v10572_v40, %v3517_v28  ;;  %7976 = vmatprep.mubr.f32.mxu0 %v3127_v10  ;;  %8099 = vmatprep.mubr.f32.mxu1 %v3674_v0  ;;  %v2914_v10 = vadd.f32 %v10572_v40, %v10165_v51 }
 0x5c8   :  { %8100 = vmatmul.mubr.f32.gmra.mrb[220].mxu1 %v3675_v36  ;;  %v3677_v48 = vmax.f32 %v3523_v50, 0.0 }
 0x5c9   :  { %v3676_v39 = vmax.f32 %v3518_v59, 0.0  ;;  %v7659_v2 = vpop.f32.mrb[158].mxu1  ;;  %v10616_v16 = vpop.f32.mrb[160].mxu0  ;;  %v3132_v51 = vmax.f32 %v2914_v10, 0.0 }
 0x5ca   :  { %v3533_v44 = vadd.f32 %v10572_v40, %v7659_v2  ;;  %v3527_v17 = vpop.f32.mrb[159].mxu1  ;;  %v10619_v28 = vpop.f32.mrb[161].mxu0  ;;  %7977 = vmatmul.mubr.f32.gmra.mrb[10].mxu0 %v3128_v62 }
 0x5cb   :  { %v3528_v45 = vadd.f32 %v10572_v40, %v3527_v17  ;;  %7979 = vmatprep.mubr.f32.mxu0 %v3129_v30  ;;  %8102 = vmatprep.mubr.f32.mxu1 %v3676_v39  ;;  %v12011_v30 = vld [vmem:[#allocation21_spill] sm:$0xff]  ;;  %v12012_v39 = vld [vmem:[#allocation23_spill] sm:$0xff] }
 0x5cc   :  { %8103 = vmatmul.mubr.f32.gmra.mrb[222].mxu1 %v3677_v48  ;;  %v3679_v59 = vmax.f32 %v3533_v44, 0.0  ;;  %v2924_v35 = vadd.f32 %v10572_v40, %v12011_v30  ;;  %v2929_v48 = vadd.f32 %v10572_v40, %v12012_v39 }
 0x5cd   :  { %v3678_v0 = vmax.f32 %v3528_v45, 0.0  ;;  %v7662_v36 = vpop.f32.mrb[160].mxu1  ;;  %v10626_v50 = vpop.f32.mrb[162].mxu0 }
 0x5ce   :  { %12009 = vst [vmem:[#allocation57_spill] sm:$0xff] %v10626_v50  ;;  %v3543_v62 = vadd.f32 %v10572_v40, %v7662_v36  ;;  %v3537_v2 = vpop.f32.mrb[161].mxu1  ;;  %v10629_v17 = vpop.f32.mrb[163].mxu0  ;;  %7980 = vmatmul.mubr.f32.gmra.mrb[12].mxu0 %v3130_v49 }
 0x5cf   :  { %12010 = vst [vmem:[#allocation58_spill] sm:$0xff] %v10629_v17  ;;  %v3538_v57 = vadd.f32 %v10572_v40, %v3537_v2  ;;  %7982 = vmatprep.mubr.f32.mxu0 %v3131_v38  ;;  %8105 = vmatprep.mubr.f32.mxu1 %v3678_v0  ;;  %v3134_v38 = vmax.f32 %v2924_v35, 0.0  ;;  %v2934_v0 = vadd.f32 %v10572_v40, %v12015_v29 }
 0x5d0   :  { %8106 = vmatmul.mubr.f32.gmra.mrb[224].mxu1 %v3679_v59  ;;  %v3681_v50 = vmax.f32 %v3543_v62, 0.0  ;;  %v3135_v59 = vmax.f32 %v2929_v48, 0.0 }
 0x5d1   :  { %v3680_v44 = vmax.f32 %v3538_v57, 0.0  ;;  %v7665_v45 = vpop.f32.mrb[162].mxu1  ;;  %v10636_v36 = vpop.f32.mrb[164].mxu0  ;;  %v12016_v57 = vld [vmem:[#allocation25_spill] sm:$0xff] }
 0x5d2   :  { %12013 = vst [vmem:[#allocation21_spill] sm:$0xff] %v10636_v36  ;;  %v3553_v49 = vadd.f32 %v10572_v40, %v7665_v45  ;;  %v3547_v17 = vpop.f32.mrb[163].mxu1  ;;  %v10639_v2 = vpop.f32.mrb[165].mxu0  ;;  %7983 = vmatmul.mubr.f32.gmra.mrb[14].mxu0 %v3132_v51  ;;  %v2939_v30 = vadd.f32 %v10572_v40, %v12016_v57 }
 0x5d3   :  { %12014 = vst [vmem:[#allocation23_spill] sm:$0xff] %v10639_v2  ;;  %v3548_v10 = vadd.f32 %v10572_v40, %v3547_v17  ;;  %7985 = vmatprep.mubr.f32.mxu0 %v3133_v25  ;;  %8108 = vmatprep.mubr.f32.mxu1 %v3680_v44  ;;  %v12019_v25 = vld [vmem:[#allocation24_spill] sm:$0xff] }
 0x5d4   :  { %8109 = vmatmul.mubr.f32.gmra.mrb[226].mxu1 %v3681_v50  ;;  %v3683_v36 = vmax.f32 %v3553_v49, 0.0  ;;  %v3136_v50 = vmax.f32 %v2934_v0, 0.0  ;;  %v2944_v48 = vadd.f32 %v10572_v40, %v12019_v25  ;;  %v3137_v44 = vmax.f32 %v2939_v30, 0.0 }
 0x5d5   :  { %v3682_v62 = vmax.f32 %v3548_v10, 0.0  ;;  %v7668_v39 = vpop.f32.mrb[164].mxu1  ;;  %v10646_v45 = vpop.f32.mrb[166].mxu0  ;;  %v12020_v10 = vld [vmem:[#allocation27_spill] sm:$0xff] }
 0x5d6   :  { %12017 = vst [vmem:[#allocation22_spill] sm:$0xff] %v10646_v45  ;;  %v3563_v51 = vadd.f32 %v10572_v40, %v7668_v39  ;;  %v3557_v2 = vpop.f32.mrb[165].mxu1  ;;  %v10649_v17 = vpop.f32.mrb[167].mxu0  ;;  %7986 = vmatmul.mubr.f32.gmra.mrb[16].mxu0 %v3134_v38  ;;  %v2949_v29 = vadd.f32 %v10572_v40, %v12020_v10 }
 0x5d7   :  { %12018 = vst [vmem:[#allocation25_spill] sm:$0xff] %v10649_v17  ;;  %v3558_v35 = vadd.f32 %v10572_v40, %v3557_v2  ;;  %7988 = vmatprep.mubr.f32.mxu0 %v3135_v59  ;;  %8111 = vmatprep.mubr.f32.mxu1 %v3682_v62  ;;  %v12023_v59 = vld [vmem:[#allocation26_spill] sm:$0xff] }
 0x5d8   :  { %8112 = vmatmul.mubr.f32.gmra.mrb[228].mxu1 %v3683_v36  ;;  %v3685_v45 = vmax.f32 %v3563_v51, 0.0  ;;  %v3138_v36 = vmax.f32 %v2944_v48, 0.0  ;;  %v2954_v30 = vadd.f32 %v10572_v40, %v12023_v59  ;;  %v3139_v62 = vmax.f32 %v2949_v29, 0.0 }
 0x5d9   :  { %v3684_v49 = vmax.f32 %v3558_v35, 0.0  ;;  %v7671_v57 = vpop.f32.mrb[166].mxu1  ;;  %v10656_v39 = vpop.f32.mrb[168].mxu0  ;;  %v12024_v35 = vld [vmem:[#allocation29_spill] sm:$0xff] }
 0x5da   :  { %12021 = vst [vmem:[#allocation24_spill] sm:$0xff] %v10656_v39  ;;  %v3573_v38 = vadd.f32 %v10572_v40, %v7671_v57  ;;  %v3567_v17 = vpop.f32.mrb[167].mxu1  ;;  %v10659_v2 = vpop.f32.mrb[169].mxu0  ;;  %7989 = vmatmul.mubr.f32.gmra.mrb[18].mxu0 %v3136_v50  ;;  %v2959_v25 = vadd.f32 %v10572_v40, %v12024_v35 }
 0x5db   :  { %12022 = vst [vmem:[#allocation27_spill] sm:$0xff] %v10659_v2  ;;  %v3568_v0 = vadd.f32 %v10572_v40, %v3567_v17  ;;  %7991 = vmatprep.mubr.f32.mxu0 %v3137_v44  ;;  %8114 = vmatprep.mubr.f32.mxu1 %v3684_v49  ;;  %v12027_v44 = vld [vmem:[#allocation28_spill] sm:$0xff] }
 0x5dc   :  { %8115 = vmatmul.mubr.f32.gmra.mrb[230].mxu1 %v3685_v45  ;;  %v3687_v39 = vmax.f32 %v3573_v38, 0.0  ;;  %v3140_v45 = vmax.f32 %v2954_v30, 0.0  ;;  %v2964_v29 = vadd.f32 %v10572_v40, %v12027_v44  ;;  %v3141_v49 = vmax.f32 %v2959_v25, 0.0 }
 0x5dd   :  { %v3686_v51 = vmax.f32 %v3568_v0, 0.0  ;;  %v7674_v10 = vpop.f32.mrb[168].mxu1  ;;  %v10666_v57 = vpop.f32.mrb[170].mxu0  ;;  %v12028_v0 = vld [vmem:[#allocation31_spill] sm:$0xff] }
 0x5de   :  { %12025 = vst [vmem:[#allocation26_spill] sm:$0xff] %v10666_v57  ;;  %v3583_v50 = vadd.f32 %v10572_v40, %v7674_v10  ;;  %v3577_v2 = vpop.f32.mrb[169].mxu1  ;;  %v10669_v17 = vpop.f32.mrb[171].mxu0  ;;  %7992 = vmatmul.mubr.f32.gmra.mrb[20].mxu0 %v3138_v36  ;;  %v2969_v59 = vadd.f32 %v10572_v40, %v12028_v0 }
 0x5df   :  { %12026 = vst [vmem:[#allocation29_spill] sm:$0xff] %v10669_v17  ;;  %v3578_v48 = vadd.f32 %v10572_v40, %v3577_v2  ;;  %7994 = vmatprep.mubr.f32.mxu0 %v3139_v62  ;;  %8117 = vmatprep.mubr.f32.mxu1 %v3686_v51  ;;  %v12031_v62 = vld [vmem:[#allocation30_spill] sm:$0xff] }
 0x5e0   :  { %8118 = vmatmul.mubr.f32.gmra.mrb[232].mxu1 %v3687_v39  ;;  %v3689_v57 = vmax.f32 %v3583_v50, 0.0  ;;  %v3142_v39 = vmax.f32 %v2964_v29, 0.0  ;;  %v2974_v25 = vadd.f32 %v10572_v40, %v12031_v62  ;;  %v3143_v51 = vmax.f32 %v2969_v59, 0.0 }
 0x5e1   :  { %v3688_v38 = vmax.f32 %v3578_v48, 0.0  ;;  %v7677_v35 = vpop.f32.mrb[170].mxu1  ;;  %v10676_v10 = vpop.f32.mrb[172].mxu0  ;;  %v12032_v48 = vld [vmem:[#allocation33_spill] sm:$0xff] }
 0x5e2   :  { %12029 = vst [vmem:[#allocation28_spill] sm:$0xff] %v10676_v10  ;;  %v3593_v36 = vadd.f32 %v10572_v40, %v7677_v35  ;;  %v3587_v17 = vpop.f32.mrb[171].mxu1  ;;  %v10679_v2 = vpop.f32.mrb[173].mxu0  ;;  %7995 = vmatmul.mubr.f32.gmra.mrb[22].mxu0 %v3140_v45  ;;  %v2979_v44 = vadd.f32 %v10572_v40, %v12032_v48 }
 0x5e3   :  { %12030 = vst [vmem:[#allocation31_spill] sm:$0xff] %v10679_v2  ;;  %v3588_v30 = vadd.f32 %v10572_v40, %v3587_v17  ;;  %7997 = vmatprep.mubr.f32.mxu0 %v3141_v49  ;;  %8120 = vmatprep.mubr.f32.mxu1 %v3688_v38  ;;  %v12035_v49 = vld [vmem:[#allocation32_spill] sm:$0xff] }
 0x5e4   :  { %8121 = vmatmul.mubr.f32.gmra.mrb[234].mxu1 %v3689_v57  ;;  %v3691_v10 = vmax.f32 %v3593_v36, 0.0  ;;  %v3144_v57 = vmax.f32 %v2974_v25, 0.0  ;;  %v2984_v59 = vadd.f32 %v10572_v40, %v12035_v49  ;;  %v3145_v38 = vmax.f32 %v2979_v44, 0.0 }
 0x5e5   :  { %v3690_v50 = vmax.f32 %v3588_v30, 0.0  ;;  %v7680_v0 = vpop.f32.mrb[172].mxu1  ;;  %v10686_v35 = vpop.f32.mrb[174].mxu0  ;;  %v12036_v30 = vld [vmem:[#allocation35_spill] sm:$0xff] }
 0x5e6   :  { %12033 = vst [vmem:[#allocation30_spill] sm:$0xff] %v10686_v35  ;;  %v3603_v45 = vadd.f32 %v10572_v40, %v7680_v0  ;;  %v3597_v2 = vpop.f32.mrb[173].mxu1  ;;  %v10689_v17 = vpop.f32.mrb[175].mxu0  ;;  %7998 = vmatmul.mubr.f32.gmra.mrb[24].mxu0 %v3142_v39  ;;  %v2989_v62 = vadd.f32 %v10572_v40, %v12036_v30 }
 0x5e7   :  { %12034 = vst [vmem:[#allocation33_spill] sm:$0xff] %v10689_v17  ;;  %v3598_v29 = vadd.f32 %v10572_v40, %v3597_v2  ;;  %8000 = vmatprep.mubr.f32.mxu0 %v3143_v51  ;;  %8123 = vmatprep.mubr.f32.mxu1 %v3690_v50  ;;  %v12039_v51 = vld [vmem:[#allocation34_spill] sm:$0xff] }
 0x5e8   :  { %8124 = vmatmul.mubr.f32.gmra.mrb[236].mxu1 %v3691_v10  ;;  %v3693_v35 = vmax.f32 %v3603_v45, 0.0  ;;  %v3146_v10 = vmax.f32 %v2984_v59, 0.0  ;;  %v2994_v44 = vadd.f32 %v10572_v40, %v12039_v51  ;;  %v3147_v50 = vmax.f32 %v2989_v62, 0.0 }
 0x5e9   :  { %v3692_v36 = vmax.f32 %v3598_v29, 0.0  ;;  %v7683_v48 = vpop.f32.mrb[174].mxu1  ;;  %v10696_v0 = vpop.f32.mrb[176].mxu0  ;;  %v12040_v29 = vld [vmem:[#allocation37_spill] sm:$0xff] }
 0x5ea   :  { %12037 = vst [vmem:[#allocation32_spill] sm:$0xff] %v10696_v0  ;;  %v3613_v39 = vadd.f32 %v10572_v40, %v7683_v48  ;;  %v3607_v17 = vpop.f32.mrb[175].mxu1  ;;  %v10699_v2 = vpop.f32.mrb[177].mxu0  ;;  %8001 = vmatmul.mubr.f32.gmra.mrb[26].mxu0 %v3144_v57  ;;  %v2999_v49 = vadd.f32 %v10572_v40, %v12040_v29 }
 0x5eb   :  { %12038 = vst [vmem:[#allocation35_spill] sm:$0xff] %v10699_v2  ;;  %v3608_v25 = vadd.f32 %v10572_v40, %v3607_v17  ;;  %8003 = vmatprep.mubr.f32.mxu0 %v3145_v38  ;;  %8126 = vmatprep.mubr.f32.mxu1 %v3692_v36  ;;  %v12043_v38 = vld [vmem:[#allocation36_spill] sm:$0xff] }
 0x5ec   :  { %8127 = vmatmul.mubr.f32.gmra.mrb[238].mxu1 %v3693_v35  ;;  %v3695_v0 = vmax.f32 %v3613_v39, 0.0  ;;  %v3148_v35 = vmax.f32 %v2994_v44, 0.0  ;;  %v3004_v62 = vadd.f32 %v10572_v40, %v12043_v38  ;;  %v3149_v36 = vmax.f32 %v2999_v49, 0.0  ;;  %v12048_v38 = vld [vmem:[#allocation41_spill] sm:$0xff] }
 0x5ed   :  { %v3694_v45 = vmax.f32 %v3608_v25, 0.0  ;;  %v7686_v30 = vpop.f32.mrb[176].mxu1  ;;  %v10706_v48 = vpop.f32.mrb[178].mxu0  ;;  %v12044_v25 = vld [vmem:[#allocation39_spill] sm:$0xff]  ;;  %v3847_v44 = vadd.f32 %v10572_v40, %v10404_v61 }
 0x5ee   :  { %12041 = vst [vmem:[#allocation34_spill] sm:$0xff] %v10706_v48  ;;  %v3623_v57 = vadd.f32 %v10572_v40, %v7686_v30  ;;  %v3617_v2 = vpop.f32.mrb[177].mxu1  ;;  %v10709_v17 = vpop.f32.mrb[179].mxu0  ;;  %8004 = vmatmul.mubr.f32.gmra.mrb[28].mxu0 %v3146_v10  ;;  %v3009_v51 = vadd.f32 %v10572_v40, %v12044_v25  ;;  %v3150_v49 = vmax.f32 %v3004_v62, 0.0  ;;  %v3857_v62 = vadd.f32 %v10572_v40, %v10414_v8 }
 0x5ef   :  { %12042 = vst [vmem:[#allocation37_spill] sm:$0xff] %v10709_v17  ;;  %v3618_v59 = vadd.f32 %v10572_v40, %v3617_v2  ;;  %8006 = vmatprep.mubr.f32.mxu0 %v3147_v50  ;;  %8129 = vmatprep.mubr.f32.mxu1 %v3694_v45  ;;  %v10727_v50 = vld [vmem:[%s11935_s12] ss:$0 sm:$0xff]  ;;  %v12047_v45 = vld [vmem:[#allocation38_spill] sm:$0xff] }
 0x5f0   :  { %8130 = vmatmul.mubr.f32.gmra.mrb[240].mxu1 %v3695_v0  ;;  %v3697_v48 = vmax.f32 %v3623_v57, 0.0  ;;  %v3014_v57 = vadd.f32 %v10572_v40, %v12047_v45  ;;  %v12050_v45 = vld [vmem:[#allocation40_spill] sm:$0xff] }
 0x5f1   :  { %v3696_v39 = vmax.f32 %v3618_v59, 0.0  ;;  %v7689_v29 = vpop.f32.mrb[178].mxu1  ;;  %v10716_v30 = vpop.f32.mrb[180].mxu0  ;;  %v3151_v59 = vmax.f32 %v3009_v51, 0.0 }
 0x5f2   :  { %12045 = vst [vmem:[#allocation36_spill] sm:$0xff] %v10716_v30  ;;  %v3633_v10 = vadd.f32 %v10572_v40, %v7689_v29  ;;  %v3627_v17 = vpop.f32.mrb[179].mxu1  ;;  %v10719_v2 = vpop.f32.mrb[181].mxu0  ;;  %8007 = vmatmul.mubr.f32.gmra.mrb[30].mxu0 %v3148_v35  ;;  %v3019_v35 = vadd.f32 %v10572_v40, %v12048_v38  ;;  %v12049_v29 = vld [vmem:[#allocation56_spill] sm:$0xff]  ;;  %v3152_v51 = vmax.f32 %v3014_v57, 0.0  ;;  %v12051_v38 = vld [vmem:[#allocation43_spill] sm:$0xff] }
 0x5f3   :  { %12046 = vst [vmem:[#allocation39_spill] sm:$0xff] %v10719_v2  ;;  %v3628_v0 = vadd.f32 %v10572_v40, %v3627_v17  ;;  %8009 = vmatprep.mubr.f32.mxu0 %v3149_v36  ;;  %8132 = vmatprep.mubr.f32.mxu1 %v3696_v39  ;;  %v3852_v17 = vadd.f32 %v10572_v40, %v12049_v29  ;;  %v4165_v2 = vmax.f32 %v3847_v44, 0.0 }
 0x5f4   :  { %8133 = vmatmul.mubr.f32.gmra.mrb[242].mxu1 %v3697_v48  ;;  %v3699_v36 = vmax.f32 %v3633_v10, 0.0  ;;  %v3153_v10 = vmax.f32 %v3019_v35, 0.0  ;;  %v3029_v44 = vadd.f32 %v10572_v40, %v12051_v38  ;;  %v3867_v35 = vadd.f32 %v10572_v40, %v10424_v9 }
 0x5f5   :  { %v3698_v25 = vmax.f32 %v3628_v0, 0.0  ;;  %v7852_v61 = vpop.f32.mrb[182].mxu0  ;;  %v3024_v0 = vadd.f32 %v10572_v40, %v12050_v45 }
 0x5f6   :  { %v4644_v39 = vadd.f32 %v7852_v61, %v10727_v50  ;;  %v4638_v30 = vpop.f32.mrb[183].mxu0  ;;  %8010 = vmatmul.mubr.f32.gmra.mrb[32].mxu0 %v3150_v49  ;;  %v3862_v49 = vadd.f32 %v10572_v40, %v10411_v63  ;;  %v3155_v63 = vmax.f32 %v3029_v44, 0.0 }
 0x5f7   :  { %v4639_v48 = vadd.f32 %v10727_v50, %v4638_v30  ;;  %8012 = vmatprep.mubr.f32.mxu0 %v3151_v59  ;;  %8135 = vmatprep.mubr.f32.mxu1 %v3698_v25  ;;  %v4166_v30 = vmax.f32 %v3852_v17, 0.0  ;;  %v4167_v25 = vmax.f32 %v3857_v62, 0.0  ;;  %v3154_v29 = vmax.f32 %v3024_v0, 0.0 }
 0x5f8   :  { %5918 = vst [vmem:[%s11936_s13 + $0x8] sm:$0xff] %v4644_v39  ;;  %8136 = vmatmul.mubr.f32.gmra.mrb[244].mxu1 %v3699_v36  ;;  %v12052_v36 = vld [vmem:[#allocation42_spill] sm:$0xff]  ;;  %v4168_v62 = vmax.f32 %v3862_v49, 0.0  ;;  %v4169_v0 = vmax.f32 %v3867_v35, 0.0  ;;  %v12055_v49 = vld [vmem:[#allocation47_spill] sm:$0xff] }
 0x5f9   :  { %5917 = vst [vmem:[%s11936_s13] sm:$0xff] %v4639_v48  ;;  %v7855_v8 = vpop.f32.mrb[184].mxu0  ;;  %8138 = vmatprep.mubr.f32.mxu1 %v4165_v2  ;;  %v3034_v39 = vadd.f32 %v10572_v40, %v12052_v36  ;;  %v12053_v2 = vld [vmem:[#allocation45_spill] sm:$0xff]  ;;  %v3872_v48 = vadd.f32 %v10572_v40, %v10421_v60  ;;  %v3887_v36 = vadd.f32 %v10572_v40, %v10444_v22 }
 0x5fa   :  { %v4654_v57 = vadd.f32 %v7855_v8, %v10727_v50  ;;  %v4648_v59 = vpop.f32.mrb[185].mxu0  ;;  %8013 = vmatmul.mubr.f32.gmra.mrb[34].mxu0 %v3152_v51  ;;  %v3039_v17 = vadd.f32 %v10572_v40, %v12053_v2  ;;  %v12054_v8 = vld [vmem:[#allocation44_spill] sm:$0xff]  ;;  %v12056_v2 = vld [vmem:[#allocation46_spill] sm:$0xff] }
 0x5fb   :  { %v4649_v61 = vadd.f32 %v10727_v50, %v4648_v59  ;;  %8015 = vmatprep.mubr.f32.mxu0 %v3153_v10  ;;  %v3877_v10 = vadd.f32 %v10572_v40, %v10434_v54  ;;  %v3156_v44 = vmax.f32 %v3034_v39, 0.0  ;;  %v4170_v59 = vmax.f32 %v3872_v48, 0.0 }
 0x5fc   :  { %5920 = vst [vmem:[%s11936_s13 + $0x18] sm:$0xff] %v4654_v57  ;;  %8139 = vmatmul.mubr.f32.gmra.mrb[246].mxu1 %v4166_v30  ;;  %v3044_v30 = vadd.f32 %v10572_v40, %v12054_v8  ;;  %v3157_v60 = vmax.f32 %v3039_v17, 0.0  ;;  %v3049_v57 = vadd.f32 %v10572_v40, %v12055_v49  ;;  %v3054_v17 = vadd.f32 %v10572_v40, %v12056_v2  ;;  %v12059_v49 = vld [vmem:[#allocation51_spill] sm:$0xff] }
 0x5fd   :  { %5919 = vst [vmem:[%s11936_s13 + $0x10] sm:$0xff] %v4649_v61  ;;  %v7858_v9 = vpop.f32.mrb[186].mxu0  ;;  %8141 = vmatprep.mubr.f32.mxu1 %v4167_v25  ;;  %v3882_v25 = vadd.f32 %v10572_v40, %v10431_v32 }
 0x5fe   :  { %v4664_v51 = vadd.f32 %v7858_v9, %v10727_v50  ;;  %v4658_v45 = vpop.f32.mrb[187].mxu0  ;;  %8016 = vmatmul.mubr.f32.gmra.mrb[36].mxu0 %v3154_v29  ;;  %v4171_v29 = vmax.f32 %v3877_v10, 0.0  ;;  %v3159_v32 = vmax.f32 %v3049_v57, 0.0  ;;  %v12057_v9 = vld [vmem:[#allocation49_spill] sm:$0xff]  ;;  %v4173_v10 = vmax.f32 %v3887_v36, 0.0 }
 0x5ff   :  { %v4659_v38 = vadd.f32 %v10727_v50, %v4658_v45  ;;  %8018 = vmatprep.mubr.f32.mxu0 %v3155_v63  ;;  %v3158_v63 = vmax.f32 %v3044_v30, 0.0  ;;  %v4172_v48 = vmax.f32 %v3882_v25, 0.0  ;;  %v3160_v8 = vmax.f32 %v3054_v17, 0.0  ;;  %v12058_v30 = vld [vmem:[#allocation48_spill] sm:$0xff]  ;;  %v12061_v17 = vld [vmem:[#allocation53_spill] sm:$0xff] }
 0x600   :  { %5922 = vst [vmem:[%s11936_s13 + $0x28] sm:$0xff] %v4664_v51  ;;  %8142 = vmatmul.mubr.f32.gmra.mrb[248].mxu1 %v4168_v62  ;;  %v3059_v62 = vadd.f32 %v10572_v40, %v12057_v9  ;;  %v3892_v51 = vadd.f32 %v10572_v40, %v10441_v46  ;;  %v3069_v57 = vadd.f32 %v10572_v40, %v12059_v49 }
 0x601   :  { %5921 = vst [vmem:[%s11936_s13 + $0x20] sm:$0xff] %v4659_v38  ;;  %v7861_v54 = vpop.f32.mrb[188].mxu0  ;;  %8144 = vmatprep.mubr.f32.mxu1 %v4169_v0  ;;  %v3897_v38 = vadd.f32 %v10572_v40, %v10454_v21 }
 0x602   :  { %v4674_v35 = vadd.f32 %v7861_v54, %v10727_v50  ;;  %v4668_v61 = vpop.f32.mrb[189].mxu0  ;;  %8019 = vmatmul.mubr.f32.gmra.mrb[38].mxu0 %v3156_v44  ;;  %v3161_v46 = vmax.f32 %v3059_v62, 0.0  ;;  %v4174_v54 = vmax.f32 %v3892_v51, 0.0  ;;  %v3912_v62 = vadd.f32 %v10572_v40, %v10461_v20 }
 0x603   :  { %v4669_v39 = vadd.f32 %v10727_v50, %v4668_v61  ;;  %8021 = vmatprep.mubr.f32.mxu0 %v3157_v60  ;;  %v3064_v60 = vadd.f32 %v10572_v40, %v12058_v30  ;;  %v4175_v61 = vmax.f32 %v3897_v38, 0.0  ;;  %v12062_v38 = vld [vmem:[#allocation52_spill] sm:$0xff] }
 0x604   :  { %5924 = vst [vmem:[%s11936_s13 + $0x38] sm:$0xff] %v4674_v35  ;;  %8145 = vmatmul.mubr.f32.gmra.mrb[250].mxu1 %v4170_v59  ;;  %v3902_v59 = vadd.f32 %v10572_v40, %v10451_v14  ;;  %v3163_v14 = vmax.f32 %v3069_v57, 0.0 }
 0x605   :  { %5923 = vst [vmem:[%s11936_s13 + $0x30] sm:$0xff] %v4669_v39  ;;  %v7864_v22 = vpop.f32.mrb[190].mxu0  ;;  %8147 = vmatprep.mubr.f32.mxu1 %v4171_v29  ;;  %v3907_v29 = vadd.f32 %v10572_v40, %v10464_v47  ;;  %v3162_v39 = vmax.f32 %v3064_v60, 0.0  ;;  %v4178_v60 = vmax.f32 %v3912_v62, 0.0 }
 0x606   :  { %v4684_v45 = vadd.f32 %v7864_v22, %v10727_v50  ;;  %v4678_v0 = vpop.f32.mrb[191].mxu0  ;;  %8022 = vmatmul.mubr.f32.gmra.mrb[40].mxu0 %v3158_v63  ;;  %v12060_v63 = vld [vmem:[#allocation50_spill] sm:$0xff]  ;;  %v4176_v9 = vmax.f32 %v3902_v59, 0.0 }
 0x607   :  { %v4679_v44 = vadd.f32 %v10727_v50, %v4678_v0  ;;  %8024 = vmatprep.mubr.f32.mxu0 %v3159_v32  ;;  %v3074_v2 = vadd.f32 %v10572_v40, %v12060_v63  ;;  %v3079_v32 = vadd.f32 %v10572_v40, %v12061_v17  ;;  %v4177_v51 = vmax.f32 %v3907_v29, 0.0 }
 0x608   :  { %5926 = vst [vmem:[%s11936_s13 + $0x48] sm:$0xff] %v4684_v45  ;;  %8148 = vmatmul.mubr.f32.gmra.mrb[252].mxu1 %v4172_v48  ;;  %v3917_v45 = vadd.f32 %v10572_v40, %v10474_v4 }
 0x609   :  { %5925 = vst [vmem:[%s11936_s13 + $0x40] sm:$0xff] %v4679_v44  ;;  %v7867_v21 = vpop.f32.mrb[192].mxu0  ;;  %8150 = vmatprep.mubr.f32.mxu1 %v4173_v10  ;;  %v3164_v10 = vmax.f32 %v3074_v2, 0.0  ;;  %v3084_v44 = vadd.f32 %v10572_v40, %v12062_v38  ;;  %v3165_v20 = vmax.f32 %v3079_v32, 0.0 }
 0x60a   :  { %v4694_v25 = vadd.f32 %v7867_v21, %v10727_v50  ;;  %v4688_v35 = vpop.f32.mrb[193].mxu0  ;;  %8025 = vmatmul.mubr.f32.gmra.mrb[42].mxu0 %v3160_v8  ;;  %v12063_v8 = vld [vmem:[#allocation55_spill] sm:$0xff]  ;;  %v4179_v21 = vmax.f32 %v3917_v45, 0.0 }
 0x60b   :  { %v4689_v36 = vadd.f32 %v10727_v50, %v4688_v35  ;;  %8027 = vmatprep.mubr.f32.mxu0 %v3161_v46  ;;  %v3089_v30 = vadd.f32 %v10572_v40, %v12063_v8  ;;  %v3922_v46 = vadd.f32 %v10572_v40, %v10471_v41  ;;  %v12064_v35 = vld [vmem:[#allocation54_spill] sm:$0xff] }
 0x60c   :  { %5928 = vst [vmem:[%s11936_s13 + $0x58] sm:$0xff] %v4694_v25  ;;  %8151 = vmatmul.mubr.f32.gmra.mrb[254].mxu1 %v4174_v54  ;;  %v3927_v54 = vadd.f32 %v10572_v40, %v10484_v7  ;;  %v3166_v25 = vmax.f32 %v3084_v44, 0.0  ;;  %v3957_v44 = vadd.f32 %v10572_v40, %v10514_v1 }
 0x60d   :  { %5927 = vst [vmem:[%s11936_s13 + $0x50] sm:$0xff] %v4689_v36  ;;  %v7870_v47 = vpop.f32.mrb[194].mxu0  ;;  %8153 = vmatprep.mubr.f32.mxu1 %v4175_v61  ;;  %v3094_v61 = vadd.f32 %v10572_v40, %v12064_v35  ;;  %v3167_v41 = vmax.f32 %v3089_v30, 0.0  ;;  %v4180_v7 = vmax.f32 %v3922_v46, 0.0  ;;  %v3932_v36 = vadd.f32 %v10572_v40, %v10481_v37 }
 0x60e   :  { %v4704_v22 = vadd.f32 %v7870_v47, %v10727_v50  ;;  %v4698_v48 = vpop.f32.mrb[195].mxu0  ;;  %8028 = vmatmul.mubr.f32.gmra.mrb[44].mxu0 %v3162_v39  ;;  %v4181_v2 = vmax.f32 %v3927_v54, 0.0  ;;  %v3962_v30 = vadd.f32 %v10572_v40, %v10511_v6  ;;  %v3967_v46 = vadd.f32 %v10572_v40, %v10524_v58 }
 0x60f   :  { %v4699_v0 = vadd.f32 %v10727_v50, %v4698_v48  ;;  %8030 = vmatprep.mubr.f32.mxu0 %v3163_v14  ;;  %v3937_v14 = vadd.f32 %v10572_v40, %v10494_v5  ;;  %v3168_v32 = vmax.f32 %v3094_v61, 0.0  ;;  %v4182_v47 = vmax.f32 %v3932_v36, 0.0 }
 0x610   :  { %5930 = vst [vmem:[%s11936_s13 + $0x68] sm:$0xff] %v4704_v22  ;;  %8154 = vmatmul.mubr.f32.gmra.mrb[0].mxu1 %v4176_v9  ;;  %v3942_v9 = vadd.f32 %v10572_v40, %v10491_v13  ;;  %v3947_v48 = vadd.f32 %v10572_v40, %v10504_v23  ;;  %v4188_v6 = vmax.f32 %v3962_v30, 0.0  ;;  %v3987_v36 = vadd.f32 %v10572_v40, %v10544_v15 }
 0x611   :  { %5929 = vst [vmem:[%s11936_s13 + $0x60] sm:$0xff] %v4699_v0  ;;  %v7873_v4 = vpop.f32.mrb[196].mxu0  ;;  %8156 = vmatprep.mubr.f32.mxu1 %v4177_v51  ;;  %v4183_v22 = vmax.f32 %v3937_v14, 0.0  ;;  %v3952_v0 = vadd.f32 %v10572_v40, %v10501_v55 }
 0x612   :  { %v4714_v49 = vadd.f32 %v7873_v4, %v10727_v50  ;;  %v4708_v57 = vpop.f32.mrb[197].mxu0  ;;  %8031 = vmatmul.mubr.f32.gmra.mrb[46].mxu0 %v3164_v10  ;;  %v4184_v45 = vmax.f32 %v3942_v9, 0.0  ;;  %v4185_v38 = vmax.f32 %v3947_v48, 0.0  ;;  %v4002_v9 = vadd.f32 %v10572_v40, %v10551_v27 }
 0x613   :  { %v4709_v59 = vadd.f32 %v10727_v50, %v4708_v57  ;;  %8033 = vmatprep.mubr.f32.mxu0 %v3165_v20  ;;  %v4186_v55 = vmax.f32 %v3952_v0, 0.0 }
 0x614   :  { %5932 = vst [vmem:[%s11936_s13 + $0x78] sm:$0xff] %v4714_v49  ;;  %8157 = vmatmul.mubr.f32.gmra.mrb[2].mxu1 %v4178_v60  ;;  %v4187_v60 = vmax.f32 %v3957_v44, 0.0  ;;  %v4196_v27 = vmax.f32 %v4002_v9, 0.0  ;;  %v4022_v44 = vadd.f32 %v10572_v40, %v10576_v53 }
 0x615   :  { %5931 = vst [vmem:[%s11936_s13 + $0x70] sm:$0xff] %v4709_v59  ;;  %v7876_v29 = vpop.f32.mrb[198].mxu0  ;;  %8159 = vmatprep.mubr.f32.mxu1 %v4179_v21  ;;  %v3972_v21 = vadd.f32 %v10572_v40, %v10521_v19  ;;  %v4189_v59 = vmax.f32 %v3967_v46, 0.0 }
 0x616   :  { %v4724_v39 = vadd.f32 %v7876_v29, %v10727_v50  ;;  %v4718_v63 = vpop.f32.mrb[199].mxu0  ;;  %8034 = vmatmul.mubr.f32.gmra.mrb[48].mxu0 %v3166_v25  ;;  %v3977_v25 = vadd.f32 %v10572_v40, %v10534_v12  ;;  %v4200_v53 = vmax.f32 %v4022_v44, 0.0 }
 0x617   :  { %v4719_v17 = vadd.f32 %v10727_v50, %v4718_v63  ;;  %8036 = vmatprep.mubr.f32.mxu0 %v3167_v41  ;;  %v4190_v19 = vmax.f32 %v3972_v21, 0.0  ;;  %v3982_v41 = vadd.f32 %v10572_v40, %v10531_v43 }
 0x618   :  { %5934 = vst [vmem:[%s11936_s13 + $0x88] sm:$0xff] %v4724_v39  ;;  %8160 = vmatmul.mubr.f32.gmra.mrb[4].mxu1 %v4180_v7  ;;  %v4191_v7 = vmax.f32 %v3977_v25, 0.0 }
 0x619   :  { %5933 = vst [vmem:[%s11936_s13 + $0x80] sm:$0xff] %v4719_v17  ;;  %v7879_v37 = vpop.f32.mrb[200].mxu0  ;;  %8162 = vmatprep.mubr.f32.mxu1 %v4181_v2  ;;  %v4192_v43 = vmax.f32 %v3982_v41, 0.0  ;;  %v3992_v2 = vadd.f32 %v10572_v40, %v10541_v26  ;;  %v4193_v17 = vmax.f32 %v3987_v36, 0.0 }
 0x61a   :  { %v4734_v5 = vadd.f32 %v7879_v37, %v10727_v50  ;;  %v4728_v62 = vpop.f32.mrb[201].mxu0  ;;  %8037 = vmatmul.mubr.f32.gmra.mrb[50].mxu0 %v3168_v32  ;;  %v3997_v32 = vadd.f32 %v10572_v40, %v10554_v3 }
 0x61b   :  { %v4729_v51 = vadd.f32 %v10727_v50, %v4728_v62  ;;  %v4194_v26 = vmax.f32 %v3992_v2, 0.0 }
 0x61c   :  { %5936 = vst [vmem:[%s11936_s13 + $0x98] sm:$0xff] %v4734_v5  ;;  %8163 = vmatmul.mubr.f32.gmra.mrb[6].mxu1 %v4182_v47  ;;  %v4195_v62 = vmax.f32 %v3997_v32, 0.0 }
 0x61d   :  { %5935 = vst [vmem:[%s11936_s13 + $0x90] sm:$0xff] %v4729_v51  ;;  %v7882_v13 = vpop.f32.mrb[202].mxu0  ;;  %8165 = vmatprep.mubr.f32.mxu1 %v4183_v22  ;;  %v4007_v22 = vadd.f32 %v10572_v40, %v10564_v24 }
 0x61e   :  { %v4744_v10 = vadd.f32 %v7882_v13, %v10727_v50  ;;  %v4738_v23 = vpop.f32.mrb[203].mxu0  ;;  %v4012_v13 = vadd.f32 %v10572_v40, %v10561_v18 }
 0x61f   :  { %v4739_v20 = vadd.f32 %v10727_v50, %v4738_v23  ;;  %v4197_v0 = vmax.f32 %v4007_v22, 0.0  ;;  %v12067_v22 = vld [vmem:[#allocation23_spill] sm:$0xff] }
 0x620   :  { %5938 = vst [vmem:[%s11936_s13 + $0xa8] sm:$0xff] %v4744_v10  ;;  %8166 = vmatmul.mubr.f32.gmra.mrb[8].mxu1 %v4184_v45  ;;  %v4017_v10 = vadd.f32 %v10572_v40, %v10579_v52  ;;  %v4198_v18 = vmax.f32 %v4012_v13, 0.0 }
 0x621   :  { %5937 = vst [vmem:[%s11936_s13 + $0xa0] sm:$0xff] %v4739_v20  ;;  %v7885_v8 = vpop.f32.mrb[204].mxu0  ;;  %8168 = vmatprep.mubr.f32.mxu1 %v4185_v38 }
 0x622   :  { %v4754_v4 = vadd.f32 %v7885_v8, %v10727_v50  ;;  %v4748_v1 = vpop.f32.mrb[205].mxu0  ;;  %v4199_v8 = vmax.f32 %v4017_v10, 0.0 }
 0x623   :  { %v4749_v49 = vadd.f32 %v10727_v50, %v4748_v1  ;;  %v10982_v1 = vld [vmem:[%s11933_s10] ss:$0 sm:$0xff] }
 0x624   :  { %5940 = vst [vmem:[%s11936_s13 + $0xb8] sm:$0xff] %v4754_v4  ;;  %8169 = vmatmul.mubr.f32.gmra.mrb[10].mxu1 %v4186_v55  ;;  %v4027_v55 = vadd.f32 %v10572_v40, %v10589_v34  ;;  %v4032_v40 = vadd.f32 %v10982_v1, %v10586_v33  ;;  %v4042_v21 = vadd.f32 %v10982_v1, %v10596_v42 }
 0x625   :  { %5939 = vst [vmem:[%s11936_s13 + $0xb0] sm:$0xff] %v4749_v49  ;;  %v7888_v57 = vpop.f32.mrb[206].mxu0  ;;  %8171 = vmatprep.mubr.f32.mxu1 %v4187_v60  ;;  %v4037_v49 = vadd.f32 %v10982_v1, %v10599_v11  ;;  %v4062_v36 = vadd.f32 %v10982_v1, %v10616_v16 }
 0x626   :  { %v4764_v54 = vadd.f32 %v7888_v57, %v10727_v50  ;;  %v4758_v58 = vpop.f32.mrb[207].mxu0  ;;  %v4201_v46 = vmax.f32 %v4027_v55, 0.0  ;;  %v4202_v33 = vmax.f32 %v4032_v40, 0.0  ;;  %v4204_v42 = vmax.f32 %v4042_v21, 0.0  ;;  %v12071_v21 = vld [vmem:[#allocation27_spill] sm:$0xff] }
 0x627   :  { %v4759_v35 = vadd.f32 %v10727_v50, %v4758_v58  ;;  %v4203_v58 = vmax.f32 %v4037_v49, 0.0 }
 0x628   :  { %5942 = vst [vmem:[%s11936_s13 + $0xc8] sm:$0xff] %v4764_v54  ;;  %8172 = vmatmul.mubr.f32.gmra.mrb[12].mxu1 %v4188_v6 }
 0x629   :  { %5941 = vst [vmem:[%s11936_s13 + $0xc0] sm:$0xff] %v4759_v35  ;;  %v7891_v61 = vpop.f32.mrb[208].mxu0  ;;  %8174 = vmatprep.mubr.f32.mxu1 %v4189_v59  ;;  %v4047_v59 = vadd.f32 %v10982_v1, %v10609_v31 }
 0x62a   :  { %v4774_v29 = vadd.f32 %v7891_v61, %v10727_v50  ;;  %v4768_v12 = vpop.f32.mrb[209].mxu0  ;;  %v4052_v61 = vadd.f32 %v10982_v1, %v10606_v56 }
 0x62b   :  { %v4769_v39 = vadd.f32 %v10727_v50, %v4768_v12  ;;  %v4205_v41 = vmax.f32 %v4047_v59, 0.0 }
 0x62c   :  { %5944 = vst [vmem:[%s11936_s13 + $0xd8] sm:$0xff] %v4774_v29  ;;  %8175 = vmatmul.mubr.f32.gmra.mrb[14].mxu1 %v4190_v19  ;;  %v4057_v29 = vadd.f32 %v10982_v1, %v10619_v28  ;;  %v4206_v56 = vmax.f32 %v4052_v61, 0.0 }
 0x62d   :  { %5943 = vst [vmem:[%s11936_s13 + $0xd0] sm:$0xff] %v4769_v39  ;;  %v7894_v63 = vpop.f32.mrb[210].mxu0  ;;  %8177 = vmatprep.mubr.f32.mxu1 %v4191_v7 }
 0x62e   :  { %v4784_v14 = vadd.f32 %v7894_v63, %v10727_v50  ;;  %v4778_v15 = vpop.f32.mrb[211].mxu0  ;;  %v4207_v63 = vmax.f32 %v4057_v29, 0.0 }
 0x62f   :  { %v4779_v37 = vadd.f32 %v10727_v50, %v4778_v15 }
 0x630   :  { %5946 = vst [vmem:[%s11936_s13 + $0xe8] sm:$0xff] %v4784_v14  ;;  %8178 = vmatmul.mubr.f32.gmra.mrb[16].mxu1 %v4192_v43  ;;  %v12065_v43 = vld [vmem:[#allocation58_spill] sm:$0xff] }
 0x631   :  { %5945 = vst [vmem:[%s11936_s13 + $0xe0] sm:$0xff] %v4779_v37  ;;  %v7897_v47 = vpop.f32.mrb[212].mxu0  ;;  %8180 = vmatprep.mubr.f32.mxu1 %v4193_v17  ;;  %v4067_v2 = vadd.f32 %v10982_v1, %v12065_v43 }
 0x632   :  { %v4794_v5 = vadd.f32 %v7897_v47, %v10727_v50  ;;  %v4788_v3 = vpop.f32.mrb[213].mxu0  ;;  %v4208_v47 = vmax.f32 %v4062_v36, 0.0 }
 0x633   :  { %v4789_v48 = vadd.f32 %v10727_v50, %v4788_v3 }
 0x634   :  { %5948 = vst [vmem:[%s11936_s13 + $0xf8] sm:$0xff] %v4794_v5  ;;  %8181 = vmatmul.mubr.f32.gmra.mrb[18].mxu1 %v4194_v26  ;;  %v12066_v26 = vld [vmem:[#allocation57_spill] sm:$0xff] }
 0x635   :  { %5947 = vst [vmem:[%s11936_s13 + $0xf0] sm:$0xff] %v4789_v48  ;;  %v7900_v51 = vpop.f32.mrb[214].mxu0  ;;  %8183 = vmatprep.mubr.f32.mxu1 %v4195_v62  ;;  %v4072_v9 = vadd.f32 %v10982_v1, %v12066_v26  ;;  %v4209_v62 = vmax.f32 %v4067_v2, 0.0  ;;  %v4077_v48 = vadd.f32 %v10982_v1, %v12067_v22 }
 0x636   :  { %v4804_v45 = vadd.f32 %v7900_v51, %v10727_v50  ;;  %v4798_v24 = vpop.f32.mrb[215].mxu0 }
 0x637   :  { %v4799_v23 = vadd.f32 %v10727_v50, %v4798_v24  ;;  %v4210_v10 = vmax.f32 %v4072_v9, 0.0 }
 0x638   :  { %5950 = vst [vmem:[%s11936_s13 + $0x108] sm:$0xff] %v4804_v45  ;;  %8184 = vmatmul.mubr.f32.gmra.mrb[20].mxu1 %v4196_v27 }
 0x639   :  { %5949 = vst [vmem:[%s11936_s13 + $0x100] sm:$0xff] %v4799_v23  ;;  %v7903_v38 = vpop.f32.mrb[216].mxu0  ;;  %8186 = vmatprep.mubr.f32.mxu1 %v4197_v0  ;;  %v12068_v23 = vld [vmem:[#allocation21_spill] sm:$0xff] }
 0x63a   :  { %v4814_v20 = vadd.f32 %v7903_v38, %v10727_v50  ;;  %v4808_v52 = vpop.f32.mrb[217].mxu0  ;;  %v4082_v38 = vadd.f32 %v10982_v1, %v12068_v23 }
 0x63b   :  { %v4809_v30 = vadd.f32 %v10727_v50, %v4808_v52  ;;  %v12069_v52 = vld [vmem:[#allocation25_spill] sm:$0xff] }
 0x63c   :  { %5952 = vst [vmem:[%s11936_s13 + $0x118] sm:$0xff] %v4814_v20  ;;  %8187 = vmatmul.mubr.f32.gmra.mrb[22].mxu1 %v4198_v18  ;;  %v4211_v20 = vmax.f32 %v4077_v48, 0.0 }
 0x63d   :  { %5951 = vst [vmem:[%s11936_s13 + $0x110] sm:$0xff] %v4809_v30  ;;  %v7906_v4 = vpop.f32.mrb[218].mxu0  ;;  %8189 = vmatprep.mubr.f32.mxu1 %v4199_v8  ;;  %v4087_v8 = vadd.f32 %v10982_v1, %v12069_v52 }
 0x63e   :  { %v4824_v34 = vadd.f32 %v7906_v4, %v10727_v50  ;;  %v4818_v60 = vpop.f32.mrb[219].mxu0 }
 0x63f   :  { %v4819_v57 = vadd.f32 %v10727_v50, %v4818_v60  ;;  %v4212_v60 = vmax.f32 %v4082_v38, 0.0 }
 0x640   :  { %5954 = vst [vmem:[%s11936_s13 + $0x128] sm:$0xff] %v4824_v34  ;;  %8190 = vmatmul.mubr.f32.gmra.mrb[24].mxu1 %v4200_v53 }
 0x641   :  { %5953 = vst [vmem:[%s11936_s13 + $0x120] sm:$0xff] %v4819_v57  ;;  %v7909_v6 = vpop.f32.mrb[220].mxu0  ;;  %8192 = vmatprep.mubr.f32.mxu1 %v4201_v46  ;;  %v12070_v46 = vld [vmem:[#allocation22_spill] sm:$0xff] }
 0x642   :  { %v4834_v54 = vadd.f32 %v7909_v6, %v10727_v50  ;;  %v4828_v11 = vpop.f32.mrb[221].mxu0  ;;  %v4092_v49 = vadd.f32 %v10982_v1, %v12070_v46 }
 0x643   :  { %v4829_v25 = vadd.f32 %v10727_v50, %v4828_v11 }
 0x644   :  { %5956 = vst [vmem:[%s11936_s13 + $0x138] sm:$0xff] %v4834_v54  ;;  %8193 = vmatmul.mubr.f32.gmra.mrb[26].mxu1 %v4202_v33  ;;  %v4213_v33 = vmax.f32 %v4087_v8, 0.0  ;;  %v4097_v54 = vadd.f32 %v10982_v1, %v12071_v21  ;;  %v4214_v61 = vmax.f32 %v4092_v49, 0.0 }
 0x645   :  { %5955 = vst [vmem:[%s11936_s13 + $0x130] sm:$0xff] %v4829_v25  ;;  %v7912_v35 = vpop.f32.mrb[222].mxu0  ;;  %8195 = vmatprep.mubr.f32.mxu1 %v4203_v58 }
 0x646   :  { %v4844_v19 = vadd.f32 %v7912_v35, %v10727_v50  ;;  %v4838_v31 = vpop.f32.mrb[223].mxu0 }
 0x647   :  { %v4839_v12 = vadd.f32 %v10727_v50, %v4838_v31 }
 0x648   :  { %5958 = vst [vmem:[%s11936_s13 + $0x148] sm:$0xff] %v4844_v19  ;;  %8196 = vmatmul.mubr.f32.gmra.mrb[28].mxu1 %v4204_v42  ;;  %v12072_v19 = vld [vmem:[#allocation24_spill] sm:$0xff] }
 0x649   :  { %5957 = vst [vmem:[%s11936_s13 + $0x140] sm:$0xff] %v4839_v12  ;;  %v7915_v7 = vpop.f32.mrb[224].mxu0  ;;  %8198 = vmatprep.mubr.f32.mxu1 %v4205_v41  ;;  %v4102_v31 = vadd.f32 %v10982_v1, %v12072_v19  ;;  %v4215_v12 = vmax.f32 %v4097_v54, 0.0 }
 0x64a   :  { %v4854_v39 = vadd.f32 %v7915_v7, %v10727_v50  ;;  %v4848_v28 = vpop.f32.mrb[225].mxu0  ;;  %v12073_v7 = vld [vmem:[#allocation29_spill] sm:$0xff] }
 0x64b   :  { %v4849_v14 = vadd.f32 %v10727_v50, %v4848_v28  ;;  %v8041_v15 = vpop.f32.mrb[180].mxu1 }
 0x64c   :  { %5960 = vst [vmem:[%s11936_s13 + $0x158] sm:$0xff] %v4854_v39  ;;  %v5274_v17 = vadd.f32 %v8041_v15, %v10727_v50  ;;  %v5268_v32 = vpop.f32.mrb[181].mxu1  ;;  %8199 = vmatmul.mubr.f32.gmra.mrb[30].mxu1 %v4206_v56  ;;  %v4107_v56 = vadd.f32 %v10982_v1, %v12073_v7  ;;  %v12074_v15 = vld [vmem:[#allocation26_spill] sm:$0xff] }
 0x64d   :  { %5959 = vst [vmem:[%s11936_s13 + $0x150] sm:$0xff] %v4849_v14  ;;  %v5269_v16 = vadd.f32 %v10727_v50, %v5268_v32  ;;  %v7918_v37 = vpop.f32.mrb[226].mxu0  ;;  %8201 = vmatprep.mubr.f32.mxu1 %v4207_v63  ;;  %v4216_v14 = vmax.f32 %v4102_v31, 0.0 }
 0x64e   :  { %6044 = vst [vmem:[%s11936_s13 + $0x3f8] sm:$0xff] %v5274_v17  ;;  %v4864_v5 = vadd.f32 %v7918_v37, %v10727_v50  ;;  %v4858_v3 = vpop.f32.mrb[227].mxu0  ;;  %v4112_v17 = vadd.f32 %v10982_v1, %v12074_v15  ;;  %v4217_v37 = vmax.f32 %v4107_v56, 0.0 }
 0x64f   :  { %6043 = vst [vmem:[%s11936_s13 + $0x3f0] sm:$0xff] %v5269_v16  ;;  %v4859_v51 = vadd.f32 %v10727_v50, %v4858_v3  ;;  %v8044_v27 = vpop.f32.mrb[182].mxu1 }
 0x650   :  { %5962 = vst [vmem:[%s11936_s13 + $0x168] sm:$0xff] %v4864_v5  ;;  %v5284_v13 = vadd.f32 %v8044_v27, %v10727_v50  ;;  %v5278_v45 = vpop.f32.mrb[183].mxu1  ;;  %8202 = vmatmul.mubr.f32.gmra.mrb[32].mxu1 %v4208_v47  ;;  %v12075_v47 = vld [vmem:[#allocation31_spill] sm:$0xff]  ;;  %v12076_v27 = vld [vmem:[#allocation28_spill] sm:$0xff] }
 0x651   :  { %5961 = vst [vmem:[%s11936_s13 + $0x160] sm:$0xff] %v4859_v51  ;;  %v5279_v24 = vadd.f32 %v10727_v50, %v5278_v45  ;;  %v7921_v0 = vpop.f32.mrb[228].mxu0  ;;  %8204 = vmatprep.mubr.f32.mxu1 %v4209_v62  ;;  %v4117_v26 = vadd.f32 %v10982_v1, %v12075_v47  ;;  %v4218_v51 = vmax.f32 %v4112_v17, 0.0 }
 0x652   :  { %6046 = vst [vmem:[%s11936_s13 + $0x408] sm:$0xff] %v5284_v13  ;;  %v4874_v18 = vadd.f32 %v7921_v0, %v10727_v50  ;;  %v4868_v44 = vpop.f32.mrb[229].mxu0  ;;  %v4122_v13 = vadd.f32 %v10982_v1, %v12076_v27 }
 0x653   :  { %6045 = vst [vmem:[%s11936_s13 + $0x400] sm:$0xff] %v5279_v24  ;;  %v4869_v55 = vadd.f32 %v10727_v50, %v4868_v44  ;;  %v8047_v30 = vpop.f32.mrb[184].mxu1  ;;  %v4219_v0 = vmax.f32 %v4117_v26, 0.0 }
 0x654   :  { %5964 = vst [vmem:[%s11936_s13 + $0x178] sm:$0xff] %v4874_v18  ;;  %v5294_v4 = vadd.f32 %v8047_v30, %v10727_v50  ;;  %v5288_v53 = vpop.f32.mrb[185].mxu1  ;;  %8205 = vmatmul.mubr.f32.gmra.mrb[34].mxu1 %v4210_v10  ;;  %v12077_v10 = vld [vmem:[#allocation33_spill] sm:$0xff]  ;;  %v12078_v30 = vld [vmem:[#allocation30_spill] sm:$0xff] }
 0x655   :  { %5963 = vst [vmem:[%s11936_s13 + $0x170] sm:$0xff] %v4869_v55  ;;  %v5289_v40 = vadd.f32 %v10727_v50, %v5288_v53  ;;  %v7924_v34 = vpop.f32.mrb[230].mxu0  ;;  %8207 = vmatprep.mubr.f32.mxu1 %v4211_v20  ;;  %v4127_v23 = vadd.f32 %v10982_v1, %v12077_v10  ;;  %v4220_v55 = vmax.f32 %v4122_v13, 0.0 }
 0x656   :  { %6048 = vst [vmem:[%s11936_s13 + $0x418] sm:$0xff] %v5294_v4  ;;  %v4884_v57 = vadd.f32 %v7924_v34, %v10727_v50  ;;  %v4878_v6 = vpop.f32.mrb[231].mxu0  ;;  %v4132_v4 = vadd.f32 %v10982_v1, %v12078_v30 }
 0x657   :  { %6047 = vst [vmem:[%s11936_s13 + $0x410] sm:$0xff] %v5289_v40  ;;  %v4879_v11 = vadd.f32 %v10727_v50, %v4878_v6  ;;  %v8050_v58 = vpop.f32.mrb[186].mxu1  ;;  %v4221_v34 = vmax.f32 %v4127_v23, 0.0 }
 0x658   :  { %5966 = vst [vmem:[%s11936_s13 + $0x188] sm:$0xff] %v4884_v57  ;;  %v5304_v59 = vadd.f32 %v8050_v58, %v10727_v50  ;;  %v5298_v25 = vpop.f32.mrb[187].mxu1  ;;  %8208 = vmatmul.mubr.f32.gmra.mrb[36].mxu1 %v4212_v60  ;;  %v12079_v60 = vld [vmem:[#allocation35_spill] sm:$0xff]  ;;  %v12080_v58 = vld [vmem:[#allocation32_spill] sm:$0xff] }
 0x659   :  { %5965 = vst [vmem:[%s11936_s13 + $0x180] sm:$0xff] %v4879_v11  ;;  %v5299_v35 = vadd.f32 %v10727_v50, %v5298_v25  ;;  %v7927_v42 = vpop.f32.mrb[232].mxu0  ;;  %8210 = vmatprep.mubr.f32.mxu1 %v4213_v33  ;;  %v4137_v46 = vadd.f32 %v10982_v1, %v12079_v60  ;;  %v4222_v11 = vmax.f32 %v4132_v4, 0.0 }
 0x65a   :  { %6050 = vst [vmem:[%s11936_s13 + $0x428] sm:$0xff] %v5304_v59  ;;  %v4894_v41 = vadd.f32 %v7927_v42, %v10727_v50  ;;  %v4888_v29 = vpop.f32.mrb[233].mxu0  ;;  %v4142_v59 = vadd.f32 %v10982_v1, %v12080_v58 }
 0x65b   :  { %6049 = vst [vmem:[%s11936_s13 + $0x420] sm:$0xff] %v5299_v35  ;;  %v4889_v36 = vadd.f32 %v10727_v50, %v4888_v29  ;;  %v8053_v39 = vpop.f32.mrb[188].mxu1  ;;  %v4223_v42 = vmax.f32 %v4137_v46, 0.0 }
 0x65c   :  { %5968 = vst [vmem:[%s11936_s13 + $0x198] sm:$0xff] %v4894_v41  ;;  %v5314_v28 = vadd.f32 %v8053_v39, %v10727_v50  ;;  %v5308_v63 = vpop.f32.mrb[189].mxu1  ;;  %8211 = vmatmul.mubr.f32.gmra.mrb[38].mxu1 %v4214_v61  ;;  %v12081_v61 = vld [vmem:[#allocation37_spill] sm:$0xff]  ;;  %v12082_v39 = vld [vmem:[#allocation34_spill] sm:$0xff] }
 0x65d   :  { %5967 = vst [vmem:[%s11936_s13 + $0x190] sm:$0xff] %v4889_v36  ;;  %v5309_v43 = vadd.f32 %v10727_v50, %v5308_v63  ;;  %v7930_v2 = vpop.f32.mrb[234].mxu0  ;;  %8213 = vmatprep.mubr.f32.mxu1 %v4215_v12  ;;  %v4147_v19 = vadd.f32 %v10982_v1, %v12081_v61  ;;  %v4224_v36 = vmax.f32 %v4142_v59, 0.0 }
 0x65e   :  { %6052 = vst [vmem:[%s11936_s13 + $0x438] sm:$0xff] %v5314_v28  ;;  %v4904_v32 = vadd.f32 %v7930_v2, %v10727_v50  ;;  %v4898_v16 = vpop.f32.mrb[235].mxu0  ;;  %v4152_v28 = vadd.f32 %v10982_v1, %v12082_v39 }
 0x65f   :  { %6051 = vst [vmem:[%s11936_s13 + $0x430] sm:$0xff] %v5309_v43  ;;  %v4899_v9 = vadd.f32 %v10727_v50, %v4898_v16  ;;  %v8056_v5 = vpop.f32.mrb[190].mxu1  ;;  %v4225_v2 = vmax.f32 %v4147_v19, 0.0 }
 0x660   :  { %5970 = vst [vmem:[%s11936_s13 + $0x1a8] sm:$0xff] %v4904_v32  ;;  %v5324_v3 = vadd.f32 %v8056_v5, %v10727_v50  ;;  %v5318_v62 = vpop.f32.mrb[191].mxu1  ;;  %8214 = vmatmul.mubr.f32.gmra.mrb[40].mxu1 %v4216_v14  ;;  %v12083_v14 = vld [vmem:[#allocation39_spill] sm:$0xff]  ;;  %v12084_v5 = vld [vmem:[#allocation36_spill] sm:$0xff] }
 0x661   :  { %5969 = vst [vmem:[%s11936_s13 + $0x1a0] sm:$0xff] %v4899_v9  ;;  %v5319_v22 = vadd.f32 %v10727_v50, %v5318_v62  ;;  %v7933_v48 = vpop.f32.mrb[236].mxu0  ;;  %8216 = vmatprep.mubr.f32.mxu1 %v4217_v37  ;;  %v4157_v15 = vadd.f32 %v10982_v1, %v12083_v14  ;;  %v4226_v9 = vmax.f32 %v4152_v28, 0.0 }
 0x662   :  { %6054 = vst [vmem:[%s11936_s13 + $0x448] sm:$0xff] %v5324_v3  ;;  %v4914_v45 = vadd.f32 %v7933_v48, %v10727_v50  ;;  %v4908_v24 = vpop.f32.mrb[237].mxu0  ;;  %v4162_v3 = vadd.f32 %v10982_v1, %v12084_v5 }
 0x663   :  { %6053 = vst [vmem:[%s11936_s13 + $0x440] sm:$0xff] %v5319_v22  ;;  %v4909_v38 = vadd.f32 %v10727_v50, %v4908_v24  ;;  %v8059_v18 = vpop.f32.mrb[192].mxu1  ;;  %v4227_v48 = vmax.f32 %v4157_v15, 0.0 }
 0x664   :  { %5972 = vst [vmem:[%s11936_s13 + $0x1b8] sm:$0xff] %v4914_v45  ;;  %v5334_v44 = vadd.f32 %v8059_v18, %v10727_v50  ;;  %v5328_v20 = vpop.f32.mrb[193].mxu1  ;;  %8217 = vmatmul.mubr.f32.gmra.mrb[42].mxu1 %v4218_v51 }
 0x665   :  { %5971 = vst [vmem:[%s11936_s13 + $0x1b0] sm:$0xff] %v4909_v38  ;;  %v5329_v52 = vadd.f32 %v10727_v50, %v5328_v20  ;;  %v7936_v8 = vpop.f32.mrb[238].mxu0  ;;  %8219 = vmatprep.mubr.f32.mxu1 %v4219_v0  ;;  %v4228_v0 = vmax.f32 %v4162_v3, 0.0  ;;  %v11242_v38 = vld [vmem:[%s11935_s12] ss:$0 sm:$0xff] }
 0x666   :  { %6056 = vst [vmem:[%s11936_s13 + $0x458] sm:$0xff] %v5334_v44  ;;  %v4924_v53 = vadd.f32 %v7936_v8, %v10727_v50  ;;  %v4918_v40 = vpop.f32.mrb[239].mxu0 }
 0x667   :  { %6055 = vst [vmem:[%s11936_s13 + $0x450] sm:$0xff] %v5329_v52  ;;  %v4919_v49 = vadd.f32 %v10727_v50, %v4918_v40  ;;  %v8062_v57 = vpop.f32.mrb[194].mxu1 }
 0x668   :  { %5974 = vst [vmem:[%s11936_s13 + $0x1c8] sm:$0xff] %v4924_v53  ;;  %v5344_v6 = vadd.f32 %v8062_v57, %v10727_v50  ;;  %v5338_v33 = vpop.f32.mrb[195].mxu1  ;;  %8220 = vmatmul.mubr.f32.gmra.mrb[44].mxu1 %v4220_v55 }
 0x669   :  { %5973 = vst [vmem:[%s11936_s13 + $0x1c0] sm:$0xff] %v4919_v49  ;;  %v5339_v21 = vadd.f32 %v10727_v50, %v5338_v33  ;;  %v7939_v54 = vpop.f32.mrb[240].mxu0  ;;  %8222 = vmatprep.mubr.f32.mxu1 %v4221_v34 }
 0x66a   :  { %6058 = vst [vmem:[%s11936_s13 + $0x468] sm:$0xff] %v5344_v6  ;;  %v4934_v25 = vadd.f32 %v7939_v54, %v10727_v50  ;;  %v4928_v35 = vpop.f32.mrb[241].mxu0 }
 0x66b   :  { %6057 = vst [vmem:[%s11936_s13 + $0x460] sm:$0xff] %v5339_v21  ;;  %v4929_v31 = vadd.f32 %v10727_v50, %v4928_v35  ;;  %v8065_v41 = vpop.f32.mrb[196].mxu1 }
 0x66c   :  { %5976 = vst [vmem:[%s11936_s13 + $0x1d8] sm:$0xff] %v4934_v25  ;;  %v5354_v29 = vadd.f32 %v8065_v41, %v10727_v50  ;;  %v5348_v12 = vpop.f32.mrb[197].mxu1  ;;  %8223 = vmatmul.mubr.f32.gmra.mrb[46].mxu1 %v4222_v11 }
 0x66d   :  { %5975 = vst [vmem:[%s11936_s13 + $0x1d0] sm:$0xff] %v4929_v31  ;;  %v5349_v7 = vadd.f32 %v10727_v50, %v5348_v12  ;;  %v7942_v56 = vpop.f32.mrb[242].mxu0  ;;  %8225 = vmatprep.mubr.f32.mxu1 %v4223_v42 }
 0x66e   :  { %6060 = vst [vmem:[%s11936_s13 + $0x478] sm:$0xff] %v5354_v29  ;;  %v4944_v63 = vadd.f32 %v7942_v56, %v10727_v50  ;;  %v4938_v43 = vpop.f32.mrb[243].mxu0 }
 0x66f   :  { %6059 = vst [vmem:[%s11936_s13 + $0x470] sm:$0xff] %v5349_v7  ;;  %v4939_v17 = vadd.f32 %v10727_v50, %v4938_v43  ;;  %v8068_v32 = vpop.f32.mrb[198].mxu1 }
 0x670   :  { %5978 = vst [vmem:[%s11936_s13 + $0x1e8] sm:$0xff] %v4944_v63  ;;  %v5364_v16 = vadd.f32 %v8068_v32, %v10727_v50  ;;  %v5358_v37 = vpop.f32.mrb[199].mxu1  ;;  %8226 = vmatmul.mubr.f32.gmra.mrb[48].mxu1 %v4224_v36 }
 0x671   :  { %5977 = vst [vmem:[%s11936_s13 + $0x1e0] sm:$0xff] %v4939_v17  ;;  %v5359_v47 = vadd.f32 %v10727_v50, %v5358_v37  ;;  %v7945_v26 = vpop.f32.mrb[244].mxu0  ;;  %8228 = vmatprep.mubr.f32.mxu1 %v4225_v2 }
 0x672   :  { %6062 = vst [vmem:[%s11936_s13 + $0x488] sm:$0xff] %v5364_v16  ;;  %v4954_v62 = vadd.f32 %v7945_v26, %v10727_v50  ;;  %v4948_v22 = vpop.f32.mrb[245].mxu0 }
 0x673   :  { %6061 = vst [vmem:[%s11936_s13 + $0x480] sm:$0xff] %v5359_v47  ;;  %v4949_v51 = vadd.f32 %v10727_v50, %v4948_v22  ;;  %v8071_v27 = vpop.f32.mrb[200].mxu1 }
 0x674   :  { %5980 = vst [vmem:[%s11936_s13 + $0x1f8] sm:$0xff] %v4954_v62  ;;  %v5374_v1 = vadd.f32 %v8071_v27, %v10727_v50  ;;  %v5368_v13 = vpop.f32.mrb[201].mxu1  ;;  %8229 = vmatmul.mubr.f32.gmra.mrb[50].mxu1 %v4226_v9 }
 0x675   :  { %5979 = vst [vmem:[%s11936_s13 + $0x1f0] sm:$0xff] %v4949_v51  ;;  %v5369_v45 = vadd.f32 %v10727_v50, %v5368_v13  ;;  %v7948_v24 = vpop.f32.mrb[246].mxu0  ;;  %8231 = vmatprep.mubr.f32.mxu1 %v4227_v48 }
 0x676   :  { %6064 = vst [vmem:[%s11936_s13 + $0x498] sm:$0xff] %v5374_v1  ;;  %v4964_v10 = vadd.f32 %v7948_v24, %v10727_v50  ;;  %v4958_v23 = vpop.f32.mrb[247].mxu0 }
 0x677   :  { %6063 = vst [vmem:[%s11936_s13 + $0x490] sm:$0xff] %v5369_v45  ;;  %v4959_v18 = vadd.f32 %v11242_v38, %v4958_v23  ;;  %v8074_v44 = vpop.f32.mrb[202].mxu1 }
 0x678   :  { %5982 = vst [vmem:[%s11936_s13 + $0x208] sm:$0xff] %v4964_v10  ;;  %v5384_v20 = vadd.f32 %v11242_v38, %v8074_v44  ;;  %v5378_v50 = vpop.f32.mrb[203].mxu1  ;;  %8232 = vmatmul.mubr.f32.gmra.mrb[52].mxu1 %v4228_v0 }
 0x679   :  { %5981 = vst [vmem:[%s11936_s13 + $0x200] sm:$0xff] %v4959_v18  ;;  %v5379_v52 = vadd.f32 %v11242_v38, %v5378_v50  ;;  %v7951_v8 = vpop.f32.mrb[248].mxu0 }
 0x67a   :  { %6066 = vst [vmem:[%s11936_s13 + $0x4a8] sm:$0xff] %v5384_v20  ;;  %v4974_v55 = vadd.f32 %v11242_v38, %v7951_v8  ;;  %v4968_v30 = vpop.f32.mrb[249].mxu0 }
 0x67b   :  { %6065 = vst [vmem:[%s11936_s13 + $0x4a0] sm:$0xff] %v5379_v52  ;;  %v4969_v4 = vadd.f32 %v11242_v38, %v4968_v30  ;;  %v8077_v53 = vpop.f32.mrb[204].mxu1 }
 0x67c   :  { %5984 = vst [vmem:[%s11936_s13 + $0x218] sm:$0xff] %v4974_v55  ;;  %v5394_v40 = vadd.f32 %v11242_v38, %v8077_v53  ;;  %v5388_v34 = vpop.f32.mrb[205].mxu1 }
 0x67d   :  { %5983 = vst [vmem:[%s11936_s13 + $0x210] sm:$0xff] %v4969_v4  ;;  %v5389_v60 = vadd.f32 %v11242_v38, %v5388_v34  ;;  %v7954_v46 = vpop.f32.mrb[250].mxu0 }
 0x67e   :  { %6068 = vst [vmem:[%s11936_s13 + $0x4b8] sm:$0xff] %v5394_v40  ;;  %v4984_v49 = vadd.f32 %v11242_v38, %v7954_v46  ;;  %v4978_v57 = vpop.f32.mrb[251].mxu0 }
 0x67f   :  { %6067 = vst [vmem:[%s11936_s13 + $0x4b0] sm:$0xff] %v5389_v60  ;;  %v4979_v6 = vadd.f32 %v11242_v38, %v4978_v57  ;;  %v8080_v33 = vpop.f32.mrb[206].mxu1 }
 0x680   :  { %5986 = vst [vmem:[%s11936_s13 + $0x228] sm:$0xff] %v4984_v49  ;;  %v5404_v21 = vadd.f32 %v11242_v38, %v8080_v33  ;;  %v5398_v54 = vpop.f32.mrb[207].mxu1 }
 0x681   :  { %5985 = vst [vmem:[%s11936_s13 + $0x220] sm:$0xff] %v4979_v6  ;;  %v5399_v11 = vadd.f32 %v11242_v38, %v5398_v54  ;;  %v7957_v58 = vpop.f32.mrb[252].mxu0 }
 0x682   :  { %6070 = vst [vmem:[%s11936_s13 + $0x4c8] sm:$0xff] %v5404_v21  ;;  %v4994_v59 = vadd.f32 %v11242_v38, %v7957_v58  ;;  %v4988_v25 = vpop.f32.mrb[253].mxu0 }
 0x683   :  { %6069 = vst [vmem:[%s11936_s13 + $0x4c0] sm:$0xff] %v5399_v11  ;;  %v4989_v35 = vadd.f32 %v11242_v38, %v4988_v25  ;;  %v8083_v42 = vpop.f32.mrb[208].mxu1 }
 0x684   :  { %5988 = vst [vmem:[%s11936_s13 + $0x238] sm:$0xff] %v4994_v59  ;;  %v5414_v61 = vadd.f32 %v11242_v38, %v8083_v42  ;;  %v5408_v19 = vpop.f32.mrb[209].mxu1 }
 0x685   :  { %5987 = vst [vmem:[%s11936_s13 + $0x230] sm:$0xff] %v4989_v35  ;;  %v5409_v31 = vadd.f32 %v11242_v38, %v5408_v19  ;;  %v7960_v41 = vpop.f32.mrb[254].mxu0 }
 0x686   :  { %6072 = vst [vmem:[%s11936_s13 + $0x4d8] sm:$0xff] %v5414_v61  ;;  %v5004_v29 = vadd.f32 %v11242_v38, %v7960_v41  ;;  %v4998_v12 = vpop.f32.mrb[255].mxu0 }
 0x687   :  { %6071 = vst [vmem:[%s11936_s13 + $0x4d0] sm:$0xff] %v5409_v31  ;;  %v4999_v7 = vadd.f32 %v11242_v38, %v4998_v12  ;;  %v8086_v56 = vpop.f32.mrb[210].mxu1 }
 0x688   :  { %5990 = vst [vmem:[%s11936_s13 + $0x248] sm:$0xff] %v5004_v29  ;;  %v5424_v36 = vadd.f32 %v11242_v38, %v8086_v56  ;;  %v5418_v39 = vpop.f32.mrb[211].mxu1 }
 0x689   :  { %5989 = vst [vmem:[%s11936_s13 + $0x240] sm:$0xff] %v4999_v7  ;;  %v5419_v28 = vadd.f32 %v11242_v38, %v5418_v39  ;;  %v7963_v63 = vpop.f32.mrb[0].mxu0 }
 0x68a   :  { %6074 = vst [vmem:[%s11936_s13 + $0x4e8] sm:$0xff] %v5424_v36  ;;  %v5014_v43 = vadd.f32 %v11242_v38, %v7963_v63  ;;  %v5008_v2 = vpop.f32.mrb[1].mxu0 }
 0x68b   :  { %6073 = vst [vmem:[%s11936_s13 + $0x4e0] sm:$0xff] %v5419_v28  ;;  %v5009_v14 = vadd.f32 %v11242_v38, %v5008_v2  ;;  %v8089_v15 = vpop.f32.mrb[212].mxu1 }
 0x68c   :  { %5992 = vst [vmem:[%s11936_s13 + $0x258] sm:$0xff] %v5014_v43  ;;  %v5434_v17 = vadd.f32 %v11242_v38, %v8089_v15  ;;  %v5428_v32 = vpop.f32.mrb[213].mxu1 }
 0x68d   :  { %5991 = vst [vmem:[%s11936_s13 + $0x250] sm:$0xff] %v5009_v14  ;;  %v5429_v16 = vadd.f32 %v11242_v38, %v5428_v32  ;;  %v7966_v37 = vpop.f32.mrb[2].mxu0 }
 0x68e   :  { %6076 = vst [vmem:[%s11936_s13 + $0x4f8] sm:$0xff] %v5434_v17  ;;  %v5024_v47 = vadd.f32 %v11242_v38, %v7966_v37  ;;  %v5018_v26 = vpop.f32.mrb[3].mxu0 }
 0x68f   :  { %6075 = vst [vmem:[%s11936_s13 + $0x4f0] sm:$0xff] %v5429_v16  ;;  %v5019_v9 = vadd.f32 %v11242_v38, %v5018_v26  ;;  %v8092_v5 = vpop.f32.mrb[214].mxu1 }
 0x690   :  { %5994 = vst [vmem:[%s11936_s13 + $0x268] sm:$0xff] %v5024_v47  ;;  %v5444_v3 = vadd.f32 %v11242_v38, %v8092_v5  ;;  %v5438_v62 = vpop.f32.mrb[215].mxu1 }
 0x691   :  { %5993 = vst [vmem:[%s11936_s13 + $0x260] sm:$0xff] %v5019_v9  ;;  %v5439_v22 = vadd.f32 %v11242_v38, %v5438_v62  ;;  %v7969_v48 = vpop.f32.mrb[4].mxu0 }
 0x692   :  { %6078 = vst [vmem:[%s11936_s13 + $0x508] sm:$0xff] %v5444_v3  ;;  %v5034_v51 = vadd.f32 %v11242_v38, %v7969_v48  ;;  %v5028_v27 = vpop.f32.mrb[5].mxu0 }
 0x693   :  { %6077 = vst [vmem:[%s11936_s13 + $0x500] sm:$0xff] %v5439_v22  ;;  %v5029_v1 = vadd.f32 %v11242_v38, %v5028_v27  ;;  %v8095_v13 = vpop.f32.mrb[216].mxu1 }
 0x694   :  { %5996 = vst [vmem:[%s11936_s13 + $0x278] sm:$0xff] %v5034_v51  ;;  %v5454_v45 = vadd.f32 %v11242_v38, %v8095_v13  ;;  %v5448_v24 = vpop.f32.mrb[217].mxu1 }
 0x695   :  { %5995 = vst [vmem:[%s11936_s13 + $0x270] sm:$0xff] %v5029_v1  ;;  %v5449_v0 = vadd.f32 %v11242_v38, %v5448_v24  ;;  %v7972_v10 = vpop.f32.mrb[6].mxu0 }
 0x696   :  { %6080 = vst [vmem:[%s11936_s13 + $0x518] sm:$0xff] %v5454_v45  ;;  %v5044_v23 = vadd.f32 %v11242_v38, %v7972_v10  ;;  %v5038_v18 = vpop.f32.mrb[7].mxu0 }
 0x697   :  { %6079 = vst [vmem:[%s11936_s13 + $0x510] sm:$0xff] %v5449_v0  ;;  %v5039_v44 = vadd.f32 %v11242_v38, %v5038_v18  ;;  %v8098_v20 = vpop.f32.mrb[218].mxu1 }
 0x698   :  { %5998 = vst [vmem:[%s11936_s13 + $0x288] sm:$0xff] %v5044_v23  ;;  %v5464_v50 = vadd.f32 %v11242_v38, %v8098_v20  ;;  %v5458_v52 = vpop.f32.mrb[219].mxu1 }
 0x699   :  { %5997 = vst [vmem:[%s11936_s13 + $0x280] sm:$0xff] %v5039_v44  ;;  %v5459_v8 = vadd.f32 %v11242_v38, %v5458_v52  ;;  %v7975_v55 = vpop.f32.mrb[8].mxu0 }
 0x69a   :  { %6082 = vst [vmem:[%s11936_s13 + $0x528] sm:$0xff] %v5464_v50  ;;  %v5054_v30 = vadd.f32 %v11242_v38, %v7975_v55  ;;  %v5048_v4 = vpop.f32.mrb[9].mxu0 }
 0x69b   :  { %6081 = vst [vmem:[%s11936_s13 + $0x520] sm:$0xff] %v5459_v8  ;;  %v5049_v53 = vadd.f32 %v11242_v38, %v5048_v4  ;;  %v8101_v40 = vpop.f32.mrb[220].mxu1 }
 0x69c   :  { %6000 = vst [vmem:[%s11936_s13 + $0x298] sm:$0xff] %v5054_v30  ;;  %v5474_v34 = vadd.f32 %v11242_v38, %v8101_v40  ;;  %v5468_v60 = vpop.f32.mrb[221].mxu1 }
 0x69d   :  { %5999 = vst [vmem:[%s11936_s13 + $0x290] sm:$0xff] %v5049_v53  ;;  %v5469_v46 = vadd.f32 %v11242_v38, %v5468_v60  ;;  %v7978_v49 = vpop.f32.mrb[10].mxu0 }
 0x69e   :  { %6084 = vst [vmem:[%s11936_s13 + $0x538] sm:$0xff] %v5474_v34  ;;  %v5064_v57 = vadd.f32 %v11242_v38, %v7978_v49  ;;  %v5058_v6 = vpop.f32.mrb[11].mxu0 }
 0x69f   :  { %6083 = vst [vmem:[%s11936_s13 + $0x530] sm:$0xff] %v5469_v46  ;;  %v5059_v33 = vadd.f32 %v11242_v38, %v5058_v6  ;;  %v8104_v21 = vpop.f32.mrb[222].mxu1 }
 0x6a0   :  { %6002 = vst [vmem:[%s11936_s13 + $0x2a8] sm:$0xff] %v5064_v57  ;;  %v5484_v54 = vadd.f32 %v11242_v38, %v8104_v21  ;;  %v5478_v11 = vpop.f32.mrb[223].mxu1 }
 0x6a1   :  { %6001 = vst [vmem:[%s11936_s13 + $0x2a0] sm:$0xff] %v5059_v33  ;;  %v5479_v58 = vadd.f32 %v11242_v38, %v5478_v11  ;;  %v7981_v59 = vpop.f32.mrb[12].mxu0 }
 0x6a2   :  { %6086 = vst [vmem:[%s11936_s13 + $0x548] sm:$0xff] %v5484_v54  ;;  %v5074_v25 = vadd.f32 %v11242_v38, %v7981_v59  ;;  %v5068_v35 = vpop.f32.mrb[13].mxu0 }
 0x6a3   :  { %6085 = vst [vmem:[%s11936_s13 + $0x540] sm:$0xff] %v5479_v58  ;;  %v5069_v42 = vadd.f32 %v11242_v38, %v5068_v35  ;;  %v8107_v61 = vpop.f32.mrb[224].mxu1 }
 0x6a4   :  { %6004 = vst [vmem:[%s11936_s13 + $0x2b8] sm:$0xff] %v5074_v25  ;;  %v5494_v19 = vadd.f32 %v11242_v38, %v8107_v61  ;;  %v5488_v31 = vpop.f32.mrb[225].mxu1 }
 0x6a5   :  { %6003 = vst [vmem:[%s11936_s13 + $0x2b0] sm:$0xff] %v5069_v42  ;;  %v5489_v41 = vadd.f32 %v11242_v38, %v5488_v31  ;;  %v7984_v29 = vpop.f32.mrb[14].mxu0 }
 0x6a6   :  { %6088 = vst [vmem:[%s11936_s13 + $0x558] sm:$0xff] %v5494_v19  ;;  %v5084_v12 = vadd.f32 %v11242_v38, %v7984_v29  ;;  %v5078_v7 = vpop.f32.mrb[15].mxu0 }
 0x6a7   :  { %6087 = vst [vmem:[%s11936_s13 + $0x550] sm:$0xff] %v5489_v41  ;;  %v5079_v56 = vadd.f32 %v11242_v38, %v5078_v7  ;;  %v8110_v36 = vpop.f32.mrb[226].mxu1 }
 0x6a8   :  { %6006 = vst [vmem:[%s11936_s13 + $0x2c8] sm:$0xff] %v5084_v12  ;;  %v5504_v39 = vadd.f32 %v11242_v38, %v8110_v36  ;;  %v5498_v28 = vpop.f32.mrb[227].mxu1 }
 0x6a9   :  { %6005 = vst [vmem:[%s11936_s13 + $0x2c0] sm:$0xff] %v5079_v56  ;;  %v5499_v63 = vadd.f32 %v11242_v38, %v5498_v28  ;;  %v7987_v43 = vpop.f32.mrb[16].mxu0 }
 0x6aa   :  { %6090 = vst [vmem:[%s11936_s13 + $0x568] sm:$0xff] %v5504_v39  ;;  %v5094_v2 = vadd.f32 %v11242_v38, %v7987_v43  ;;  %v5088_v14 = vpop.f32.mrb[17].mxu0 }
 0x6ab   :  { %6089 = vst [vmem:[%s11936_s13 + $0x560] sm:$0xff] %v5499_v63  ;;  %v5089_v15 = vadd.f32 %v11242_v38, %v5088_v14  ;;  %v8113_v17 = vpop.f32.mrb[228].mxu1 }
 0x6ac   :  { %6008 = vst [vmem:[%s11936_s13 + $0x2d8] sm:$0xff] %v5094_v2  ;;  %v5514_v32 = vadd.f32 %v11242_v38, %v8113_v17  ;;  %v5508_v16 = vpop.f32.mrb[229].mxu1 }
 0x6ad   :  { %6007 = vst [vmem:[%s11936_s13 + $0x2d0] sm:$0xff] %v5089_v15  ;;  %v5509_v37 = vadd.f32 %v11242_v38, %v5508_v16  ;;  %v7990_v47 = vpop.f32.mrb[18].mxu0 }
 0x6ae   :  { %6092 = vst [vmem:[%s11936_s13 + $0x578] sm:$0xff] %v5514_v32  ;;  %v5104_v26 = vadd.f32 %v11242_v38, %v7990_v47  ;;  %v5098_v9 = vpop.f32.mrb[19].mxu0 }
 0x6af   :  { %6091 = vst [vmem:[%s11936_s13 + $0x570] sm:$0xff] %v5509_v37  ;;  %v5099_v5 = vadd.f32 %v11242_v38, %v5098_v9  ;;  %v8116_v3 = vpop.f32.mrb[230].mxu1 }
 0x6b0   :  { %6010 = vst [vmem:[%s11936_s13 + $0x2e8] sm:$0xff] %v5104_v26  ;;  %v5524_v62 = vadd.f32 %v11242_v38, %v8116_v3  ;;  %v5518_v22 = vpop.f32.mrb[231].mxu1 }
 0x6b1   :  { %6009 = vst [vmem:[%s11936_s13 + $0x2e0] sm:$0xff] %v5099_v5  ;;  %v5519_v48 = vadd.f32 %v11242_v38, %v5518_v22  ;;  %v7993_v51 = vpop.f32.mrb[20].mxu0 }
 0x6b2   :  { %6094 = vst [vmem:[%s11936_s13 + $0x588] sm:$0xff] %v5524_v62  ;;  %v5114_v27 = vadd.f32 %v11242_v38, %v7993_v51  ;;  %v5108_v1 = vpop.f32.mrb[21].mxu0 }
 0x6b3   :  { %6093 = vst [vmem:[%s11936_s13 + $0x580] sm:$0xff] %v5519_v48  ;;  %v5109_v13 = vadd.f32 %v11242_v38, %v5108_v1  ;;  %v8119_v45 = vpop.f32.mrb[232].mxu1 }
 0x6b4   :  { %6012 = vst [vmem:[%s11936_s13 + $0x2f8] sm:$0xff] %v5114_v27  ;;  %v5534_v24 = vadd.f32 %v11242_v38, %v8119_v45  ;;  %v5528_v0 = vpop.f32.mrb[233].mxu1 }
 0x6b5   :  { %6011 = vst [vmem:[%s11936_s13 + $0x2f0] sm:$0xff] %v5109_v13  ;;  %v5529_v10 = vadd.f32 %v11242_v38, %v5528_v0  ;;  %v7996_v23 = vpop.f32.mrb[22].mxu0 }
 0x6b6   :  { %6096 = vst [vmem:[%s11936_s13 + $0x598] sm:$0xff] %v5534_v24  ;;  %v5124_v18 = vadd.f32 %v11242_v38, %v7996_v23  ;;  %v5118_v44 = vpop.f32.mrb[23].mxu0 }
 0x6b7   :  { %6095 = vst [vmem:[%s11936_s13 + $0x590] sm:$0xff] %v5529_v10  ;;  %v5119_v20 = vadd.f32 %v11242_v38, %v5118_v44  ;;  %v8122_v50 = vpop.f32.mrb[234].mxu1 }
 0x6b8   :  { %6014 = vst [vmem:[%s11936_s13 + $0x308] sm:$0xff] %v5124_v18  ;;  %v5544_v52 = vadd.f32 %v11242_v38, %v8122_v50  ;;  %v5538_v8 = vpop.f32.mrb[235].mxu1 }
 0x6b9   :  { %6013 = vst [vmem:[%s11936_s13 + $0x300] sm:$0xff] %v5119_v20  ;;  %v5539_v55 = vadd.f32 %v11242_v38, %v5538_v8  ;;  %v7999_v30 = vpop.f32.mrb[24].mxu0 }
 0x6ba   :  { %6098 = vst [vmem:[%s11936_s13 + $0x5a8] sm:$0xff] %v5544_v52  ;;  %v5134_v4 = vadd.f32 %v11242_v38, %v7999_v30  ;;  %v5128_v53 = vpop.f32.mrb[25].mxu0 }
 0x6bb   :  { %6097 = vst [vmem:[%s11936_s13 + $0x5a0] sm:$0xff] %v5539_v55  ;;  %v5129_v40 = vadd.f32 %v11242_v38, %v5128_v53  ;;  %v8125_v34 = vpop.f32.mrb[236].mxu1 }
 0x6bc   :  { %6016 = vst [vmem:[%s11936_s13 + $0x318] sm:$0xff] %v5134_v4  ;;  %v5554_v60 = vadd.f32 %v11242_v38, %v8125_v34  ;;  %v5548_v46 = vpop.f32.mrb[237].mxu1 }
 0x6bd   :  { %6015 = vst [vmem:[%s11936_s13 + $0x310] sm:$0xff] %v5129_v40  ;;  %v5549_v49 = vadd.f32 %v11242_v38, %v5548_v46  ;;  %v8002_v57 = vpop.f32.mrb[26].mxu0 }
 0x6be   :  { %6100 = vst [vmem:[%s11936_s13 + $0x5b8] sm:$0xff] %v5554_v60  ;;  %v5144_v6 = vadd.f32 %v11242_v38, %v8002_v57  ;;  %v5138_v33 = vpop.f32.mrb[27].mxu0 }
 0x6bf   :  { %6099 = vst [vmem:[%s11936_s13 + $0x5b0] sm:$0xff] %v5549_v49  ;;  %v5139_v21 = vadd.f32 %v11242_v38, %v5138_v33  ;;  %v8128_v54 = vpop.f32.mrb[238].mxu1 }
 0x6c0   :  { %6018 = vst [vmem:[%s11936_s13 + $0x328] sm:$0xff] %v5144_v6  ;;  %v5564_v11 = vadd.f32 %v11242_v38, %v8128_v54  ;;  %v5558_v58 = vpop.f32.mrb[239].mxu1 }
 0x6c1   :  { %6017 = vst [vmem:[%s11936_s13 + $0x320] sm:$0xff] %v5139_v21  ;;  %v5559_v59 = vadd.f32 %v11242_v38, %v5558_v58  ;;  %v8005_v25 = vpop.f32.mrb[28].mxu0 }
 0x6c2   :  { %6102 = vst [vmem:[%s11936_s13 + $0x5c8] sm:$0xff] %v5564_v11  ;;  %v5154_v35 = vadd.f32 %v11242_v38, %v8005_v25  ;;  %v5148_v42 = vpop.f32.mrb[29].mxu0 }
 0x6c3   :  { %6101 = vst [vmem:[%s11936_s13 + $0x5c0] sm:$0xff] %v5559_v59  ;;  %v5149_v61 = vadd.f32 %v11242_v38, %v5148_v42  ;;  %v8131_v19 = vpop.f32.mrb[240].mxu1 }
 0x6c4   :  { %6020 = vst [vmem:[%s11936_s13 + $0x338] sm:$0xff] %v5154_v35  ;;  %v5574_v31 = vadd.f32 %v11242_v38, %v8131_v19  ;;  %v5568_v41 = vpop.f32.mrb[241].mxu1 }
 0x6c5   :  { %6019 = vst [vmem:[%s11936_s13 + $0x330] sm:$0xff] %v5149_v61  ;;  %v5569_v29 = vadd.f32 %v11242_v38, %v5568_v41  ;;  %v8008_v12 = vpop.f32.mrb[30].mxu0 }
 0x6c6   :  { %6104 = vst [vmem:[%s11936_s13 + $0x5d8] sm:$0xff] %v5574_v31  ;;  %v5164_v7 = vadd.f32 %v11242_v38, %v8008_v12  ;;  %v5158_v56 = vpop.f32.mrb[31].mxu0 }
 0x6c7   :  { %6103 = vst [vmem:[%s11936_s13 + $0x5d0] sm:$0xff] %v5569_v29  ;;  %v5159_v36 = vadd.f32 %v11242_v38, %v5158_v56  ;;  %v8134_v39 = vpop.f32.mrb[242].mxu1 }
 0x6c8   :  { %6022 = vst [vmem:[%s11936_s13 + $0x348] sm:$0xff] %v5164_v7  ;;  %v5584_v28 = vadd.f32 %v11242_v38, %v8134_v39  ;;  %v5578_v63 = vpop.f32.mrb[243].mxu1 }
 0x6c9   :  { %6021 = vst [vmem:[%s11936_s13 + $0x340] sm:$0xff] %v5159_v36  ;;  %v5579_v43 = vadd.f32 %v11242_v38, %v5578_v63  ;;  %v8011_v2 = vpop.f32.mrb[32].mxu0 }
 0x6ca   :  { %6106 = vst [vmem:[%s11936_s13 + $0x5e8] sm:$0xff] %v5584_v28  ;;  %v5174_v14 = vadd.f32 %v11242_v38, %v8011_v2  ;;  %v5168_v15 = vpop.f32.mrb[33].mxu0 }
 0x6cb   :  { %6105 = vst [vmem:[%s11936_s13 + $0x5e0] sm:$0xff] %v5579_v43  ;;  %v5169_v17 = vadd.f32 %v11242_v38, %v5168_v15  ;;  %v8137_v32 = vpop.f32.mrb[244].mxu1 }
 0x6cc   :  { %6024 = vst [vmem:[%s11936_s13 + $0x358] sm:$0xff] %v5174_v14  ;;  %v5594_v16 = vadd.f32 %v11242_v38, %v8137_v32  ;;  %v5588_v37 = vpop.f32.mrb[245].mxu1 }
 0x6cd   :  { %6023 = vst [vmem:[%s11936_s13 + $0x350] sm:$0xff] %v5169_v17  ;;  %v5589_v47 = vadd.f32 %v11242_v38, %v5588_v37  ;;  %v8014_v26 = vpop.f32.mrb[34].mxu0 }
 0x6ce   :  { %6108 = vst [vmem:[%s11936_s13 + $0x5f8] sm:$0xff] %v5594_v16  ;;  %v5184_v9 = vadd.f32 %v11242_v38, %v8014_v26  ;;  %v5178_v5 = vpop.f32.mrb[35].mxu0 }
 0x6cf   :  { %6107 = vst [vmem:[%s11936_s13 + $0x5f0] sm:$0xff] %v5589_v47  ;;  %v5179_v3 = vadd.f32 %v11242_v38, %v5178_v5  ;;  %v8140_v62 = vpop.f32.mrb[246].mxu1 }
 0x6d0   :  { %6026 = vst [vmem:[%s11936_s13 + $0x368] sm:$0xff] %v5184_v9  ;;  %v5604_v22 = vadd.f32 %v11242_v38, %v8140_v62  ;;  %v5598_v48 = vpop.f32.mrb[247].mxu1 }
 0x6d1   :  { %6025 = vst [vmem:[%s11936_s13 + $0x360] sm:$0xff] %v5179_v3  ;;  %v5599_v51 = vadd.f32 %v11242_v38, %v5598_v48  ;;  %v8017_v27 = vpop.f32.mrb[36].mxu0 }
 0x6d2   :  { %6110 = vst [vmem:[%s11936_s13 + $0x608] sm:$0xff] %v5604_v22  ;;  %v5194_v1 = vadd.f32 %v11242_v38, %v8017_v27  ;;  %v5188_v13 = vpop.f32.mrb[37].mxu0 }
 0x6d3   :  { %6109 = vst [vmem:[%s11936_s13 + $0x600] sm:$0xff] %v5599_v51  ;;  %v5189_v45 = vadd.f32 %v11242_v38, %v5188_v13  ;;  %v8143_v24 = vpop.f32.mrb[248].mxu1 }
 0x6d4   :  { %6028 = vst [vmem:[%s11936_s13 + $0x378] sm:$0xff] %v5194_v1  ;;  %v5614_v0 = vadd.f32 %v11242_v38, %v8143_v24  ;;  %v5608_v10 = vpop.f32.mrb[249].mxu1 }
 0x6d5   :  { %6027 = vst [vmem:[%s11936_s13 + $0x370] sm:$0xff] %v5189_v45  ;;  %v5609_v23 = vadd.f32 %v11242_v38, %v5608_v10  ;;  %v8020_v18 = vpop.f32.mrb[38].mxu0 }
 0x6d6   :  { %6112 = vst [vmem:[%s11936_s13 + $0x618] sm:$0xff] %v5614_v0  ;;  %v5204_v44 = vadd.f32 %v11242_v38, %v8020_v18  ;;  %v5198_v20 = vpop.f32.mrb[39].mxu0 }
 0x6d7   :  { %6111 = vst [vmem:[%s11936_s13 + $0x610] sm:$0xff] %v5609_v23  ;;  %v5199_v50 = vadd.f32 %v11242_v38, %v5198_v20  ;;  %v8146_v52 = vpop.f32.mrb[250].mxu1 }
 0x6d8   :  { %6030 = vst [vmem:[%s11936_s13 + $0x388] sm:$0xff] %v5204_v44  ;;  %v5624_v8 = vadd.f32 %v11242_v38, %v8146_v52  ;;  %v5618_v55 = vpop.f32.mrb[251].mxu1 }
 0x6d9   :  { %6029 = vst [vmem:[%s11936_s13 + $0x380] sm:$0xff] %v5199_v50  ;;  %v5619_v30 = vadd.f32 %v11242_v38, %v5618_v55  ;;  %v8023_v4 = vpop.f32.mrb[40].mxu0 }
 0x6da   :  { %6114 = vst [vmem:[%s11936_s13 + $0x628] sm:$0xff] %v5624_v8  ;;  %v5214_v53 = vadd.f32 %v11242_v38, %v8023_v4  ;;  %v5208_v40 = vpop.f32.mrb[41].mxu0 }
 0x6db   :  { %6113 = vst [vmem:[%s11936_s13 + $0x620] sm:$0xff] %v5619_v30  ;;  %v5209_v34 = vadd.f32 %v11242_v38, %v5208_v40  ;;  %v8149_v60 = vpop.f32.mrb[252].mxu1 }
 0x6dc   :  { %6032 = vst [vmem:[%s11936_s13 + $0x398] sm:$0xff] %v5214_v53  ;;  %v5634_v46 = vadd.f32 %v11242_v38, %v8149_v60  ;;  %v5628_v49 = vpop.f32.mrb[253].mxu1 }
 0x6dd   :  { %6031 = vst [vmem:[%s11936_s13 + $0x390] sm:$0xff] %v5209_v34  ;;  %v5629_v57 = vadd.f32 %v11242_v38, %v5628_v49  ;;  %v8026_v6 = vpop.f32.mrb[42].mxu0 }
 0x6de   :  { %6116 = vst [vmem:[%s11936_s13 + $0x638] sm:$0xff] %v5634_v46  ;;  %v5224_v33 = vadd.f32 %v11242_v38, %v8026_v6  ;;  %v5218_v21 = vpop.f32.mrb[43].mxu0 }
 0x6df   :  { %6115 = vst [vmem:[%s11936_s13 + $0x630] sm:$0xff] %v5629_v57  ;;  %v5219_v54 = vadd.f32 %v11242_v38, %v5218_v21  ;;  %v8152_v11 = vpop.f32.mrb[254].mxu1 }
 0x6e0   :  { %6034 = vst [vmem:[%s11936_s13 + $0x3a8] sm:$0xff] %v5224_v33  ;;  %v5644_v58 = vadd.f32 %v11242_v38, %v8152_v11  ;;  %v5638_v59 = vpop.f32.mrb[255].mxu1 }
 0x6e1   :  { %6033 = vst [vmem:[%s11936_s13 + $0x3a0] sm:$0xff] %v5219_v54  ;;  %v5639_v25 = vadd.f32 %v11242_v38, %v5638_v59  ;;  %v8029_v35 = vpop.f32.mrb[44].mxu0 }
 0x6e2   :  { %6118 = vst [vmem:[%s11936_s13 + $0x648] sm:$0xff] %v5644_v58  ;;  %v5234_v42 = vadd.f32 %v11242_v38, %v8029_v35  ;;  %v5228_v61 = vpop.f32.mrb[45].mxu0 }
 0x6e3   :  { %6117 = vst [vmem:[%s11936_s13 + $0x640] sm:$0xff] %v5639_v25  ;;  %v5229_v19 = vadd.f32 %v11242_v38, %v5228_v61  ;;  %v8155_v31 = vpop.f32.mrb[0].mxu1 }
 0x6e4   :  { %6036 = vst [vmem:[%s11936_s13 + $0x3b8] sm:$0xff] %v5234_v42  ;;  %v5654_v41 = vadd.f32 %v11242_v38, %v8155_v31  ;;  %v5648_v29 = vpop.f32.mrb[1].mxu1 }
 0x6e5   :  { %6035 = vst [vmem:[%s11936_s13 + $0x3b0] sm:$0xff] %v5229_v19  ;;  %v5649_v12 = vadd.f32 %v11242_v38, %v5648_v29  ;;  %v8032_v7 = vpop.f32.mrb[46].mxu0 }
 0x6e6   :  { %6120 = vst [vmem:[%s11936_s13 + $0x658] sm:$0xff] %v5654_v41  ;;  %v5244_v56 = vadd.f32 %v11242_v38, %v8032_v7  ;;  %v5238_v36 = vpop.f32.mrb[47].mxu0 }
 0x6e7   :  { %6119 = vst [vmem:[%s11936_s13 + $0x650] sm:$0xff] %v5649_v12  ;;  %v5239_v39 = vadd.f32 %v11242_v38, %v5238_v36  ;;  %v8158_v28 = vpop.f32.mrb[2].mxu1 }
 0x6e8   :  { %6038 = vst [vmem:[%s11936_s13 + $0x3c8] sm:$0xff] %v5244_v56  ;;  %v5664_v63 = vadd.f32 %v11242_v38, %v8158_v28  ;;  %v5658_v43 = vpop.f32.mrb[3].mxu1 }
 0x6e9   :  { %6037 = vst [vmem:[%s11936_s13 + $0x3c0] sm:$0xff] %v5239_v39  ;;  %v5659_v2 = vadd.f32 %v11242_v38, %v5658_v43  ;;  %v8035_v14 = vpop.f32.mrb[48].mxu0 }
 0x6ea   :  { %6122 = vst [vmem:[%s11936_s13 + $0x668] sm:$0xff] %v5664_v63  ;;  %v5254_v15 = vadd.f32 %v11242_v38, %v8035_v14  ;;  %v5248_v17 = vpop.f32.mrb[49].mxu0 }
 0x6eb   :  { %6121 = vst [vmem:[%s11936_s13 + $0x660] sm:$0xff] %v5659_v2  ;;  %v5249_v32 = vadd.f32 %v11242_v38, %v5248_v17  ;;  %v8161_v16 = vpop.f32.mrb[4].mxu1 }
 0x6ec   :  { %6040 = vst [vmem:[%s11936_s13 + $0x3d8] sm:$0xff] %v5254_v15  ;;  %v5674_v37 = vadd.f32 %v11242_v38, %v8161_v16  ;;  %v5668_v47 = vpop.f32.mrb[5].mxu1 }
 0x6ed   :  { %6039 = vst [vmem:[%s11936_s13 + $0x3d0] sm:$0xff] %v5249_v32  ;;  %v5669_v26 = vadd.f32 %v11242_v38, %v5668_v47  ;;  %v8038_v9 = vpop.f32.mrb[50].mxu0 }
 0x6ee   :  { %6124 = vst [vmem:[%s11936_s13 + $0x678] sm:$0xff] %v5674_v37  ;;  %v5264_v5 = vadd.f32 %v11242_v38, %v8038_v9  ;;  %v5258_v3 = vpop.f32.mrb[51].mxu0 }
 0x6ef   :  { %6123 = vst [vmem:[%s11936_s13 + $0x670] sm:$0xff] %v5669_v26  ;;  %v5259_v62 = vadd.f32 %v11242_v38, %v5258_v3  ;;  %v8164_v22 = vpop.f32.mrb[6].mxu1 }
 0x6f0   :  { %6042 = vst [vmem:[%s11936_s13 + $0x3e8] sm:$0xff] %v5264_v5  ;;  %v5684_v48 = vadd.f32 %v11242_v38, %v8164_v22  ;;  %v5678_v51 = vpop.f32.mrb[7].mxu1 }
 0x6f1   :  { %6041 = vst [vmem:[%s11936_s13 + $0x3e0] sm:$0xff] %v5259_v62  ;;  %v5679_v27 = vadd.f32 %v11242_v38, %v5678_v51 }
 0x6f2   :  { %6126 = vst [vmem:[%s11936_s13 + $0x688] sm:$0xff] %v5684_v48 }
 0x6f3   :  { %6125 = vst [vmem:[%s11936_s13 + $0x680] sm:$0xff] %v5679_v27  ;;  %v8167_v1 = vpop.f32.mrb[8].mxu1 }
 0x6f4   :  { %v5694_v13 = vadd.f32 %v11242_v38, %v8167_v1  ;;  %v5688_v45 = vpop.f32.mrb[9].mxu1 }
 0x6f5   :  { %v5689_v24 = vadd.f32 %v11242_v38, %v5688_v45 }
 0x6f6   :  { %6128 = vst [vmem:[%s11936_s13 + $0x698] sm:$0xff] %v5694_v13 }
 0x6f7   :  { %6127 = vst [vmem:[%s11936_s13 + $0x690] sm:$0xff] %v5689_v24  ;;  %v8170_v0 = vpop.f32.mrb[10].mxu1 }
 0x6f8   :  { %v5704_v10 = vadd.f32 %v11242_v38, %v8170_v0  ;;  %v5698_v23 = vpop.f32.mrb[11].mxu1 }
 0x6f9   :  { %v5699_v18 = vadd.f32 %v11242_v38, %v5698_v23 }
 0x6fa   :  { %6130 = vst [vmem:[%s11936_s13 + $0x6a8] sm:$0xff] %v5704_v10 }
 0x6fb   :  { %6129 = vst [vmem:[%s11936_s13 + $0x6a0] sm:$0xff] %v5699_v18  ;;  %v8173_v44 = vpop.f32.mrb[12].mxu1 }
 0x6fc   :  { %v5714_v20 = vadd.f32 %v11242_v38, %v8173_v44  ;;  %v5708_v50 = vpop.f32.mrb[13].mxu1 }
 0x6fd   :  { %v5709_v52 = vadd.f32 %v11242_v38, %v5708_v50 }
 0x6fe   :  { %6132 = vst [vmem:[%s11936_s13 + $0x6b8] sm:$0xff] %v5714_v20 }
 0x6ff   :  { %6131 = vst [vmem:[%s11936_s13 + $0x6b0] sm:$0xff] %v5709_v52  ;;  %v8176_v8 = vpop.f32.mrb[14].mxu1 }
 0x700   :  { %v5724_v55 = vadd.f32 %v11242_v38, %v8176_v8  ;;  %v5718_v30 = vpop.f32.mrb[15].mxu1 }
 0x701   :  { %v5719_v4 = vadd.f32 %v11242_v38, %v5718_v30 }
 0x702   :  { %6134 = vst [vmem:[%s11936_s13 + $0x6c8] sm:$0xff] %v5724_v55 }
 0x703   :  { %6133 = vst [vmem:[%s11936_s13 + $0x6c0] sm:$0xff] %v5719_v4  ;;  %v8179_v53 = vpop.f32.mrb[16].mxu1 }
 0x704   :  { %v5734_v40 = vadd.f32 %v11242_v38, %v8179_v53  ;;  %v5728_v34 = vpop.f32.mrb[17].mxu1 }
 0x705   :  { %v5729_v60 = vadd.f32 %v11242_v38, %v5728_v34 }
 0x706   :  { %6136 = vst [vmem:[%s11936_s13 + $0x6d8] sm:$0xff] %v5734_v40 }
 0x707   :  { %6135 = vst [vmem:[%s11936_s13 + $0x6d0] sm:$0xff] %v5729_v60  ;;  %v8182_v46 = vpop.f32.mrb[18].mxu1 }
 0x708   :  { %v5744_v49 = vadd.f32 %v11242_v38, %v8182_v46  ;;  %v5738_v57 = vpop.f32.mrb[19].mxu1 }
 0x709   :  { %v5739_v6 = vadd.f32 %v11242_v38, %v5738_v57 }
 0x70a   :  { %6138 = vst [vmem:[%s11936_s13 + $0x6e8] sm:$0xff] %v5744_v49 }
 0x70b   :  { %6137 = vst [vmem:[%s11936_s13 + $0x6e0] sm:$0xff] %v5739_v6  ;;  %v8185_v33 = vpop.f32.mrb[20].mxu1 }
 0x70c   :  { %v5754_v21 = vadd.f32 %v11242_v38, %v8185_v33  ;;  %v5748_v54 = vpop.f32.mrb[21].mxu1 }
 0x70d   :  { %v5749_v11 = vadd.f32 %v11242_v38, %v5748_v54 }
 0x70e   :  { %6140 = vst [vmem:[%s11936_s13 + $0x6f8] sm:$0xff] %v5754_v21 }
 0x70f   :  { %6139 = vst [vmem:[%s11936_s13 + $0x6f0] sm:$0xff] %v5749_v11  ;;  %v8188_v58 = vpop.f32.mrb[22].mxu1 }
 0x710   :  { %v5764_v59 = vadd.f32 %v11242_v38, %v8188_v58  ;;  %v5758_v25 = vpop.f32.mrb[23].mxu1 }
 0x711   :  { %v5759_v35 = vadd.f32 %v11242_v38, %v5758_v25 }
 0x712   :  { %6142 = vst [vmem:[%s11936_s13 + $0x708] sm:$0xff] %v5764_v59 }
 0x713   :  { %6141 = vst [vmem:[%s11936_s13 + $0x700] sm:$0xff] %v5759_v35  ;;  %v8191_v42 = vpop.f32.mrb[24].mxu1 }
 0x714   :  { %v5774_v61 = vadd.f32 %v11242_v38, %v8191_v42  ;;  %v5768_v19 = vpop.f32.mrb[25].mxu1 }
 0x715   :  { %v5769_v31 = vadd.f32 %v11242_v38, %v5768_v19 }
 0x716   :  { %6144 = vst [vmem:[%s11936_s13 + $0x718] sm:$0xff] %v5774_v61 }
 0x717   :  { %6143 = vst [vmem:[%s11936_s13 + $0x710] sm:$0xff] %v5769_v31  ;;  %v8194_v41 = vpop.f32.mrb[26].mxu1 }
 0x718   :  { %v5784_v29 = vadd.f32 %v11242_v38, %v8194_v41  ;;  %v5778_v12 = vpop.f32.mrb[27].mxu1 }
 0x719   :  { %v5779_v7 = vadd.f32 %v11242_v38, %v5778_v12 }
 0x71a   :  { %6146 = vst [vmem:[%s11936_s13 + $0x728] sm:$0xff] %v5784_v29 }
 0x71b   :  { %6145 = vst [vmem:[%s11936_s13 + $0x720] sm:$0xff] %v5779_v7  ;;  %v8197_v56 = vpop.f32.mrb[28].mxu1 }
 0x71c   :  { %v5794_v36 = vadd.f32 %v11242_v38, %v8197_v56  ;;  %v5788_v39 = vpop.f32.mrb[29].mxu1 }
 0x71d   :  { %v5789_v28 = vadd.f32 %v11242_v38, %v5788_v39 }
 0x71e   :  { %6148 = vst [vmem:[%s11936_s13 + $0x738] sm:$0xff] %v5794_v36 }
 0x71f   :  { %6147 = vst [vmem:[%s11936_s13 + $0x730] sm:$0xff] %v5789_v28  ;;  %v8200_v63 = vpop.f32.mrb[30].mxu1 }
 0x720   :  { %v5804_v43 = vadd.f32 %v11242_v38, %v8200_v63  ;;  %v5798_v2 = vpop.f32.mrb[31].mxu1 }
 0x721   :  { %v5799_v14 = vadd.f32 %v11242_v38, %v5798_v2 }
 0x722   :  { %6150 = vst [vmem:[%s11936_s13 + $0x748] sm:$0xff] %v5804_v43 }
 0x723   :  { %6149 = vst [vmem:[%s11936_s13 + $0x740] sm:$0xff] %v5799_v14  ;;  %v8203_v15 = vpop.f32.mrb[32].mxu1 }
 0x724   :  { %v5814_v17 = vadd.f32 %v11242_v38, %v8203_v15  ;;  %v5808_v32 = vpop.f32.mrb[33].mxu1 }
 0x725   :  { %v5809_v16 = vadd.f32 %v11242_v38, %v5808_v32 }
 0x726   :  { %6152 = vst [vmem:[%s11936_s13 + $0x758] sm:$0xff] %v5814_v17 }
 0x727   :  { %6151 = vst [vmem:[%s11936_s13 + $0x750] sm:$0xff] %v5809_v16  ;;  %v8206_v37 = vpop.f32.mrb[34].mxu1 }
 0x728   :  { %v5824_v47 = vadd.f32 %v11242_v38, %v8206_v37  ;;  %v5818_v26 = vpop.f32.mrb[35].mxu1 }
 0x729   :  { %v5819_v9 = vadd.f32 %v11242_v38, %v5818_v26 }
 0x72a   :  { %6154 = vst [vmem:[%s11936_s13 + $0x768] sm:$0xff] %v5824_v47 }
 0x72b   :  { %6153 = vst [vmem:[%s11936_s13 + $0x760] sm:$0xff] %v5819_v9  ;;  %v8209_v5 = vpop.f32.mrb[36].mxu1 }
 0x72c   :  { %v5834_v3 = vadd.f32 %v11242_v38, %v8209_v5  ;;  %v5828_v62 = vpop.f32.mrb[37].mxu1 }
 0x72d   :  { %v5829_v22 = vadd.f32 %v11242_v38, %v5828_v62 }
 0x72e   :  { %6156 = vst [vmem:[%s11936_s13 + $0x778] sm:$0xff] %v5834_v3 }
 0x72f   :  { %6155 = vst [vmem:[%s11936_s13 + $0x770] sm:$0xff] %v5829_v22  ;;  %v8212_v48 = vpop.f32.mrb[38].mxu1 }
 0x730   :  { %v5844_v51 = vadd.f32 %v11242_v38, %v8212_v48  ;;  %v5838_v27 = vpop.f32.mrb[39].mxu1 }
 0x731   :  { %v5839_v1 = vadd.f32 %v11242_v38, %v5838_v27 }
 0x732   :  { %6158 = vst [vmem:[%s11936_s13 + $0x788] sm:$0xff] %v5844_v51 }
 0x733   :  { %6157 = vst [vmem:[%s11936_s13 + $0x780] sm:$0xff] %v5839_v1  ;;  %v8215_v13 = vpop.f32.mrb[40].mxu1 }
 0x734   :  { %v5854_v45 = vadd.f32 %v11242_v38, %v8215_v13  ;;  %v5848_v24 = vpop.f32.mrb[41].mxu1 }
 0x735   :  { %v5849_v0 = vadd.f32 %v11242_v38, %v5848_v24 }
 0x736   :  { %6160 = vst [vmem:[%s11936_s13 + $0x798] sm:$0xff] %v5854_v45 }
 0x737   :  { %6159 = vst [vmem:[%s11936_s13 + $0x790] sm:$0xff] %v5849_v0  ;;  %v8218_v10 = vpop.f32.mrb[42].mxu1 }
 0x738   :  { %v5864_v23 = vadd.f32 %v11242_v38, %v8218_v10  ;;  %v5858_v18 = vpop.f32.mrb[43].mxu1 }
 0x739   :  { %v5859_v44 = vadd.f32 %v11242_v38, %v5858_v18 }
 0x73a   :  { %6162 = vst [vmem:[%s11936_s13 + $0x7a8] sm:$0xff] %v5864_v23 }
 0x73b   :  { %6161 = vst [vmem:[%s11936_s13 + $0x7a0] sm:$0xff] %v5859_v44  ;;  %v8221_v20 = vpop.f32.mrb[44].mxu1 }
 0x73c   :  { %v5874_v50 = vadd.f32 %v11242_v38, %v8221_v20  ;;  %v5868_v52 = vpop.f32.mrb[45].mxu1 }
 0x73d   :  { %v5869_v8 = vadd.f32 %v11242_v38, %v5868_v52 }
 0x73e   :  { %6164 = vst [vmem:[%s11936_s13 + $0x7b8] sm:$0xff] %v5874_v50 }
 0x73f   :  { %6163 = vst [vmem:[%s11936_s13 + $0x7b0] sm:$0xff] %v5869_v8  ;;  %v8224_v55 = vpop.f32.mrb[46].mxu1 }
 0x740   :  { %v5884_v30 = vadd.f32 %v11242_v38, %v8224_v55  ;;  %v5878_v4 = vpop.f32.mrb[47].mxu1 }
 0x741   :  { %v5879_v53 = vadd.f32 %v11242_v38, %v5878_v4 }
 0x742   :  { %6166 = vst [vmem:[%s11936_s13 + $0x7c8] sm:$0xff] %v5884_v30 }
 0x743   :  { %6165 = vst [vmem:[%s11936_s13 + $0x7c0] sm:$0xff] %v5879_v53  ;;  %v8227_v40 = vpop.f32.mrb[48].mxu1 }
 0x744   :  { %v5894_v34 = vadd.f32 %v11242_v38, %v8227_v40  ;;  %v5888_v60 = vpop.f32.mrb[49].mxu1 }
 0x745   :  { %v5889_v46 = vadd.f32 %v11242_v38, %v5888_v60 }
 0x746   :  { %6168 = vst [vmem:[%s11936_s13 + $0x7d8] sm:$0xff] %v5894_v34 }
 0x747   :  { %6167 = vst [vmem:[%s11936_s13 + $0x7d0] sm:$0xff] %v5889_v46  ;;  %v8230_v49 = vpop.f32.mrb[50].mxu1 }
 0x748   :  { %v5904_v57 = vadd.f32 %v11242_v38, %v8230_v49  ;;  %v5898_v6 = vpop.f32.mrb[51].mxu1 }
 0x749   :  { %v5899_v33 = vadd.f32 %v11242_v38, %v5898_v6 }
 0x74a   :  { %6170 = vst [vmem:[%s11936_s13 + $0x7e8] sm:$0xff] %v5904_v57 }
 0x74b   :  { %6169 = vst [vmem:[%s11936_s13 + $0x7e0] sm:$0xff] %v5899_v33  ;;  %v8233_v21 = vpop.f32.mrb[52].mxu1 }
 0x74c   :  { %v5914_v54 = vadd.f32 %v11242_v38, %v8233_v21  ;;  %v5908_v11 = vpop.f32.mrb[53].mxu1 }
 0x74d   :  { %v5909_v58 = vadd.f32 %v11242_v38, %v5908_v11 }
 0x74e   :  { %6172 = vst [vmem:[%s11936_s13 + $0x7f8] sm:$0xff] %v5914_v54 }
 0x74f   :  { %6171 = vst [vmem:[%s11936_s13 + $0x7f0] sm:$0xff] %v5909_v58 }
 0x750   :  { %6177 = vsyncpa [#allocation8], 1 }
 0x751   :  { %6178 = vsyncpa [#allocation10], 1 }
 0x752   :  { %6179 = vsyncpa [#allocation13], 1 }
 0x753   :  { %6180 = vsyncpa [#allocation16], 1 }

</bundles_post_ra>
